<compile_context>
chip_gen: v5e
topology: v5e:2x2
jax: 0.10.0
libtpu: 0.0.40
codegen_flags: <defaults>
</compile_context>

<pallas_src>
import functools

import jax
import jax.numpy as jnp
from jax.experimental import pallas as pl
from jax.experimental.pallas import tpu as pltpu

LANE = 128          # vreg lane width: hidden/embed dims are padded to a multiple
BF16_SUBLANE = 16   # bf16 packs 16 sublanes per vreg -> batch-tile granularity


def _round_up(x, m):
    return ((x + m - 1) // m) * m


def _default_block_batch(batch, max_bc=256):
    """Batch rows per grid step (the only parallel dim inside the recurrence).

    Bigger is better for MXU M-occupancy up to the MXU width (128 on v5e,
    256 on v6e/v7x), bounded by VMEM; multiples of 16 keep bf16 vregs full.
    On v7x prefer a BC giving >= 2 grid steps so both TensorCores are used.
    """
    return max(BF16_SUBLANE, min(max_bc, _round_up(batch, BF16_SUBLANE)))


# -----------------------------------------------------------------------------
# Pallas kernel: stacked LSTM over a time-major sequence, fused length masking
# -----------------------------------------------------------------------------
def encoder_lstm_kernel(x_ref,       # (T, BC, Ep)   bf16  embedded input, time-major
                        w_ih0_ref,   # (Ep, 4Hp)     bf16  layer-0 input projection
                        w_ihr_ref,   # (Lr, Hp, 4Hp) bf16  layers >= 1 input projection
                        w_hh_ref,    # (L, Hp, 4Hp)  bf16  recurrent weights
                        b_ref,       # (L, 1, 4Hp)   f32   b_ih + b_hh (gate-padded)
                        h0_ref,      # (L, BC, Hp)   f32
                        c0_ref,      # (L, BC, Hp)   f32
                        len_ref,     # (BC, 1)       int32 sequence lengths
                        out_ref,     # (T, BC, Hp)   f32   length-masked outputs
                        xseq_ref,    # scratch (T, BC, Hp)   bf16  inter-layer activations
                        gx_ref):     # scratch (Tc, BC, 4Hp) f32   time-chunked input gates
    T, BC, Hp = out_ref.shape
    Tc = gx_ref.shape[0]
    G4 = gx_ref.shape[-1]            # 4 * Hp
    L = w_hh_ref.shape[0]
    n_chunks = T // Tc
    lens = len_ref[...]              # (BC, 1) int32

    for layer in range(L):           # static Python loop over LSTM layers
        last = layer == L - 1
        h = h0_ref[layer]
        c = c0_ref[layer]

        for ck in range(n_chunks):   # static Python loop over time chunks
            t0 = ck * Tc

            # ---- hoisted input projection for this chunk: one bf16 MXU matmul ----
            if layer == 0:
                xin = x_ref[pl.ds(t0, Tc)]               # (Tc, BC, Ep) bf16
                w_in = w_ih0_ref[...]
            else:
                xin = xseq_ref[pl.ds(t0, Tc)]            # (Tc, BC, Hp) bf16
                w_in = w_ihr_ref[layer - 1]
            gx = jnp.dot(xin.reshape(Tc * BC, xin.shape[-1]), w_in,
                         preferred_element_type=jnp.float32)
            gx_ref[...] = (gx + b_ref[layer]).reshape(Tc, BC, G4)

            def step(tl, carry, layer=layer, t0=t0, last=last):
                h, c = carry
                gates = gx_ref[tl] + jnp.dot(
                    h.astype(jnp.bfloat16), w_hh_ref[layer],
                    preferred_element_type=jnp.float32)
                # PyTorch gate order i, f, g, o; Hp is a lane multiple -> dense slices.
                i_g = jax.nn.sigmoid(gates[:, 0 * Hp:1 * Hp])
                f_g = jax.nn.sigmoid(gates[:, 1 * Hp:2 * Hp])
                g_g = jnp.tanh(gates[:, 2 * Hp:3 * Hp])
                o_g = jax.nn.sigmoid(gates[:, 3 * Hp:4 * Hp])
                c_new = f_g * c + i_g * g_g
                h_new = o_g * jnp.tanh(c_new)
                t = t0 + tl
                if last:
                    # pack/pad semantics fused into the store: zero for t >= length.
                    out_ref[t] = jnp.where(lens > t, h_new, 0.0).astype(out_ref.dtype)
                else:
                    xseq_ref[t] = h_new.astype(xseq_ref.dtype)
                return h_new, c_new

            h, c = jax.lax.fori_loop(0, Tc, step, (h, c), unroll=min(Tc, 8))


# -----------------------------------------------------------------------------
# Wrapper: embedding gather, padding/layout, pallas_call plumbing (jittable)
# -----------------------------------------------------------------------------
@functools.partial(jax.jit,
                   static_argnames=("hidden_size", "block_batch", "time_chunk"))
def encoder_forward(params, tokens, lengths, *, hidden_size,
                    block_batch=None, time_chunk=None):
    """tokens (B,T) int32, lengths (B,) int32 -> (B, T, hidden_size) f32 (zero past len)."""
    B, T = tokens.shape
    L, Hp, G4 = params["w_hh"].shape
    Ep = params["w_ih0"].shape[0]
    Lr = params["w_ihr"].shape[0]

    BC = block_batch if block_batch is not None else _default_block_batch(B)
    Bp = _round_up(B, BC)

    Tc = time_chunk if time_chunk is not None else min(T, 32)
    while T % Tc:                    # static divisor of T
        Tc -= 1

    # Embedding gather directly in time-major order (no (B,T,E) transpose pass);
    # the table is already bf16 + feature-padded, so the gather output is kernel-ready.
    x = jnp.take(params["emb"], tokens.T, axis=0)                  # (T, B, Ep) bf16
    x = jnp.pad(x, ((0, 0), (0, Bp - B), (0, 0)))

    h0 = jnp.pad(params["h0"], ((0, 0), (0, Bp - B), (0, 0)))
    c0 = jnp.pad(params["c0"], ((0, 0), (0, Bp - B), (0, 0)))
    len_p = jnp.pad(lengths.astype(jnp.int32), (0, Bp - B)).reshape(Bp, 1)

    # Explicit VMEM budget: blocks are double-buffered by the pipeliner. Keeps the
    # larger batch tile legal on v5e (16 MiB scoped default) and bounded for v7x (64 MiB).
    blk = (T * BC * Ep * 2 + Ep * G4 * 2 + Lr * Hp * G4 * 2 + L * Hp * G4 * 2
           + L * G4 * 4 + 2 * L * BC * Hp * 4 + BC * 4 + T * BC * Hp * 4)
    scratch = T * BC * Hp * 2 + Tc * BC * G4 * 4
    vmem_limit = int(min(64 * 2 ** 20, max(32 * 2 ** 20, 2 * (2 * blk + scratch))))

    out_tbh = pl.pallas_call(
        encoder_lstm_kernel,
        out_shape=jax.ShapeDtypeStruct((T, Bp, Hp), jnp.float32),
        grid_spec=pltpu.PrefetchScalarGridSpec(
            num_scalar_prefetch=0,
            grid=(Bp // BC,),                                      # independent batch chunks
            in_specs=[
                pl.BlockSpec((T, BC, Ep),  lambda b: (0, b, 0)),   # x (bf16)
                pl.BlockSpec((Ep, G4),     lambda b: (0, 0)),      # W_ih layer 0
                pl.BlockSpec((Lr, Hp, G4), lambda b: (0, 0, 0)),   # W_ih layers >= 1
                pl.BlockSpec((L, Hp, G4),  lambda b: (0, 0, 0)),   # W_hh
                pl.BlockSpec((L, 1, G4),   lambda b: (0, 0, 0)),   # bias
                pl.BlockSpec((L, BC, Hp),  lambda b: (0, b, 0)),   # h0
                pl.BlockSpec((L, BC, Hp),  lambda b: (0, b, 0)),   # c0
                pl.BlockSpec((BC, 1),      lambda b: (b, 0)),      # lengths (int32)
            ],
            out_specs=pl.BlockSpec((T, BC, Hp), lambda b: (0, b, 0)),
            scratch_shapes=[
                pltpu.VMEM((T, BC, Hp), jnp.bfloat16),   # inter-layer activations
                pltpu.VMEM((Tc, BC, G4), jnp.float32),   # time-chunked input gates
            ],
        ),
        compiler_params=pltpu.CompilerParams(
            dimension_semantics=("parallel",),           # megacore across batch chunks
            vmem_limit_bytes=vmem_limit,
        ),
    )(x, params["w_ih0"], params["w_ihr"], params["w_hh"], params["b"],
      h0, c0, len_p)

    # Crop lane/batch padding, back to PyTorch batch_first layout (already zero-masked).
    return jnp.transpose(out_tbh[:, :B, :hidden_size], (1, 0, 2))


# -----------------------------------------------------------------------------
# Parameter preparation (pad to lane multiples, pre-transpose, cast to bf16)
# -----------------------------------------------------------------------------
def _pad_gates(w_t, Hp):
    """(K, 4H) -> (K, 4Hp): zero-pad each of the i,f,g,o gate blocks to Hp lanes."""
    K, H4 = w_t.shape
    H = H4 // 4
    return jnp.pad(w_t.reshape(K, 4, H), ((0, 0), (0, 0), (0, Hp - H))).reshape(K, 4 * Hp)


def prepare_params(emb, w_ih, w_hh, b_ih, b_hh, h0, c0):
    """Pre-pad / transpose / cast weights for the kernel.

    * hidden/embed dims zero-padded to lane multiples (128): gate slices and output
      stores become lane-dense; padded columns provably stay zero through the LSTM.
    * layer-0 input weights (4H,E) kept separate from layers>=1 (4H,H), matching
      PyTorch's stacked LSTM (no silent E == H assumption).
    * matmul operands in bf16 (MXU peak path); bias/state stay f32.
    """
    L = w_hh.shape[0]
    H = w_hh.shape[2]
    E = emb.shape[1]
    Hp = _round_up(H, LANE)
    Ep = _round_up(E, LANE)

    w_ih_list = ([w_ih[l] for l in range(L)]
                 if getattr(w_ih, "ndim", 0) == 3 else list(w_ih))

    w0 = _pad_gates(w_ih_list[0].T, Hp)                        # (E, 4Hp)
    w0 = jnp.pad(w0, ((0, Ep - E), (0, 0)))                    # (Ep, 4Hp)

    if L > 1:
        wr = jnp.stack([
            jnp.pad(_pad_gates(w_ih_list[l].T, Hp),
                    ((0, Hp - w_ih_list[l].shape[1]), (0, 0)))
            for l in range(1, L)])                              # (L-1, Hp, 4Hp)
    else:
        wr = jnp.zeros((1, Hp, 4 * Hp), jnp.float32)            # dummy, never indexed

    whh = jnp.stack([jnp.pad(_pad_gates(w_hh[l].T, Hp), ((0, Hp - H), (0, 0)))
                     for l in range(L)])                        # (L, Hp, 4Hp)

    bias = (b_ih + b_hh).reshape(L, 4, H)
    bias = jnp.pad(bias, ((0, 0), (0, 0), (0, Hp - H))).reshape(L, 1, 4 * Hp)

    return {
        "emb": jnp.pad(emb, ((0, 0), (0, Ep - E))).astype(jnp.bfloat16),  # row 0 (PAD) zero
        "w_ih0": w0.astype(jnp.bfloat16),
        "w_ihr": wr.astype(jnp.bfloat16),
        "w_hh": whh.astype(jnp.bfloat16),
        "b": bias.astype(jnp.float32),
        "h0": jnp.pad(h0, ((0, 0), (0, 0), (0, Hp - H))).astype(jnp.float32),
        "c0": jnp.pad(c0, ((0, 0), (0, 0), (0, Hp - H))).astype(jnp.float32),
    }


# -----------------------------------------------------------------------------
# Pure-JAX reference with the same precision policy (bf16 matmuls, f32 gate math)
# -----------------------------------------------------------------------------
def encoder_reference(p_raw, tokens, lengths):
    emb, w_ih, w_hh, b_ih, b_hh, h0, c0 = (p_raw[k] for k in
                                           ("emb", "w_ih", "w_hh", "b_ih", "b_hh", "h0", "c0"))
    B, T = tokens.shape
    L, H4, _ = w_hh.shape
    H = H4 // 4

    def mm(a, b):
        return jnp.dot(a.astype(jnp.bfloat16), b.astype(jnp.bfloat16),
                       preferred_element_type=jnp.float32)

    x = emb[tokens]                                            # (B, T, E)
    for layer in range(L):
        h, c = h0[layer], c0[layer]
        outs = []
        for t in range(T):
            gates = mm(x[:, t], w_ih[layer].T) + mm(h, w_hh[layer].T) + b_ih[layer] + b_hh[layer]
            i_g = jax.nn.sigmoid(gates[:, 0 * H:1 * H])
            f_g = jax.nn.sigmoid(gates[:, 1 * H:2 * H])
            g_g = jnp.tanh(gates[:, 2 * H:3 * H])
            o_g = jax.nn.sigmoid(gates[:, 3 * H:4 * H])
            c = f_g * c + i_g * g_g
            h = o_g * jnp.tanh(c)
            outs.append(h)
        x = jnp.stack(outs, axis=1)
    mask = (jnp.arange(T)[None, :] < lengths[:, None]).astype(jnp.float32)
    return x * mask[:, :, None]


# -----------------------------------------------------------------------------
if __name__ == "__main__":
    VOCAB, EMBED, HIDDEN, LAYERS = 64, 32, 32, 2
    BATCH, SEQ = 2, 8

    key = jax.random.PRNGKey(0)
    keys = iter(jax.random.split(key, 16))

    emb = jax.random.normal(next(keys), (VOCAB, EMBED), jnp.float32).at[0].set(0.0)

    s = 1.0 / float(HIDDEN ** 0.5)
    w_ih = jax.random.uniform(next(keys), (LAYERS, 4 * HIDDEN, EMBED), jnp.float32, -s, s)
    w_hh = jax.random.uniform(next(keys), (LAYERS, 4 * HIDDEN, HIDDEN), jnp.float32, -s, s)
    b_ih = jax.random.uniform(next(keys), (LAYERS, 4 * HIDDEN), jnp.float32, -s, s)
    b_hh = jax.random.uniform(next(keys), (LAYERS, 4 * HIDDEN), jnp.float32, -s, s)

    # encode_init_hidden uses torch.randn -> deterministic normal here.
    h0 = jax.random.normal(next(keys), (LAYERS, BATCH, HIDDEN), jnp.float32)
    c0 = jax.random.normal(next(keys), (LAYERS, BATCH, HIDDEN), jnp.float32)

    lengths = jnp.array([SEQ, 5], dtype=jnp.int32)             # sorted descending
    tokens = jax.random.randint(next(keys), (BATCH, SEQ), 1, VOCAB, jnp.int32)
    pad_mask = jnp.arange(SEQ)[None, :] < lengths[:, None]
    tokens = jnp.where(pad_mask, tokens, 0)                    # PAD token id 0

    params = prepare_params(emb, w_ih, w_hh, b_ih, b_hh, h0, c0)
    params_raw = {"emb": emb, "w_ih": w_ih, "w_hh": w_hh,
                  "b_ih": b_ih, "b_hh": b_hh, "h0": h0, "c0": c0}

    out = encoder_forward(params, tokens, lengths, hidden_size=HIDDEN)
    out = jax.block_until_ready(out)

    ref = encoder_reference(params_raw, tokens, lengths)
    assert out.shape == ref.shape, (out.shape, ref.shape)
    assert jnp.allclose(out, ref, atol=2e-2, rtol=2e-2), \
        float(jnp.max(jnp.abs(out - ref)))

    print("KERNEL_OK")
</pallas_src>

<mosaic_0001>
module attributes {stable_mosaic.version = 11 : i64} {
  func.func @encoder_lstm_kernel(%arg0: i32, %arg1: memref<8x16x128xbf16, #tpu.memory_space<vmem>>, %arg2: memref<128x512xbf16, #tpu.memory_space<vmem>>, %arg3: memref<1x128x512xbf16, #tpu.memory_space<vmem>>, %arg4: memref<2x128x512xbf16, #tpu.memory_space<vmem>>, %arg5: memref<2x1x512xf32, #tpu.memory_space<vmem>>, %arg6: memref<2x16x128xf32, #tpu.memory_space<vmem>>, %arg7: memref<2x16x128xf32, #tpu.memory_space<vmem>>, %arg8: memref<16x1xi32, #tpu.memory_space<vmem>>, %arg9: memref<8x16x128xf32, #tpu.memory_space<vmem>>, %arg10: memref<8x16x128xbf16, #tpu.memory_space<vmem>>, %arg11: memref<8x16x512xf32, #tpu.memory_space<vmem>>) attributes {dimension_semantics = [#tpu.dimension_semantics<parallel>], iteration_bounds = array<i64: 1>, scalar_prefetch = 0 : i64, scratch_operands = 2 : i64, tpu.core_type = #tpu.core_type<tc>, window_params = [{transform_indices = @transform_0, window_bounds = array<i64: 8, 16, 128>}, {pipeline_mode = #tpu.pipeline_mode<synchronous>, transform_indices = @transform_1, window_bounds = array<i64: 128, 512>}, {pipeline_mode = #tpu.pipeline_mode<synchronous>, transform_indices = @transform_2, window_bounds = array<i64: 1, 128, 512>}, {pipeline_mode = #tpu.pipeline_mode<synchronous>, transform_indices = @transform_3, window_bounds = array<i64: 2, 128, 512>}, {pipeline_mode = #tpu.pipeline_mode<synchronous>, transform_indices = @transform_4, window_bounds = array<i64: 2, 1, 512>}, {transform_indices = @transform_5, window_bounds = array<i64: 2, 16, 128>}, {transform_indices = @transform_6, window_bounds = array<i64: 2, 16, 128>}, {transform_indices = @transform_7, window_bounds = array<i64: 16, 1>}, {transform_indices = @transform_8, window_bounds = array<i64: 8, 16, 128>}]} {
    %c0 = arith.constant 0 : index
    %c0_0 = arith.constant 0 : index
    %0 = vector.load %arg8[%c0, %c0_0] : memref<16x1xi32, #tpu.memory_space<vmem>>, vector<16x1xi32>
    %c0_1 = arith.constant 0 : index
    %c0_2 = arith.constant 0 : index
    %c0_3 = arith.constant 0 : index
    %1 = vector.load %arg6[%c0_1, %c0_2, %c0_3] : memref<2x16x128xf32, #tpu.memory_space<vmem>>, vector<1x16x128xf32>
    %2 = vector.shape_cast %1 : vector<1x16x128xf32> to vector<16x128xf32>
    %c0_4 = arith.constant 0 : index
    %c0_5 = arith.constant 0 : index
    %c0_6 = arith.constant 0 : index
    %3 = vector.load %arg7[%c0_4, %c0_5, %c0_6] : memref<2x16x128xf32, #tpu.memory_space<vmem>>, vector<1x16x128xf32>
    %4 = vector.shape_cast %3 : vector<1x16x128xf32> to vector<16x128xf32>
    %c0_7 = arith.constant 0 : index
    %c0_8 = arith.constant 0 : index
    %c0_9 = arith.constant 0 : index
    %5 = vector.load %arg1[%c0_7, %c0_8, %c0_9] : memref<8x16x128xbf16, #tpu.memory_space<vmem>>, vector<8x16x128xbf16>
    %c0_10 = arith.constant 0 : index
    %c0_11 = arith.constant 0 : index
    %6 = vector.load %arg2[%c0_10, %c0_11] : memref<128x512xbf16, #tpu.memory_space<vmem>>, vector<128x512xbf16>
    %7 = vector.shape_cast %5 : vector<8x16x128xbf16> to vector<128x128xbf16>
    %cst = arith.constant dense<0.000000e+00> : vector<128x512xf32>
    %8 = tpu.matmul %7, %6, %cst {dimension_numbers = #tpu.dot_dimension_numbers<[1], [0], [0], [1], [0, 0, 1, 1], [], []>} : vector<128x128xbf16>, vector<128x512xbf16>, vector<128x512xf32> -> vector<128x512xf32>
    %c0_12 = arith.constant 0 : index
    %c0_13 = arith.constant 0 : index
    %c0_14 = arith.constant 0 : index
    %9 = vector.load %arg5[%c0_12, %c0_13, %c0_14] : memref<2x1x512xf32, #tpu.memory_space<vmem>>, vector<1x1x512xf32>
    %10 = vector.shape_cast %9 : vector<1x1x512xf32> to vector<1x512xf32>
    %11 = vector.broadcast %10 : vector<1x512xf32> to vector<128x512xf32>
    %12 = arith.addf %8, %11 : vector<128x512xf32>
    %13 = vector.shape_cast %12 : vector<128x512xf32> to vector<8x16x512xf32>
    %c0_15 = arith.constant 0 : index
    %c0_16 = arith.constant 0 : index
    %c0_17 = arith.constant 0 : index
    %14 = vector.load %arg11[%c0_15, %c0_16, %c0_17] : memref<8x16x512xf32, #tpu.memory_space<vmem>>, vector<8x16x512xf32>
    tpu.vector_store %arg11[%c0_15, %c0_16, %c0_17], %13 {strides = array<i32>} : memref<8x16x512xf32, #tpu.memory_space<vmem>>, vector<8x16x512xf32>,
    %c0_i32 = arith.constant 0 : i32
    %15 = arith.index_cast %c0_i32 : i32 to index
    %c0_18 = arith.constant 0 : index
    %c0_19 = arith.constant 0 : index
    %16 = vector.load %arg11[%15, %c0_18, %c0_19] : memref<8x16x512xf32, #tpu.memory_space<vmem>>, vector<1x16x512xf32>
    %17 = vector.shape_cast %16 : vector<1x16x512xf32> to vector<16x512xf32>
    %18 = arith.truncf %2 : vector<16x128xf32> to vector<16x128xbf16>
    %c0_20 = arith.constant 0 : index
    %c0_21 = arith.constant 0 : index
    %c0_22 = arith.constant 0 : index
    %19 = vector.load %arg4[%c0_20, %c0_21, %c0_22] : memref<2x128x512xbf16, #tpu.memory_space<vmem>>, vector<1x128x512xbf16>
    %20 = vector.shape_cast %19 : vector<1x128x512xbf16> to vector<128x512xbf16>
    %cst_23 = arith.constant dense<0.000000e+00> : vector<16x512xf32>
    %21 = tpu.matmul %18, %20, %cst_23 {dimension_numbers = #tpu.dot_dimension_numbers<[1], [0], [0], [1], [0, 0, 1, 1], [], []>} : vector<16x128xbf16>, vector<128x512xbf16>, vector<16x512xf32> -> vector<16x512xf32>
    %22 = arith.addf %17, %21 : vector<16x512xf32>
    %23 = vector.extract_strided_slice %22 {offsets = [0, 0], sizes = [16, 128], strides = [1, 1]} : vector<16x512xf32> to vector<16x128xf32>
    %24 = arith.negf %23 : vector<16x128xf32>
    %25 = math.exp %24 : vector<16x128xf32>
    %cst_24 = arith.constant 1.000000e+00 : f32
    %26 = vector.broadcast %cst_24 : f32 to vector<16x128xf32>
    %27 = arith.addf %26, %25 : vector<16x128xf32>
    %28 = arith.divf %26, %27 : vector<16x128xf32>
    %29 = vector.extract_strided_slice %22 {offsets = [0, 128], sizes = [16, 128], strides = [1, 1]} : vector<16x512xf32> to vector<16x128xf32>
    %30 = arith.negf %29 : vector<16x128xf32>
    %31 = math.exp %30 : vector<16x128xf32>
    %cst_25 = arith.constant 1.000000e+00 : f32
    %32 = vector.broadcast %cst_25 : f32 to vector<16x128xf32>
    %33 = arith.addf %32, %31 : vector<16x128xf32>
    %34 = arith.divf %32, %33 : vector<16x128xf32>
    %35 = vector.extract_strided_slice %22 {offsets = [0, 256], sizes = [16, 128], strides = [1, 1]} : vector<16x512xf32> to vector<16x128xf32>
    %36 = math.tanh %35 : vector<16x128xf32>
    %37 = vector.extract_strided_slice %22 {offsets = [0, 384], sizes = [16, 128], strides = [1, 1]} : vector<16x512xf32> to vector<16x128xf32>
    %38 = arith.negf %37 : vector<16x128xf32>
    %39 = math.exp %38 : vector<16x128xf32>
    %cst_26 = arith.constant 1.000000e+00 : f32
    %40 = vector.broadcast %cst_26 : f32 to vector<16x128xf32>
    %41 = arith.addf %40, %39 : vector<16x128xf32>
    %42 = arith.divf %40, %41 : vector<16x128xf32>
    %43 = arith.mulf %34, %4 : vector<16x128xf32>
    %44 = arith.mulf %28, %36 : vector<16x128xf32>
    %45 = arith.addf %43, %44 : vector<16x128xf32>
    %46 = math.tanh %45 : vector<16x128xf32>
    %47 = arith.mulf %42, %46 : vector<16x128xf32>
    %c0_i32_27 = arith.constant 0 : i32
    %48 = arith.addi %c0_i32_27, %c0_i32 : i32
    %49 = arith.truncf %47 : vector<16x128xf32> to vector<16x128xbf16>
    %50 = arith.index_cast %48 : i32 to index
    %c0_28 = arith.constant 0 : index
    %c0_29 = arith.constant 0 : index
    %51 = vector.load %arg10[%50, %c0_28, %c0_29] : memref<8x16x128xbf16, #tpu.memory_space<vmem>>, vector<1x16x128xbf16>
    %52 = vector.shape_cast %51 : vector<1x16x128xbf16> to vector<16x128xbf16>
    %53 = vector.shape_cast %49 : vector<16x128xbf16> to vector<1x16x128xbf16>
    tpu.vector_store %arg10[%50, %c0_28, %c0_29], %53 {strides = array<i32>} : memref<8x16x128xbf16, #tpu.memory_space<vmem>>, vector<1x16x128xbf16>,
    %c1_i32 = arith.constant 1 : i32
    %54 = arith.index_cast %c1_i32 : i32 to index
    %c0_30 = arith.constant 0 : index
    %c0_31 = arith.constant 0 : index
    %55 = vector.load %arg11[%54, %c0_30, %c0_31] : memref<8x16x512xf32, #tpu.memory_space<vmem>>, vector<1x16x512xf32>
    %56 = vector.shape_cast %55 : vector<1x16x512xf32> to vector<16x512xf32>
    %57 = arith.truncf %47 : vector<16x128xf32> to vector<16x128xbf16>
    %c0_32 = arith.constant 0 : index
    %c0_33 = arith.constant 0 : index
    %c0_34 = arith.constant 0 : index
    %58 = vector.load %arg4[%c0_32, %c0_33, %c0_34] : memref<2x128x512xbf16, #tpu.memory_space<vmem>>, vector<1x128x512xbf16>
    %59 = vector.shape_cast %58 : vector<1x128x512xbf16> to vector<128x512xbf16>
    %cst_35 = arith.constant dense<0.000000e+00> : vector<16x512xf32>
    %60 = tpu.matmul %57, %59, %cst_35 {dimension_numbers = #tpu.dot_dimension_numbers<[1], [0], [0], [1], [0, 0, 1, 1], [], []>} : vector<16x128xbf16>, vector<128x512xbf16>, vector<16x512xf32> -> vector<16x512xf32>
    %61 = arith.addf %56, %60 : vector<16x512xf32>
    %62 = vector.extract_strided_slice %61 {offsets = [0, 0], sizes = [16, 128], strides = [1, 1]} : vector<16x512xf32> to vector<16x128xf32>
    %63 = arith.negf %62 : vector<16x128xf32>
    %64 = math.exp %63 : vector<16x128xf32>
    %cst_36 = arith.constant 1.000000e+00 : f32
    %65 = vector.broadcast %cst_36 : f32 to vector<16x128xf32>
    %66 = arith.addf %65, %64 : vector<16x128xf32>
    %67 = arith.divf %65, %66 : vector<16x128xf32>
    %68 = vector.extract_strided_slice %61 {offsets = [0, 128], sizes = [16, 128], strides = [1, 1]} : vector<16x512xf32> to vector<16x128xf32>
    %69 = arith.negf %68 : vector<16x128xf32>
    %70 = math.exp %69 : vector<16x128xf32>
    %cst_37 = arith.constant 1.000000e+00 : f32
    %71 = vector.broadcast %cst_37 : f32 to vector<16x128xf32>
    %72 = arith.addf %71, %70 : vector<16x128xf32>
    %73 = arith.divf %71, %72 : vector<16x128xf32>
    %74 = vector.extract_strided_slice %61 {offsets = [0, 256], sizes = [16, 128], strides = [1, 1]} : vector<16x512xf32> to vector<16x128xf32>
    %75 = math.tanh %74 : vector<16x128xf32>
    %76 = vector.extract_strided_slice %61 {offsets = [0, 384], sizes = [16, 128], strides = [1, 1]} : vector<16x512xf32> to vector<16x128xf32>
    %77 = arith.negf %76 : vector<16x128xf32>
    %78 = math.exp %77 : vector<16x128xf32>
    %cst_38 = arith.constant 1.000000e+00 : f32
    %79 = vector.broadcast %cst_38 : f32 to vector<16x128xf32>
    %80 = arith.addf %79, %78 : vector<16x128xf32>
    %81 = arith.divf %79, %80 : vector<16x128xf32>
    %82 = arith.mulf %73, %45 : vector<16x128xf32>
    %83 = arith.mulf %67, %75 : vector<16x128xf32>
    %84 = arith.addf %82, %83 : vector<16x128xf32>
    %85 = math.tanh %84 : vector<16x128xf32>
    %86 = arith.mulf %81, %85 : vector<16x128xf32>
    %c0_i32_39 = arith.constant 0 : i32
    %87 = arith.addi %c0_i32_39, %c1_i32 : i32
    %88 = arith.truncf %86 : vector<16x128xf32> to vector<16x128xbf16>
    %89 = arith.index_cast %87 : i32 to index
    %c0_40 = arith.constant 0 : index
    %c0_41 = arith.constant 0 : index
    %90 = vector.load %arg10[%89, %c0_40, %c0_41] : memref<8x16x128xbf16, #tpu.memory_space<vmem>>, vector<1x16x128xbf16>
    %91 = vector.shape_cast %90 : vector<1x16x128xbf16> to vector<16x128xbf16>
    %92 = vector.shape_cast %88 : vector<16x128xbf16> to vector<1x16x128xbf16>
    tpu.vector_store %arg10[%89, %c0_40, %c0_41], %92 {strides = array<i32>} : memref<8x16x128xbf16, #tpu.memory_space<vmem>>, vector<1x16x128xbf16>,
    %c2_i32 = arith.constant 2 : i32
    %93 = arith.index_cast %c2_i32 : i32 to index
    %c0_42 = arith.constant 0 : index
    %c0_43 = arith.constant 0 : index
    %94 = vector.load %arg11[%93, %c0_42, %c0_43] : memref<8x16x512xf32, #tpu.memory_space<vmem>>, vector<1x16x512xf32>
    %95 = vector.shape_cast %94 : vector<1x16x512xf32> to vector<16x512xf32>
    %96 = arith.truncf %86 : vector<16x128xf32> to vector<16x128xbf16>
    %c0_44 = arith.constant 0 : index
    %c0_45 = arith.constant 0 : index
    %c0_46 = arith.constant 0 : index
    %97 = vector.load %arg4[%c0_44, %c0_45, %c0_46] : memref<2x128x512xbf16, #tpu.memory_space<vmem>>, vector<1x128x512xbf16>
    %98 = vector.shape_cast %97 : vector<1x128x512xbf16> to vector<128x512xbf16>
    %cst_47 = arith.constant dense<0.000000e+00> : vector<16x512xf32>
    %99 = tpu.matmul %96, %98, %cst_47 {dimension_numbers = #tpu.dot_dimension_numbers<[1], [0], [0], [1], [0, 0, 1, 1], [], []>} : vector<16x128xbf16>, vector<128x512xbf16>, vector<16x512xf32> -> vector<16x512xf32>
    %100 = arith.addf %95, %99 : vector<16x512xf32>
    %101 = vector.extract_strided_slice %100 {offsets = [0, 0], sizes = [16, 128], strides = [1, 1]} : vector<16x512xf32> to vector<16x128xf32>
    %102 = arith.negf %101 : vector<16x128xf32>
    %103 = math.exp %102 : vector<16x128xf32>
    %cst_48 = arith.constant 1.000000e+00 : f32
    %104 = vector.broadcast %cst_48 : f32 to vector<16x128xf32>
    %105 = arith.addf %104, %103 : vector<16x128xf32>
    %106 = arith.divf %104, %105 : vector<16x128xf32>
    %107 = vector.extract_strided_slice %100 {offsets = [0, 128], sizes = [16, 128], strides = [1, 1]} : vector<16x512xf32> to vector<16x128xf32>
    %108 = arith.negf %107 : vector<16x128xf32>
    %109 = math.exp %108 : vector<16x128xf32>
    %cst_49 = arith.constant 1.000000e+00 : f32
    %110 = vector.broadcast %cst_49 : f32 to vector<16x128xf32>
    %111 = arith.addf %110, %109 : vector<16x128xf32>
    %112 = arith.divf %110, %111 : vector<16x128xf32>
    %113 = vector.extract_strided_slice %100 {offsets = [0, 256], sizes = [16, 128], strides = [1, 1]} : vector<16x512xf32> to vector<16x128xf32>
    %114 = math.tanh %113 : vector<16x128xf32>
    %115 = vector.extract_strided_slice %100 {offsets = [0, 384], sizes = [16, 128], strides = [1, 1]} : vector<16x512xf32> to vector<16x128xf32>
    %116 = arith.negf %115 : vector<16x128xf32>
    %117 = math.exp %116 : vector<16x128xf32>
    %cst_50 = arith.constant 1.000000e+00 : f32
    %118 = vector.broadcast %cst_50 : f32 to vector<16x128xf32>
    %119 = arith.addf %118, %117 : vector<16x128xf32>
    %120 = arith.divf %118, %119 : vector<16x128xf32>
    %121 = arith.mulf %112, %84 : vector<16x128xf32>
    %122 = arith.mulf %106, %114 : vector<16x128xf32>
    %123 = arith.addf %121, %122 : vector<16x128xf32>
    %124 = math.tanh %123 : vector<16x128xf32>
    %125 = arith.mulf %120, %124 : vector<16x128xf32>
    %c0_i32_51 = arith.constant 0 : i32
    %126 = arith.addi %c0_i32_51, %c2_i32 : i32
    %127 = arith.truncf %125 : vector<16x128xf32> to vector<16x128xbf16>
    %128 = arith.index_cast %126 : i32 to index
    %c0_52 = arith.constant 0 : index
    %c0_53 = arith.constant 0 : index
    %129 = vector.load %arg10[%128, %c0_52, %c0_53] : memref<8x16x128xbf16, #tpu.memory_space<vmem>>, vector<1x16x128xbf16>
    %130 = vector.shape_cast %129 : vector<1x16x128xbf16> to vector<16x128xbf16>
    %131 = vector.shape_cast %127 : vector<16x128xbf16> to vector<1x16x128xbf16>
    tpu.vector_store %arg10[%128, %c0_52, %c0_53], %131 {strides = array<i32>} : memref<8x16x128xbf16, #tpu.memory_space<vmem>>, vector<1x16x128xbf16>,
    %c3_i32 = arith.constant 3 : i32
    %132 = arith.index_cast %c3_i32 : i32 to index
    %c0_54 = arith.constant 0 : index
    %c0_55 = arith.constant 0 : index
    %133 = vector.load %arg11[%132, %c0_54, %c0_55] : memref<8x16x512xf32, #tpu.memory_space<vmem>>, vector<1x16x512xf32>
    %134 = vector.shape_cast %133 : vector<1x16x512xf32> to vector<16x512xf32>
    %135 = arith.truncf %125 : vector<16x128xf32> to vector<16x128xbf16>
    %c0_56 = arith.constant 0 : index
    %c0_57 = arith.constant 0 : index
    %c0_58 = arith.constant 0 : index
    %136 = vector.load %arg4[%c0_56, %c0_57, %c0_58] : memref<2x128x512xbf16, #tpu.memory_space<vmem>>, vector<1x128x512xbf16>
    %137 = vector.shape_cast %136 : vector<1x128x512xbf16> to vector<128x512xbf16>
    %cst_59 = arith.constant dense<0.000000e+00> : vector<16x512xf32>
    %138 = tpu.matmul %135, %137, %cst_59 {dimension_numbers = #tpu.dot_dimension_numbers<[1], [0], [0], [1], [0, 0, 1, 1], [], []>} : vector<16x128xbf16>, vector<128x512xbf16>, vector<16x512xf32> -> vector<16x512xf32>
    %139 = arith.addf %134, %138 : vector<16x512xf32>
    %140 = vector.extract_strided_slice %139 {offsets = [0, 0], sizes = [16, 128], strides = [1, 1]} : vector<16x512xf32> to vector<16x128xf32>
    %141 = arith.negf %140 : vector<16x128xf32>
    %142 = math.exp %141 : vector<16x128xf32>
    %cst_60 = arith.constant 1.000000e+00 : f32
    %143 = vector.broadcast %cst_60 : f32 to vector<16x128xf32>
    %144 = arith.addf %143, %142 : vector<16x128xf32>
    %145 = arith.divf %143, %144 : vector<16x128xf32>
    %146 = vector.extract_strided_slice %139 {offsets = [0, 128], sizes = [16, 128], strides = [1, 1]} : vector<16x512xf32> to vector<16x128xf32>
    %147 = arith.negf %146 : vector<16x128xf32>
    %148 = math.exp %147 : vector<16x128xf32>
    %cst_61 = arith.constant 1.000000e+00 : f32
    %149 = vector.broadcast %cst_61 : f32 to vector<16x128xf32>
    %150 = arith.addf %149, %148 : vector<16x128xf32>
    %151 = arith.divf %149, %150 : vector<16x128xf32>
    %152 = vector.extract_strided_slice %139 {offsets = [0, 256], sizes = [16, 128], strides = [1, 1]} : vector<16x512xf32> to vector<16x128xf32>
    %153 = math.tanh %152 : vector<16x128xf32>
    %154 = vector.extract_strided_slice %139 {offsets = [0, 384], sizes = [16, 128], strides = [1, 1]} : vector<16x512xf32> to vector<16x128xf32>
    %155 = arith.negf %154 : vector<16x128xf32>
    %156 = math.exp %155 : vector<16x128xf32>
    %cst_62 = arith.constant 1.000000e+00 : f32
    %157 = vector.broadcast %cst_62 : f32 to vector<16x128xf32>
    %158 = arith.addf %157, %156 : vector<16x128xf32>
    %159 = arith.divf %157, %158 : vector<16x128xf32>
    %160 = arith.mulf %151, %123 : vector<16x128xf32>
    %161 = arith.mulf %145, %153 : vector<16x128xf32>
    %162 = arith.addf %160, %161 : vector<16x128xf32>
    %163 = math.tanh %162 : vector<16x128xf32>
    %164 = arith.mulf %159, %163 : vector<16x128xf32>
    %c0_i32_63 = arith.constant 0 : i32
    %165 = arith.addi %c0_i32_63, %c3_i32 : i32
    %166 = arith.truncf %164 : vector<16x128xf32> to vector<16x128xbf16>
    %167 = arith.index_cast %165 : i32 to index
    %c0_64 = arith.constant 0 : index
    %c0_65 = arith.constant 0 : index
    %168 = vector.load %arg10[%167, %c0_64, %c0_65] : memref<8x16x128xbf16, #tpu.memory_space<vmem>>, vector<1x16x128xbf16>
    %169 = vector.shape_cast %168 : vector<1x16x128xbf16> to vector<16x128xbf16>
    %170 = vector.shape_cast %166 : vector<16x128xbf16> to vector<1x16x128xbf16>
    tpu.vector_store %arg10[%167, %c0_64, %c0_65], %170 {strides = array<i32>} : memref<8x16x128xbf16, #tpu.memory_space<vmem>>, vector<1x16x128xbf16>,
    %c4_i32 = arith.constant 4 : i32
    %171 = arith.index_cast %c4_i32 : i32 to index
    %c0_66 = arith.constant 0 : index
    %c0_67 = arith.constant 0 : index
    %172 = vector.load %arg11[%171, %c0_66, %c0_67] : memref<8x16x512xf32, #tpu.memory_space<vmem>>, vector<1x16x512xf32>
    %173 = vector.shape_cast %172 : vector<1x16x512xf32> to vector<16x512xf32>
    %174 = arith.truncf %164 : vector<16x128xf32> to vector<16x128xbf16>
    %c0_68 = arith.constant 0 : index
    %c0_69 = arith.constant 0 : index
    %c0_70 = arith.constant 0 : index
    %175 = vector.load %arg4[%c0_68, %c0_69, %c0_70] : memref<2x128x512xbf16, #tpu.memory_space<vmem>>, vector<1x128x512xbf16>
    %176 = vector.shape_cast %175 : vector<1x128x512xbf16> to vector<128x512xbf16>
    %cst_71 = arith.constant dense<0.000000e+00> : vector<16x512xf32>
    %177 = tpu.matmul %174, %176, %cst_71 {dimension_numbers = #tpu.dot_dimension_numbers<[1], [0], [0], [1], [0, 0, 1, 1], [], []>} : vector<16x128xbf16>, vector<128x512xbf16>, vector<16x512xf32> -> vector<16x512xf32>
    %178 = arith.addf %173, %177 : vector<16x512xf32>
    %179 = vector.extract_strided_slice %178 {offsets = [0, 0], sizes = [16, 128], strides = [1, 1]} : vector<16x512xf32> to vector<16x128xf32>
    %180 = arith.negf %179 : vector<16x128xf32>
    %181 = math.exp %180 : vector<16x128xf32>
    %cst_72 = arith.constant 1.000000e+00 : f32
    %182 = vector.broadcast %cst_72 : f32 to vector<16x128xf32>
    %183 = arith.addf %182, %181 : vector<16x128xf32>
    %184 = arith.divf %182, %183 : vector<16x128xf32>
    %185 = vector.extract_strided_slice %178 {offsets = [0, 128], sizes = [16, 128], strides = [1, 1]} : vector<16x512xf32> to vector<16x128xf32>
    %186 = arith.negf %185 : vector<16x128xf32>
    %187 = math.exp %186 : vector<16x128xf32>
    %cst_73 = arith.constant 1.000000e+00 : f32
    %188 = vector.broadcast %cst_73 : f32 to vector<16x128xf32>
    %189 = arith.addf %188, %187 : vector<16x128xf32>
    %190 = arith.divf %188, %189 : vector<16x128xf32>
    %191 = vector.extract_strided_slice %178 {offsets = [0, 256], sizes = [16, 128], strides = [1, 1]} : vector<16x512xf32> to vector<16x128xf32>
    %192 = math.tanh %191 : vector<16x128xf32>
    %193 = vector.extract_strided_slice %178 {offsets = [0, 384], sizes = [16, 128], strides = [1, 1]} : vector<16x512xf32> to vector<16x128xf32>
    %194 = arith.negf %193 : vector<16x128xf32>
    %195 = math.exp %194 : vector<16x128xf32>
    %cst_74 = arith.constant 1.000000e+00 : f32
    %196 = vector.broadcast %cst_74 : f32 to vector<16x128xf32>
    %197 = arith.addf %196, %195 : vector<16x128xf32>
    %198 = arith.divf %196, %197 : vector<16x128xf32>
    %199 = arith.mulf %190, %162 : vector<16x128xf32>
    %200 = arith.mulf %184, %192 : vector<16x128xf32>
    %201 = arith.addf %199, %200 : vector<16x128xf32>
    %202 = math.tanh %201 : vector<16x128xf32>
    %203 = arith.mulf %198, %202 : vector<16x128xf32>
    %c0_i32_75 = arith.constant 0 : i32
    %204 = arith.addi %c0_i32_75, %c4_i32 : i32
    %205 = arith.truncf %203 : vector<16x128xf32> to vector<16x128xbf16>
    %206 = arith.index_cast %204 : i32 to index
    %c0_76 = arith.constant 0 : index
    %c0_77 = arith.constant 0 : index
    %207 = vector.load %arg10[%206, %c0_76, %c0_77] : memref<8x16x128xbf16, #tpu.memory_space<vmem>>, vector<1x16x128xbf16>
    %208 = vector.shape_cast %207 : vector<1x16x128xbf16> to vector<16x128xbf16>
    %209 = vector.shape_cast %205 : vector<16x128xbf16> to vector<1x16x128xbf16>
    tpu.vector_store %arg10[%206, %c0_76, %c0_77], %209 {strides = array<i32>} : memref<8x16x128xbf16, #tpu.memory_space<vmem>>, vector<1x16x128xbf16>,
    %c5_i32 = arith.constant 5 : i32
    %210 = arith.index_cast %c5_i32 : i32 to index
    %c0_78 = arith.constant 0 : index
    %c0_79 = arith.constant 0 : index
    %211 = vector.load %arg11[%210, %c0_78, %c0_79] : memref<8x16x512xf32, #tpu.memory_space<vmem>>, vector<1x16x512xf32>
    %212 = vector.shape_cast %211 : vector<1x16x512xf32> to vector<16x512xf32>
    %213 = arith.truncf %203 : vector<16x128xf32> to vector<16x128xbf16>
    %c0_80 = arith.constant 0 : index
    %c0_81 = arith.constant 0 : index
    %c0_82 = arith.constant 0 : index
    %214 = vector.load %arg4[%c0_80, %c0_81, %c0_82] : memref<2x128x512xbf16, #tpu.memory_space<vmem>>, vector<1x128x512xbf16>
    %215 = vector.shape_cast %214 : vector<1x128x512xbf16> to vector<128x512xbf16>
    %cst_83 = arith.constant dense<0.000000e+00> : vector<16x512xf32>
    %216 = tpu.matmul %213, %215, %cst_83 {dimension_numbers = #tpu.dot_dimension_numbers<[1], [0], [0], [1], [0, 0, 1, 1], [], []>} : vector<16x128xbf16>, vector<128x512xbf16>, vector<16x512xf32> -> vector<16x512xf32>
    %217 = arith.addf %212, %216 : vector<16x512xf32>
    %218 = vector.extract_strided_slice %217 {offsets = [0, 0], sizes = [16, 128], strides = [1, 1]} : vector<16x512xf32> to vector<16x128xf32>
    %219 = arith.negf %218 : vector<16x128xf32>
    %220 = math.exp %219 : vector<16x128xf32>
    %cst_84 = arith.constant 1.000000e+00 : f32
    %221 = vector.broadcast %cst_84 : f32 to vector<16x128xf32>
    %222 = arith.addf %221, %220 : vector<16x128xf32>
    %223 = arith.divf %221, %222 : vector<16x128xf32>
    %224 = vector.extract_strided_slice %217 {offsets = [0, 128], sizes = [16, 128], strides = [1, 1]} : vector<16x512xf32> to vector<16x128xf32>
    %225 = arith.negf %224 : vector<16x128xf32>
    %226 = math.exp %225 : vector<16x128xf32>
    %cst_85 = arith.constant 1.000000e+00 : f32
    %227 = vector.broadcast %cst_85 : f32 to vector<16x128xf32>
    %228 = arith.addf %227, %226 : vector<16x128xf32>
    %229 = arith.divf %227, %228 : vector<16x128xf32>
    %230 = vector.extract_strided_slice %217 {offsets = [0, 256], sizes = [16, 128], strides = [1, 1]} : vector<16x512xf32> to vector<16x128xf32>
    %231 = math.tanh %230 : vector<16x128xf32>
    %232 = vector.extract_strided_slice %217 {offsets = [0, 384], sizes = [16, 128], strides = [1, 1]} : vector<16x512xf32> to vector<16x128xf32>
    %233 = arith.negf %232 : vector<16x128xf32>
    %234 = math.exp %233 : vector<16x128xf32>
    %cst_86 = arith.constant 1.000000e+00 : f32
    %235 = vector.broadcast %cst_86 : f32 to vector<16x128xf32>
    %236 = arith.addf %235, %234 : vector<16x128xf32>
    %237 = arith.divf %235, %236 : vector<16x128xf32>
    %238 = arith.mulf %229, %201 : vector<16x128xf32>
    %239 = arith.mulf %223, %231 : vector<16x128xf32>
    %240 = arith.addf %238, %239 : vector<16x128xf32>
    %241 = math.tanh %240 : vector<16x128xf32>
    %242 = arith.mulf %237, %241 : vector<16x128xf32>
    %c0_i32_87 = arith.constant 0 : i32
    %243 = arith.addi %c0_i32_87, %c5_i32 : i32
    %244 = arith.truncf %242 : vector<16x128xf32> to vector<16x128xbf16>
    %245 = arith.index_cast %243 : i32 to index
    %c0_88 = arith.constant 0 : index
    %c0_89 = arith.constant 0 : index
    %246 = vector.load %arg10[%245, %c0_88, %c0_89] : memref<8x16x128xbf16, #tpu.memory_space<vmem>>, vector<1x16x128xbf16>
    %247 = vector.shape_cast %246 : vector<1x16x128xbf16> to vector<16x128xbf16>
    %248 = vector.shape_cast %244 : vector<16x128xbf16> to vector<1x16x128xbf16>
    tpu.vector_store %arg10[%245, %c0_88, %c0_89], %248 {strides = array<i32>} : memref<8x16x128xbf16, #tpu.memory_space<vmem>>, vector<1x16x128xbf16>,
    %c6_i32 = arith.constant 6 : i32
    %249 = arith.index_cast %c6_i32 : i32 to index
    %c0_90 = arith.constant 0 : index
    %c0_91 = arith.constant 0 : index
    %250 = vector.load %arg11[%249, %c0_90, %c0_91] : memref<8x16x512xf32, #tpu.memory_space<vmem>>, vector<1x16x512xf32>
    %251 = vector.shape_cast %250 : vector<1x16x512xf32> to vector<16x512xf32>
    %252 = arith.truncf %242 : vector<16x128xf32> to vector<16x128xbf16>
    %c0_92 = arith.constant 0 : index
    %c0_93 = arith.constant 0 : index
    %c0_94 = arith.constant 0 : index
    %253 = vector.load %arg4[%c0_92, %c0_93, %c0_94] : memref<2x128x512xbf16, #tpu.memory_space<vmem>>, vector<1x128x512xbf16>
    %254 = vector.shape_cast %253 : vector<1x128x512xbf16> to vector<128x512xbf16>
    %cst_95 = arith.constant dense<0.000000e+00> : vector<16x512xf32>
    %255 = tpu.matmul %252, %254, %cst_95 {dimension_numbers = #tpu.dot_dimension_numbers<[1], [0], [0], [1], [0, 0, 1, 1], [], []>} : vector<16x128xbf16>, vector<128x512xbf16>, vector<16x512xf32> -> vector<16x512xf32>
    %256 = arith.addf %251, %255 : vector<16x512xf32>
    %257 = vector.extract_strided_slice %256 {offsets = [0, 0], sizes = [16, 128], strides = [1, 1]} : vector<16x512xf32> to vector<16x128xf32>
    %258 = arith.negf %257 : vector<16x128xf32>
    %259 = math.exp %258 : vector<16x128xf32>
    %cst_96 = arith.constant 1.000000e+00 : f32
    %260 = vector.broadcast %cst_96 : f32 to vector<16x128xf32>
    %261 = arith.addf %260, %259 : vector<16x128xf32>
    %262 = arith.divf %260, %261 : vector<16x128xf32>
    %263 = vector.extract_strided_slice %256 {offsets = [0, 128], sizes = [16, 128], strides = [1, 1]} : vector<16x512xf32> to vector<16x128xf32>
    %264 = arith.negf %263 : vector<16x128xf32>
    %265 = math.exp %264 : vector<16x128xf32>
    %cst_97 = arith.constant 1.000000e+00 : f32
    %266 = vector.broadcast %cst_97 : f32 to vector<16x128xf32>
    %267 = arith.addf %266, %265 : vector<16x128xf32>
    %268 = arith.divf %266, %267 : vector<16x128xf32>
    %269 = vector.extract_strided_slice %256 {offsets = [0, 256], sizes = [16, 128], strides = [1, 1]} : vector<16x512xf32> to vector<16x128xf32>
    %270 = math.tanh %269 : vector<16x128xf32>
    %271 = vector.extract_strided_slice %256 {offsets = [0, 384], sizes = [16, 128], strides = [1, 1]} : vector<16x512xf32> to vector<16x128xf32>
    %272 = arith.negf %271 : vector<16x128xf32>
    %273 = math.exp %272 : vector<16x128xf32>
    %cst_98 = arith.constant 1.000000e+00 : f32
    %274 = vector.broadcast %cst_98 : f32 to vector<16x128xf32>
    %275 = arith.addf %274, %273 : vector<16x128xf32>
    %276 = arith.divf %274, %275 : vector<16x128xf32>
    %277 = arith.mulf %268, %240 : vector<16x128xf32>
    %278 = arith.mulf %262, %270 : vector<16x128xf32>
    %279 = arith.addf %277, %278 : vector<16x128xf32>
    %280 = math.tanh %279 : vector<16x128xf32>
    %281 = arith.mulf %276, %280 : vector<16x128xf32>
    %c0_i32_99 = arith.constant 0 : i32
    %282 = arith.addi %c0_i32_99, %c6_i32 : i32
    %283 = arith.truncf %281 : vector<16x128xf32> to vector<16x128xbf16>
    %284 = arith.index_cast %282 : i32 to index
    %c0_100 = arith.constant 0 : index
    %c0_101 = arith.constant 0 : index
    %285 = vector.load %arg10[%284, %c0_100, %c0_101] : memref<8x16x128xbf16, #tpu.memory_space<vmem>>, vector<1x16x128xbf16>
    %286 = vector.shape_cast %285 : vector<1x16x128xbf16> to vector<16x128xbf16>
    %287 = vector.shape_cast %283 : vector<16x128xbf16> to vector<1x16x128xbf16>
    tpu.vector_store %arg10[%284, %c0_100, %c0_101], %287 {strides = array<i32>} : memref<8x16x128xbf16, #tpu.memory_space<vmem>>, vector<1x16x128xbf16>,
    %c7_i32 = arith.constant 7 : i32
    %288 = arith.index_cast %c7_i32 : i32 to index
    %c0_102 = arith.constant 0 : index
    %c0_103 = arith.constant 0 : index
    %289 = vector.load %arg11[%288, %c0_102, %c0_103] : memref<8x16x512xf32, #tpu.memory_space<vmem>>, vector<1x16x512xf32>
    %290 = vector.shape_cast %289 : vector<1x16x512xf32> to vector<16x512xf32>
    %291 = arith.truncf %281 : vector<16x128xf32> to vector<16x128xbf16>
    %c0_104 = arith.constant 0 : index
    %c0_105 = arith.constant 0 : index
    %c0_106 = arith.constant 0 : index
    %292 = vector.load %arg4[%c0_104, %c0_105, %c0_106] : memref<2x128x512xbf16, #tpu.memory_space<vmem>>, vector<1x128x512xbf16>
    %293 = vector.shape_cast %292 : vector<1x128x512xbf16> to vector<128x512xbf16>
    %cst_107 = arith.constant dense<0.000000e+00> : vector<16x512xf32>
    %294 = tpu.matmul %291, %293, %cst_107 {dimension_numbers = #tpu.dot_dimension_numbers<[1], [0], [0], [1], [0, 0, 1, 1], [], []>} : vector<16x128xbf16>, vector<128x512xbf16>, vector<16x512xf32> -> vector<16x512xf32>
    %295 = arith.addf %290, %294 : vector<16x512xf32>
    %296 = vector.extract_strided_slice %295 {offsets = [0, 0], sizes = [16, 128], strides = [1, 1]} : vector<16x512xf32> to vector<16x128xf32>
    %297 = arith.negf %296 : vector<16x128xf32>
    %298 = math.exp %297 : vector<16x128xf32>
    %cst_108 = arith.constant 1.000000e+00 : f32
    %299 = vector.broadcast %cst_108 : f32 to vector<16x128xf32>
    %300 = arith.addf %299, %298 : vector<16x128xf32>
    %301 = arith.divf %299, %300 : vector<16x128xf32>
    %302 = vector.extract_strided_slice %295 {offsets = [0, 128], sizes = [16, 128], strides = [1, 1]} : vector<16x512xf32> to vector<16x128xf32>
    %303 = arith.negf %302 : vector<16x128xf32>
    %304 = math.exp %303 : vector<16x128xf32>
    %cst_109 = arith.constant 1.000000e+00 : f32
    %305 = vector.broadcast %cst_109 : f32 to vector<16x128xf32>
    %306 = arith.addf %305, %304 : vector<16x128xf32>
    %307 = arith.divf %305, %306 : vector<16x128xf32>
    %308 = vector.extract_strided_slice %295 {offsets = [0, 256], sizes = [16, 128], strides = [1, 1]} : vector<16x512xf32> to vector<16x128xf32>
    %309 = math.tanh %308 : vector<16x128xf32>
    %310 = vector.extract_strided_slice %295 {offsets = [0, 384], sizes = [16, 128], strides = [1, 1]} : vector<16x512xf32> to vector<16x128xf32>
    %311 = arith.negf %310 : vector<16x128xf32>
    %312 = math.exp %311 : vector<16x128xf32>
    %cst_110 = arith.constant 1.000000e+00 : f32
    %313 = vector.broadcast %cst_110 : f32 to vector<16x128xf32>
    %314 = arith.addf %313, %312 : vector<16x128xf32>
    %315 = arith.divf %313, %314 : vector<16x128xf32>
    %316 = arith.mulf %307, %279 : vector<16x128xf32>
    %317 = arith.mulf %301, %309 : vector<16x128xf32>
    %318 = arith.addf %316, %317 : vector<16x128xf32>
    %319 = math.tanh %318 : vector<16x128xf32>
    %320 = arith.mulf %315, %319 : vector<16x128xf32>
    %c0_i32_111 = arith.constant 0 : i32
    %321 = arith.addi %c0_i32_111, %c7_i32 : i32
    %322 = arith.truncf %320 : vector<16x128xf32> to vector<16x128xbf16>
    %323 = arith.index_cast %321 : i32 to index
    %c0_112 = arith.constant 0 : index
    %c0_113 = arith.constant 0 : index
    %324 = vector.load %arg10[%323, %c0_112, %c0_113] : memref<8x16x128xbf16, #tpu.memory_space<vmem>>, vector<1x16x128xbf16>
    %325 = vector.shape_cast %324 : vector<1x16x128xbf16> to vector<16x128xbf16>
    %326 = vector.shape_cast %322 : vector<16x128xbf16> to vector<1x16x128xbf16>
    tpu.vector_store %arg10[%323, %c0_112, %c0_113], %326 {strides = array<i32>} : memref<8x16x128xbf16, #tpu.memory_space<vmem>>, vector<1x16x128xbf16>,
    %c8_i32 = arith.constant 8 : i32
    %c1 = arith.constant 1 : index
    %c0_114 = arith.constant 0 : index
    %c0_115 = arith.constant 0 : index
    %327 = vector.load %arg6[%c1, %c0_114, %c0_115] : memref<2x16x128xf32, #tpu.memory_space<vmem>>, vector<1x16x128xf32>
    %328 = vector.shape_cast %327 : vector<1x16x128xf32> to vector<16x128xf32>
    %c1_116 = arith.constant 1 : index
    %c0_117 = arith.constant 0 : index
    %c0_118 = arith.constant 0 : index
    %329 = vector.load %arg7[%c1_116, %c0_117, %c0_118] : memref<2x16x128xf32, #tpu.memory_space<vmem>>, vector<1x16x128xf32>
    %330 = vector.shape_cast %329 : vector<1x16x128xf32> to vector<16x128xf32>
    %c0_119 = arith.constant 0 : index
    %c0_120 = arith.constant 0 : index
    %c0_121 = arith.constant 0 : index
    %331 = vector.load %arg10[%c0_119, %c0_120, %c0_121] : memref<8x16x128xbf16, #tpu.memory_space<vmem>>, vector<8x16x128xbf16>
    %c0_122 = arith.constant 0 : index
    %c0_123 = arith.constant 0 : index
    %c0_124 = arith.constant 0 : index
    %332 = vector.load %arg3[%c0_122, %c0_123, %c0_124] : memref<1x128x512xbf16, #tpu.memory_space<vmem>>, vector<1x128x512xbf16>
    %333 = vector.shape_cast %332 : vector<1x128x512xbf16> to vector<128x512xbf16>
    %334 = vector.shape_cast %331 : vector<8x16x128xbf16> to vector<128x128xbf16>
    %cst_125 = arith.constant dense<0.000000e+00> : vector<128x512xf32>
    %335 = tpu.matmul %334, %333, %cst_125 {dimension_numbers = #tpu.dot_dimension_numbers<[1], [0], [0], [1], [0, 0, 1, 1], [], []>} : vector<128x128xbf16>, vector<128x512xbf16>, vector<128x512xf32> -> vector<128x512xf32>
    %c1_126 = arith.constant 1 : index
    %c0_127 = arith.constant 0 : index
    %c0_128 = arith.constant 0 : index
    %336 = vector.load %arg5[%c1_126, %c0_127, %c0_128] : memref<2x1x512xf32, #tpu.memory_space<vmem>>, vector<1x1x512xf32>
    %337 = vector.shape_cast %336 : vector<1x1x512xf32> to vector<1x512xf32>
    %338 = vector.broadcast %337 : vector<1x512xf32> to vector<128x512xf32>
    %339 = arith.addf %335, %338 : vector<128x512xf32>
    %340 = vector.shape_cast %339 : vector<128x512xf32> to vector<8x16x512xf32>
    %c0_129 = arith.constant 0 : index
    %c0_130 = arith.constant 0 : index
    %c0_131 = arith.constant 0 : index
    %341 = vector.load %arg11[%c0_129, %c0_130, %c0_131] : memref<8x16x512xf32, #tpu.memory_space<vmem>>, vector<8x16x512xf32>
    tpu.vector_store %arg11[%c0_129, %c0_130, %c0_131], %340 {strides = array<i32>} : memref<8x16x512xf32, #tpu.memory_space<vmem>>, vector<8x16x512xf32>,
    %c0_i32_132 = arith.constant 0 : i32
    %342 = arith.index_cast %c0_i32_132 : i32 to index
    %c0_133 = arith.constant 0 : index
    %c0_134 = arith.constant 0 : index
    %343 = vector.load %arg11[%342, %c0_133, %c0_134] : memref<8x16x512xf32, #tpu.memory_space<vmem>>, vector<1x16x512xf32>
    %344 = vector.shape_cast %343 : vector<1x16x512xf32> to vector<16x512xf32>
    %345 = arith.truncf %328 : vector<16x128xf32> to vector<16x128xbf16>
    %c1_135 = arith.constant 1 : index
    %c0_136 = arith.constant 0 : index
    %c0_137 = arith.constant 0 : index
    %346 = vector.load %arg4[%c1_135, %c0_136, %c0_137] : memref<2x128x512xbf16, #tpu.memory_space<vmem>>, vector<1x128x512xbf16>
    %347 = vector.shape_cast %346 : vector<1x128x512xbf16> to vector<128x512xbf16>
    %cst_138 = arith.constant dense<0.000000e+00> : vector<16x512xf32>
    %348 = tpu.matmul %345, %347, %cst_138 {dimension_numbers = #tpu.dot_dimension_numbers<[1], [0], [0], [1], [0, 0, 1, 1], [], []>} : vector<16x128xbf16>, vector<128x512xbf16>, vector<16x512xf32> -> vector<16x512xf32>
    %349 = arith.addf %344, %348 : vector<16x512xf32>
    %350 = vector.extract_strided_slice %349 {offsets = [0, 0], sizes = [16, 128], strides = [1, 1]} : vector<16x512xf32> to vector<16x128xf32>
    %351 = arith.negf %350 : vector<16x128xf32>
    %352 = math.exp %351 : vector<16x128xf32>
    %cst_139 = arith.constant 1.000000e+00 : f32
    %353 = vector.broadcast %cst_139 : f32 to vector<16x128xf32>
    %354 = arith.addf %353, %352 : vector<16x128xf32>
    %355 = arith.divf %353, %354 : vector<16x128xf32>
    %356 = vector.extract_strided_slice %349 {offsets = [0, 128], sizes = [16, 128], strides = [1, 1]} : vector<16x512xf32> to vector<16x128xf32>
    %357 = arith.negf %356 : vector<16x128xf32>
    %358 = math.exp %357 : vector<16x128xf32>
    %cst_140 = arith.constant 1.000000e+00 : f32
    %359 = vector.broadcast %cst_140 : f32 to vector<16x128xf32>
    %360 = arith.addf %359, %358 : vector<16x128xf32>
    %361 = arith.divf %359, %360 : vector<16x128xf32>
    %362 = vector.extract_strided_slice %349 {offsets = [0, 256], sizes = [16, 128], strides = [1, 1]} : vector<16x512xf32> to vector<16x128xf32>
    %363 = math.tanh %362 : vector<16x128xf32>
    %364 = vector.extract_strided_slice %349 {offsets = [0, 384], sizes = [16, 128], strides = [1, 1]} : vector<16x512xf32> to vector<16x128xf32>
    %365 = arith.negf %364 : vector<16x128xf32>
    %366 = math.exp %365 : vector<16x128xf32>
    %cst_141 = arith.constant 1.000000e+00 : f32
    %367 = vector.broadcast %cst_141 : f32 to vector<16x128xf32>
    %368 = arith.addf %367, %366 : vector<16x128xf32>
    %369 = arith.divf %367, %368 : vector<16x128xf32>
    %370 = arith.mulf %361, %330 : vector<16x128xf32>
    %371 = arith.mulf %355, %363 : vector<16x128xf32>
    %372 = arith.addf %370, %371 : vector<16x128xf32>
    %373 = math.tanh %372 : vector<16x128xf32>
    %374 = arith.mulf %369, %373 : vector<16x128xf32>
    %c0_i32_142 = arith.constant 0 : i32
    %375 = arith.addi %c0_i32_142, %c0_i32_132 : i32
    %376 = vector.broadcast %375 : i32 to vector<16x1xi32>
    %377 = arith.cmpi sgt, %0, %376 : vector<16x1xi32>
    %cst_143 = arith.constant 0.000000e+00 : f32
    %378 = vector.shape_cast %377 : vector<16x1xi1> to vector<16x1xi1>
    %379 = vector.broadcast %378 : vector<16x1xi1> to vector<16x128xi1>
    %380 = vector.broadcast %cst_143 : f32 to vector<16x128xf32>
    %381 = arith.select %379, %374, %380 : vector<16x128xi1>, vector<16x128xf32>
    %382 = arith.index_cast %375 : i32 to index
    %c0_144 = arith.constant 0 : index
    %c0_145 = arith.constant 0 : index
    %383 = vector.load %arg9[%382, %c0_144, %c0_145] : memref<8x16x128xf32, #tpu.memory_space<vmem>>, vector<1x16x128xf32>
    %384 = vector.shape_cast %383 : vector<1x16x128xf32> to vector<16x128xf32>
    %385 = vector.shape_cast %381 : vector<16x128xf32> to vector<1x16x128xf32>
    tpu.vector_store %arg9[%382, %c0_144, %c0_145], %385 {strides = array<i32>} : memref<8x16x128xf32, #tpu.memory_space<vmem>>, vector<1x16x128xf32>,
    %c1_i32_146 = arith.constant 1 : i32
    %386 = arith.index_cast %c1_i32_146 : i32 to index
    %c0_147 = arith.constant 0 : index
    %c0_148 = arith.constant 0 : index
    %387 = vector.load %arg11[%386, %c0_147, %c0_148] : memref<8x16x512xf32, #tpu.memory_space<vmem>>, vector<1x16x512xf32>
    %388 = vector.shape_cast %387 : vector<1x16x512xf32> to vector<16x512xf32>
    %389 = arith.truncf %374 : vector<16x128xf32> to vector<16x128xbf16>
    %c1_149 = arith.constant 1 : index
    %c0_150 = arith.constant 0 : index
    %c0_151 = arith.constant 0 : index
    %390 = vector.load %arg4[%c1_149, %c0_150, %c0_151] : memref<2x128x512xbf16, #tpu.memory_space<vmem>>, vector<1x128x512xbf16>
    %391 = vector.shape_cast %390 : vector<1x128x512xbf16> to vector<128x512xbf16>
    %cst_152 = arith.constant dense<0.000000e+00> : vector<16x512xf32>
    %392 = tpu.matmul %389, %391, %cst_152 {dimension_numbers = #tpu.dot_dimension_numbers<[1], [0], [0], [1], [0, 0, 1, 1], [], []>} : vector<16x128xbf16>, vector<128x512xbf16>, vector<16x512xf32> -> vector<16x512xf32>
    %393 = arith.addf %388, %392 : vector<16x512xf32>
    %394 = vector.extract_strided_slice %393 {offsets = [0, 0], sizes = [16, 128], strides = [1, 1]} : vector<16x512xf32> to vector<16x128xf32>
    %395 = arith.negf %394 : vector<16x128xf32>
    %396 = math.exp %395 : vector<16x128xf32>
    %cst_153 = arith.constant 1.000000e+00 : f32
    %397 = vector.broadcast %cst_153 : f32 to vector<16x128xf32>
    %398 = arith.addf %397, %396 : vector<16x128xf32>
    %399 = arith.divf %397, %398 : vector<16x128xf32>
    %400 = vector.extract_strided_slice %393 {offsets = [0, 128], sizes = [16, 128], strides = [1, 1]} : vector<16x512xf32> to vector<16x128xf32>
    %401 = arith.negf %400 : vector<16x128xf32>
    %402 = math.exp %401 : vector<16x128xf32>
    %cst_154 = arith.constant 1.000000e+00 : f32
    %403 = vector.broadcast %cst_154 : f32 to vector<16x128xf32>
    %404 = arith.addf %403, %402 : vector<16x128xf32>
    %405 = arith.divf %403, %404 : vector<16x128xf32>
    %406 = vector.extract_strided_slice %393 {offsets = [0, 256], sizes = [16, 128], strides = [1, 1]} : vector<16x512xf32> to vector<16x128xf32>
    %407 = math.tanh %406 : vector<16x128xf32>
    %408 = vector.extract_strided_slice %393 {offsets = [0, 384], sizes = [16, 128], strides = [1, 1]} : vector<16x512xf32> to vector<16x128xf32>
    %409 = arith.negf %408 : vector<16x128xf32>
    %410 = math.exp %409 : vector<16x128xf32>
    %cst_155 = arith.constant 1.000000e+00 : f32
    %411 = vector.broadcast %cst_155 : f32 to vector<16x128xf32>
    %412 = arith.addf %411, %410 : vector<16x128xf32>
    %413 = arith.divf %411, %412 : vector<16x128xf32>
    %414 = arith.mulf %405, %372 : vector<16x128xf32>
    %415 = arith.mulf %399, %407 : vector<16x128xf32>
    %416 = arith.addf %414, %415 : vector<16x128xf32>
    %417 = math.tanh %416 : vector<16x128xf32>
    %418 = arith.mulf %413, %417 : vector<16x128xf32>
    %c0_i32_156 = arith.constant 0 : i32
    %419 = arith.addi %c0_i32_156, %c1_i32_146 : i32
    %420 = vector.broadcast %419 : i32 to vector<16x1xi32>
    %421 = arith.cmpi sgt, %0, %420 : vector<16x1xi32>
    %cst_157 = arith.constant 0.000000e+00 : f32
    %422 = vector.shape_cast %421 : vector<16x1xi1> to vector<16x1xi1>
    %423 = vector.broadcast %422 : vector<16x1xi1> to vector<16x128xi1>
    %424 = vector.broadcast %cst_157 : f32 to vector<16x128xf32>
    %425 = arith.select %423, %418, %424 : vector<16x128xi1>, vector<16x128xf32>
    %426 = arith.index_cast %419 : i32 to index
    %c0_158 = arith.constant 0 : index
    %c0_159 = arith.constant 0 : index
    %427 = vector.load %arg9[%426, %c0_158, %c0_159] : memref<8x16x128xf32, #tpu.memory_space<vmem>>, vector<1x16x128xf32>
    %428 = vector.shape_cast %427 : vector<1x16x128xf32> to vector<16x128xf32>
    %429 = vector.shape_cast %425 : vector<16x128xf32> to vector<1x16x128xf32>
    tpu.vector_store %arg9[%426, %c0_158, %c0_159], %429 {strides = array<i32>} : memref<8x16x128xf32, #tpu.memory_space<vmem>>, vector<1x16x128xf32>,
    %c2_i32_160 = arith.constant 2 : i32
    %430 = arith.index_cast %c2_i32_160 : i32 to index
    %c0_161 = arith.constant 0 : index
    %c0_162 = arith.constant 0 : index
    %431 = vector.load %arg11[%430, %c0_161, %c0_162] : memref<8x16x512xf32, #tpu.memory_space<vmem>>, vector<1x16x512xf32>
    %432 = vector.shape_cast %431 : vector<1x16x512xf32> to vector<16x512xf32>
    %433 = arith.truncf %418 : vector<16x128xf32> to vector<16x128xbf16>
    %c1_163 = arith.constant 1 : index
    %c0_164 = arith.constant 0 : index
    %c0_165 = arith.constant 0 : index
    %434 = vector.load %arg4[%c1_163, %c0_164, %c0_165] : memref<2x128x512xbf16, #tpu.memory_space<vmem>>, vector<1x128x512xbf16>
    %435 = vector.shape_cast %434 : vector<1x128x512xbf16> to vector<128x512xbf16>
    %cst_166 = arith.constant dense<0.000000e+00> : vector<16x512xf32>
    %436 = tpu.matmul %433, %435, %cst_166 {dimension_numbers = #tpu.dot_dimension_numbers<[1], [0], [0], [1], [0, 0, 1, 1], [], []>} : vector<16x128xbf16>, vector<128x512xbf16>, vector<16x512xf32> -> vector<16x512xf32>
    %437 = arith.addf %432, %436 : vector<16x512xf32>
    %438 = vector.extract_strided_slice %437 {offsets = [0, 0], sizes = [16, 128], strides = [1, 1]} : vector<16x512xf32> to vector<16x128xf32>
    %439 = arith.negf %438 : vector<16x128xf32>
    %440 = math.exp %439 : vector<16x128xf32>
    %cst_167 = arith.constant 1.000000e+00 : f32
    %441 = vector.broadcast %cst_167 : f32 to vector<16x128xf32>
    %442 = arith.addf %441, %440 : vector<16x128xf32>
    %443 = arith.divf %441, %442 : vector<16x128xf32>
    %444 = vector.extract_strided_slice %437 {offsets = [0, 128], sizes = [16, 128], strides = [1, 1]} : vector<16x512xf32> to vector<16x128xf32>
    %445 = arith.negf %444 : vector<16x128xf32>
    %446 = math.exp %445 : vector<16x128xf32>
    %cst_168 = arith.constant 1.000000e+00 : f32
    %447 = vector.broadcast %cst_168 : f32 to vector<16x128xf32>
    %448 = arith.addf %447, %446 : vector<16x128xf32>
    %449 = arith.divf %447, %448 : vector<16x128xf32>
    %450 = vector.extract_strided_slice %437 {offsets = [0, 256], sizes = [16, 128], strides = [1, 1]} : vector<16x512xf32> to vector<16x128xf32>
    %451 = math.tanh %450 : vector<16x128xf32>
    %452 = vector.extract_strided_slice %437 {offsets = [0, 384], sizes = [16, 128], strides = [1, 1]} : vector<16x512xf32> to vector<16x128xf32>
    %453 = arith.negf %452 : vector<16x128xf32>
    %454 = math.exp %453 : vector<16x128xf32>
    %cst_169 = arith.constant 1.000000e+00 : f32
    %455 = vector.broadcast %cst_169 : f32 to vector<16x128xf32>
    %456 = arith.addf %455, %454 : vector<16x128xf32>
    %457 = arith.divf %455, %456 : vector<16x128xf32>
    %458 = arith.mulf %449, %416 : vector<16x128xf32>
    %459 = arith.mulf %443, %451 : vector<16x128xf32>
    %460 = arith.addf %458, %459 : vector<16x128xf32>
    %461 = math.tanh %460 : vector<16x128xf32>
    %462 = arith.mulf %457, %461 : vector<16x128xf32>
    %c0_i32_170 = arith.constant 0 : i32
    %463 = arith.addi %c0_i32_170, %c2_i32_160 : i32
    %464 = vector.broadcast %463 : i32 to vector<16x1xi32>
    %465 = arith.cmpi sgt, %0, %464 : vector<16x1xi32>
    %cst_171 = arith.constant 0.000000e+00 : f32
    %466 = vector.shape_cast %465 : vector<16x1xi1> to vector<16x1xi1>
    %467 = vector.broadcast %466 : vector<16x1xi1> to vector<16x128xi1>
    %468 = vector.broadcast %cst_171 : f32 to vector<16x128xf32>
    %469 = arith.select %467, %462, %468 : vector<16x128xi1>, vector<16x128xf32>
    %470 = arith.index_cast %463 : i32 to index
    %c0_172 = arith.constant 0 : index
    %c0_173 = arith.constant 0 : index
    %471 = vector.load %arg9[%470, %c0_172, %c0_173] : memref<8x16x128xf32, #tpu.memory_space<vmem>>, vector<1x16x128xf32>
    %472 = vector.shape_cast %471 : vector<1x16x128xf32> to vector<16x128xf32>
    %473 = vector.shape_cast %469 : vector<16x128xf32> to vector<1x16x128xf32>
    tpu.vector_store %arg9[%470, %c0_172, %c0_173], %473 {strides = array<i32>} : memref<8x16x128xf32, #tpu.memory_space<vmem>>, vector<1x16x128xf32>,
    %c3_i32_174 = arith.constant 3 : i32
    %474 = arith.index_cast %c3_i32_174 : i32 to index
    %c0_175 = arith.constant 0 : index
    %c0_176 = arith.constant 0 : index
    %475 = vector.load %arg11[%474, %c0_175, %c0_176] : memref<8x16x512xf32, #tpu.memory_space<vmem>>, vector<1x16x512xf32>
    %476 = vector.shape_cast %475 : vector<1x16x512xf32> to vector<16x512xf32>
    %477 = arith.truncf %462 : vector<16x128xf32> to vector<16x128xbf16>
    %c1_177 = arith.constant 1 : index
    %c0_178 = arith.constant 0 : index
    %c0_179 = arith.constant 0 : index
    %478 = vector.load %arg4[%c1_177, %c0_178, %c0_179] : memref<2x128x512xbf16, #tpu.memory_space<vmem>>, vector<1x128x512xbf16>
    %479 = vector.shape_cast %478 : vector<1x128x512xbf16> to vector<128x512xbf16>
    %cst_180 = arith.constant dense<0.000000e+00> : vector<16x512xf32>
    %480 = tpu.matmul %477, %479, %cst_180 {dimension_numbers = #tpu.dot_dimension_numbers<[1], [0], [0], [1], [0, 0, 1, 1], [], []>} : vector<16x128xbf16>, vector<128x512xbf16>, vector<16x512xf32> -> vector<16x512xf32>
    %481 = arith.addf %476, %480 : vector<16x512xf32>
    %482 = vector.extract_strided_slice %481 {offsets = [0, 0], sizes = [16, 128], strides = [1, 1]} : vector<16x512xf32> to vector<16x128xf32>
    %483 = arith.negf %482 : vector<16x128xf32>
    %484 = math.exp %483 : vector<16x128xf32>
    %cst_181 = arith.constant 1.000000e+00 : f32
    %485 = vector.broadcast %cst_181 : f32 to vector<16x128xf32>
    %486 = arith.addf %485, %484 : vector<16x128xf32>
    %487 = arith.divf %485, %486 : vector<16x128xf32>
    %488 = vector.extract_strided_slice %481 {offsets = [0, 128], sizes = [16, 128], strides = [1, 1]} : vector<16x512xf32> to vector<16x128xf32>
    %489 = arith.negf %488 : vector<16x128xf32>
    %490 = math.exp %489 : vector<16x128xf32>
    %cst_182 = arith.constant 1.000000e+00 : f32
    %491 = vector.broadcast %cst_182 : f32 to vector<16x128xf32>
    %492 = arith.addf %491, %490 : vector<16x128xf32>
    %493 = arith.divf %491, %492 : vector<16x128xf32>
    %494 = vector.extract_strided_slice %481 {offsets = [0, 256], sizes = [16, 128], strides = [1, 1]} : vector<16x512xf32> to vector<16x128xf32>
    %495 = math.tanh %494 : vector<16x128xf32>
    %496 = vector.extract_strided_slice %481 {offsets = [0, 384], sizes = [16, 128], strides = [1, 1]} : vector<16x512xf32> to vector<16x128xf32>
    %497 = arith.negf %496 : vector<16x128xf32>
    %498 = math.exp %497 : vector<16x128xf32>
    %cst_183 = arith.constant 1.000000e+00 : f32
    %499 = vector.broadcast %cst_183 : f32 to vector<16x128xf32>
    %500 = arith.addf %499, %498 : vector<16x128xf32>
    %501 = arith.divf %499, %500 : vector<16x128xf32>
    %502 = arith.mulf %493, %460 : vector<16x128xf32>
    %503 = arith.mulf %487, %495 : vector<16x128xf32>
    %504 = arith.addf %502, %503 : vector<16x128xf32>
    %505 = math.tanh %504 : vector<16x128xf32>
    %506 = arith.mulf %501, %505 : vector<16x128xf32>
    %c0_i32_184 = arith.constant 0 : i32
    %507 = arith.addi %c0_i32_184, %c3_i32_174 : i32
    %508 = vector.broadcast %507 : i32 to vector<16x1xi32>
    %509 = arith.cmpi sgt, %0, %508 : vector<16x1xi32>
    %cst_185 = arith.constant 0.000000e+00 : f32
    %510 = vector.shape_cast %509 : vector<16x1xi1> to vector<16x1xi1>
    %511 = vector.broadcast %510 : vector<16x1xi1> to vector<16x128xi1>
    %512 = vector.broadcast %cst_185 : f32 to vector<16x128xf32>
    %513 = arith.select %511, %506, %512 : vector<16x128xi1>, vector<16x128xf32>
    %514 = arith.index_cast %507 : i32 to index
    %c0_186 = arith.constant 0 : index
    %c0_187 = arith.constant 0 : index
    %515 = vector.load %arg9[%514, %c0_186, %c0_187] : memref<8x16x128xf32, #tpu.memory_space<vmem>>, vector<1x16x128xf32>
    %516 = vector.shape_cast %515 : vector<1x16x128xf32> to vector<16x128xf32>
    %517 = vector.shape_cast %513 : vector<16x128xf32> to vector<1x16x128xf32>
    tpu.vector_store %arg9[%514, %c0_186, %c0_187], %517 {strides = array<i32>} : memref<8x16x128xf32, #tpu.memory_space<vmem>>, vector<1x16x128xf32>,
    %c4_i32_188 = arith.constant 4 : i32
    %518 = arith.index_cast %c4_i32_188 : i32 to index
    %c0_189 = arith.constant 0 : index
    %c0_190 = arith.constant 0 : index
    %519 = vector.load %arg11[%518, %c0_189, %c0_190] : memref<8x16x512xf32, #tpu.memory_space<vmem>>, vector<1x16x512xf32>
    %520 = vector.shape_cast %519 : vector<1x16x512xf32> to vector<16x512xf32>
    %521 = arith.truncf %506 : vector<16x128xf32> to vector<16x128xbf16>
    %c1_191 = arith.constant 1 : index
    %c0_192 = arith.constant 0 : index
    %c0_193 = arith.constant 0 : index
    %522 = vector.load %arg4[%c1_191, %c0_192, %c0_193] : memref<2x128x512xbf16, #tpu.memory_space<vmem>>, vector<1x128x512xbf16>
    %523 = vector.shape_cast %522 : vector<1x128x512xbf16> to vector<128x512xbf16>
    %cst_194 = arith.constant dense<0.000000e+00> : vector<16x512xf32>
    %524 = tpu.matmul %521, %523, %cst_194 {dimension_numbers = #tpu.dot_dimension_numbers<[1], [0], [0], [1], [0, 0, 1, 1], [], []>} : vector<16x128xbf16>, vector<128x512xbf16>, vector<16x512xf32> -> vector<16x512xf32>
    %525 = arith.addf %520, %524 : vector<16x512xf32>
    %526 = vector.extract_strided_slice %525 {offsets = [0, 0], sizes = [16, 128], strides = [1, 1]} : vector<16x512xf32> to vector<16x128xf32>
    %527 = arith.negf %526 : vector<16x128xf32>
    %528 = math.exp %527 : vector<16x128xf32>
    %cst_195 = arith.constant 1.000000e+00 : f32
    %529 = vector.broadcast %cst_195 : f32 to vector<16x128xf32>
    %530 = arith.addf %529, %528 : vector<16x128xf32>
    %531 = arith.divf %529, %530 : vector<16x128xf32>
    %532 = vector.extract_strided_slice %525 {offsets = [0, 128], sizes = [16, 128], strides = [1, 1]} : vector<16x512xf32> to vector<16x128xf32>
    %533 = arith.negf %532 : vector<16x128xf32>
    %534 = math.exp %533 : vector<16x128xf32>
    %cst_196 = arith.constant 1.000000e+00 : f32
    %535 = vector.broadcast %cst_196 : f32 to vector<16x128xf32>
    %536 = arith.addf %535, %534 : vector<16x128xf32>
    %537 = arith.divf %535, %536 : vector<16x128xf32>
    %538 = vector.extract_strided_slice %525 {offsets = [0, 256], sizes = [16, 128], strides = [1, 1]} : vector<16x512xf32> to vector<16x128xf32>
    %539 = math.tanh %538 : vector<16x128xf32>
    %540 = vector.extract_strided_slice %525 {offsets = [0, 384], sizes = [16, 128], strides = [1, 1]} : vector<16x512xf32> to vector<16x128xf32>
    %541 = arith.negf %540 : vector<16x128xf32>
    %542 = math.exp %541 : vector<16x128xf32>
    %cst_197 = arith.constant 1.000000e+00 : f32
    %543 = vector.broadcast %cst_197 : f32 to vector<16x128xf32>
    %544 = arith.addf %543, %542 : vector<16x128xf32>
    %545 = arith.divf %543, %544 : vector<16x128xf32>
    %546 = arith.mulf %537, %504 : vector<16x128xf32>
    %547 = arith.mulf %531, %539 : vector<16x128xf32>
    %548 = arith.addf %546, %547 : vector<16x128xf32>
    %549 = math.tanh %548 : vector<16x128xf32>
    %550 = arith.mulf %545, %549 : vector<16x128xf32>
    %c0_i32_198 = arith.constant 0 : i32
    %551 = arith.addi %c0_i32_198, %c4_i32_188 : i32
    %552 = vector.broadcast %551 : i32 to vector<16x1xi32>
    %553 = arith.cmpi sgt, %0, %552 : vector<16x1xi32>
    %cst_199 = arith.constant 0.000000e+00 : f32
    %554 = vector.shape_cast %553 : vector<16x1xi1> to vector<16x1xi1>
    %555 = vector.broadcast %554 : vector<16x1xi1> to vector<16x128xi1>
    %556 = vector.broadcast %cst_199 : f32 to vector<16x128xf32>
    %557 = arith.select %555, %550, %556 : vector<16x128xi1>, vector<16x128xf32>
    %558 = arith.index_cast %551 : i32 to index
    %c0_200 = arith.constant 0 : index
    %c0_201 = arith.constant 0 : index
    %559 = vector.load %arg9[%558, %c0_200, %c0_201] : memref<8x16x128xf32, #tpu.memory_space<vmem>>, vector<1x16x128xf32>
    %560 = vector.shape_cast %559 : vector<1x16x128xf32> to vector<16x128xf32>
    %561 = vector.shape_cast %557 : vector<16x128xf32> to vector<1x16x128xf32>
    tpu.vector_store %arg9[%558, %c0_200, %c0_201], %561 {strides = array<i32>} : memref<8x16x128xf32, #tpu.memory_space<vmem>>, vector<1x16x128xf32>,
    %c5_i32_202 = arith.constant 5 : i32
    %562 = arith.index_cast %c5_i32_202 : i32 to index
    %c0_203 = arith.constant 0 : index
    %c0_204 = arith.constant 0 : index
    %563 = vector.load %arg11[%562, %c0_203, %c0_204] : memref<8x16x512xf32, #tpu.memory_space<vmem>>, vector<1x16x512xf32>
    %564 = vector.shape_cast %563 : vector<1x16x512xf32> to vector<16x512xf32>
    %565 = arith.truncf %550 : vector<16x128xf32> to vector<16x128xbf16>
    %c1_205 = arith.constant 1 : index
    %c0_206 = arith.constant 0 : index
    %c0_207 = arith.constant 0 : index
    %566 = vector.load %arg4[%c1_205, %c0_206, %c0_207] : memref<2x128x512xbf16, #tpu.memory_space<vmem>>, vector<1x128x512xbf16>
    %567 = vector.shape_cast %566 : vector<1x128x512xbf16> to vector<128x512xbf16>
    %cst_208 = arith.constant dense<0.000000e+00> : vector<16x512xf32>
    %568 = tpu.matmul %565, %567, %cst_208 {dimension_numbers = #tpu.dot_dimension_numbers<[1], [0], [0], [1], [0, 0, 1, 1], [], []>} : vector<16x128xbf16>, vector<128x512xbf16>, vector<16x512xf32> -> vector<16x512xf32>
    %569 = arith.addf %564, %568 : vector<16x512xf32>
    %570 = vector.extract_strided_slice %569 {offsets = [0, 0], sizes = [16, 128], strides = [1, 1]} : vector<16x512xf32> to vector<16x128xf32>
    %571 = arith.negf %570 : vector<16x128xf32>
    %572 = math.exp %571 : vector<16x128xf32>
    %cst_209 = arith.constant 1.000000e+00 : f32
    %573 = vector.broadcast %cst_209 : f32 to vector<16x128xf32>
    %574 = arith.addf %573, %572 : vector<16x128xf32>
    %575 = arith.divf %573, %574 : vector<16x128xf32>
    %576 = vector.extract_strided_slice %569 {offsets = [0, 128], sizes = [16, 128], strides = [1, 1]} : vector<16x512xf32> to vector<16x128xf32>
    %577 = arith.negf %576 : vector<16x128xf32>
    %578 = math.exp %577 : vector<16x128xf32>
    %cst_210 = arith.constant 1.000000e+00 : f32
    %579 = vector.broadcast %cst_210 : f32 to vector<16x128xf32>
    %580 = arith.addf %579, %578 : vector<16x128xf32>
    %581 = arith.divf %579, %580 : vector<16x128xf32>
    %582 = vector.extract_strided_slice %569 {offsets = [0, 256], sizes = [16, 128], strides = [1, 1]} : vector<16x512xf32> to vector<16x128xf32>
    %583 = math.tanh %582 : vector<16x128xf32>
    %584 = vector.extract_strided_slice %569 {offsets = [0, 384], sizes = [16, 128], strides = [1, 1]} : vector<16x512xf32> to vector<16x128xf32>
    %585 = arith.negf %584 : vector<16x128xf32>
    %586 = math.exp %585 : vector<16x128xf32>
    %cst_211 = arith.constant 1.000000e+00 : f32
    %587 = vector.broadcast %cst_211 : f32 to vector<16x128xf32>
    %588 = arith.addf %587, %586 : vector<16x128xf32>
    %589 = arith.divf %587, %588 : vector<16x128xf32>
    %590 = arith.mulf %581, %548 : vector<16x128xf32>
    %591 = arith.mulf %575, %583 : vector<16x128xf32>
    %592 = arith.addf %590, %591 : vector<16x128xf32>
    %593 = math.tanh %592 : vector<16x128xf32>
    %594 = arith.mulf %589, %593 : vector<16x128xf32>
    %c0_i32_212 = arith.constant 0 : i32
    %595 = arith.addi %c0_i32_212, %c5_i32_202 : i32
    %596 = vector.broadcast %595 : i32 to vector<16x1xi32>
    %597 = arith.cmpi sgt, %0, %596 : vector<16x1xi32>
    %cst_213 = arith.constant 0.000000e+00 : f32
    %598 = vector.shape_cast %597 : vector<16x1xi1> to vector<16x1xi1>
    %599 = vector.broadcast %598 : vector<16x1xi1> to vector<16x128xi1>
    %600 = vector.broadcast %cst_213 : f32 to vector<16x128xf32>
    %601 = arith.select %599, %594, %600 : vector<16x128xi1>, vector<16x128xf32>
    %602 = arith.index_cast %595 : i32 to index
    %c0_214 = arith.constant 0 : index
    %c0_215 = arith.constant 0 : index
    %603 = vector.load %arg9[%602, %c0_214, %c0_215] : memref<8x16x128xf32, #tpu.memory_space<vmem>>, vector<1x16x128xf32>
    %604 = vector.shape_cast %603 : vector<1x16x128xf32> to vector<16x128xf32>
    %605 = vector.shape_cast %601 : vector<16x128xf32> to vector<1x16x128xf32>
    tpu.vector_store %arg9[%602, %c0_214, %c0_215], %605 {strides = array<i32>} : memref<8x16x128xf32, #tpu.memory_space<vmem>>, vector<1x16x128xf32>,
    %c6_i32_216 = arith.constant 6 : i32
    %606 = arith.index_cast %c6_i32_216 : i32 to index
    %c0_217 = arith.constant 0 : index
    %c0_218 = arith.constant 0 : index
    %607 = vector.load %arg11[%606, %c0_217, %c0_218] : memref<8x16x512xf32, #tpu.memory_space<vmem>>, vector<1x16x512xf32>
    %608 = vector.shape_cast %607 : vector<1x16x512xf32> to vector<16x512xf32>
    %609 = arith.truncf %594 : vector<16x128xf32> to vector<16x128xbf16>
    %c1_219 = arith.constant 1 : index
    %c0_220 = arith.constant 0 : index
    %c0_221 = arith.constant 0 : index
    %610 = vector.load %arg4[%c1_219, %c0_220, %c0_221] : memref<2x128x512xbf16, #tpu.memory_space<vmem>>, vector<1x128x512xbf16>
    %611 = vector.shape_cast %610 : vector<1x128x512xbf16> to vector<128x512xbf16>
    %cst_222 = arith.constant dense<0.000000e+00> : vector<16x512xf32>
    %612 = tpu.matmul %609, %611, %cst_222 {dimension_numbers = #tpu.dot_dimension_numbers<[1], [0], [0], [1], [0, 0, 1, 1], [], []>} : vector<16x128xbf16>, vector<128x512xbf16>, vector<16x512xf32> -> vector<16x512xf32>
    %613 = arith.addf %608, %612 : vector<16x512xf32>
    %614 = vector.extract_strided_slice %613 {offsets = [0, 0], sizes = [16, 128], strides = [1, 1]} : vector<16x512xf32> to vector<16x128xf32>
    %615 = arith.negf %614 : vector<16x128xf32>
    %616 = math.exp %615 : vector<16x128xf32>
    %cst_223 = arith.constant 1.000000e+00 : f32
    %617 = vector.broadcast %cst_223 : f32 to vector<16x128xf32>
    %618 = arith.addf %617, %616 : vector<16x128xf32>
    %619 = arith.divf %617, %618 : vector<16x128xf32>
    %620 = vector.extract_strided_slice %613 {offsets = [0, 128], sizes = [16, 128], strides = [1, 1]} : vector<16x512xf32> to vector<16x128xf32>
    %621 = arith.negf %620 : vector<16x128xf32>
    %622 = math.exp %621 : vector<16x128xf32>
    %cst_224 = arith.constant 1.000000e+00 : f32
    %623 = vector.broadcast %cst_224 : f32 to vector<16x128xf32>
    %624 = arith.addf %623, %622 : vector<16x128xf32>
    %625 = arith.divf %623, %624 : vector<16x128xf32>
    %626 = vector.extract_strided_slice %613 {offsets = [0, 256], sizes = [16, 128], strides = [1, 1]} : vector<16x512xf32> to vector<16x128xf32>
    %627 = math.tanh %626 : vector<16x128xf32>
    %628 = vector.extract_strided_slice %613 {offsets = [0, 384], sizes = [16, 128], strides = [1, 1]} : vector<16x512xf32> to vector<16x128xf32>
    %629 = arith.negf %628 : vector<16x128xf32>
    %630 = math.exp %629 : vector<16x128xf32>
    %cst_225 = arith.constant 1.000000e+00 : f32
    %631 = vector.broadcast %cst_225 : f32 to vector<16x128xf32>
    %632 = arith.addf %631, %630 : vector<16x128xf32>
    %633 = arith.divf %631, %632 : vector<16x128xf32>
    %634 = arith.mulf %625, %592 : vector<16x128xf32>
    %635 = arith.mulf %619, %627 : vector<16x128xf32>
    %636 = arith.addf %634, %635 : vector<16x128xf32>
    %637 = math.tanh %636 : vector<16x128xf32>
    %638 = arith.mulf %633, %637 : vector<16x128xf32>
    %c0_i32_226 = arith.constant 0 : i32
    %639 = arith.addi %c0_i32_226, %c6_i32_216 : i32
    %640 = vector.broadcast %639 : i32 to vector<16x1xi32>
    %641 = arith.cmpi sgt, %0, %640 : vector<16x1xi32>
    %cst_227 = arith.constant 0.000000e+00 : f32
    %642 = vector.shape_cast %641 : vector<16x1xi1> to vector<16x1xi1>
    %643 = vector.broadcast %642 : vector<16x1xi1> to vector<16x128xi1>
    %644 = vector.broadcast %cst_227 : f32 to vector<16x128xf32>
    %645 = arith.select %643, %638, %644 : vector<16x128xi1>, vector<16x128xf32>
    %646 = arith.index_cast %639 : i32 to index
    %c0_228 = arith.constant 0 : index
    %c0_229 = arith.constant 0 : index
    %647 = vector.load %arg9[%646, %c0_228, %c0_229] : memref<8x16x128xf32, #tpu.memory_space<vmem>>, vector<1x16x128xf32>
    %648 = vector.shape_cast %647 : vector<1x16x128xf32> to vector<16x128xf32>
    %649 = vector.shape_cast %645 : vector<16x128xf32> to vector<1x16x128xf32>
    tpu.vector_store %arg9[%646, %c0_228, %c0_229], %649 {strides = array<i32>} : memref<8x16x128xf32, #tpu.memory_space<vmem>>, vector<1x16x128xf32>,
    %c7_i32_230 = arith.constant 7 : i32
    %650 = arith.index_cast %c7_i32_230 : i32 to index
    %c0_231 = arith.constant 0 : index
    %c0_232 = arith.constant 0 : index
    %651 = vector.load %arg11[%650, %c0_231, %c0_232] : memref<8x16x512xf32, #tpu.memory_space<vmem>>, vector<1x16x512xf32>
    %652 = vector.shape_cast %651 : vector<1x16x512xf32> to vector<16x512xf32>
    %653 = arith.truncf %638 : vector<16x128xf32> to vector<16x128xbf16>
    %c1_233 = arith.constant 1 : index
    %c0_234 = arith.constant 0 : index
    %c0_235 = arith.constant 0 : index
    %654 = vector.load %arg4[%c1_233, %c0_234, %c0_235] : memref<2x128x512xbf16, #tpu.memory_space<vmem>>, vector<1x128x512xbf16>
    %655 = vector.shape_cast %654 : vector<1x128x512xbf16> to vector<128x512xbf16>
    %cst_236 = arith.constant dense<0.000000e+00> : vector<16x512xf32>
    %656 = tpu.matmul %653, %655, %cst_236 {dimension_numbers = #tpu.dot_dimension_numbers<[1], [0], [0], [1], [0, 0, 1, 1], [], []>} : vector<16x128xbf16>, vector<128x512xbf16>, vector<16x512xf32> -> vector<16x512xf32>
    %657 = arith.addf %652, %656 : vector<16x512xf32>
    %658 = vector.extract_strided_slice %657 {offsets = [0, 0], sizes = [16, 128], strides = [1, 1]} : vector<16x512xf32> to vector<16x128xf32>
    %659 = arith.negf %658 : vector<16x128xf32>
    %660 = math.exp %659 : vector<16x128xf32>
    %cst_237 = arith.constant 1.000000e+00 : f32
    %661 = vector.broadcast %cst_237 : f32 to vector<16x128xf32>
    %662 = arith.addf %661, %660 : vector<16x128xf32>
    %663 = arith.divf %661, %662 : vector<16x128xf32>
    %664 = vector.extract_strided_slice %657 {offsets = [0, 128], sizes = [16, 128], strides = [1, 1]} : vector<16x512xf32> to vector<16x128xf32>
    %665 = arith.negf %664 : vector<16x128xf32>
    %666 = math.exp %665 : vector<16x128xf32>
    %cst_238 = arith.constant 1.000000e+00 : f32
    %667 = vector.broadcast %cst_238 : f32 to vector<16x128xf32>
    %668 = arith.addf %667, %666 : vector<16x128xf32>
    %669 = arith.divf %667, %668 : vector<16x128xf32>
    %670 = vector.extract_strided_slice %657 {offsets = [0, 256], sizes = [16, 128], strides = [1, 1]} : vector<16x512xf32> to vector<16x128xf32>
    %671 = math.tanh %670 : vector<16x128xf32>
    %672 = vector.extract_strided_slice %657 {offsets = [0, 384], sizes = [16, 128], strides = [1, 1]} : vector<16x512xf32> to vector<16x128xf32>
    %673 = arith.negf %672 : vector<16x128xf32>
    %674 = math.exp %673 : vector<16x128xf32>
    %cst_239 = arith.constant 1.000000e+00 : f32
    %675 = vector.broadcast %cst_239 : f32 to vector<16x128xf32>
    %676 = arith.addf %675, %674 : vector<16x128xf32>
    %677 = arith.divf %675, %676 : vector<16x128xf32>
    %678 = arith.mulf %669, %636 : vector<16x128xf32>
    %679 = arith.mulf %663, %671 : vector<16x128xf32>
    %680 = arith.addf %678, %679 : vector<16x128xf32>
    %681 = math.tanh %680 : vector<16x128xf32>
    %682 = arith.mulf %677, %681 : vector<16x128xf32>
    %c0_i32_240 = arith.constant 0 : i32
    %683 = arith.addi %c0_i32_240, %c7_i32_230 : i32
    %684 = vector.broadcast %683 : i32 to vector<16x1xi32>
    %685 = arith.cmpi sgt, %0, %684 : vector<16x1xi32>
    %cst_241 = arith.constant 0.000000e+00 : f32
    %686 = vector.shape_cast %685 : vector<16x1xi1> to vector<16x1xi1>
    %687 = vector.broadcast %686 : vector<16x1xi1> to vector<16x128xi1>
    %688 = vector.broadcast %cst_241 : f32 to vector<16x128xf32>
    %689 = arith.select %687, %682, %688 : vector<16x128xi1>, vector<16x128xf32>
    %690 = arith.index_cast %683 : i32 to index
    %c0_242 = arith.constant 0 : index
    %c0_243 = arith.constant 0 : index
    %691 = vector.load %arg9[%690, %c0_242, %c0_243] : memref<8x16x128xf32, #tpu.memory_space<vmem>>, vector<1x16x128xf32>
    %692 = vector.shape_cast %691 : vector<1x16x128xf32> to vector<16x128xf32>
    %693 = vector.shape_cast %689 : vector<16x128xf32> to vector<1x16x128xf32>
    tpu.vector_store %arg9[%690, %c0_242, %c0_243], %693 {strides = array<i32>} : memref<8x16x128xf32, #tpu.memory_space<vmem>>, vector<1x16x128xf32>,
    %c8_i32_244 = arith.constant 8 : i32
    return
  }
  func.func @transform_0(%arg0: i32) -> (i32, i32, i32) {
    %c0_i32 = arith.constant 0 : i32
    %c0_i32_0 = arith.constant 0 : i32
    %c0_i32_1 = arith.constant 0 : i32
    return %c0_i32, %arg0, %c0_i32_0 : i32, i32, i32
  }
  func.func @transform_1(%arg0: i32) -> (i32, i32) {
    %c0_i32 = arith.constant 0 : i32
    %c0_i32_0 = arith.constant 0 : i32
    %c0_i32_1 = arith.constant 0 : i32
    return %c0_i32, %c0_i32_0 : i32, i32
  }
  func.func @transform_2(%arg0: i32) -> (i32, i32, i32) {
    %c0_i32 = arith.constant 0 : i32
    %c0_i32_0 = arith.constant 0 : i32
    %c0_i32_1 = arith.constant 0 : i32
    %c0_i32_2 = arith.constant 0 : i32
    return %c0_i32, %c0_i32_0, %c0_i32_1 : i32, i32, i32
  }
  func.func @transform_3(%arg0: i32) -> (i32, i32, i32) {
    %c0_i32 = arith.constant 0 : i32
    %c0_i32_0 = arith.constant 0 : i32
    %c0_i32_1 = arith.constant 0 : i32
    %c0_i32_2 = arith.constant 0 : i32
    return %c0_i32, %c0_i32_0, %c0_i32_1 : i32, i32, i32
  }
  func.func @transform_4(%arg0: i32) -> (i32, i32, i32) {
    %c0_i32 = arith.constant 0 : i32
    %c0_i32_0 = arith.constant 0 : i32
    %c0_i32_1 = arith.constant 0 : i32
    %c0_i32_2 = arith.constant 0 : i32
    return %c0_i32, %c0_i32_0, %c0_i32_1 : i32, i32, i32
  }
  func.func @transform_5(%arg0: i32) -> (i32, i32, i32) {
    %c0_i32 = arith.constant 0 : i32
    %c0_i32_0 = arith.constant 0 : i32
    %c0_i32_1 = arith.constant 0 : i32
    return %c0_i32, %arg0, %c0_i32_0 : i32, i32, i32
  }
  func.func @transform_6(%arg0: i32) -> (i32, i32, i32) {
    %c0_i32 = arith.constant 0 : i32
    %c0_i32_0 = arith.constant 0 : i32
    %c0_i32_1 = arith.constant 0 : i32
    return %c0_i32, %arg0, %c0_i32_0 : i32, i32, i32
  }
  func.func @transform_7(%arg0: i32) -> (i32, i32) {
    %c0_i32 = arith.constant 0 : i32
    %c0_i32_0 = arith.constant 0 : i32
    return %arg0, %c0_i32 : i32, i32
  }
  func.func @transform_8(%arg0: i32) -> (i32, i32, i32) {
    %c0_i32 = arith.constant 0 : i32
    %c0_i32_0 = arith.constant 0 : i32
    %c0_i32_1 = arith.constant 0 : i32
    return %c0_i32, %arg0, %c0_i32_0 : i32, i32, i32
  }
}

</mosaic_0001>

<bundles_post_ra>
// kernel: encoder_forward.1
= control target key start
LH: loop header
LB: loop body
LE: loop exit
PB: predicated region body
PF: predicated region fallthrough
CT: control target
= control target key end

     0   :  { %13 = vsyncpa [#allocation5], 0  ;;  %s14003_s0 = inlined_call_operand.vmem [shape: bf16[8,16,128], index: 0, kind: input, shape index: {}]   ;;  %s14004_s1 = inlined_call_operand.hbm [shape: bf16[128,512], index: 1, kind: input, shape index: {}]   ;;  %s14005_s2 = inlined_call_operand.hbm [shape: bf16[1,128,512], index: 2, kind: input, shape index: {}]   ;;  %s14006_s3 = inlined_call_operand.hbm [shape: bf16[2,128,512], index: 3, kind: input, shape index: {}]   ;;  %s14007_s4 = inlined_call_operand.vmem [shape: f32[2,1,512], index: 4, kind: input, shape index: {}]   ;;  %s14008_s5 = inlined_call_operand.vmem [shape: f32[2,16,128], index: 5, kind: input, shape index: {}]   ;;  %s14009_s6 = inlined_call_operand.vmem [shape: f32[2,16,128], index: 6, kind: input, shape index: {}]   ;;  %s14010_s7 = inlined_call_operand.vmem [shape: s32[16,1], index: 7, kind: input, shape index: {}]   ;;  %s14011_s8 = inlined_call_operand.vmem [shape: f32[8,16,128], index: 8, kind: output, shape index: {}]  }
   0x1   :  { %14 = vsyncpa [#allocation7], 0  ;;  %s34_s29 = sshll.u32 %s14005_s2, 4  ;;  %s11338_s30 = smov [#allocation6]   ;;  %s35_s29 = int_to_ptr.hbm [resolvable:$true] %s34_s29 }
   0x2   :  { %s36_s9 = sshll.u32 %s11338_s30, 4  ;;  %s21_s12 = sshll.u32 %s14004_s1, 4  ;;  %s37_s9 = int_to_ptr.vmem [resolvable:$true] %s36_s9  ;;  %s22_s12 = int_to_ptr.hbm [resolvable:$true] %s21_s12 }
   0x3   :  { %s11339_s13 = smov 256   ;;  %s11340_s14 = smov 16  }
   0x4   :  { %42 = dma.hbm_to_vmem [thread:$0]  %s35_s29, 4096, %s37_s9, [#allocation7], %s11339_s13, %s11339_s13, %s11340_s14  }
   0x5   :  { %s11341_s15 = smov [#allocation4]   ;;  %s47_s19 = sshll.u32 %s14006_s3, 4  ;;  %s48_s19 = int_to_ptr.hbm [resolvable:$true] %s47_s19 }
   0x6   :  { %s23_s16 = sshll.u32 %s11341_s15, 4  ;;  %s11342_s2 = smov [#allocation8]   ;;  %s24_s16 = int_to_ptr.vmem [resolvable:$true] %s23_s16 }
   0x7   :  { %29 = dma.hbm_to_vmem [thread:$0]  %s22_s12, 4096, %s24_s16, [#allocation5], %s11339_s13, %s11339_s13, %s11340_s14  }
   0x8   :  { %s49_s20 = sshll.u32 %s11342_s2, 4  ;;  %s50_s20 = int_to_ptr.vmem [resolvable:$true] %s49_s20 }
   0x9   :  { %55 = dma.hbm_to_vmem [thread:$0]  %s48_s19, 8192, %s50_s20, [#allocation7], %s11339_s13, %s11339_s13, %s11340_s14  }
   0xa   :  { %11334 = dma.done.wait [#allocation5], 4096  }
   0xb   :  { %11335 = vsyncadd [#allocation5], 4294963200 }
   0xc   :  { %11336 = dma.done.wait [#allocation7], 12288  }
   0xd   :  { %11337 = vsyncadd [#allocation7], 4294955008  ;;  %v7766_v0 = vld [vmem:[#allocation4 + $0xe0] sm:$0xf]  ;;  %v10141_v1 = vld [vmem:[#allocation4 + $0xec] sm:$0xf0] }
   0xe   :  { %v10139_v2 = vld [vmem:[#allocation4 + $0xe4] sm:$0xf]  ;;  %v7767_v3 = vor.u32 %v10141_v1, %v7766_v0  ;;  %v7768_v4 = vld [vmem:[#allocation4 + $0xf0] sm:$0xf0]  ;;  %v7774_v5 = vld [vmem:[#allocation4 + $0xe8] sm:$0xf] }
   0xf   :  { %v10142_v6 = vld [vmem:[#allocation4 + $0xf4] sm:$0xf0]  ;;  %v7771_v7 = vor.u32 %v10139_v2, %v7768_v4  ;;  %v10140_v9 = vld [vmem:[#allocation4 + $0xec] sm:$0xf]  ;;  %v7776_v10 = vld [vmem:[#allocation4 + $0xf8] sm:$0xf0] }
  0x10   :  { %v7775_v8 = vor.u32 %v10142_v6, %v7774_v5  ;;  %v7750_v11 = vld [vmem:[#allocation4 + $0xc0] sm:$0xf]  ;;  %348 = vmatpush.bf16.msra.mxu0 %v7767_v3  ;;  %v7779_v12 = vor.u32 %v10140_v9, %v7776_v10  ;;  %v10137_v13 = vld [vmem:[#allocation4 + $0xcc] sm:$0xf0]  ;;  %v10135_v14 = vld [vmem:[#allocation4 + $0xc4] sm:$0xf] }
  0x11   :  { %v7752_v15 = vld [vmem:[#allocation4 + $0xd0] sm:$0xf0]  ;;  %397 = vmatpush.bf16.msra.mxu1 %v7771_v7  ;;  %v7751_v16 = vor.u32 %v10137_v13, %v7750_v11  ;;  %v7758_v18 = vld [vmem:[#allocation4 + $0xc8] sm:$0xf]  ;;  %v10138_v19 = vld [vmem:[#allocation4 + $0xd4] sm:$0xf0] }
  0x12   :  { %446 = vmatpush.bf16.msra.mxu2 %v7775_v8  ;;  %v7755_v17 = vor.u32 %v10135_v14, %v7752_v15  ;;  %v10136_v20 = vld [vmem:[#allocation4 + $0xcc] sm:$0xf]  ;;  %495 = vmatpush.bf16.msra.mxu3 %v7779_v12  ;;  %v7759_v21 = vor.u32 %v10138_v19, %v7758_v18  ;;  %v7760_v22 = vld [vmem:[#allocation4 + $0xd8] sm:$0xf0]  ;;  %v7734_v23 = vld [vmem:[#allocation4 + $0xa0] sm:$0xf] }
  0x13   :  { %v10133_v24 = vld [vmem:[#allocation4 + $0xac] sm:$0xf0]  ;;  %v7763_v25 = vor.u32 %v10136_v20, %v7760_v22  ;;  %v10131_v26 = vld [vmem:[#allocation4 + $0xa4] sm:$0xf]  ;;  %v7736_v27 = vld [vmem:[#allocation4 + $0xb0] sm:$0xf0] }
  0x14   :  { %v7742_v28 = vld [vmem:[#allocation4 + $0xa8] sm:$0xf]  ;;  %349 = vmatpush.bf16.msra.mxu0 %v7751_v16  ;;  %v7735_v29 = vor.u32 %v10133_v24, %v7734_v23  ;;  %v10134_v30 = vld [vmem:[#allocation4 + $0xb4] sm:$0xf0]  ;;  %v10132_v31 = vld [vmem:[#allocation4 + $0xac] sm:$0xf]  ;;  %v7739_v33 = vor.u32 %v10131_v26, %v7736_v27 }
  0x15   :  { %v7744_v32 = vld [vmem:[#allocation4 + $0xb8] sm:$0xf0]  ;;  %398 = vmatpush.bf16.msra.mxu1 %v7755_v17  ;;  %v7743_v34 = vor.u32 %v10134_v30, %v7742_v28  ;;  %v7718_v35 = vld [vmem:[#allocation4 + $0x80] sm:$0xf]  ;;  %v10129_v36 = vld [vmem:[#allocation4 + $0x8c] sm:$0xf0] }
  0x16   :  { %447 = vmatpush.bf16.msra.mxu2 %v7759_v21  ;;  %v10127_v37 = vld [vmem:[#allocation4 + $0x84] sm:$0xf]  ;;  %496 = vmatpush.bf16.msra.mxu3 %v7763_v25  ;;  %v7747_v38 = vor.u32 %v10132_v31, %v7744_v32  ;;  %v7720_v39 = vld [vmem:[#allocation4 + $0x90] sm:$0xf0]  ;;  %v7726_v40 = vld [vmem:[#allocation4 + $0x88] sm:$0xf]  ;;  %v7719_v44 = vor.u32 %v10129_v36, %v7718_v35 }
  0x17   :  { %v10130_v41 = vld [vmem:[#allocation4 + $0x94] sm:$0xf0]  ;;  %v10128_v42 = vld [vmem:[#allocation4 + $0x8c] sm:$0xf]  ;;  %v7728_v43 = vld [vmem:[#allocation4 + $0x98] sm:$0xf0]  ;;  %v7723_v45 = vor.u32 %v10127_v37, %v7720_v39 }
  0x18   :  { %350 = vmatpush.bf16.msra.mxu0 %v7735_v29  ;;  %v7727_v46 = vor.u32 %v10130_v41, %v7726_v40  ;;  %v7702_v47 = vld [vmem:[#allocation4 + $0x60] sm:$0xf]  ;;  %v10125_v48 = vld [vmem:[#allocation4 + $0x6c] sm:$0xf0]  ;;  %v10123_v49 = vld [vmem:[#allocation4 + $0x64] sm:$0xf]  ;;  %v7731_v50 = vor.u32 %v10128_v42, %v7728_v43 }
  0x19   :  { %399 = vmatpush.bf16.msra.mxu1 %v7739_v33  ;;  %v7704_v51 = vld [vmem:[#allocation4 + $0x70] sm:$0xf0]  ;;  %v7710_v52 = vld [vmem:[#allocation4 + $0x68] sm:$0xf]  ;;  %v10126_v53 = vld [vmem:[#allocation4 + $0x74] sm:$0xf0]  ;;  %v7703_v56 = vor.u32 %v10125_v48, %v7702_v47 }
  0x1a   :  { %448 = vmatpush.bf16.msra.mxu2 %v7743_v34  ;;  %497 = vmatpush.bf16.msra.mxu3 %v7747_v38  ;;  %v10124_v54 = vld [vmem:[#allocation4 + $0x6c] sm:$0xf]  ;;  %v7712_v55 = vld [vmem:[#allocation4 + $0x78] sm:$0xf0]  ;;  %v7707_v57 = vor.u32 %v10123_v49, %v7704_v51  ;;  %v7711_v58 = vor.u32 %v10126_v53, %v7710_v52  ;;  %v7686_v59 = vld [vmem:[#allocation4 + $0x40] sm:$0xf] }
  0x1b   :  { %v10121_v60 = vld [vmem:[#allocation4 + $0x4c] sm:$0xf0]  ;;  %v10119_v61 = vld [vmem:[#allocation4 + $0x44] sm:$0xf]  ;;  %v7715_v62 = vor.u32 %v10124_v54, %v7712_v55  ;;  %v7688_v63 = vld [vmem:[#allocation4 + $0x50] sm:$0xf0] }
  0x1c   :  { %351 = vmatpush.bf16.msra.mxu0 %v7719_v44  ;;  %v7694_v0 = vld [vmem:[#allocation4 + $0x48] sm:$0xf]  ;;  %v10122_v1 = vld [vmem:[#allocation4 + $0x54] sm:$0xf0]  ;;  %v10120_v2 = vld [vmem:[#allocation4 + $0x4c] sm:$0xf]  ;;  %v7687_v4 = vor.u32 %v10121_v60, %v7686_v59  ;;  %v7691_v5 = vor.u32 %v10119_v61, %v7688_v63 }
  0x1d   :  { %400 = vmatpush.bf16.msra.mxu1 %v7723_v45  ;;  %v7696_v3 = vld [vmem:[#allocation4 + $0x58] sm:$0xf0]  ;;  %v7695_v6 = vor.u32 %v10122_v1, %v7694_v0  ;;  %v7670_v7 = vld [vmem:[#allocation4 + $0x20] sm:$0xf]  ;;  %v10117_v8 = vld [vmem:[#allocation4 + $0x2c] sm:$0xf0] }
  0x1e   :  { %449 = vmatpush.bf16.msra.mxu2 %v7727_v46  ;;  %498 = vmatpush.bf16.msra.mxu3 %v7731_v50  ;;  %v10115_v9 = vld [vmem:[#allocation4 + $0x24] sm:$0xf]  ;;  %v7699_v10 = vor.u32 %v10120_v2, %v7696_v3  ;;  %v7672_v11 = vld [vmem:[#allocation4 + $0x30] sm:$0xf0]  ;;  %v7678_v12 = vld [vmem:[#allocation4 + $0x28] sm:$0xf]  ;;  %v7671_v16 = vor.u32 %v10117_v8, %v7670_v7 }
  0x1f   :  { %v10118_v13 = vld [vmem:[#allocation4 + $0x34] sm:$0xf0]  ;;  %v10116_v14 = vld [vmem:[#allocation4 + $0x2c] sm:$0xf]  ;;  %v7680_v15 = vld [vmem:[#allocation4 + $0x38] sm:$0xf0]  ;;  %v7675_v18 = vor.u32 %v10115_v9, %v7672_v11 }
  0x20   :  { %352 = vmatpush.bf16.msra.mxu0 %v7703_v56  ;;  %v7654_v17 = vld [vmem:[#allocation4] sm:$0xf]  ;;  %v7679_v19 = vor.u32 %v10118_v13, %v7678_v12  ;;  %v10113_v20 = vld [vmem:[#allocation4 + $0xc] sm:$0xf0]  ;;  %v10111_v21 = vld [vmem:[#allocation4 + $0x4] sm:$0xf]  ;;  %v7683_v23 = vor.u32 %v10116_v14, %v7680_v15 }
  0x21   :  { %401 = vmatpush.bf16.msra.mxu1 %v7707_v57  ;;  %v7656_v22 = vld [vmem:[#allocation4 + $0x10] sm:$0xf0]  ;;  %v7662_v24 = vld [vmem:[#allocation4 + $0x8] sm:$0xf]  ;;  %v10114_v25 = vld [vmem:[#allocation4 + $0x14] sm:$0xf0]  ;;  %v7655_v30 = vor.u32 %v10113_v20, %v7654_v17 }
  0x22   :  { %450 = vmatpush.bf16.msra.mxu2 %v7711_v58  ;;  %499 = vmatpush.bf16.msra.mxu3 %v7715_v62  ;;  %v10112_v26 = vld [vmem:[#allocation4 + $0xc] sm:$0xf]  ;;  %v7664_v27 = vld [vmem:[#allocation4 + $0x18] sm:$0xf0]  ;;  %v7894_v28 = vld [vmem:[#allocation8 + $0xe0] sm:$0xf]  ;;  %v7659_v33 = vor.u32 %v10111_v21, %v7656_v22  ;;  %v7663_v34 = vor.u32 %v10114_v25, %v7662_v24 }
  0x23   :  { %v10173_v29 = vld [vmem:[#allocation8 + $0xec] sm:$0xf0]  ;;  %v10171_v31 = vld [vmem:[#allocation8 + $0xe4] sm:$0xf]  ;;  %v7896_v32 = vld [vmem:[#allocation8 + $0xf0] sm:$0xf0]  ;;  %v7667_v36 = vor.u32 %v10112_v26, %v7664_v27 }
  0x24   :  { %353 = vmatpush.bf16.msra.mxu0 %v7687_v4  ;;  %v10103_v35 = vld [vmem:[%s14003_s0] sm:$0xff]  ;;  %v7895_v37 = vor.u32 %v10173_v29, %v7894_v28  ;;  %v10172_v38 = vld [vmem:[#allocation8 + $0xec] sm:$0xf]  ;;  %v7902_v39 = vld [vmem:[#allocation8 + $0xe8] sm:$0xf]  ;;  %v7899_v41 = vor.u32 %v10171_v31, %v7896_v32 }
  0x25   :  { %402 = vmatpush.bf16.msra.mxu1 %v7691_v5  ;;  %v10174_v40 = vld [vmem:[#allocation8 + $0xf4] sm:$0xf0]  ;;  %v7904_v42 = vld [vmem:[#allocation8 + $0xf8] sm:$0xf0]  ;;  %v7878_v43 = vld [vmem:[#allocation8 + $0xc0] sm:$0xf] }
  0x26   :  { %451 = vmatpush.bf16.msra.mxu2 %v7695_v6  ;;  %500 = vmatpush.bf16.msra.mxu3 %v7699_v10  ;;  %v10169_v44 = vld [vmem:[#allocation8 + $0xcc] sm:$0xf0]  ;;  %v10167_v45 = vld [vmem:[#allocation8 + $0xc4] sm:$0xf]  ;;  %v7880_v46 = vld [vmem:[#allocation8 + $0xd0] sm:$0xf0]  ;;  %v7903_v47 = vor.u32 %v10174_v40, %v7902_v39  ;;  %v7907_v48 = vor.u32 %v10172_v38, %v7904_v42 }
  0x27   :  { %v7879_v49 = vor.u32 %v10169_v44, %v7878_v43  ;;  %v7886_v50 = vld [vmem:[#allocation8 + $0xc8] sm:$0xf]  ;;  %v10170_v51 = vld [vmem:[#allocation8 + $0xd4] sm:$0xf0]  ;;  %v7883_v52 = vor.u32 %v10167_v45, %v7880_v46  ;;  %v10168_v53 = vld [vmem:[#allocation8 + $0xcc] sm:$0xf] }
  0x28   :  { %354 = vmatpush.bf16.msra.mxu0 %v7671_v16  ;;  %v7888_v54 = vld [vmem:[#allocation8 + $0xd8] sm:$0xf0]  ;;  %v7887_v55 = vor.u32 %v10170_v51, %v7886_v50  ;;  %v7862_v56 = vld [vmem:[#allocation8 + $0xa0] sm:$0xf]  ;;  %v10165_v57 = vld [vmem:[#allocation8 + $0xac] sm:$0xf0] }
  0x29   :  { %403 = vmatpush.bf16.msra.mxu1 %v7675_v18  ;;  %v10163_v58 = vld [vmem:[#allocation8 + $0xa4] sm:$0xf]  ;;  %v7891_v59 = vor.u32 %v10168_v53, %v7888_v54  ;;  %v7863_v60 = vor.u32 %v10165_v57, %v7862_v56  ;;  %v7864_v61 = vld [vmem:[#allocation8 + $0xb0] sm:$0xf0]  ;;  %v10164_v62 = vld [vmem:[#allocation8 + $0xac] sm:$0xf] }
  0x2a   :  { %452 = vmatpush.bf16.msra.mxu2 %v7679_v19  ;;  %501 = vmatpush.bf16.msra.mxu3 %v7683_v23  ;;  %v7867_v63 = vor.u32 %v10163_v58, %v7864_v61  ;;  %v7872_v0 = vld [vmem:[#allocation8 + $0xb8] sm:$0xf0]  ;;  %v7870_v1 = vld [vmem:[#allocation8 + $0xa8] sm:$0xf]  ;;  %v10166_v2 = vld [vmem:[#allocation8 + $0xb4] sm:$0xf0] }
  0x2b   :  { %v7871_v3 = vor.u32 %v10166_v2, %v7870_v1  ;;  %v7875_v4 = vor.u32 %v10164_v62, %v7872_v0  ;;  %v10104_v5 = vld [vmem:[%s14003_s0 + $0x8] sm:$0xff]  ;;  %v7846_v6 = vld [vmem:[#allocation8 + $0x80] sm:$0xf]  ;;  %v10161_v7 = vld [vmem:[#allocation8 + $0x8c] sm:$0xf0] }
  0x2c   :  { %355 = vmatpush.bf16.msra.mxu0 %v7655_v30  ;;  %v10159_v8 = vld [vmem:[#allocation8 + $0x84] sm:$0xf]  ;;  %v7847_v9 = vor.u32 %v10161_v7, %v7846_v6  ;;  %v7848_v10 = vld [vmem:[#allocation8 + $0x90] sm:$0xf0]  ;;  %v10160_v11 = vld [vmem:[#allocation8 + $0x8c] sm:$0xf] }
  0x2d   :  { %404 = vmatpush.bf16.msra.mxu1 %v7659_v33  ;;  %v7856_v12 = vld [vmem:[#allocation8 + $0x98] sm:$0xf0]  ;;  %v7851_v13 = vor.u32 %v10159_v8, %v7848_v10  ;;  %v7854_v15 = vld [vmem:[#allocation8 + $0x88] sm:$0xf]  ;;  %v10162_v16 = vld [vmem:[#allocation8 + $0x94] sm:$0xf0] }
  0x2e   :  { %453 = vmatpush.bf16.msra.mxu2 %v7663_v34  ;;  %502 = vmatpush.bf16.msra.mxu3 %v7667_v36  ;;  %v7859_v14 = vor.u32 %v10160_v11, %v7856_v12  ;;  %v7855_v17 = vor.u32 %v10162_v16, %v7854_v15  ;;  %v10105_v18 = vld [vmem:[%s14003_s0 + $0x10] sm:$0xff]  ;;  %v7830_v19 = vld [vmem:[#allocation8 + $0x60] sm:$0xf]  ;;  %v10155_v21 = vld [vmem:[#allocation8 + $0x64] sm:$0xf] }
  0x2f   :  { %356 = vmatmul.bf16.vlgmr.msra.gmra.mxu0 %v10103_v35  ;;  %v10157_v20 = vld [vmem:[#allocation8 + $0x6c] sm:$0xf0]  ;;  %v7832_v23 = vld [vmem:[#allocation8 + $0x70] sm:$0xf0]  ;;  %v10156_v24 = vld [vmem:[#allocation8 + $0x6c] sm:$0xf] }
  0x30   :  { %809 = vmatpush.bf16.msrb.mxu0 %v7895_v37  ;;  %405 = vmatmul.bf16.vlgmr.msra.gmra.mxu1 %v10103_v35  ;;  %v7831_v22 = vor.u32 %v10157_v20, %v7830_v19  ;;  %v7840_v25 = vld [vmem:[#allocation8 + $0x78] sm:$0xf0]  ;;  %v7835_v26 = vor.u32 %v10155_v21, %v7832_v23  ;;  %v7838_v28 = vld [vmem:[#allocation8 + $0x68] sm:$0xf]  ;;  %v10158_v29 = vld [vmem:[#allocation8 + $0x74] sm:$0xf0] }
  0x31   :  { %823 = vmatpush.bf16.msrb.mxu1 %v7899_v41  ;;  %454 = vmatmul.bf16.vlgmr.msra.gmra.mxu2 %v10103_v35  ;;  %v7843_v27 = vor.u32 %v10156_v24, %v7840_v25  ;;  %v7839_v30 = vor.u32 %v10158_v29, %v7838_v28  ;;  %v10106_v31 = vld [vmem:[%s14003_s0 + $0x18] sm:$0xff]  ;;  %v7814_v32 = vld [vmem:[#allocation8 + $0x40] sm:$0xf]  ;;  %v10153_v33 = vld [vmem:[#allocation8 + $0x4c] sm:$0xf0] }
  0x32   :  { %503 = vmatmul.bf16.vlgmr.msra.gmra.mxu3 %v10103_v35  ;;  %837 = vmatpush.bf16.msrb.mxu2 %v7903_v47  ;;  %v10151_v34 = vld [vmem:[#allocation8 + $0x44] sm:$0xf]  ;;  %v7815_v35 = vor.u32 %v10153_v33, %v7814_v32  ;;  %v7816_v36 = vld [vmem:[#allocation8 + $0x50] sm:$0xf0]  ;;  %v10152_v37 = vld [vmem:[#allocation8 + $0x4c] sm:$0xf] }
  0x33   :  { %851 = vmatpush.bf16.msrb.mxu3 %v7907_v48  ;;  %v7824_v38 = vld [vmem:[#allocation8 + $0x58] sm:$0xf0]  ;;  %v7819_v39 = vor.u32 %v10151_v34, %v7816_v36  ;;  %v7822_v41 = vld [vmem:[#allocation8 + $0x48] sm:$0xf]  ;;  %v10154_v42 = vld [vmem:[#allocation8 + $0x54] sm:$0xf0] }
  0x34   :  { %810 = vmatpush.bf16.msrb.mxu0 %v7879_v49  ;;  %v7827_v40 = vor.u32 %v10152_v37, %v7824_v38  ;;  %v7823_v43 = vor.u32 %v10154_v42, %v7822_v41  ;;  %v10107_v44 = vld [vmem:[%s14003_s0 + $0x20] sm:$0xff]  ;;  %v10149_v46 = vld [vmem:[#allocation8 + $0x2c] sm:$0xf0]  ;;  %v7800_v49 = vld [vmem:[#allocation8 + $0x30] sm:$0xf0] }
  0x35   :  { %824 = vmatpush.bf16.msrb.mxu1 %v7883_v52  ;;  %v7798_v45 = vld [vmem:[#allocation8 + $0x20] sm:$0xf]  ;;  %v10147_v47 = vld [vmem:[#allocation8 + $0x24] sm:$0xf]  ;;  %v10148_v50 = vld [vmem:[#allocation8 + $0x2c] sm:$0xf] }
  0x36   :  { %838 = vmatpush.bf16.msrb.mxu2 %v7887_v55  ;;  %v7799_v48 = vor.u32 %v10149_v46, %v7798_v45  ;;  %v7808_v51 = vld [vmem:[#allocation8 + $0x38] sm:$0xf0]  ;;  %v7803_v52 = vor.u32 %v10147_v47, %v7800_v49  ;;  %v7806_v54 = vld [vmem:[#allocation8 + $0x28] sm:$0xf]  ;;  %v10150_v55 = vld [vmem:[#allocation8 + $0x34] sm:$0xf0] }
  0x37   :  { %852 = vmatpush.bf16.msrb.mxu3 %v7891_v59  ;;  %v7811_v53 = vor.u32 %v10148_v50, %v7808_v51  ;;  %v7807_v56 = vor.u32 %v10150_v55, %v7806_v54  ;;  %v10108_v57 = vld [vmem:[%s14003_s0 + $0x28] sm:$0xff]  ;;  %v7782_v58 = vld [vmem:[#allocation8] sm:$0xf]  ;;  %v10145_v59 = vld [vmem:[#allocation8 + $0xc] sm:$0xf0] }
  0x38   :  { %811 = vmatpush.bf16.msrb.mxu0 %v7863_v60  ;;  %v10143_v60 = vld [vmem:[#allocation8 + $0x4] sm:$0xf]  ;;  %v7783_v61 = vor.u32 %v10145_v59, %v7782_v58  ;;  %v7784_v62 = vld [vmem:[#allocation8 + $0x10] sm:$0xf0]  ;;  %v7792_v0 = vld [vmem:[#allocation8 + $0x18] sm:$0xf0] }
  0x39   :  { %825 = vmatpush.bf16.msrb.mxu1 %v7867_v63  ;;  %v10144_v63 = vld [vmem:[#allocation8 + $0xc] sm:$0xf]  ;;  %v7787_v1 = vor.u32 %v10143_v60, %v7784_v62  ;;  %v10110_v7 = vld [vmem:[%s14003_s0 + $0x38] sm:$0xff]  ;;  %v78_v8 = vld [vmem:[%s14008_s5] sm:$0xff] }
  0x3a   :  { %839 = vmatpush.bf16.msrb.mxu2 %v7871_v3  ;;  %v7795_v2 = vor.u32 %v10144_v63, %v7792_v0  ;;  %v10109_v3 = vld [vmem:[%s14003_s0 + $0x30] sm:$0xff] }
  0x3b   :  { %853 = vmatpush.bf16.msrb.mxu3 %v7875_v4  ;;  %v7790_v4 = vld [vmem:[#allocation8 + $0x8] sm:$0xf] }
  0x3c   :  { %812 = vmatpush.bf16.msrb.mxu0 %v7847_v9  ;;  %v79_v9 = vld [vmem:[%s14008_s5 + $0x8] sm:$0xff] }
  0x3d   :  { %826 = vmatpush.bf16.msrb.mxu1 %v7851_v13  ;;  %v616_v10 = vpack.c.bf16 %v79_v9, %v78_v8 }
  0x3e   :  { %840 = vmatpush.bf16.msrb.mxu2 %v7855_v17 }
  0x3f   :  { %361 = vmatmul.bf16.gmra.mxu0 %v10104_v5  ;;  %854 = vmatpush.bf16.msrb.mxu3 %v7859_v14 }
  0x40   :  { %410 = vmatmul.bf16.gmra.mxu1 %v10104_v5  ;;  %813 = vmatpush.bf16.msrb.mxu0 %v7831_v22 }
  0x41   :  { %459 = vmatmul.bf16.gmra.mxu2 %v10104_v5  ;;  %827 = vmatpush.bf16.msrb.mxu1 %v7835_v26 }
  0x42   :  { %508 = vmatmul.bf16.gmra.mxu3 %v10104_v5  ;;  %841 = vmatpush.bf16.msrb.mxu2 %v7839_v30  ;;  %v10146_v5 = vld [vmem:[#allocation8 + $0x14] sm:$0xf0] }
  0x43   :  { %855 = vmatpush.bf16.msrb.mxu3 %v7843_v27  ;;  %v7791_v6 = vor.u32 %v10146_v5, %v7790_v4  ;;  %v11547_v5 = vld [vmem:[%s14007_s4] sm:$0xf] }
  0x44   :  { %814 = vmatpush.bf16.msrb.mxu0 %v7815_v35  ;;  %v11556_v9 = vperm.slane %v11547_v5, 0 }
  0x45   :  { %828 = vmatpush.bf16.msrb.mxu1 %v7819_v39 }
  0x46   :  { %842 = vmatpush.bf16.msrb.mxu2 %v7823_v43 }
  0x47   :  { %856 = vmatpush.bf16.msrb.mxu3 %v7827_v40 }
  0x48   :  { %815 = vmatpush.bf16.msrb.mxu0 %v7799_v48 }
  0x49   :  { %829 = vmatpush.bf16.msrb.mxu1 %v7803_v52 }
  0x4a   :  { %843 = vmatpush.bf16.msrb.mxu2 %v7807_v56 }
  0x4b   :  { %857 = vmatpush.bf16.msrb.mxu3 %v7811_v53 }
  0x4c   :  { %816 = vmatpush.bf16.msrb.mxu0 %v7783_v61 }
  0x4d   :  { %830 = vmatpush.bf16.msrb.mxu1 %v7787_v1 }
  0x4e   :  { %844 = vmatpush.bf16.msrb.mxu2 %v7791_v6 }
  0x4f   :  { %366 = vmatmul.bf16.gmra.mxu0 %v10105_v18  ;;  %858 = vmatpush.bf16.msrb.mxu3 %v7795_v2 }
  0x50   :  { %415 = vmatmul.bf16.gmra.mxu1 %v10105_v18 }
  0x51   :  { %464 = vmatmul.bf16.gmra.mxu2 %v10105_v18 }
  0x52   :  { %513 = vmatmul.bf16.gmra.mxu3 %v10105_v18 }
  0x5f   :  { %371 = vmatmul.bf16.gmra.mxu0 %v10106_v31 }
  0x60   :  { %420 = vmatmul.bf16.gmra.mxu1 %v10106_v31 }
  0x61   :  { %469 = vmatmul.bf16.gmra.mxu2 %v10106_v31 }
  0x62   :  { %518 = vmatmul.bf16.gmra.mxu3 %v10106_v31 }
  0x6f   :  { %376 = vmatmul.bf16.gmra.mxu0 %v10107_v44 }
  0x70   :  { %425 = vmatmul.bf16.gmra.mxu1 %v10107_v44 }
  0x71   :  { %474 = vmatmul.bf16.gmra.mxu2 %v10107_v44 }
  0x72   :  { %523 = vmatmul.bf16.gmra.mxu3 %v10107_v44 }
  0x7f   :  { %381 = vmatmul.bf16.gmra.mxu0 %v10108_v57 }
  0x80   :  { %430 = vmatmul.bf16.gmra.mxu1 %v10108_v57 }
  0x81   :  { %479 = vmatmul.bf16.gmra.mxu2 %v10108_v57 }
  0x82   :  { %528 = vmatmul.bf16.gmra.mxu3 %v10108_v57 }
  0x8f   :  { %386 = vmatmul.bf16.gmra.mxu0 %v10109_v3 }
  0x90   :  { %435 = vmatmul.bf16.gmra.mxu1 %v10109_v3 }
  0x91   :  { %484 = vmatmul.bf16.gmra.mxu2 %v10109_v3 }
  0x92   :  { %533 = vmatmul.bf16.gmra.mxu3 %v10109_v3 }
  0x9f   :  { %391 = vmatmul.bf16.gmra.mxu0 %v10110_v7 }
  0xa0   :  { %440 = vmatmul.bf16.gmra.mxu1 %v10110_v7 }
  0xa1   :  { %489 = vmatmul.bf16.gmra.mxu2 %v10110_v7 }
  0xa2   :  { %538 = vmatmul.bf16.gmra.mxu3 %v10110_v7 }
  0xac   :  { %v11428_v11 = vpop.f32.mrf.mxu0 }
  0xad   :  { %v11430_v12 = vpop.f32.mrf.mxu1 }
  0xaf   :  { %817 = vmatmul.bf16.vlgmr.msrb.gmra.mxu0 %v616_v10 }
  0xb0   :  { %831 = vmatmul.bf16.vlgmr.msrb.gmra.mxu1 %v616_v10 }
  0xb1   :  { %845 = vmatmul.bf16.vlgmr.msrb.gmra.mxu2 %v616_v10 }
  0xb2   :  { %859 = vmatmul.bf16.vlgmr.msrb.gmra.mxu3 %v616_v10 }
  0xb4   :  { %v11432_v13 = vpop.f32.mrf.mxu2  ;;  %v11436_v15 = vpop.f32.mrf.mxu0 }
  0xb5   :  { %v11434_v14 = vpop.f32.mrf.mxu3  ;;  %v11438_v16 = vpop.f32.mrf.mxu1 }
  0xbc   :  { %v11440_v17 = vpop.f32.mrf.mxu2  ;;  %v11444_v19 = vpop.f32.mrf.mxu0 }
  0xbd   :  { %v11442_v18 = vpop.f32.mrf.mxu3  ;;  %v11446_v20 = vpop.f32.mrf.mxu1 }
  0xc4   :  { %v11448_v21 = vpop.f32.mrf.mxu2  ;;  %v11452_v23 = vpop.f32.mrf.mxu0 }
  0xc5   :  { %v11450_v22 = vpop.f32.mrf.mxu3  ;;  %v11454_v24 = vpop.f32.mrf.mxu1 }
  0xcc   :  { %v11456_v25 = vpop.f32.mrf.mxu2  ;;  %v11460_v27 = vpop.f32.mrf.mxu0 }
  0xcd   :  { %v11458_v26 = vpop.f32.mrf.mxu3  ;;  %v11462_v28 = vpop.f32.mrf.mxu1 }
  0xd4   :  { %v11464_v29 = vpop.f32.mrf.mxu2  ;;  %v11468_v31 = vpop.f32.mrf.mxu0 }
  0xd5   :  { %v11466_v30 = vpop.f32.mrf.mxu3  ;;  %v11470_v32 = vpop.f32.mrf.mxu1 }
  0xdc   :  { %v11472_v33 = vpop.f32.mrf.mxu2  ;;  %v11476_v35 = vpop.f32.mrf.mxu0 }
  0xdd   :  { %v11474_v34 = vpop.f32.mrf.mxu3  ;;  %v11478_v36 = vpop.f32.mrf.mxu1 }
  0xe4   :  { %v11480_v37 = vpop.f32.mrf.mxu2  ;;  %v11484_v39 = vpop.f32.mrf.mxu0 }
  0xe5   :  { %14014 = vst [vmem:[#allocation11_spill] sm:$0xff] %v11480_v37  ;;  %v11482_v38 = vpop.f32.mrf.mxu3  ;;  %v11486_v40 = vpop.f32.mrf.mxu1 }
  0xec   :  { %v11488_v41 = vpop.f32.mrf.mxu2  ;;  %v11492_v43 = vpop.f32.mrf.mxu0 }
  0xed   :  { %14015 = vst [vmem:[#allocation12_spill] sm:$0xff] %v11488_v41  ;;  %v11490_v42 = vpop.f32.mrf.mxu3  ;;  %v11494_v44 = vpop.f32.mrf.mxu1 }
  0xee   :  { %14016 = vst [vmem:[#allocation13_spill] sm:$0xff] %v11490_v42 }
  0xef   :  { %14017 = vst [vmem:[#allocation14_spill] sm:$0xff] %v11492_v43 }
  0xf0   :  { %14018 = vst [vmem:[#allocation15_spill] sm:$0xff] %v11494_v44 }
  0xf4   :  { %v11496_v45 = vpop.f32.mrf.mxu2  ;;  %v11500_v47 = vpop.f32.mrf.mxu0 }
  0xf5   :  { %14019 = vst [vmem:[#allocation16_spill] sm:$0xff] %v11496_v45  ;;  %v11498_v46 = vpop.f32.mrf.mxu3  ;;  %v11502_v48 = vpop.f32.mrf.mxu1  ;;  %v7948_v45 = vld [vmem:[#allocation8 + $0x40] sm:$0xf] }
  0xf6   :  { %14020 = vst [vmem:[#allocation17_spill] sm:$0xff] %v11498_v46 }
  0xf7   :  { %14021 = vst [vmem:[#allocation18_spill] sm:$0xff] %v11500_v47 }
  0xf8   :  { %14022 = vst [vmem:[#allocation19_spill] sm:$0xff] %v11502_v48  ;;  %v10185_v48 = vld [vmem:[#allocation8 + $0x4c] sm:$0xf0] }
  0xfc   :  { %v11504_v49 = vpop.f32.mrf.mxu2  ;;  %v11508_v51 = vpop.f32.mrf.mxu0 }
  0xfd   :  { %14023 = vst [vmem:[#allocation20_spill] sm:$0xff] %v11504_v49  ;;  %v11506_v50 = vpop.f32.mrf.mxu3  ;;  %v11510_v52 = vpop.f32.mrf.mxu1  ;;  %v10200_v49 = vld [vmem:[#allocation8 + $0xcc] sm:$0xf] }
  0xfe   :  { %14024 = vst [vmem:[#allocation21_spill] sm:$0xff] %v11506_v50 }
  0xff   :  { %14025 = vst [vmem:[#allocation22_spill] sm:$0xff] %v11508_v51  ;;  %v10202_v51 = vld [vmem:[#allocation8 + $0xd4] sm:$0xf0] }
 0x100   :  { %14026 = vst [vmem:[#allocation23_spill] sm:$0xff] %v11510_v52 }
 0x104   :  { %v11512_v53 = vpop.f32.mrf.mxu2  ;;  %v11516_v55 = vpop.f32.mrf.mxu0 }
 0x105   :  { %14027 = vst [vmem:[#allocation24_spill] sm:$0xff] %v11512_v53  ;;  %v11514_v54 = vpop.f32.mrf.mxu3  ;;  %v11518_v56 = vpop.f32.mrf.mxu1  ;;  %v11570_v53 = vperm.slane %v11547_v5, 3 }
 0x106   :  { %14028 = vst [vmem:[#allocation25_spill] sm:$0xff] %v11514_v54  ;;  %v10201_v54 = vld [vmem:[#allocation8 + $0xcc] sm:$0xf0] }
 0x107   :  { %14029 = vst [vmem:[#allocation26_spill] sm:$0xff] %v11516_v55 }
 0x108   :  { %14030 = vst [vmem:[#allocation27_spill] sm:$0xff] %v11518_v56 }
 0x10c   :  { %v11520_v57 = vpop.f32.mrf.mxu2  ;;  %v11524_v59 = vpop.f32.mrf.mxu0 }
 0x10d   :  { %14031 = vst [vmem:[#allocation28_spill] sm:$0xff] %v11520_v57  ;;  %v11522_v58 = vpop.f32.mrf.mxu3  ;;  %v11526_v60 = vpop.f32.mrf.mxu1  ;;  %v10204_v57 = vld [vmem:[#allocation8 + $0xec] sm:$0xf] }
 0x10e   :  { %14032 = vst [vmem:[#allocation29_spill] sm:$0xff] %v11522_v58  ;;  %v8038_v58 = vld [vmem:[#allocation8 + $0xf8] sm:$0xf0] }
 0x10f   :  { %14033 = vst [vmem:[#allocation30_spill] sm:$0xff] %v11524_v59 }
 0x110   :  { %14034 = vst [vmem:[#allocation31_spill] sm:$0xff] %v11526_v60 }
 0x114   :  { %v11528_v61 = vpop.f32.mrf.mxu2  ;;  %v11532_v63 = vpop.f32.mrf.mxu0 }
 0x115   :  { %14035 = vst [vmem:[#allocation32_spill] sm:$0xff] %v11528_v61  ;;  %v11530_v62 = vpop.f32.mrf.mxu3  ;;  %v11534_v0 = vpop.f32.mrf.mxu1  ;;  %v358_v61 = vadd.f32 %v11428_v11, %v11556_v9  ;;  %v8041_v11 = vor.u32 %v10204_v57, %v8038_v58 }
 0x116   :  { %14036 = vst [vmem:[#allocation33_spill] sm:$0xff] %v11530_v62 }
 0x117   :  { %14037 = vst [vmem:[#allocation34_spill] sm:$0xff] %v11532_v63  ;;  %v8036_v63 = vld [vmem:[#allocation8 + $0xe8] sm:$0xf]  ;;  %1252 = vmatpush.bf16.msra.mxu3 %v8041_v11 }
 0x118   :  { %14038 = vst [vmem:[#allocation35_spill] sm:$0xff] %v11534_v0 }
 0x11c   :  { %v11538_v2 = vpop.f32.mrf.mxu0  ;;  %v11540_v3 = vpop.f32.mrf.mxu2 }
 0x11d   :  { %v11536_v1 = vpop.f32.mrf.mxu3  ;;  %14040 = vst [vmem:[#allocation37_spill] sm:$0xff] %v11538_v2  ;;  %v11542_v4 = vpop.f32.mrf.mxu1  ;;  %v11561_v2 = vperm.slane %v11547_v5, 1 }
 0x11e   :  { %14039 = vst [vmem:[#allocation36_spill] sm:$0xff] %v11536_v1  ;;  %v10203_v1 = vld [vmem:[#allocation8 + $0xe4] sm:$0xf] }
 0x11f   :  { %14041 = vst [vmem:[#allocation38_spill] sm:$0xff] %v11540_v3  ;;  %v10205_v3 = vld [vmem:[#allocation8 + $0xec] sm:$0xf0] }
 0x120   :  { %14042 = vst [vmem:[#allocation39_spill] sm:$0xff] %v11542_v4  ;;  %v8028_v4 = vld [vmem:[#allocation8 + $0xe0] sm:$0xf] }
 0x121   :  { %v8029_v0 = vor.u32 %v10205_v3, %v8028_v4  ;;  %v8012_v4 = vld [vmem:[#allocation8 + $0xc0] sm:$0xf] }
 0x123   :  { %1210 = vmatpush.bf16.msra.mxu0 %v8029_v0 }
 0x124   :  { %v11551_v7 = vpop.f32.mrf.mxu0  ;;  %v11558_v10 = vpop.f32.mrf.mxu2 }
 0x125   :  { %v11549_v6 = vpop.f32.mrf.mxu3  ;;  %14044 = vst [vmem:[#allocation41_spill] sm:$0xff] %v11551_v7  ;;  %v11553_v8 = vpop.f32.mrf.mxu1  ;;  %v10206_v7 = vld [vmem:[#allocation8 + $0xf4] sm:$0xf0] }
 0x126   :  { %14043 = vst [vmem:[#allocation40_spill] sm:$0xff] %v11549_v6  ;;  %v8030_v6 = vld [vmem:[#allocation8 + $0xf0] sm:$0xf0]  ;;  %v8037_v59 = vor.u32 %v10206_v7, %v8036_v63  ;;  %v8020_v63 = vld [vmem:[#allocation8 + $0xc8] sm:$0xf] }
 0x127   :  { %14045 = vst [vmem:[#allocation42_spill] sm:$0xff] %v11553_v8  ;;  %v407_v8 = vadd.f32 %v11430_v12, %v11561_v2  ;;  %v10199_v12 = vld [vmem:[#allocation8 + $0xc4] sm:$0xf]  ;;  %v8021_v57 = vor.u32 %v10202_v51, %v8020_v63  ;;  %v409_v51 = vadd.f32 %v11438_v16, %v11561_v2 }
 0x128   :  { %14046 = vst [vmem:[#allocation43_spill] sm:$0xff] %v11558_v10  ;;  %v8033_v10 = vor.u32 %v10203_v1, %v8030_v6  ;;  %1238 = vmatpush.bf16.msra.mxu2 %v8037_v59  ;;  %v8014_v1 = vld [vmem:[#allocation8 + $0xd0] sm:$0xf0]  ;;  %v7996_v59 = vld [vmem:[#allocation8 + $0xa0] sm:$0xf] }
 0x129   :  { %v8017_v7 = vor.u32 %v10199_v12, %v8014_v1  ;;  %v8006_v12 = vld [vmem:[#allocation8 + $0xb8] sm:$0xf0] }
 0x12a   :  { %1224 = vmatpush.bf16.msra.mxu1 %v8033_v10  ;;  %v8004_v10 = vld [vmem:[#allocation8 + $0xa8] sm:$0xf] }
 0x12c   :  { %v818_v60 = vpop.f32.mrf.mxu0  ;;  %v11572_v50 = vpop.f32.mrf.mxu2  ;;  %1239 = vmatpush.bf16.msra.mxu2 %v8021_v57  ;;  %v10193_v57 = vld [vmem:[#allocation8 + $0x8c] sm:$0xf0] }
 0x12d   :  { %v11567_v62 = vpop.f32.mrf.mxu3  ;;  %v865_v56 = vadd.f32 %v818_v60, %v358_v61  ;;  %v832_v55 = vpop.f32.mrf.mxu1  ;;  %14048 = vst [vmem:[#allocation45_spill] sm:$0xff] %v11572_v50  ;;  %v10197_v60 = vld [vmem:[#allocation8 + $0xac] sm:$0xf0]  ;;  %v360_v61 = vadd.f32 %v11436_v15, %v11556_v9  ;;  %v7982_v50 = vld [vmem:[#allocation8 + $0x90] sm:$0xf0] }
 0x12e   :  { %14047 = vst [vmem:[#allocation44_spill] sm:$0xff] %v11567_v62  ;;  %v866_v3 = vadd.f32 %v832_v55, %v407_v8  ;;  %v8013_v62 = vor.u32 %v10201_v54, %v8012_v4  ;;  %v8022_v55 = vld [vmem:[#allocation8 + $0xd8] sm:$0xf0]  ;;  %1225 = vmatpush.bf16.msra.mxu1 %v8017_v7  ;;  %v505_v54 = vadd.f32 %v11434_v14, %v11570_v53  ;;  %v7998_v8 = vld [vmem:[#allocation8 + $0xb0] sm:$0xf0] }
 0x12f   :  { %v7908_v52 = vmul.f32 -1.442695, %v865_v56  ;;  %v8025_v58 = vor.u32 %v10200_v49, %v8022_v55  ;;  %v10195_v56 = vld [vmem:[#allocation8 + $0xa4] sm:$0xf]  ;;  %v7997_v0 = vor.u32 %v10197_v60, %v7996_v59  ;;  %v10196_v4 = vld [vmem:[#allocation8 + $0xac] sm:$0xf] }
 0x130   :  { %v7910_v6 = vmul.f32 -1.442695, %v866_v3  ;;  %1211 = vmatpush.bf16.msra.mxu0 %v8013_v62  ;;  %v8001_v49 = vor.u32 %v10195_v56, %v7998_v8  ;;  %v8009_v15 = vor.u32 %v10196_v4, %v8006_v12  ;;  %v7980_v7 = vld [vmem:[#allocation8 + $0x80] sm:$0xf]  ;;  %v10191_v55 = vld [vmem:[#allocation8 + $0x84] sm:$0xf] }
 0x131   :  { %10744 = vpow2.f32 %v7908_v52  ;;  %v10198_v52 = vld [vmem:[#allocation8 + $0xb4] sm:$0xf0]  ;;  %1253 = vmatpush.bf16.msra.mxu3 %v8025_v58  ;;  %v7981_v16 = vor.u32 %v10193_v57, %v7980_v7  ;;  %v10189_v4 = vld [vmem:[#allocation8 + $0x6c] sm:$0xf0]  ;;  %v10187_v12 = vld [vmem:[#allocation8 + $0x64] sm:$0xf] }
 0x132   :  { %10746 = vpow2.f32 %v7910_v6  ;;  %v8005_v3 = vor.u32 %v10198_v52, %v8004_v10  ;;  %1226 = vmatpush.bf16.msra.mxu1 %v8001_v49  ;;  %v7988_v52 = vld [vmem:[#allocation8 + $0x88] sm:$0xf]  ;;  %v7990_v49 = vld [vmem:[#allocation8 + $0x98] sm:$0xf0] }
 0x134   :  { %v820_v11 = vpop.f32.mrf.mxu0  ;;  %1212 = vmatpush.bf16.msra.mxu0 %v7997_v0  ;;  %1240 = vmatpush.bf16.msra.mxu2 %v8005_v3 }
 0x135   :  { %v860_v62 = vpop.f32.mrf.mxu3  ;;  %v869_v14 = vadd.f32 %v820_v11, %v360_v61  ;;  %v834_v63 = vpop.f32.mrf.mxu1  ;;  %1254 = vmatpush.bf16.msra.mxu3 %v8009_v15  ;;  %v11583_v61 = vperm.slane %v11547_v5, 2  ;;  %v7964_v5 = vld [vmem:[#allocation8 + $0x60] sm:$0xf]  ;;  %v7966_v15 = vld [vmem:[#allocation8 + $0x70] sm:$0xf0] }
 0x136   :  { %v868_v1 = vadd.f32 %v860_v62, %v505_v54  ;;  %v870_v6 = vadd.f32 %v834_v63, %v409_v51  ;;  %v7985_v54 = vor.u32 %v10191_v55, %v7982_v50  ;;  %v10194_v51 = vld [vmem:[#allocation8 + $0x94] sm:$0xf0]  ;;  %v507_v62 = vadd.f32 %v11442_v18, %v11570_v53  ;;  %v846_v11 = vpop.f32.mrf.mxu2  ;;  %v10192_v50 = vld [vmem:[#allocation8 + $0x8c] sm:$0xf] }
 0x137   :  { %v10745_v59 = vpop.eup %10744  ;;  %v7909_v8 = vmul.f32 -1.442695, %v869_v14  ;;  %v7989_v18 = vor.u32 %v10194_v51, %v7988_v52  ;;  %v7993_v7 = vor.u32 %v10192_v50, %v7990_v49  ;;  %v7965_v57 = vor.u32 %v10189_v4, %v7964_v5  ;;  %v10190_v55 = vld [vmem:[#allocation8 + $0x74] sm:$0xf0]  ;;  %v7950_v50 = vld [vmem:[#allocation8 + $0x50] sm:$0xf0] }
 0x138   :  { %v7912_v60 = vmul.f32 -1.442695, %v868_v1  ;;  %v10747_v58 = vpop.eup %10746  ;;  %v11580_v56 = vadd.f32 1.0, %v10745_v59  ;;  %v7911_v10 = vmul.f32 -1.442695, %v870_v6  ;;  %1213 = vmatpush.bf16.msra.mxu0 %v7981_v16  ;;  %1227 = vmatpush.bf16.msra.mxu1 %v7985_v54  ;;  %v456_v1 = vadd.f32 %v11432_v13, %v11583_v61 }
 0x139   :  { %v11585_v0 = vadd.f32 1.0, %v10747_v58  ;;  %v7972_v6 = vld [vmem:[#allocation8 + $0x68] sm:$0xf]  ;;  %v10188_v59 = vld [vmem:[#allocation8 + $0x6c] sm:$0xf]  ;;  %v7969_v54 = vor.u32 %v10187_v12, %v7966_v15  ;;  %v458_v13 = vadd.f32 %v11440_v17, %v11583_v61  ;;  %1241 = vmatpush.bf16.msra.mxu2 %v7989_v18  ;;  %1255 = vmatpush.bf16.msra.mxu3 %v7993_v7  ;;  %v7949_v5 = vor.u32 %v10185_v48, %v7948_v45 }
 0x13a   :  { %10748 = vpow2.f32 %v7912_v60  ;;  %v890_v14 = vand.u32 2147483647, %v11580_v56  ;;  %v7974_v60 = vld [vmem:[#allocation8 + $0x78] sm:$0xf0]  ;;  %v867_v58 = vadd.f32 %v846_v11, %v456_v1  ;;  %v7973_v52 = vor.u32 %v10190_v55, %v7972_v6  ;;  %v7956_v4 = vld [vmem:[#allocation8 + $0x48] sm:$0xf] }
 0x13b   :  { %10750 = vrcp.f32 %v11580_v56  ;;  %v7977_v51 = vor.u32 %v10188_v59, %v7974_v60  ;;  %v10186_v17 = vld [vmem:[#allocation8 + $0x54] sm:$0xf0]  ;;  %v10184_v12 = vld [vmem:[#allocation8 + $0x4c] sm:$0xf]  ;;  %v930_v15 = vand.u32 2147483648, %v11585_v0  ;;  %v892_v6 = vand.u32 2147483648, %v11580_v56 }
 0x13c   :  { %10752 = vrcp.f32 %v11585_v0  ;;  %1214 = vmatpush.bf16.msra.mxu0 %v7965_v57  ;;  %1228 = vmatpush.bf16.msra.mxu1 %v7969_v54  ;;  %v7958_v18 = vld [vmem:[#allocation8 + $0x58] sm:$0xf0]  ;;  %v7932_v7 = vld [vmem:[#allocation8 + $0x20] sm:$0xf]  ;;  %v928_v45 = vand.u32 2147483647, %v11585_v0  ;;  %vm886_vm2 = vweird.f32 %v11580_v56  ;;  %vm924_vm3 = vweird.f32 %v11585_v0 }
 0x13d   :  { %10754 = vpow2.f32 %v7909_v8  ;;  %v862_v3 = vpop.f32.mrf.mxu3  ;;  %v10181_v59 = vld [vmem:[#allocation8 + $0x2c] sm:$0xf0]  ;;  %1242 = vmatpush.bf16.msra.mxu2 %v7973_v52  ;;  %1256 = vmatpush.bf16.msra.mxu3 %v7977_v51  ;;  %v7961_v54 = vor.u32 %v10184_v12, %v7958_v18  ;;  %vm11625_vm4 = vcmp.eq.f32.partialorder %v890_v14, 8.507059e+37  ;;  %v7924_v12 = vld [vmem:[#allocation8 + $0x8] sm:$0xf] }
 0x13e   :  { %10756 = vpow2.f32 %v7911_v10  ;;  %v872_v63 = vadd.f32 %v862_v3, %v507_v62  ;;  %v10183_v62 = vld [vmem:[#allocation8 + $0x44] sm:$0xf]  ;;  %vm929_vm7 = vcmp.eq.f32.partialorder %v928_v45, 8.507059e+37 }
 0x13f   :  { %v7953_v3 = vor.u32 %v10183_v62, %v7950_v50  ;;  %v848_v50 = vpop.f32.mrf.mxu2 }
 0x140   :  { %v10749_v16 = vpop.eup %10748  ;;  %v7913_v8 = vmul.f32 -1.442695, %v872_v63  ;;  %1215 = vmatpush.bf16.msra.mxu0 %v7949_v5 }
 0x141   :  { %v11594_v47 = vpop.eup %10750  ;;  %v11598_v10 = vadd.f32 1.0, %v10749_v16  ;;  %1229 = vmatpush.bf16.msra.mxu1 %v7953_v3  ;;  %v893_v3 = vor.u32 1.1754944e-38, %v892_v6  ;;  %1257 = vmatpush.bf16.msra.mxu3 %v7961_v54 }
 0x142   :  { %v11600_v49 = vpop.eup %10752  ;;  %v882_v11 = vmul.f32 %v11594_v47, %v11580_v56  ;;  %10758 = vpow2.f32 %v7913_v8  ;;  %v7957_v8 = vor.u32 %v10186_v17, %v7956_v4  ;;  %vm887_vm0 = vweird.f32 %v11594_v47  ;;  %v80_v17 = vld [vmem:[%s14009_s6] sm:$0xff] }
 0x143   :  { %v10755_v1 = vpop.eup %10754  ;;  %v920_v63 = vmul.f32 %v11600_v49, %v11585_v0  ;;  %10760 = vrcp.f32 %v11598_v10  ;;  %vm925_vm1 = vweird.f32 %v11600_v49  ;;  %vm11636_vm5 = vmor %vm886_vm2, %vm887_vm0  ;;  %v871_v56 = vadd.f32 %v848_v50, %v458_v13  ;;  %v7942_v50 = vld [vmem:[#allocation8 + $0x38] sm:$0xf0] }
 0x144   :  { %v10757_v55 = vpop.eup %10756  ;;  %v883_v57 = vsub.f32 1.0, %v882_v11  ;;  %10762 = vtanh.f32 %v867_v58  ;;  %v11610_v48 = vadd.f32 1.0, %v10755_v1  ;;  %v7933_v58 = vor.u32 %v10181_v59, %v7932_v7  ;;  %v10179_v11 = vld [vmem:[#allocation8 + $0x24] sm:$0xf]  ;;  %v7934_v1 = vld [vmem:[#allocation8 + $0x30] sm:$0xf0]  ;;  %1243 = vmatpush.bf16.msra.mxu2 %v7957_v8  ;;  %vm11645_vm6 = vmor %vm924_vm3, %vm925_vm1 }
 0x145   :  { %v921_v60 = vsub.f32 1.0, %v920_v63  ;;  %v11612_v16 = vadd.f32 1.0, %v10757_v55  ;;  %v7937_v6 = vor.u32 %v10179_v11, %v7934_v1  ;;  %v931_v55 = vor.u32 1.1754944e-38, %v930_v15  ;;  %v7940_v59 = vld [vmem:[#allocation8 + $0x28] sm:$0xf] }
 0x146   :  { %v884_v62 = vmul.f32 %v11594_v47, %v883_v57  ;;  %10764 = vrcp.f32 %v11610_v48  ;;  %1216 = vmatpush.bf16.msra.mxu0 %v7933_v58  ;;  %v905_v15 = vand.u32 2147483647, %v11610_v48  ;;  %v7916_v58 = vld [vmem:[#allocation8] sm:$0xf]  ;;  %v10177_v1 = vld [vmem:[#allocation8 + $0xc] sm:$0xf0]  ;;  %vm901_vm10 = vweird.f32 %v11610_v48 }
 0x147   :  { %v922_v63 = vmul.f32 %v11600_v49, %v921_v60  ;;  %10766 = vrcp.f32 %v11612_v16  ;;  %v10182_v60 = vld [vmem:[#allocation8 + $0x34] sm:$0xf0]  ;;  %1230 = vmatpush.bf16.msra.mxu1 %v7937_v6  ;;  %v945_v7 = vand.u32 2147483648, %v11612_v16  ;;  %vm939_vm11 = vweird.f32 %v11612_v16 }
 0x148   :  { %v10759_v52 = vpop.eup %10758  ;;  %v885_v51 = vadd.f32 %v11594_v47, %v884_v62  ;;  %v10180_v62 = vld [vmem:[#allocation8 + $0x2c] sm:$0xf]  ;;  %vm906_vm15 = vcmp.eq.f32.partialorder %v905_v15, 8.507059e+37  ;;  %vm964_vm1 = vweird.f32 %v11598_v10  ;;  %v968_v15 = vand.u32 2147483647, %v11598_v10 }
 0x149   :  { %v11629_v4 = vpop.eup %10760  ;;  %v923_v0 = vadd.f32 %v11600_v49, %v922_v63  ;;  %v11641_v14 = vadd.f32 1.0, %v10759_v52  ;;  %v10175_v63 = vld [vmem:[#allocation8 + $0x4] sm:$0xf]  ;;  %v7945_v46 = vor.u32 %v10180_v62, %v7942_v50 }
 0x14a   :  { %v10763_v18 = vpop.eup %10762  ;;  %v889_v57 = vsel %vm11636_vm5, %v11594_v47, %v885_v51  ;;  %v960_v13 = vmul.f32 %v11629_v4, %v11598_v10  ;;  %vm965_vm13 = vweird.f32 %v11629_v4  ;;  %vm969_vm5 = vcmp.eq.f32.partialorder %v968_v15, 8.507059e+37 }
 0x14b   :  { %v894_v8 = vsel %vm11625_vm4, %v893_v3, %v889_v57  ;;  %v927_v54 = vsel %vm11645_vm6, %v11600_v49, %v923_v0  ;;  %10768 = vrcp.f32 %v11641_v14  ;;  %v7918_v3 = vld [vmem:[#allocation8 + $0x10] sm:$0xf0]  ;;  %v10178_v49 = vld [vmem:[#allocation8 + $0x14] sm:$0xf0]  ;;  %1258 = vmatpush.bf16.msra.mxu3 %v7945_v46  ;;  %v946_v46 = vor.u32 1.1754944e-38, %v945_v7  ;;  %vm966_vm2 = vmor %vm964_vm1, %vm965_vm13 }
 0x14c   :  { %v10765_v47 = vpop.eup %10764  ;;  %v932_v45 = vsel %vm929_vm7, %v931_v55, %v927_v54  ;;  %v991_v11 = vmul.f32 %v10763_v18, %v894_v8  ;;  %v961_v0 = vsub.f32 1.0, %v960_v13  ;;  %10770 = vtanh.f32 %v871_v56  ;;  %v10176_v55 = vld [vmem:[#allocation8 + $0xc] sm:$0xf]  ;;  %v7926_v18 = vld [vmem:[#allocation8 + $0x18] sm:$0xf0] }
 0x14d   :  { %v10767_v52 = vpop.eup %10766  ;;  %v989_v51 = vmul.f32 %v932_v45, %v80_v17  ;;  %v897_v5 = vmul.f32 %v10765_v47, %v11610_v48  ;;  %v7941_v54 = vor.u32 %v10182_v60, %v7940_v59  ;;  %v907_v17 = vand.u32 2147483648, %v11610_v48 }
 0x14e   :  { %v935_v6 = vmul.f32 %v10767_v52, %v11612_v16  ;;  %v7917_v45 = vor.u32 %v10177_v1, %v7916_v58  ;;  %v7921_v43 = vor.u32 %v10175_v63, %v7918_v3  ;;  %vm902_vm8 = vweird.f32 %v10765_v47 }
 0x14f   :  { %v11664_v57 = vadd.f32 %v991_v11, %v989_v51  ;;  %v898_v8 = vsub.f32 1.0, %v897_v5  ;;  %1244 = vmatpush.bf16.msra.mxu2 %v7941_v54  ;;  %v7925_v13 = vor.u32 %v10178_v49, %v7924_v12  ;;  %v7929_v42 = vor.u32 %v10176_v55, %v7926_v18  ;;  %vm903_vm12 = vmor %vm901_vm10, %vm902_vm8 }
 0x150   :  { %v936_v44 = vsub.f32 1.0, %v935_v6  ;;  %vm940_vm9 = vweird.f32 %v10767_v52  ;;  %v943_v11 = vand.u32 2147483647, %v11612_v16  ;;  %1217 = vmatpush.bf16.msra.mxu0 %v7917_v45  ;;  %1231 = vmatpush.bf16.msra.mxu1 %v7921_v43  ;;  %v962_v59 = vmul.f32 %v11629_v4, %v961_v0 }
 0x151   :  { %v899_v41 = vmul.f32 %v10765_v47, %v898_v8  ;;  %v10769_v37 = vpop.eup %10768  ;;  %v908_v58 = vor.u32 1.1754944e-38, %v907_v17  ;;  %vm941_vm14 = vmor %vm939_vm11, %vm940_vm9  ;;  %1259 = vmatpush.bf16.msra.mxu3 %v7929_v42  ;;  %10772 = vtanh.f32 %v11664_v57  ;;  %v970_v12 = vand.u32 2147483648, %v11598_v10 }
 0x152   :  { %v937_v56 = vmul.f32 %v10767_v52, %v936_v44  ;;  %v975_v62 = vmul.f32 %v10769_v37, %v11641_v14  ;;  %v10771_v50 = vpop.eup %10770  ;;  %vm944_vm0 = vcmp.eq.f32.partialorder %v943_v11, 8.507059e+37  ;;  %v963_v3 = vadd.f32 %v11629_v4, %v962_v59 }
 0x153   :  { %v900_v60 = vadd.f32 %v10765_v47, %v899_v41  ;;  %v81_v41 = vld [vmem:[%s14009_s6 + $0x8] sm:$0xff]  ;;  %1245 = vmatpush.bf16.msra.mxu2 %v7925_v13  ;;  %vm980_vm3 = vweird.f32 %v10769_v37  ;;  %v971_v6 = vor.u32 1.1754944e-38, %v970_v12  ;;  %v985_v7 = vand.u32 2147483648, %v11641_v14 }
 0x154   :  { %v938_v44 = vadd.f32 %v10767_v52, %v937_v56  ;;  %v976_v48 = vsub.f32 1.0, %v975_v62  ;;  %vm979_vm4 = vweird.f32 %v11641_v14  ;;  %v983_v10 = vand.u32 2147483647, %v11641_v14 }
 0x155   :  { %v904_v43 = vsel %vm903_vm12, %v10765_v47, %v900_v60  ;;  %v967_v47 = vsel %vm966_vm2, %v11629_v4, %v963_v3  ;;  %vm981_vm6 = vmor %vm979_vm4, %vm980_vm3  ;;  %v986_v54 = vor.u32 1.1754944e-38, %v985_v7  ;;  %v412_v14 = vadd.f32 %v11446_v20, %v11561_v2  ;;  %v10238_v3 = vld [vmem:[#allocation8 + $0xf4] sm:$0xf0] }
 0x156   :  { %v909_v16 = vsel %vm906_vm15, %v908_v58, %v904_v43  ;;  %v942_v1 = vsel %vm941_vm14, %v10767_v52, %v938_v44  ;;  %v977_v5 = vmul.f32 %v10769_v37, %v976_v48  ;;  %v972_v55 = vsel %vm969_vm5, %v971_v6, %v967_v47  ;;  %v8162_v48 = vld [vmem:[#allocation8 + $0xe0] sm:$0xf] }
 0x157   :  { %v947_v63 = vsel %vm944_vm0, %v946_v46, %v942_v1  ;;  %v992_v51 = vmul.f32 %v10771_v50, %v909_v16  ;;  %v10773_v0 = vpop.eup %10772  ;;  %vm984_vm7 = vcmp.eq.f32.partialorder %v983_v10, 8.507059e+37  ;;  %v10237_v16 = vld [vmem:[#allocation8 + $0xec] sm:$0xf0]  ;;  %v10235_v1 = vld [vmem:[#allocation8 + $0xe4] sm:$0xf]  ;;  %v365_v20 = vadd.f32 %v11452_v23, %v11556_v9 }
 0x158   :  { %v990_v49 = vmul.f32 %v947_v63, %v81_v41  ;;  %v978_v52 = vadd.f32 %v10769_v37, %v977_v5  ;;  %v997_v8 = vmul.f32 %v10773_v0, %v972_v55  ;;  %v510_v63 = vadd.f32 %v11450_v22, %v11570_v53  ;;  %v8164_v5 = vld [vmem:[#allocation8 + $0xf0] sm:$0xf0]  ;;  %v8172_v0 = vld [vmem:[#allocation8 + $0xf8] sm:$0xf0]  ;;  %v10231_v23 = vld [vmem:[#allocation8 + $0xc4] sm:$0xf] }
 0x159   :  { %v414_v12 = vadd.f32 %v11454_v24, %v11561_v2  ;;  %v8167_v15 = vor.u32 %v10235_v1, %v8164_v5  ;;  %v461_v5 = vadd.f32 %v11448_v21, %v11583_v61  ;;  %v10223_v21 = vld [vmem:[#allocation8 + $0x84] sm:$0xf] }
 0x15a   :  { %v11685_v42 = vadd.f32 %v992_v51, %v990_v49  ;;  %v982_v18 = vsel %vm981_vm6, %v10769_v37, %v978_v52  ;;  %v999_v13 = vpack.c.bf16 %v997_v8, %v997_v8  ;;  %v363_v37 = vadd.f32 %v11444_v19, %v11556_v9  ;;  %v8170_v19 = vld [vmem:[#allocation8 + $0xe8] sm:$0xf]  ;;  %v10236_v52 = vld [vmem:[#allocation8 + $0xec] sm:$0xf] }
 0x15b   :  { %v987_v17 = vsel %vm984_vm7, %v986_v54, %v982_v18  ;;  %v8163_v51 = vor.u32 %v10237_v16, %v8162_v48  ;;  %v8171_v47 = vor.u32 %v10238_v3, %v8170_v19  ;;  %v8175_v22 = vor.u32 %v10236_v52, %v8172_v0  ;;  %1626 = vmatpush.bf16.msrb.mxu1 %v8167_v15  ;;  %v10233_v54 = vld [vmem:[#allocation8 + $0xcc] sm:$0xf0]  ;;  %v8138_v3 = vld [vmem:[#allocation8 + $0xa8] sm:$0xf]  ;;  %v8140_v52 = vld [vmem:[#allocation8 + $0xb8] sm:$0xf0] }
 0x15c   :  { %10774 = vtanh.f32 %v11685_v42  ;;  %v1046_v59 = vunpack.c.l.b16 %v999_v13  ;;  %v10229_v48 = vld [vmem:[#allocation8 + $0xac] sm:$0xf0]  ;;  %v512_v16 = vadd.f32 %v11458_v26, %v11570_v53 }
 0x15d   :  { %1612 = vmatpush.bf16.msrb.mxu0 %v8163_v51  ;;  %1640 = vmatpush.bf16.msrb.mxu2 %v8171_v47  ;;  %v8132_v51 = vld [vmem:[#allocation8 + $0xb0] sm:$0xf0]  ;;  %v10228_v47 = vld [vmem:[#allocation8 + $0xac] sm:$0xf] }
 0x15e   :  { %1654 = vmatpush.bf16.msrb.mxu3 %v8175_v22  ;;  %v8114_v22 = vld [vmem:[#allocation8 + $0x80] sm:$0xf] }
 0x162   :  { %v10775_v4 = vpop.eup %10774 }
 0x163   :  { %v998_v45 = vmul.f32 %v10775_v4, %v987_v17  ;;  %v8148_v17 = vld [vmem:[#allocation8 + $0xd0] sm:$0xf0] }
 0x165   :  { %v1000_v56 = vpack.c.bf16 %v998_v45, %v998_v45  ;;  %v10698_v11 = vpack.c.bf16 %v998_v45, %v997_v8  ;;  %v8146_v8 = vld [vmem:[#allocation8 + $0xc0] sm:$0xf]  ;;  %v8154_v45 = vld [vmem:[#allocation8 + $0xc8] sm:$0xf] }
 0x166   :  { %v8147_v24 = vor.u32 %v10233_v54, %v8146_v8 }
 0x167   :  { %10699 = vst [vmem:[#allocation2 + $0x30] sm:$0xff] %v10698_v11   ;;  %v1047_v60 = vunpack.c.l.b16 %v1000_v56 }
 0x168   :  { %1613 = vmatpush.bf16.msrb.mxu0 %v8147_v24 }
 0x169   :  { %v1048_v62 = vpack.c.b16 %v1047_v60, %v1046_v59  ;;  %v8151_v59 = vor.u32 %v10231_v23, %v8148_v17  ;;  %v10234_v60 = vld [vmem:[#allocation8 + $0xd4] sm:$0xf0]  ;;  %v463_v17 = vadd.f32 %v11456_v25, %v11583_v61 }
 0x16b   :  { %1218 = vmatmul.bf16.vlgmr.msra.gmra.mxu0 %v1048_v62  ;;  %1232 = vmatmul.bf16.vlgmr.msra.gmra.mxu1 %v1048_v62 }
 0x16c   :  { %1246 = vmatmul.bf16.vlgmr.msra.gmra.mxu2 %v1048_v62  ;;  %1260 = vmatmul.bf16.vlgmr.msra.gmra.mxu3 %v1048_v62 }
 0x16d   :  { %1627 = vmatpush.bf16.msrb.mxu1 %v8151_v59 }
 0x1e8   :  { %v1219_v50 = vpop.f32.mrf.mxu0  ;;  %v1233_v46 = vpop.f32.mrf.mxu1 }
 0x1e9   :  { %v1266_v58 = vadd.f32 %v1219_v50, %v363_v37  ;;  %v1267_v44 = vadd.f32 %v1233_v46, %v412_v14  ;;  %v8155_v14 = vor.u32 %v10234_v60, %v8154_v45  ;;  %v10232_v50 = vld [vmem:[#allocation8 + $0xcc] sm:$0xf]  ;;  %v8156_v46 = vld [vmem:[#allocation8 + $0xd8] sm:$0xf0]  ;;  %v10215_v60 = vld [vmem:[#allocation8 + $0x44] sm:$0xf] }
 0x1eb   :  { %v8042_v41 = vmul.f32 -1.442695, %v1266_v58  ;;  %v8044_v43 = vmul.f32 -1.442695, %v1267_v44  ;;  %1641 = vmatpush.bf16.msrb.mxu2 %v8155_v14 }
 0x1ed   :  { %10776 = vpow2.f32 %v8042_v41  ;;  %v8159_v41 = vor.u32 %v10232_v50, %v8156_v46 }
 0x1ee   :  { %10778 = vpow2.f32 %v8044_v43  ;;  %v8130_v43 = vld [vmem:[#allocation8 + $0xa0] sm:$0xf] }
 0x1ef   :  { %v1261_v49 = vpop.f32.mrf.mxu3  ;;  %v1247_v44 = vpop.f32.mrf.mxu2  ;;  %1655 = vmatpush.bf16.msrb.mxu3 %v8159_v41  ;;  %v8131_v26 = vor.u32 %v10229_v48, %v8130_v43  ;;  %v8122_v48 = vld [vmem:[#allocation8 + $0x88] sm:$0xf] }
 0x1f0   :  { %v1269_v6 = vadd.f32 %v1261_v49, %v510_v63  ;;  %v1221_v7 = vpop.f32.mrf.mxu0  ;;  %v1235_v10 = vpop.f32.mrf.mxu1  ;;  %v10227_v63 = vld [vmem:[#allocation8 + $0xa4] sm:$0xf]  ;;  %v1268_v8 = vadd.f32 %v1247_v44, %v461_v5  ;;  %v8124_v5 = vld [vmem:[#allocation8 + $0x98] sm:$0xf0] }
 0x1f1   :  { %v1270_v55 = vadd.f32 %v1221_v7, %v365_v20  ;;  %v1271_v18 = vadd.f32 %v1235_v10, %v414_v12  ;;  %v10230_v20 = vld [vmem:[#allocation8 + $0xb4] sm:$0xf0]  ;;  %v8143_v10 = vor.u32 %v10228_v47, %v8140_v52  ;;  %1614 = vmatpush.bf16.msrb.mxu0 %v8131_v26  ;;  %v10221_v26 = vld [vmem:[#allocation8 + $0x6c] sm:$0xf0] }
 0x1f2   :  { %v8046_v4 = vmul.f32 -1.442695, %v1269_v6  ;;  %v8135_v6 = vor.u32 %v10227_v63, %v8132_v51  ;;  %v8139_v7 = vor.u32 %v10230_v20, %v8138_v3  ;;  %v10224_v51 = vld [vmem:[#allocation8 + $0x8c] sm:$0xf] }
 0x1f3   :  { %v10777_v13 = vpop.eup %10776  ;;  %v8043_v56 = vmul.f32 -1.442695, %v1270_v55  ;;  %v8045_v11 = vmul.f32 -1.442695, %v1271_v18  ;;  %v10225_v55 = vld [vmem:[#allocation8 + $0x8c] sm:$0xf0]  ;;  %1656 = vmatpush.bf16.msrb.mxu3 %v8143_v10 }
 0x1f4   :  { %v10779_v62 = vpop.eup %10778  ;;  %v11702_v37 = vadd.f32 1.0, %v10777_v13  ;;  %10780 = vpow2.f32 %v8046_v4  ;;  %v8115_v23 = vor.u32 %v10225_v55, %v8114_v22  ;;  %v8116_v4 = vld [vmem:[#allocation8 + $0x90] sm:$0xf0]  ;;  %1628 = vmatpush.bf16.msrb.mxu1 %v8135_v6  ;;  %1642 = vmatpush.bf16.msrb.mxu2 %v8139_v7  ;;  %v8127_v7 = vor.u32 %v10224_v51, %v8124_v5  ;;  %v10219_v10 = vld [vmem:[#allocation8 + $0x64] sm:$0xf] }
 0x1f5   :  { %v11704_v58 = vadd.f32 1.0, %v10779_v62  ;;  %10782 = vpow2.f32 %v8043_v56  ;;  %v8119_v56 = vor.u32 %v10223_v21, %v8116_v4  ;;  %v8100_v22 = vld [vmem:[#allocation8 + $0x70] sm:$0xf0] }
 0x1f6   :  { %10784 = vrcp.f32 %v11702_v37  ;;  %v1291_v19 = vand.u32 2147483647, %v11702_v37  ;;  %v1293_v49 = vand.u32 2147483648, %v11702_v37  ;;  %vm1287_vm9 = vweird.f32 %v11702_v37  ;;  %1615 = vmatpush.bf16.msrb.mxu0 %v8115_v23 }
 0x1f7   :  { %10786 = vrcp.f32 %v11704_v58  ;;  %v1263_v1 = vpop.f32.mrf.mxu3  ;;  %v1331_v12 = vand.u32 2147483648, %v11704_v58  ;;  %v1329_v62 = vand.u32 2147483647, %v11704_v58  ;;  %v1249_v43 = vpop.f32.mrf.mxu2  ;;  %vm1325_vm13 = vweird.f32 %v11704_v58  ;;  %1657 = vmatpush.bf16.msrb.mxu3 %v8127_v7  ;;  %v8066_v7 = vld [vmem:[#allocation8 + $0x20] sm:$0xf] }
 0x1f8   :  { %10788 = vpow2.f32 %v8045_v11  ;;  %v1273_v15 = vadd.f32 %v1263_v1, %v512_v16  ;;  %vm11727_vm8 = vcmp.eq.f32.partialorder %v1291_v19, 8.507059e+37  ;;  %v1294_v46 = vor.u32 1.1754944e-38, %v1293_v49  ;;  %v10226_v16 = vld [vmem:[#allocation8 + $0x94] sm:$0xf0]  ;;  %1629 = vmatpush.bf16.msrb.mxu1 %v8119_v56 }
 0x1f9   :  { %v1332_v50 = vor.u32 1.1754944e-38, %v1331_v12  ;;  %vm11743_vm12 = vcmp.eq.f32.partialorder %v1329_v62, 8.507059e+37  ;;  %v1272_v12 = vadd.f32 %v1249_v43, %v463_v17  ;;  %v10222_v62 = vld [vmem:[#allocation8 + $0x74] sm:$0xf0] }
 0x1fa   :  { %v10781_v0 = vpop.eup %10780  ;;  %v8047_v13 = vmul.f32 -1.442695, %v1273_v15  ;;  %v8098_v15 = vld [vmem:[#allocation8 + $0x60] sm:$0xf] }
 0x1fb   :  { %v10783_v18 = vpop.eup %10782  ;;  %v11715_v54 = vadd.f32 1.0, %v10781_v0  ;;  %v8099_v56 = vor.u32 %v10221_v26, %v8098_v15  ;;  %v10218_v0 = vld [vmem:[#allocation8 + $0x54] sm:$0xf0] }
 0x1fc   :  { %v11717_v24 = vpop.eup %10784  ;;  %v11721_v45 = vadd.f32 1.0, %v10783_v18 }
 0x1fd   :  { %v11723_v11 = vpop.eup %10786  ;;  %v1283_v59 = vmul.f32 %v11717_v24, %v11702_v37  ;;  %10790 = vrcp.f32 %v11715_v54  ;;  %vm1288_vm10 = vweird.f32 %v11717_v24  ;;  %1616 = vmatpush.bf16.msrb.mxu0 %v8099_v56 }
 0x1fe   :  { %v10789_v25 = vpop.eup %10788  ;;  %v1321_v14 = vmul.f32 %v11723_v11, %v11704_v58  ;;  %10792 = vrcp.f32 %v11721_v45  ;;  %v1308_v63 = vand.u32 2147483648, %v11721_v45  ;;  %vm1326_vm11 = vweird.f32 %v11723_v11  ;;  %vm11758_vm14 = vmor %vm1287_vm9, %vm1288_vm10 }
 0x1ff   :  { %v1284_v44 = vsub.f32 1.0, %v1283_v59  ;;  %10794 = vtanh.f32 %v1268_v8  ;;  %v11737_v41 = vadd.f32 1.0, %v10789_v25  ;;  %v1306_v49 = vand.u32 2147483647, %v11721_v45  ;;  %vm11767_vm15 = vmor %vm1325_vm13, %vm1326_vm11  ;;  %v8106_v59 = vld [vmem:[#allocation8 + $0x68] sm:$0xf] }
 0x200   :  { %v1322_v1 = vsub.f32 1.0, %v1321_v14  ;;  %10796 = vpow2.f32 %v8047_v13  ;;  %v8123_v58 = vor.u32 %v10226_v16, %v8122_v48  ;;  %v11774_v8 = vor.u32 1.1754944e-38, %v1308_v63  ;;  %v10220_v25 = vld [vmem:[#allocation8 + $0x6c] sm:$0xf]  ;;  %v8108_v14 = vld [vmem:[#allocation8 + $0x78] sm:$0xf0] }
 0x201   :  { %v1285_v19 = vmul.f32 %v11717_v24, %v1284_v44  ;;  %10798 = vrcp.f32 %v11737_v41  ;;  %v1346_v6 = vand.u32 2147483648, %v11737_v41  ;;  %v1344_v23 = vand.u32 2147483647, %v11737_v41  ;;  %v10217_v63 = vld [vmem:[#allocation8 + $0x4c] sm:$0xf0] }
 0x202   :  { %v1323_v20 = vmul.f32 %v11723_v11, %v1322_v1  ;;  %1643 = vmatpush.bf16.msrb.mxu2 %v8123_v58  ;;  %v8103_v16 = vor.u32 %v10219_v10, %v8100_v22  ;;  %v8082_v1 = vld [vmem:[#allocation8 + $0x40] sm:$0xf]  ;;  %10800 = vtanh.f32 %v1272_v12  ;;  %v10216_v58 = vld [vmem:[#allocation8 + $0x4c] sm:$0xf]  ;;  %vm1302_vm1 = vweird.f32 %v11721_v45  ;;  %v10213_v10 = vld [vmem:[#allocation8 + $0x2c] sm:$0xf0] }
 0x203   :  { %v11751_v47 = vpop.eup %10790  ;;  %v1286_v52 = vadd.f32 %v11717_v24, %v1285_v19  ;;  %v8107_v21 = vor.u32 %v10222_v62, %v8106_v59  ;;  %v8083_v56 = vor.u32 %v10217_v63, %v8082_v1  ;;  %v8076_v62 = vld [vmem:[#allocation8 + $0x38] sm:$0xf0]  ;;  %vm1307_vm4 = vcmp.eq.f32.partialorder %v1306_v49, 8.507059e+37 }
 0x204   :  { %v11763_v55 = vpop.eup %10792  ;;  %v1324_v37 = vadd.f32 %v11723_v11, %v1323_v20  ;;  %v1361_v18 = vmul.f32 %v11751_v47, %v11715_v54  ;;  %1630 = vmatpush.bf16.msrb.mxu1 %v8103_v16  ;;  %v10212_v16 = vld [vmem:[#allocation8 + $0x2c] sm:$0xf]  ;;  %v8067_v1 = vor.u32 %v10213_v10, %v8066_v7  ;;  %vm1340_vm5 = vweird.f32 %v11737_v41  ;;  %v8060_v10 = vld [vmem:[#allocation8 + $0x18] sm:$0xf0] }
 0x205   :  { %v10795_v4 = vpop.eup %10794  ;;  %v1290_v17 = vsel %vm11758_vm14, %v11717_v24, %v1286_v52  ;;  %v1298_v13 = vmul.f32 %v11763_v55, %v11721_v45  ;;  %vm1303_vm0 = vweird.f32 %v11763_v55  ;;  %v8090_v52 = vld [vmem:[#allocation8 + $0x48] sm:$0xf]  ;;  %1617 = vmatpush.bf16.msrb.mxu0 %v8083_v56  ;;  %vm1345_vm7 = vcmp.eq.f32.partialorder %v1344_v23, 8.507059e+37  ;;  %v10208_v23 = vld [vmem:[#allocation8 + $0xc] sm:$0xf] }
 0x206   :  { %v10797_v44 = vpop.eup %10796  ;;  %v1295_v43 = vsel %vm11727_vm8, %v1294_v46, %v1290_v17  ;;  %v1328_v24 = vsel %vm11767_vm15, %v11723_v11, %v1324_v37  ;;  %v1362_v48 = vsub.f32 1.0, %v1361_v18  ;;  %v8084_v46 = vld [vmem:[#allocation8 + $0x50] sm:$0xf0]  ;;  %vm11804_vm2 = vmor %vm1302_vm1, %vm1303_vm0  ;;  %v8111_v37 = vor.u32 %v10220_v25, %v8108_v14  ;;  %v10211_v18 = vld [vmem:[#allocation8 + $0x24] sm:$0xf]  ;;  %1644 = vmatpush.bf16.msrb.mxu2 %v8107_v21 }
 0x207   :  { %v11788_v51 = vpop.eup %10798  ;;  %v1333_v5 = vsel %vm11743_vm12, %v1332_v50, %v1328_v24  ;;  %v1392_v19 = vmul.f32 %v10795_v4, %v1295_v43  ;;  %v1299_v20 = vsub.f32 1.0, %v1298_v13  ;;  %v11792_v15 = vadd.f32 1.0, %v10797_v44  ;;  %v8092_v50 = vld [vmem:[#allocation8 + $0x58] sm:$0xf0]  ;;  %v8068_v4 = vld [vmem:[#allocation8 + $0x30] sm:$0xf0] }
 0x208   :  { %v1390_v26 = vmul.f32 %v1333_v5, %v11664_v57  ;;  %v1336_v11 = vmul.f32 %v11788_v51, %v11737_v41  ;;  %v1363_v17 = vmul.f32 %v11751_v47, %v1362_v48  ;;  %v8087_v44 = vor.u32 %v10215_v60, %v8084_v46  ;;  %v8074_v43 = vld [vmem:[#allocation8 + $0x28] sm:$0xf]  ;;  %v10214_v24 = vld [vmem:[#allocation8 + $0x34] sm:$0xf0]  ;;  %1658 = vmatpush.bf16.msrb.mxu3 %v8111_v37  ;;  %v8050_v25 = vld [vmem:[#allocation8] sm:$0xf] }
 0x209   :  { %v1300_v3 = vmul.f32 %v11763_v55, %v1299_v20  ;;  %10802 = vrcp.f32 %v11792_v15  ;;  %vm1341_vm3 = vweird.f32 %v11788_v51  ;;  %v8095_v59 = vor.u32 %v10216_v58, %v8092_v50  ;;  %v10209_v14 = vld [vmem:[#allocation8 + $0xc] sm:$0xf0]  ;;  %v10801_v20 = vpop.eup %10800  ;;  %v10210_v50 = vld [vmem:[#allocation8 + $0x14] sm:$0xf0]  ;;  %1618 = vmatpush.bf16.msrb.mxu0 %v8067_v1 }
 0x20a   :  { %v11800_v22 = vadd.f32 %v1392_v19, %v1390_v26  ;;  %v1337_v57 = vsub.f32 1.0, %v1336_v11  ;;  %v8091_v19 = vor.u32 %v10218_v0, %v8090_v52  ;;  %1631 = vmatpush.bf16.msrb.mxu1 %v8087_v44  ;;  %v8071_v63 = vor.u32 %v10211_v18, %v8068_v4  ;;  %v10207_v11 = vld [vmem:[#allocation8 + $0x4] sm:$0xf]  ;;  %v8052_v52 = vld [vmem:[#allocation8 + $0x10] sm:$0xf0]  ;;  %vm1342_vm6 = vmor %vm1340_vm5, %vm1341_vm3 }
 0x20b   :  { %v1301_v13 = vadd.f32 %v11763_v55, %v1300_v3  ;;  %v1347_v60 = vor.u32 1.1754944e-38, %v1346_v6  ;;  %v8075_v45 = vor.u32 %v10214_v24, %v8074_v43  ;;  %v8079_v49 = vor.u32 %v10212_v16, %v8076_v62  ;;  %v8058_v3 = vld [vmem:[#allocation8 + $0x8] sm:$0xf]  ;;  %v10268_v4 = vld [vmem:[#allocation8 + $0xec] sm:$0xf] }
 0x20c   :  { %v1338_v5 = vmul.f32 %v11788_v51, %v1337_v57  ;;  %v8051_v0 = vor.u32 %v10209_v14, %v8050_v25  ;;  %10804 = vtanh.f32 %v11800_v22  ;;  %1645 = vmatpush.bf16.msrb.mxu2 %v8091_v19  ;;  %1659 = vmatpush.bf16.msrb.mxu3 %v8095_v59  ;;  %vm1366_vm8 = vweird.f32 %v11751_v47 }
 0x20d   :  { %v1305_v48 = vsel %vm11804_vm2, %v11763_v55, %v1301_v13  ;;  %v8055_v41 = vor.u32 %v10207_v11, %v8052_v52  ;;  %v1364_v57 = vadd.f32 %v11751_v47, %v1363_v17  ;;  %v1371_v12 = vand.u32 2147483648, %v11715_v54 }
 0x20e   :  { %v1310_v46 = vsel %vm1307_vm4, %v11774_v8, %v1305_v48  ;;  %v1339_v26 = vadd.f32 %v11788_v51, %v1338_v5  ;;  %1632 = vmatpush.bf16.msrb.mxu1 %v8071_v63  ;;  %vm1365_vm9 = vweird.f32 %v11715_v54  ;;  %v8059_v37 = vor.u32 %v10210_v50, %v8058_v3  ;;  %1619 = vmatpush.bf16.msrb.mxu0 %v8051_v0  ;;  %v8296_v3 = vld [vmem:[#allocation8 + $0xe0] sm:$0xf]  ;;  %v10267_v50 = vld [vmem:[#allocation8 + $0xe4] sm:$0xf] }
 0x20f   :  { %v10803_v55 = vpop.eup %10802  ;;  %v1393_v58 = vmul.f32 %v10801_v20, %v1310_v46  ;;  %v1369_v18 = vand.u32 2147483647, %v11715_v54  ;;  %vm11835_vm10 = vmor %vm1365_vm9, %vm1366_vm8  ;;  %v8063_v17 = vor.u32 %v10208_v23, %v8060_v10  ;;  %v1372_v43 = vor.u32 1.1754944e-38, %v1371_v12  ;;  %v8304_v12 = vld [vmem:[#allocation8 + $0xe8] sm:$0xf] }
 0x210   :  { %v1343_v6 = vsel %vm1342_vm6, %v11788_v51, %v1339_v26  ;;  %v1376_v8 = vmul.f32 %v10803_v55, %v11792_v15  ;;  %1646 = vmatpush.bf16.msrb.mxu2 %v8075_v45  ;;  %1660 = vmatpush.bf16.msrb.mxu3 %v8079_v49  ;;  %vm1381_vm11 = vweird.f32 %v10803_v55  ;;  %v1386_v54 = vand.u32 2147483648, %v11792_v15 }
 0x211   :  { %v1348_v7 = vsel %vm1345_vm7, %v1347_v60, %v1343_v6  ;;  %vm1380_vm12 = vweird.f32 %v11792_v15  ;;  %vm1370_vm13 = vcmp.eq.f32.partialorder %v1369_v18, 8.507059e+37  ;;  %v1384_v16 = vand.u32 2147483647, %v11792_v15 }
 0x212   :  { %v1391_v51 = vmul.f32 %v1348_v7, %v11685_v42  ;;  %v1377_v21 = vsub.f32 1.0, %v1376_v8  ;;  %1633 = vmatpush.bf16.msrb.mxu1 %v8055_v41  ;;  %v1368_v42 = vsel %vm11835_vm10, %v11751_v47, %v1364_v57  ;;  %v10805_v44 = vpop.eup %10804  ;;  %vm1382_vm14 = vmor %vm1380_vm12, %vm1381_vm11  ;;  %v1387_v47 = vor.u32 1.1754944e-38, %v1386_v54  ;;  %v8298_v57 = vld [vmem:[#allocation8 + $0xf0] sm:$0xf0] }
 0x213   :  { %v1373_v5 = vsel %vm1370_vm13, %v1372_v43, %v1368_v42  ;;  %vm1385_vm15 = vcmp.eq.f32.partialorder %v1384_v16, 8.507059e+37  ;;  %v368_v15 = vadd.f32 %v11460_v27, %v11556_v9  ;;  %v417_v26 = vadd.f32 %v11462_v28, %v11561_v2  ;;  %v10269_v28 = vld [vmem:[#allocation8 + $0xec] sm:$0xf0] }
 0x214   :  { %v11839_v13 = vadd.f32 %v1393_v58, %v1391_v51  ;;  %v1378_v56 = vmul.f32 %v10803_v55, %v1377_v21  ;;  %1647 = vmatpush.bf16.msrb.mxu2 %v8059_v37  ;;  %1661 = vmatpush.bf16.msrb.mxu3 %v8063_v17  ;;  %v1398_v59 = vmul.f32 %v10805_v44, %v1373_v5  ;;  %v10270_v51 = vld [vmem:[#allocation8 + $0xf4] sm:$0xf0]  ;;  %v8280_v44 = vld [vmem:[#allocation8 + $0xc0] sm:$0xf]  ;;  %v10265_v16 = vld [vmem:[#allocation8 + $0xcc] sm:$0xf0] }
 0x215   :  { %v515_v6 = vadd.f32 %v11466_v30, %v11570_v53  ;;  %v370_v58 = vadd.f32 %v11468_v31, %v11556_v9  ;;  %v419_v27 = vadd.f32 %v11470_v32, %v11561_v2  ;;  %v8297_v10 = vor.u32 %v10269_v28, %v8296_v3  ;;  %v8306_v31 = vld [vmem:[#allocation8 + $0xf8] sm:$0xf0] }
 0x216   :  { %10806 = vtanh.f32 %v11839_v13  ;;  %v1379_v24 = vadd.f32 %v10803_v55, %v1378_v56  ;;  %v1400_v48 = vpack.c.bf16 %v1398_v59, %v1398_v59  ;;  %v8301_v37 = vor.u32 %v10267_v50, %v8298_v57 }
 0x217   :  { %v8305_v18 = vor.u32 %v10270_v51, %v8304_v12  ;;  %2014 = vmatpush.bf16.msra.mxu0 %v8297_v10  ;;  %v8309_v32 = vor.u32 %v10268_v4, %v8306_v31  ;;  %v468_v12 = vadd.f32 %v11472_v33, %v11583_v61 }
 0x218   :  { %v1383_v19 = vsel %vm1382_vm14, %v10803_v55, %v1379_v24  ;;  %v1448_v20 = vunpack.c.l.b16 %v1400_v48  ;;  %2028 = vmatpush.bf16.msra.mxu1 %v8301_v37  ;;  %v8288_v48 = vld [vmem:[#allocation8 + $0xc8] sm:$0xf] }
 0x219   :  { %v1388_v25 = vsel %vm1385_vm15, %v1387_v47, %v1383_v19  ;;  %2042 = vmatpush.bf16.msra.mxu2 %v8305_v18  ;;  %2056 = vmatpush.bf16.msra.mxu3 %v8309_v32  ;;  %v10263_v47 = vld [vmem:[#allocation8 + $0xc4] sm:$0xf]  ;;  %v10260_v32 = vld [vmem:[#allocation8 + $0xac] sm:$0xf]  ;;  %v10254_v18 = vld [vmem:[#allocation8 + $0x74] sm:$0xf0] }
 0x21c   :  { %v10807_v62 = vpop.eup %10806 }
 0x21d   :  { %v1399_v14 = vmul.f32 %v10807_v62, %v1388_v25  ;;  %v8282_v62 = vld [vmem:[#allocation8 + $0xd0] sm:$0xf0]  ;;  %v517_v25 = vadd.f32 %v11474_v34, %v11570_v53 }
 0x21f   :  { %v1401_v1 = vpack.c.bf16 %v1399_v14, %v1399_v14  ;;  %v10703_v63 = vpack.c.bf16 %v1399_v14, %v1398_v59  ;;  %v8281_v59 = vor.u32 %v10265_v16, %v8280_v44 }
 0x221   :  { %10704 = vst [vmem:[#allocation2] sm:$0xff] %v10703_v63   ;;  %v1449_v60 = vunpack.c.l.b16 %v1401_v1  ;;  %2015 = vmatpush.bf16.msra.mxu0 %v8281_v59  ;;  %v10266_v1 = vld [vmem:[#allocation8 + $0xd4] sm:$0xf0]  ;;  %v10264_v63 = vld [vmem:[#allocation8 + $0xcc] sm:$0xf] }
 0x223   :  { %v1450_v46 = vpack.c.b16 %v1449_v60, %v1448_v20  ;;  %v8290_v20 = vld [vmem:[#allocation8 + $0xd8] sm:$0xf0]  ;;  %v8264_v60 = vld [vmem:[#allocation8 + $0xa0] sm:$0xf] }
 0x225   :  { %1620 = vmatmul.bf16.vlgmr.msrb.gmra.mxu0 %v1450_v46  ;;  %1634 = vmatmul.bf16.vlgmr.msrb.gmra.mxu1 %v1450_v46 }
 0x226   :  { %1648 = vmatmul.bf16.vlgmr.msrb.gmra.mxu2 %v1450_v46  ;;  %1662 = vmatmul.bf16.vlgmr.msrb.gmra.mxu3 %v1450_v46  ;;  %v466_v46 = vadd.f32 %v11464_v29, %v11583_v61 }
 0x2a2   :  { %v1621_v11 = vpop.f32.mrf.mxu0  ;;  %v1635_v52 = vpop.f32.mrf.mxu1 }
 0x2a3   :  { %v1668_v55 = vadd.f32 %v1621_v11, %v368_v15  ;;  %v1669_v45 = vadd.f32 %v1635_v52, %v417_v26  ;;  %v8285_v11 = vor.u32 %v10263_v47, %v8282_v62  ;;  %v10261_v52 = vld [vmem:[#allocation8 + $0xac] sm:$0xf0] }
 0x2a5   :  { %v8176_v49 = vmul.f32 -1.442695, %v1668_v55  ;;  %v8178_v0 = vmul.f32 -1.442695, %v1669_v45  ;;  %v10259_v55 = vld [vmem:[#allocation8 + $0xa4] sm:$0xf]  ;;  %v8289_v45 = vor.u32 %v10266_v1, %v8288_v48  ;;  %2029 = vmatpush.bf16.msra.mxu1 %v8285_v11 }
 0x2a6   :  { %v10248_v11 = vld [vmem:[#allocation8 + $0x4c] sm:$0xf] }
 0x2a7   :  { %10808 = vpow2.f32 %v8176_v49  ;;  %v8293_v49 = vor.u32 %v10264_v63, %v8290_v20  ;;  %2043 = vmatpush.bf16.msra.mxu2 %v8289_v45 }
 0x2a8   :  { %10810 = vpow2.f32 %v8178_v0  ;;  %v8265_v0 = vor.u32 %v10261_v52, %v8264_v60 }
 0x2a9   :  { %v1663_v8 = vpop.f32.mrf.mxu3  ;;  %v1649_v19 = vpop.f32.mrf.mxu2  ;;  %2057 = vmatpush.bf16.msra.mxu3 %v8293_v49 }
 0x2aa   :  { %v1671_v7 = vadd.f32 %v1663_v8, %v515_v6  ;;  %v1623_v41 = vpop.f32.mrf.mxu0  ;;  %v1637_v23 = vpop.f32.mrf.mxu1  ;;  %v8266_v6 = vld [vmem:[#allocation8 + $0xb0] sm:$0xf0]  ;;  %v1670_v3 = vadd.f32 %v1649_v19, %v466_v46  ;;  %2016 = vmatpush.bf16.msra.mxu0 %v8265_v0  ;;  %v8256_v46 = vld [vmem:[#allocation8 + $0x88] sm:$0xf] }
 0x2ab   :  { %v1672_v21 = vadd.f32 %v1623_v41, %v370_v58  ;;  %v1673_v30 = vadd.f32 %v1637_v23, %v419_v27  ;;  %v8272_v58 = vld [vmem:[#allocation8 + $0xa8] sm:$0xf]  ;;  %v10262_v27 = vld [vmem:[#allocation8 + $0xb4] sm:$0xf0]  ;;  %v8269_v50 = vor.u32 %v10259_v55, %v8266_v6 }
 0x2ac   :  { %v8180_v56 = vmul.f32 -1.442695, %v1671_v7  ;;  %v8273_v10 = vor.u32 %v10262_v27, %v8272_v58 }
 0x2ad   :  { %v10809_v17 = vpop.eup %10808  ;;  %v8177_v42 = vmul.f32 -1.442695, %v1672_v21  ;;  %v8179_v24 = vmul.f32 -1.442695, %v1673_v30  ;;  %2030 = vmatpush.bf16.msra.mxu1 %v8269_v50  ;;  %v8232_v50 = vld [vmem:[#allocation8 + $0x60] sm:$0xf] }
 0x2ae   :  { %v10811_v43 = vpop.eup %10810  ;;  %v11858_v54 = vadd.f32 1.0, %v10809_v17  ;;  %10812 = vpow2.f32 %v8180_v56  ;;  %v8274_v17 = vld [vmem:[#allocation8 + $0xb8] sm:$0xf0]  ;;  %2044 = vmatpush.bf16.msra.mxu2 %v8273_v10 }
 0x2af   :  { %v11860_v5 = vadd.f32 1.0, %v10811_v43  ;;  %10814 = vpow2.f32 %v8177_v42  ;;  %v8248_v43 = vld [vmem:[#allocation8 + $0x80] sm:$0xf]  ;;  %v8277_v20 = vor.u32 %v10260_v32, %v8274_v17  ;;  %v10252_v32 = vld [vmem:[#allocation8 + $0x6c] sm:$0xf] }
 0x2b0   :  { %10816 = vrcp.f32 %v11858_v54  ;;  %v1693_v15 = vand.u32 2147483647, %v11858_v54  ;;  %v1695_v7 = vand.u32 2147483648, %v11858_v54  ;;  %vm1689_vm1 = vweird.f32 %v11858_v54 }
 0x2b1   :  { %10818 = vrcp.f32 %v11860_v5  ;;  %v1665_v14 = vpop.f32.mrf.mxu3  ;;  %v1733_v21 = vand.u32 2147483648, %v11860_v5  ;;  %v1731_v4 = vand.u32 2147483647, %v11860_v5  ;;  %v1651_v56 = vpop.f32.mrf.mxu2  ;;  %vm1727_vm2 = vweird.f32 %v11860_v5  ;;  %2058 = vmatpush.bf16.msra.mxu3 %v8277_v20 }
 0x2b2   :  { %10820 = vpow2.f32 %v8179_v24  ;;  %v1675_v26 = vadd.f32 %v1665_v14, %v517_v25  ;;  %vm11886_vm0 = vcmp.eq.f32.partialorder %v1693_v15, 8.507059e+37  ;;  %v1696_v44 = vor.u32 1.1754944e-38, %v1695_v7  ;;  %v10257_v24 = vld [vmem:[#allocation8 + $0x8c] sm:$0xf0]  ;;  %v10255_v25 = vld [vmem:[#allocation8 + $0x84] sm:$0xf] }
 0x2b3   :  { %v1734_v47 = vor.u32 1.1754944e-38, %v1733_v21  ;;  %v1674_v62 = vadd.f32 %v1651_v56, %v468_v12  ;;  %v8250_v14 = vld [vmem:[#allocation8 + $0x90] sm:$0xf0]  ;;  %vm11905_vm5 = vcmp.eq.f32.partialorder %v1731_v4, 8.507059e+37  ;;  %v8249_v60 = vor.u32 %v10257_v24, %v8248_v43  ;;  %v10258_v15 = vld [vmem:[#allocation8 + $0x94] sm:$0xf0] }
 0x2b4   :  { %v10813_v34 = vpop.eup %10812  ;;  %v8181_v23 = vmul.f32 -1.442695, %v1675_v26  ;;  %v8253_v27 = vor.u32 %v10255_v25, %v8250_v14  ;;  %v8257_v10 = vor.u32 %v10258_v15, %v8256_v46  ;;  %v10251_v12 = vld [vmem:[#allocation8 + $0x64] sm:$0xf]  ;;  %v8240_v21 = vld [vmem:[#allocation8 + $0x68] sm:$0xf] }
 0x2b5   :  { %v10815_v8 = vpop.eup %10814  ;;  %v11869_v28 = vadd.f32 1.0, %v10813_v34  ;;  %2017 = vmatpush.bf16.msra.mxu0 %v8249_v60  ;;  %v8216_v43 = vld [vmem:[#allocation8 + $0x40] sm:$0xf]  ;;  %v8224_v14 = vld [vmem:[#allocation8 + $0x48] sm:$0xf]  ;;  %v8241_v15 = vor.u32 %v10254_v18, %v8240_v21 }
 0x2b6   :  { %v11871_v29 = vpop.eup %10816  ;;  %v11874_v41 = vadd.f32 1.0, %v10815_v8  ;;  %v10256_v8 = vld [vmem:[#allocation8 + $0x8c] sm:$0xf]  ;;  %2031 = vmatpush.bf16.msra.mxu1 %v8253_v27  ;;  %2045 = vmatpush.bf16.msra.mxu2 %v8257_v10  ;;  %v10245_v27 = vld [vmem:[#allocation8 + $0x2c] sm:$0xf0] }
 0x2b7   :  { %v11876_v57 = vpop.eup %10818  ;;  %v1685_v51 = vmul.f32 %v11871_v29, %v11858_v54  ;;  %10822 = vrcp.f32 %v11869_v28  ;;  %vm1690_vm3 = vweird.f32 %v11871_v29  ;;  %v8202_v10 = vld [vmem:[#allocation8 + $0x30] sm:$0xf0]  ;;  %v10244_v18 = vld [vmem:[#allocation8 + $0x2c] sm:$0xf] }
 0x2b8   :  { %v10821_v30 = vpop.eup %10820  ;;  %v1723_v37 = vmul.f32 %v11876_v57, %v11860_v5  ;;  %10824 = vrcp.f32 %v11874_v41  ;;  %v1710_v19 = vand.u32 2147483648, %v11874_v41  ;;  %vm1728_vm4 = vweird.f32 %v11876_v57  ;;  %vm11915_vm6 = vmor %vm1689_vm1, %vm1690_vm3  ;;  %v10253_v5 = vld [vmem:[#allocation8 + $0x6c] sm:$0xf0] }
 0x2b9   :  { %v1686_v33 = vsub.f32 1.0, %v1685_v51  ;;  %10826 = vtanh.f32 %v1670_v3  ;;  %v11893_v31 = vadd.f32 1.0, %v10821_v30  ;;  %v1708_v45 = vand.u32 2147483647, %v11874_v41  ;;  %vm11930_vm7 = vmor %vm1727_vm2, %vm1728_vm4  ;;  %v8258_v3 = vld [vmem:[#allocation8 + $0x98] sm:$0xf0] }
 0x2ba   :  { %v1724_v42 = vsub.f32 1.0, %v1723_v37  ;;  %10828 = vpow2.f32 %v8181_v23  ;;  %v11939_v58 = vor.u32 1.1754944e-38, %v1710_v19  ;;  %v8234_v51 = vld [vmem:[#allocation8 + $0x70] sm:$0xf0]  ;;  %vm1704_vm9 = vweird.f32 %v11874_v41  ;;  %v10247_v19 = vld [vmem:[#allocation8 + $0x44] sm:$0xf]  ;;  %2046 = vmatpush.bf16.msra.mxu2 %v8241_v15 }
 0x2bb   :  { %v1687_v16 = vmul.f32 %v11871_v29, %v1686_v33  ;;  %10830 = vrcp.f32 %v11893_v31  ;;  %v1748_v34 = vand.u32 2147483648, %v11893_v31  ;;  %v8233_v25 = vor.u32 %v10253_v5, %v8232_v50  ;;  %v10243_v5 = vld [vmem:[#allocation8 + $0x24] sm:$0xf]  ;;  %v8194_v15 = vld [vmem:[#allocation8 + $0x18] sm:$0xf0] }
 0x2bc   :  { %v1725_v59 = vmul.f32 %v11876_v57, %v1724_v42  ;;  %10832 = vtanh.f32 %v1674_v62  ;;  %v8261_v62 = vor.u32 %v10256_v8, %v8258_v3  ;;  %v1746_v60 = vand.u32 2147483647, %v11893_v31 }
 0x2bd   :  { %v11902_v48 = vpop.eup %10822  ;;  %v1688_v1 = vadd.f32 %v11871_v29, %v1687_v16  ;;  %v10249_v16 = vld [vmem:[#allocation8 + $0x4c] sm:$0xf0]  ;;  %v8237_v46 = vor.u32 %v10251_v12, %v8234_v51  ;;  %2018 = vmatpush.bf16.msra.mxu0 %v8233_v25  ;;  %vm1709_vm12 = vcmp.eq.f32.partialorder %v1708_v45, 8.507059e+37  ;;  %vm1742_vm13 = vweird.f32 %v11893_v31  ;;  %v8208_v12 = vld [vmem:[#allocation8 + $0x28] sm:$0xf] }
 0x2be   :  { %v11909_v26 = vpop.eup %10824  ;;  %v1726_v52 = vadd.f32 %v11876_v57, %v1725_v59  ;;  %v11922_v55 = vmul.f32 %v11902_v48, %v11869_v28  ;;  %v8218_v59 = vld [vmem:[#allocation8 + $0x50] sm:$0xf0]  ;;  %2059 = vmatpush.bf16.msra.mxu3 %v8261_v62  ;;  %v8217_v54 = vor.u32 %v10249_v16, %v8216_v43  ;;  %v10246_v51 = vld [vmem:[#allocation8 + $0x34] sm:$0xf0]  ;;  %v1749_v45 = vor.u32 1.1754944e-38, %v1748_v34 }
 0x2bf   :  { %v10827_v49 = vpop.eup %10826  ;;  %v1692_v0 = vsel %vm11915_vm6, %v11871_v29, %v1688_v1  ;;  %v1700_v6 = vmul.f32 %v11909_v26, %v11874_v41  ;;  %vm1705_vm8 = vweird.f32 %v11909_v26  ;;  %v10250_v1 = vld [vmem:[#allocation8 + $0x54] sm:$0xf0]  ;;  %2032 = vmatpush.bf16.msra.mxu1 %v8237_v46  ;;  %v8221_v3 = vor.u32 %v10247_v19, %v8218_v59  ;;  %v8186_v43 = vld [vmem:[#allocation8 + $0x10] sm:$0xf0]  ;;  %v8192_v19 = vld [vmem:[#allocation8 + $0x8] sm:$0xf] }
 0x2c0   :  { %v10829_v7 = vpop.eup %10828  ;;  %v1697_v23 = vsel %vm11886_vm0, %v1696_v44, %v1692_v0  ;;  %v1730_v29 = vsel %vm11930_vm7, %v11876_v57, %v1726_v52  ;;  %v1764_v57 = vsub.f32 1.0, %v11922_v55  ;;  %v8242_v44 = vld [vmem:[#allocation8 + $0x78] sm:$0xf0]  ;;  %vm11965_vm10 = vmor %vm1704_vm9, %vm1705_vm8  ;;  %v8225_v50 = vor.u32 %v10250_v1, %v8224_v14  ;;  %v10242_v59 = vld [vmem:[#allocation8 + $0x14] sm:$0xf0] }
 0x2c1   :  { %v11946_v30 = vpop.eup %10830  ;;  %v1735_v37 = vsel %vm11905_vm5, %v1734_v47, %v1730_v29  ;;  %v1794_v4 = vmul.f32 %v10827_v49, %v1697_v23  ;;  %v1701_v33 = vsub.f32 1.0, %v1700_v6  ;;  %v11950_v56 = vadd.f32 1.0, %v10829_v7  ;;  %v8226_v0 = vld [vmem:[#allocation8 + $0x58] sm:$0xf0]  ;;  %v8200_v6 = vld [vmem:[#allocation8 + $0x20] sm:$0xf]  ;;  %2019 = vmatpush.bf16.msra.mxu0 %v8217_v54 }
 0x2c2   :  { %v1792_v17 = vmul.f32 %v1735_v37, %v11800_v22  ;;  %v1738_v42 = vmul.f32 %v11946_v30, %v11893_v31  ;;  %v10833_v52 = vpop.eup %10832  ;;  %vm1743_vm11 = vweird.f32 %v11946_v30  ;;  %v8245_v49 = vor.u32 %v10252_v32, %v8242_v44  ;;  %v8210_v32 = vld [vmem:[#allocation8 + $0x38] sm:$0xf0]  ;;  %2047 = vmatpush.bf16.msra.mxu2 %v8225_v50  ;;  %v10239_v44 = vld [vmem:[#allocation8 + $0x4] sm:$0xf]  ;;  %v10240_v46 = vld [vmem:[#allocation8 + $0xc] sm:$0xf] }
 0x2c3   :  { %v1702_v24 = vmul.f32 %v11909_v26, %v1701_v33  ;;  %10834 = vrcp.f32 %v11950_v56  ;;  %v1765_v7 = vmul.f32 %v11902_v48, %v1764_v57  ;;  %vm11985_vm14 = vmor %vm1742_vm13, %vm1743_vm11  ;;  %vm1747_vm15 = vcmp.eq.f32.partialorder %v1746_v60, 8.507059e+37  ;;  %2033 = vmatpush.bf16.msra.mxu1 %v8221_v3 }
 0x2c4   :  { %v11960_v22 = vadd.f32 %v1794_v4, %v1792_v17  ;;  %v1739_v47 = vsub.f32 1.0, %v1738_v42  ;;  %v8229_v21 = vor.u32 %v10248_v11, %v8226_v0  ;;  %v8201_v37 = vor.u32 %v10245_v27, %v8200_v6  ;;  %2060 = vmatpush.bf16.msra.mxu3 %v8245_v49  ;;  %v8184_v17 = vld [vmem:[#allocation8] sm:$0xf]  ;;  %v10241_v42 = vld [vmem:[#allocation8 + $0xc] sm:$0xf0] }
 0x2c5   :  { %v1703_v63 = vadd.f32 %v11909_v26, %v1702_v24  ;;  %vm1768_vm0 = vweird.f32 %v11902_v48  ;;  %v8205_v34 = vor.u32 %v10243_v5, %v8202_v10  ;;  %v8209_v57 = vor.u32 %v10246_v51, %v8208_v12 }
 0x2c6   :  { %v1740_v55 = vmul.f32 %v11946_v30, %v1739_v47  ;;  %10836 = vtanh.f32 %v11960_v22  ;;  %v1766_v47 = vadd.f32 %v11902_v48, %v1765_v7  ;;  %vm1767_vm1 = vweird.f32 %v11869_v28  ;;  %2020 = vmatpush.bf16.msra.mxu0 %v8201_v37 }
 0x2c7   :  { %v1707_v8 = vsel %vm11965_vm10, %v11909_v26, %v1703_v63  ;;  %v8213_v62 = vor.u32 %v10244_v18, %v8210_v32  ;;  %v1771_v25 = vand.u32 2147483647, %v11869_v28  ;;  %vm12005_vm2 = vmor %vm1767_vm1, %vm1768_vm0  ;;  %v8185_v63 = vor.u32 %v10241_v42, %v8184_v17  ;;  %2034 = vmatpush.bf16.msra.mxu1 %v8205_v34  ;;  %2048 = vmatpush.bf16.msra.mxu2 %v8209_v57  ;;  %v8430_v42 = vld [vmem:[#allocation8 + $0xe0] sm:$0xf] }
 0x2c8   :  { %v1712_v23 = vsel %vm1709_vm12, %v11939_v58, %v1707_v8  ;;  %v1741_v29 = vadd.f32 %v11946_v30, %v1740_v55  ;;  %2061 = vmatpush.bf16.msra.mxu3 %v8229_v21  ;;  %v8189_v20 = vor.u32 %v10239_v44, %v8186_v43  ;;  %v8193_v60 = vor.u32 %v10242_v59, %v8192_v19  ;;  %v10301_v44 = vld [vmem:[#allocation8 + $0xec] sm:$0xf0]  ;;  %v10299_v43 = vld [vmem:[#allocation8 + $0xe4] sm:$0xf] }
 0x2c9   :  { %v11981_v26 = vpop.eup %10834  ;;  %v1795_v4 = vmul.f32 %v10833_v52, %v1712_v23  ;;  %v1788_v55 = vand.u32 2147483648, %v11950_v56  ;;  %vm1782_vm4 = vweird.f32 %v11950_v56  ;;  %vm1772_vm5 = vcmp.eq.f32.partialorder %v1771_v25, 8.507059e+37 }
 0x2ca   :  { %v1745_v58 = vsel %vm11985_vm14, %v11946_v30, %v1741_v29  ;;  %v1778_v33 = vmul.f32 %v11981_v26, %v11950_v56  ;;  %v1773_v30 = vand.u32 2147483648, %v11869_v28  ;;  %v1770_v28 = vsel %vm12005_vm2, %v11902_v48, %v1766_v47  ;;  %2021 = vmatpush.bf16.msra.mxu0 %v8185_v63  ;;  %v8440_v63 = vld [vmem:[#allocation8 + $0xf8] sm:$0xf0] }
 0x2cb   :  { %v1750_v31 = vsel %vm1747_vm15, %v1749_v45, %v1745_v58  ;;  %vm1783_vm3 = vweird.f32 %v11981_v26  ;;  %v1786_v54 = vand.u32 2147483647, %v11950_v56  ;;  %v8197_v0 = vor.u32 %v10240_v46, %v8194_v15  ;;  %2035 = vmatpush.bf16.msra.mxu1 %v8189_v20  ;;  %2049 = vmatpush.bf16.msra.mxu2 %v8193_v60  ;;  %v8414_v15 = vld [vmem:[#allocation8 + $0xc0] sm:$0xf] }
 0x2cc   :  { %v1793_v24 = vmul.f32 %v1750_v31, %v11839_v13  ;;  %v1779_v16 = vsub.f32 1.0, %v1778_v33  ;;  %v10837_v11 = vpop.eup %10836  ;;  %v1774_v52 = vor.u32 1.1754944e-38, %v1773_v30  ;;  %2062 = vmatpush.bf16.msra.mxu3 %v8213_v62  ;;  %vm1784_vm6 = vmor %vm1782_vm4, %vm1783_vm3  ;;  %v1789_v8 = vor.u32 1.1754944e-38, %v1788_v55  ;;  %v10302_v62 = vld [vmem:[#allocation8 + $0xf4] sm:$0xf0]  ;;  %v14081_v55 = vld [vmem:[#allocation11_spill] sm:$0xff] }
 0x2cd   :  { %vm1787_vm7 = vcmp.eq.f32.partialorder %v1786_v54, 8.507059e+37  ;;  %v373_v51 = vadd.f32 %v11476_v35, %v11556_v9  ;;  %v520_v33 = vadd.f32 %v11482_v38, %v11570_v53  ;;  %v375_v18 = vadd.f32 %v11484_v39, %v11556_v9  ;;  %v8438_v38 = vld [vmem:[#allocation8 + $0xe8] sm:$0xf] }
 0x2ce   :  { %v12009_v1 = vadd.f32 %v1795_v4, %v1793_v24  ;;  %v1780_v13 = vmul.f32 %v11981_v26, %v1779_v16  ;;  %v1775_v6 = vsel %vm1772_vm5, %v1774_v52, %v1770_v28  ;;  %v424_v35 = vadd.f32 %v11486_v40, %v11561_v2  ;;  %v8432_v16 = vld [vmem:[#allocation8 + $0xf0] sm:$0xf0]  ;;  %v10297_v28 = vld [vmem:[#allocation8 + $0xcc] sm:$0xf0] }
 0x2cf   :  { %v1800_v27 = vmul.f32 %v10837_v11, %v1775_v6  ;;  %v8431_v24 = vor.u32 %v10301_v44, %v8430_v42  ;;  %v8435_v39 = vor.u32 %v10299_v43, %v8432_v16  ;;  %v8439_v14 = vor.u32 %v10302_v62, %v8438_v38  ;;  %v10295_v11 = vld [vmem:[#allocation8 + $0xc4] sm:$0xf]  ;;  %v8416_v52 = vld [vmem:[#allocation8 + $0xd0] sm:$0xf0]  ;;  %v10298_v6 = vld [vmem:[#allocation8 + $0xd4] sm:$0xf0] }
 0x2d0   :  { %10838 = vtanh.f32 %v12009_v1  ;;  %v1781_v49 = vadd.f32 %v11981_v26, %v1780_v13  ;;  %2063 = vmatpush.bf16.msra.mxu3 %v8197_v0  ;;  %v10300_v13 = vld [vmem:[#allocation8 + $0xec] sm:$0xf]  ;;  %v8422_v0 = vld [vmem:[#allocation8 + $0xc8] sm:$0xf] }
 0x2d1   :  { %v1802_v7 = vpack.c.bf16 %v1800_v27, %v1800_v27  ;;  %2416 = vmatpush.bf16.msrb.mxu0 %v8431_v24  ;;  %2430 = vmatpush.bf16.msrb.mxu1 %v8435_v39  ;;  %v8443_v46 = vor.u32 %v10300_v13, %v8440_v63  ;;  %v10294_v39 = vld [vmem:[#allocation8 + $0xb4] sm:$0xf0]  ;;  %v8408_v13 = vld [vmem:[#allocation8 + $0xb8] sm:$0xf0] }
 0x2d2   :  { %v1785_v48 = vsel %vm1784_vm6, %v11981_v26, %v1781_v49  ;;  %v422_v26 = vadd.f32 %v11478_v36, %v11561_v2  ;;  %2444 = vmatpush.bf16.msrb.mxu2 %v8439_v14  ;;  %v471_v49 = vadd.f32 %v14081_v55, %v11583_v61  ;;  %v10292_v14 = vld [vmem:[#allocation8 + $0xac] sm:$0xf]  ;;  %v10279_v55 = vld [vmem:[#allocation8 + $0x44] sm:$0xf] }
 0x2d3   :  { %v1790_v50 = vsel %vm1787_vm7, %v1789_v8, %v1785_v48  ;;  %v1850_v56 = vunpack.c.l.b16 %v1802_v7  ;;  %v14082_v48 = vld [vmem:[#allocation13_spill] sm:$0xff] }
 0x2d4   :  { %2458 = vmatpush.bf16.msrb.mxu3 %v8443_v46 }
 0x2d6   :  { %v10839_v3 = vpop.eup %10838 }
 0x2d7   :  { %v1801_v5 = vmul.f32 %v10839_v3, %v1790_v50  ;;  %v8415_v3 = vor.u32 %v10297_v28, %v8414_v15  ;;  %v10296_v50 = vld [vmem:[#allocation8 + $0xcc] sm:$0xf]  ;;  %v8382_v15 = vld [vmem:[#allocation8 + $0x80] sm:$0xf]  ;;  %v10289_v28 = vld [vmem:[#allocation8 + $0x8c] sm:$0xf0] }
 0x2d9   :  { %v1803_v23 = vpack.c.bf16 %v1801_v5, %v1801_v5  ;;  %v10708_v29 = vpack.c.bf16 %v1801_v5, %v1800_v27  ;;  %v522_v27 = vadd.f32 %v14082_v48, %v11570_v53  ;;  %v8424_v5 = vld [vmem:[#allocation8 + $0xd8] sm:$0xf0]  ;;  %2417 = vmatpush.bf16.msrb.mxu0 %v8415_v3  ;;  %v10280_v48 = vld [vmem:[#allocation8 + $0x4c] sm:$0xf] }
 0x2db   :  { %10709 = vst [vmem:[#allocation2 + $0x18] sm:$0xff] %v10708_v29   ;;  %v1851_v10 = vunpack.c.l.b16 %v1803_v23  ;;  %v8419_v29 = vor.u32 %v10295_v11, %v8416_v52 }
 0x2dd   :  { %v1852_v12 = vpack.c.b16 %v1851_v10, %v1850_v56  ;;  %v8423_v56 = vor.u32 %v10298_v6, %v8422_v0  ;;  %v8427_v10 = vor.u32 %v10296_v50, %v8424_v5  ;;  %2431 = vmatpush.bf16.msrb.mxu1 %v8419_v29  ;;  %v8384_v0 = vld [vmem:[#allocation8 + $0x90] sm:$0xf0]  ;;  %v8390_v50 = vld [vmem:[#allocation8 + $0x88] sm:$0xf]  ;;  %v8411_v29 = vor.u32 %v10292_v14, %v8408_v13  ;;  %v8350_v13 = vld [vmem:[#allocation8 + $0x40] sm:$0xf] }
 0x2df   :  { %2022 = vmatmul.bf16.vlgmr.msra.gmra.mxu0 %v1852_v12  ;;  %2036 = vmatmul.bf16.vlgmr.msra.gmra.mxu1 %v1852_v12 }
 0x2e0   :  { %2050 = vmatmul.bf16.vlgmr.msra.gmra.mxu2 %v1852_v12  ;;  %2064 = vmatmul.bf16.vlgmr.msra.gmra.mxu3 %v1852_v12  ;;  %v8398_v12 = vld [vmem:[#allocation8 + $0xa0] sm:$0xf] }
 0x2e1   :  { %2445 = vmatpush.bf16.msrb.mxu2 %v8423_v56  ;;  %2459 = vmatpush.bf16.msrb.mxu3 %v8427_v10  ;;  %v8383_v56 = vor.u32 %v10289_v28, %v8382_v15  ;;  %v10290_v10 = vld [vmem:[#allocation8 + $0x94] sm:$0xf0] }
 0x2e5   :  { %2460 = vmatpush.bf16.msrb.mxu3 %v8411_v29 }
 0x35c   :  { %v2023_v41 = vpop.f32.mrf.mxu0  ;;  %v2037_v45 = vpop.f32.mrf.mxu1 }
 0x35d   :  { %v2070_v21 = vadd.f32 %v2023_v41, %v373_v51  ;;  %v2071_v37 = vadd.f32 %v2037_v45, %v422_v26  ;;  %v10293_v51 = vld [vmem:[#allocation8 + $0xac] sm:$0xf0]  ;;  %v10291_v26 = vld [vmem:[#allocation8 + $0xa4] sm:$0xf] }
 0x35f   :  { %v8310_v58 = vmul.f32 -1.442695, %v2070_v21  ;;  %v8312_v4 = vmul.f32 -1.442695, %v2071_v37  ;;  %v8399_v37 = vor.u32 %v10293_v51, %v8398_v12  ;;  %v10288_v12 = vld [vmem:[#allocation8 + $0x8c] sm:$0xf] }
 0x360   :  { %v8392_v51 = vld [vmem:[#allocation8 + $0x98] sm:$0xf0] }
 0x361   :  { %10840 = vpow2.f32 %v8310_v58  ;;  %v8400_v58 = vld [vmem:[#allocation8 + $0xb0] sm:$0xf0]  ;;  %2418 = vmatpush.bf16.msrb.mxu0 %v8399_v37 }
 0x362   :  { %10842 = vpow2.f32 %v8312_v4 }
 0x363   :  { %v2065_v32 = vpop.f32.mrf.mxu3  ;;  %v2051_v60 = vpop.f32.mrf.mxu2 }
 0x364   :  { %v2073_v17 = vadd.f32 %v2065_v32, %v520_v33  ;;  %v2025_v36 = vpop.f32.mrf.mxu0  ;;  %v2039_v31 = vpop.f32.mrf.mxu1  ;;  %v2072_v23 = vadd.f32 %v2051_v60, %v471_v49  ;;  %v8352_v49 = vld [vmem:[#allocation8 + $0x50] sm:$0xf0] }
 0x365   :  { %v2074_v34 = vadd.f32 %v2025_v36, %v375_v18  ;;  %v2075_v57 = vadd.f32 %v2039_v31, %v424_v35  ;;  %v8403_v35 = vor.u32 %v10291_v26, %v8400_v58  ;;  %v8366_v58 = vld [vmem:[#allocation8 + $0x60] sm:$0xf]  ;;  %2419 = vmatpush.bf16.msrb.mxu0 %v8383_v56 }
 0x366   :  { %v8314_v30 = vmul.f32 -1.442695, %v2073_v17  ;;  %v14083_v17 = vld [vmem:[#allocation12_spill] sm:$0xff] }
 0x367   :  { %v10841_v19 = vpop.eup %10840  ;;  %v8311_v59 = vmul.f32 -1.442695, %v2074_v34  ;;  %v8313_v47 = vmul.f32 -1.442695, %v2075_v57  ;;  %v473_v36 = vadd.f32 %v14083_v17, %v11583_v61  ;;  %2432 = vmatpush.bf16.msrb.mxu1 %v8403_v35 }
 0x368   :  { %v10843_v25 = vpop.eup %10842  ;;  %v12032_v40 = vadd.f32 1.0, %v10841_v19  ;;  %10844 = vpow2.f32 %v8314_v30 }
 0x369   :  { %v12034_v20 = vadd.f32 1.0, %v10843_v25  ;;  %10846 = vpow2.f32 %v8311_v59 }
 0x36a   :  { %10848 = vrcp.f32 %v12032_v40  ;;  %v2095_v8 = vand.u32 2147483647, %v12032_v40  ;;  %v2097_v33 = vand.u32 2147483648, %v12032_v40  ;;  %vm2091_vm9 = vweird.f32 %v12032_v40 }
 0x36b   :  { %10850 = vrcp.f32 %v12034_v20  ;;  %v2067_v54 = vpop.f32.mrf.mxu3  ;;  %v2135_v34 = vand.u32 2147483648, %v12034_v20  ;;  %v2133_v43 = vand.u32 2147483647, %v12034_v20  ;;  %v2053_v16 = vpop.f32.mrf.mxu2  ;;  %vm2129_vm12 = vweird.f32 %v12034_v20 }
 0x36c   :  { %10852 = vpow2.f32 %v8313_v47  ;;  %v2077_v21 = vadd.f32 %v2067_v54, %v522_v27  ;;  %vm12060_vm8 = vcmp.eq.f32.partialorder %v2095_v8, 8.507059e+37  ;;  %v2098_v59 = vor.u32 1.1754944e-38, %v2097_v33  ;;  %v8406_v47 = vld [vmem:[#allocation8 + $0xa8] sm:$0xf]  ;;  %v10287_v54 = vld [vmem:[#allocation8 + $0x84] sm:$0xf] }
 0x36d   :  { %v2136_v62 = vor.u32 1.1754944e-38, %v2135_v34  ;;  %v2076_v60 = vadd.f32 %v2053_v16, %v473_v36  ;;  %vm12087_vm14 = vcmp.eq.f32.partialorder %v2133_v43, 8.507059e+37  ;;  %v10283_v33 = vld [vmem:[#allocation8 + $0x64] sm:$0xf]  ;;  %v8374_v34 = vld [vmem:[#allocation8 + $0x68] sm:$0xf] }
 0x36e   :  { %v10845_v7 = vpop.eup %10844  ;;  %v8315_v38 = vmul.f32 -1.442695, %v2077_v21  ;;  %v8376_v16 = vld [vmem:[#allocation8 + $0x78] sm:$0xf0] }
 0x36f   :  { %v10847_v41 = vpop.eup %10846  ;;  %v12043_v45 = vadd.f32 1.0, %v10845_v7 }
 0x370   :  { %v12045_v4 = vpop.eup %10848  ;;  %v12048_v18 = vadd.f32 1.0, %v10847_v41 }
 0x371   :  { %v12050_v32 = vpop.eup %10850  ;;  %v2087_v31 = vmul.f32 %v12045_v4, %v12032_v40  ;;  %10854 = vrcp.f32 %v12043_v45  ;;  %vm2092_vm10 = vweird.f32 %v12045_v4 }
 0x372   :  { %v10853_v57 = vpop.eup %10852  ;;  %v2125_v42 = vmul.f32 %v12050_v32, %v12034_v20  ;;  %10856 = vtanh.f32 %v2072_v23  ;;  %vm2130_vm11 = vweird.f32 %v12050_v32  ;;  %v2110_v46 = vand.u32 2147483647, %v12048_v18  ;;  %vm12083_vm13 = vmor %vm2091_vm9, %vm2092_vm10 }
 0x373   :  { %v2088_v30 = vsub.f32 1.0, %v2087_v31  ;;  %10858 = vrcp.f32 %v12048_v18  ;;  %v12066_v24 = vadd.f32 1.0, %v10853_v57  ;;  %v8407_v20 = vor.u32 %v10294_v39, %v8406_v47  ;;  %vm12093_vm15 = vmor %vm2129_vm12, %vm2130_vm11  ;;  %v8368_v31 = vld [vmem:[#allocation8 + $0x70] sm:$0xf0]  ;;  %v10286_v57 = vld [vmem:[#allocation8 + $0x74] sm:$0xf0] }
 0x374   :  { %v2126_v19 = vsub.f32 1.0, %v2125_v42  ;;  %v2112_v8 = vand.u32 2147483648, %v12048_v18  ;;  %vm12115_vm0 = vcmp.eq.f32.partialorder %v2110_v46, 8.507059e+37  ;;  %vm2106_vm1 = vweird.f32 %v12048_v18 }
 0x375   :  { %v2089_v25 = vmul.f32 %v12045_v4, %v2088_v30  ;;  %10860 = vrcp.f32 %v12066_v24  ;;  %v2150_v27 = vand.u32 2147483648, %v12066_v24  ;;  %v2148_v3 = vand.u32 2147483647, %v12066_v24  ;;  %2446 = vmatpush.bf16.msrb.mxu2 %v8407_v20  ;;  %v10284_v30 = vld [vmem:[#allocation8 + $0x6c] sm:$0xf] }
 0x376   :  { %v2127_v63 = vmul.f32 %v12050_v32, %v2126_v19  ;;  %10862 = vpow2.f32 %v8315_v38  ;;  %v8395_v47 = vor.u32 %v10288_v12, %v8392_v51  ;;  %v8371_v15 = vor.u32 %v10283_v33, %v8368_v31  ;;  %v10275_v12 = vld [vmem:[#allocation8 + $0x24] sm:$0xf]  ;;  %v8336_v51 = vld [vmem:[#allocation8 + $0x30] sm:$0xf0]  ;;  %v8344_v31 = vld [vmem:[#allocation8 + $0x38] sm:$0xf0] }
 0x377   :  { %v12076_v11 = vpop.eup %10854  ;;  %v2090_v52 = vadd.f32 %v12045_v4, %v2089_v25  ;;  %10864 = vtanh.f32 %v2076_v60  ;;  %v8375_v28 = vor.u32 %v10286_v57, %v8374_v34  ;;  %vm2144_vm5 = vweird.f32 %v12066_v24  ;;  %v10273_v34 = vld [vmem:[#allocation8 + $0xc] sm:$0xf0] }
 0x378   :  { %v10857_v6 = vpop.eup %10856  ;;  %v2128_v40 = vadd.f32 %v12050_v32, %v2127_v63  ;;  %v2165_v23 = vmul.f32 %v12076_v11, %v12043_v45  ;;  %v10281_v63 = vld [vmem:[#allocation8 + $0x4c] sm:$0xf0]  ;;  %2461 = vmatpush.bf16.msrb.mxu3 %v8395_v47  ;;  %vm2149_vm7 = vcmp.eq.f32.partialorder %v2148_v3, 8.507059e+37  ;;  %v8318_v3 = vld [vmem:[#allocation8] sm:$0xf]  ;;  %vm2169_vm9 = vweird.f32 %v12043_v45 }
 0x379   :  { %v12101_v5 = vpop.eup %10858  ;;  %v2094_v7 = vsel %vm12083_vm13, %v12045_v4, %v2090_v52  ;;  %v10285_v4 = vld [vmem:[#allocation8 + $0x6c] sm:$0xf0]  ;;  %v8379_v52 = vor.u32 %v10284_v30, %v8376_v16  ;;  %v8351_v56 = vor.u32 %v10281_v63, %v8350_v13  ;;  %v2173_v30 = vand.u32 2147483647, %v12043_v45 }
 0x37a   :  { %v2099_v26 = vsel %vm12060_vm8, %v2098_v59, %v2094_v7  ;;  %v2132_v41 = vsel %vm12093_vm15, %v12050_v32, %v2128_v40  ;;  %v2102_v21 = vmul.f32 %v12101_v5, %v12048_v18  ;;  %v8387_v32 = vor.u32 %v10287_v54, %v8384_v0  ;;  %v8358_v0 = vld [vmem:[#allocation8 + $0x48] sm:$0xf]  ;;  %v10277_v7 = vld [vmem:[#allocation8 + $0x2c] sm:$0xf0] }
 0x37b   :  { %v12119_v35 = vpop.eup %10860  ;;  %v2137_v17 = vsel %vm12087_vm14, %v2136_v62, %v2132_v41  ;;  %v2196_v36 = vmul.f32 %v10857_v6, %v2099_v26  ;;  %vm2107_vm2 = vweird.f32 %v12101_v5  ;;  %v2166_v19 = vsub.f32 1.0, %v2165_v23  ;;  %v10282_v6 = vld [vmem:[#allocation8 + $0x54] sm:$0xf0]  ;;  %v14101_v26 = vld [vmem:[#allocation15_spill] sm:$0xff] }
 0x37c   :  { %v2194_v42 = vmul.f32 %v2137_v17, %v11960_v22  ;;  %v2103_v44 = vsub.f32 1.0, %v2102_v21  ;;  %v2140_v43 = vmul.f32 %v12119_v35, %v12066_v24  ;;  %v10863_v38 = vpop.eup %10862  ;;  %2433 = vmatpush.bf16.msrb.mxu1 %v8387_v32  ;;  %v8391_v59 = vor.u32 %v10290_v10, %v8390_v50  ;;  %vm12135_vm3 = vmor %vm2106_vm1, %vm2107_vm2  ;;  %v8334_v50 = vld [vmem:[#allocation8 + $0x20] sm:$0xf]  ;;  %2462 = vmatpush.bf16.msrb.mxu3 %v8379_v52  ;;  %v10278_v32 = vld [vmem:[#allocation8 + $0x34] sm:$0xf0] }
 0x37d   :  { %v8367_v39 = vor.u32 %v10285_v4, %v8366_v58  ;;  %v2113_v22 = vor.u32 1.1754944e-38, %v2112_v8  ;;  %v12139_v46 = vadd.f32 1.0, %v10863_v38  ;;  %v10865_v20 = vpop.eup %10864  ;;  %vm2145_vm4 = vweird.f32 %v12119_v35  ;;  %v8360_v8 = vld [vmem:[#allocation8 + $0x58] sm:$0xf0]  ;;  %v8342_v58 = vld [vmem:[#allocation8 + $0x28] sm:$0xf] }
 0x37e   :  { %v12128_v62 = vadd.f32 %v2196_v36, %v2194_v42  ;;  %v2141_v25 = vsub.f32 1.0, %v2140_v43  ;;  %v2104_v14 = vmul.f32 %v12101_v5, %v2103_v44  ;;  %2447 = vmatpush.bf16.msrb.mxu2 %v8391_v59  ;;  %v2167_v40 = vmul.f32 %v12076_v11, %v2166_v19  ;;  %vm12153_vm6 = vmor %vm2144_vm5, %vm2145_vm4  ;;  %v10271_v42 = vld [vmem:[#allocation8 + $0x4] sm:$0xf]  ;;  %v8320_v44 = vld [vmem:[#allocation8 + $0x10] sm:$0xf0] }
 0x37f   :  { %2420 = vmatpush.bf16.msrb.mxu0 %v8367_v39  ;;  %10866 = vrcp.f32 %v12139_v46  ;;  %v8355_v10 = vor.u32 %v10279_v55, %v8352_v49  ;;  %v2151_v41 = vor.u32 1.1754944e-38, %v2150_v27  ;;  %v8363_v17 = vor.u32 %v10280_v48, %v8360_v8  ;;  %v10276_v27 = vld [vmem:[#allocation8 + $0x2c] sm:$0xf]  ;;  %v8326_v59 = vld [vmem:[#allocation8 + $0x8] sm:$0xf] }
 0x380   :  { %v2142_v54 = vmul.f32 %v12119_v35, %v2141_v25  ;;  %v2105_v18 = vadd.f32 %v12101_v5, %v2104_v14  ;;  %2434 = vmatpush.bf16.msrb.mxu1 %v8371_v15  ;;  %v8335_v36 = vor.u32 %v10277_v7, %v8334_v50  ;;  %10868 = vtanh.f32 %v12128_v62  ;;  %v10274_v25 = vld [vmem:[#allocation8 + $0x14] sm:$0xf0]  ;;  %v10272_v14 = vld [vmem:[#allocation8 + $0xc] sm:$0xf] }
 0x381   :  { %v8339_v24 = vor.u32 %v10275_v12, %v8336_v51  ;;  %v2168_v57 = vadd.f32 %v12076_v11, %v2167_v40  ;;  %vm2170_vm8 = vweird.f32 %v12076_v11  ;;  %v2175_v16 = vand.u32 2147483648, %v12043_v45  ;;  %2463 = vmatpush.bf16.msrb.mxu3 %v8363_v17 }
 0x382   :  { %v2109_v23 = vsel %vm12135_vm3, %v12101_v5, %v2105_v18  ;;  %v2143_v29 = vadd.f32 %v12119_v35, %v2142_v54  ;;  %2448 = vmatpush.bf16.msrb.mxu2 %v8375_v28  ;;  %v8359_v5 = vor.u32 %v10282_v6, %v8358_v0  ;;  %v8343_v38 = vor.u32 %v10278_v32, %v8342_v58  ;;  %vm12178_vm10 = vmor %vm2169_vm9, %vm2170_vm8  ;;  %v10333_v32 = vld [vmem:[#allocation8 + $0xec] sm:$0xf0] }
 0x383   :  { %v2114_v21 = vsel %vm12115_vm0, %v2113_v22, %v2109_v23  ;;  %2421 = vmatpush.bf16.msrb.mxu0 %v8351_v56  ;;  %v8347_v19 = vor.u32 %v10276_v27, %v8344_v31  ;;  %v8328_v22 = vld [vmem:[#allocation8 + $0x18] sm:$0xf0]  ;;  %v8323_v63 = vor.u32 %v10271_v42, %v8320_v44  ;;  %v2172_v45 = vsel %vm12178_vm10, %v12076_v11, %v2168_v57  ;;  %v10331_v27 = vld [vmem:[#allocation8 + $0xe4] sm:$0xf]  ;;  %v14102_v31 = vld [vmem:[#allocation17_spill] sm:$0xff] }
 0x384   :  { %v2147_v4 = vsel %vm12153_vm6, %v12119_v35, %v2143_v29  ;;  %v2197_v33 = vmul.f32 %v10865_v20, %v2114_v21  ;;  %2435 = vmatpush.bf16.msrb.mxu1 %v8355_v10  ;;  %v2176_v28 = vor.u32 1.1754944e-38, %v2175_v16  ;;  %v2190_v52 = vand.u32 2147483648, %v12139_v46  ;;  %v10334_v57 = vld [vmem:[#allocation8 + $0xf4] sm:$0xf0]  ;;  %v14104_v44 = vld [vmem:[#allocation19_spill] sm:$0xff] }
 0x385   :  { %v2152_v37 = vsel %vm2149_vm7, %v2151_v41, %v2147_v4  ;;  %v10867_v43 = vpop.eup %10866  ;;  %2464 = vmatpush.bf16.msrb.mxu3 %v8347_v19  ;;  %v8327_v55 = vor.u32 %v10274_v25, %v8326_v59  ;;  %v8331_v49 = vor.u32 %v10272_v14, %v8328_v22  ;;  %vm2174_vm11 = vcmp.eq.f32.partialorder %v2173_v30, 8.507059e+37  ;;  %v10332_v19 = vld [vmem:[#allocation8 + $0xec] sm:$0xf]  ;;  %v8574_v59 = vld [vmem:[#allocation8 + $0xf8] sm:$0xf0] }
 0x386   :  { %v2195_v35 = vmul.f32 %v2152_v37, %v12009_v1  ;;  %2449 = vmatpush.bf16.msrb.mxu2 %v8359_v5  ;;  %v2180_v39 = vmul.f32 %v10867_v43, %v12139_v46  ;;  %v8319_v1 = vor.u32 %v10273_v34, %v8318_v3  ;;  %v10869_v15 = vpop.eup %10868  ;;  %vm2185_vm12 = vweird.f32 %v10867_v43  ;;  %v8566_v3 = vld [vmem:[#allocation8 + $0xf0] sm:$0xf0]  ;;  %v8572_v34 = vld [vmem:[#allocation8 + $0xe8] sm:$0xf] }
 0x387   :  { %2422 = vmatpush.bf16.msrb.mxu0 %v8335_v36  ;;  %v2188_v54 = vand.u32 2147483647, %v12139_v46  ;;  %v2177_v18 = vsel %vm2174_vm11, %v2176_v28, %v2172_v45  ;;  %vm2184_vm13 = vweird.f32 %v12139_v46  ;;  %v2191_v6 = vor.u32 1.1754944e-38, %v2190_v52  ;;  %v14100_v46 = vld [vmem:[#allocation14_spill] sm:$0xff]  ;;  %v8564_v36 = vld [vmem:[#allocation8 + $0xe0] sm:$0xf] }
 0x388   :  { %v12173_v47 = vadd.f32 %v2197_v33, %v2195_v35  ;;  %2436 = vmatpush.bf16.msrb.mxu1 %v8339_v24  ;;  %v2181_v60 = vsub.f32 1.0, %v2180_v39  ;;  %v2202_v0 = vmul.f32 %v10869_v15, %v2177_v18  ;;  %vm2186_vm14 = vmor %vm2184_vm13, %vm2185_vm12  ;;  %v378_v51 = vadd.f32 %v14100_v46, %v11556_v9  ;;  %v14103_v35 = vld [vmem:[#allocation18_spill] sm:$0xff]  ;;  %v10329_v45 = vld [vmem:[#allocation8 + $0xcc] sm:$0xf0] }
 0x389   :  { %2465 = vmatpush.bf16.msrb.mxu3 %v8331_v49  ;;  %vm2189_vm15 = vcmp.eq.f32.partialorder %v2188_v54, 8.507059e+37  ;;  %v427_v41 = vadd.f32 %v14101_v26, %v11561_v2  ;;  %v525_v37 = vadd.f32 %v14102_v31, %v11570_v53  ;;  %v8565_v24 = vor.u32 %v10333_v32, %v8564_v36  ;;  %v8550_v52 = vld [vmem:[#allocation8 + $0xd0] sm:$0xf0]  ;;  %v14105_v46 = vld [vmem:[#allocation16_spill] sm:$0xff]  ;;  %v8542_v36 = vld [vmem:[#allocation8 + $0xb8] sm:$0xf0] }
 0x38a   :  { %10870 = vtanh.f32 %v12173_v47  ;;  %2450 = vmatpush.bf16.msrb.mxu2 %v8343_v38  ;;  %v2182_v20 = vmul.f32 %v10867_v43, %v2181_v60  ;;  %v2204_v7 = vpack.c.bf16 %v2202_v0, %v2202_v0  ;;  %v380_v42 = vadd.f32 %v14103_v35, %v11556_v9  ;;  %v10327_v60 = vld [vmem:[#allocation8 + $0xc4] sm:$0xf] }
 0x38b   :  { %2423 = vmatpush.bf16.msrb.mxu0 %v8319_v1  ;;  %v8569_v16 = vor.u32 %v10331_v27, %v8566_v3  ;;  %v8573_v38 = vor.u32 %v10334_v57, %v8572_v34  ;;  %v8577_v14 = vor.u32 %v10332_v19, %v8574_v59  ;;  %v8553_v18 = vor.u32 %v10327_v60, %v8550_v52  ;;  %v8516_v3 = vld [vmem:[#allocation8 + $0x80] sm:$0xf]  ;;  %v10321_v34 = vld [vmem:[#allocation8 + $0x8c] sm:$0xf0]  ;;  %v10319_v57 = vld [vmem:[#allocation8 + $0x84] sm:$0xf] }
 0x38c   :  { %2437 = vmatpush.bf16.msrb.mxu1 %v8323_v63  ;;  %v2183_v11 = vadd.f32 %v10867_v43, %v2182_v20  ;;  %v2252_v56 = vunpack.c.l.b16 %v2204_v7  ;;  %v8548_v63 = vld [vmem:[#allocation8 + $0xc0] sm:$0xf] }
 0x38d   :  { %2860 = vmatpush.bf16.msra.mxu3 %v8577_v14  ;;  %v8549_v28 = vor.u32 %v10329_v45, %v8548_v63 }
 0x38e   :  { %2451 = vmatpush.bf16.msrb.mxu2 %v8327_v55  ;;  %v2187_v40 = vsel %vm2186_vm14, %v10867_v43, %v2183_v11  ;;  %v429_v43 = vadd.f32 %v14104_v44, %v11561_v2  ;;  %v8556_v55 = vld [vmem:[#allocation8 + $0xc8] sm:$0xf]  ;;  %v10330_v11 = vld [vmem:[#allocation8 + $0xd4] sm:$0xf0] }
 0x38f   :  { %v2192_v8 = vsel %vm2189_vm15, %v2191_v6, %v2187_v40  ;;  %2818 = vmatpush.bf16.msra.mxu0 %v8565_v24  ;;  %v10328_v40 = vld [vmem:[#allocation8 + $0xcc] sm:$0xf] }
 0x390   :  { %v10871_v48 = vpop.eup %10870  ;;  %2832 = vmatpush.bf16.msra.mxu1 %v8569_v16 }
 0x391   :  { %v2203_v50 = vmul.f32 %v10871_v48, %v2192_v8  ;;  %v8557_v48 = vor.u32 %v10330_v11, %v8556_v55  ;;  %v8558_v8 = vld [vmem:[#allocation8 + $0xd8] sm:$0xf0] }
 0x392   :  { %2846 = vmatpush.bf16.msra.mxu2 %v8573_v38 }
 0x393   :  { %v2205_v23 = vpack.c.bf16 %v2203_v50, %v2203_v50  ;;  %v10713_v29 = vpack.c.bf16 %v2203_v50, %v2202_v0  ;;  %2819 = vmatpush.bf16.msra.mxu0 %v8549_v28 }
 0x394   :  { %2833 = vmatpush.bf16.msra.mxu1 %v8553_v18  ;;  %v10322_v18 = vld [vmem:[#allocation8 + $0x94] sm:$0xf0] }
 0x395   :  { %10714 = vst [vmem:[#allocation2 + $0x10] sm:$0xff] %v10713_v29   ;;  %v2253_v10 = vunpack.c.l.b16 %v2205_v23  ;;  %v8561_v23 = vor.u32 %v10328_v40, %v8558_v8  ;;  %v8532_v29 = vld [vmem:[#allocation8 + $0xa0] sm:$0xf]  ;;  %v8526_v40 = vld [vmem:[#allocation8 + $0x98] sm:$0xf0] }
 0x396   :  { %2847 = vmatpush.bf16.msra.mxu2 %v8557_v48  ;;  %v10320_v48 = vld [vmem:[#allocation8 + $0x8c] sm:$0xf] }
 0x397   :  { %v2254_v12 = vpack.c.b16 %v2253_v10, %v2252_v56  ;;  %v10325_v56 = vld [vmem:[#allocation8 + $0xac] sm:$0xf0]  ;;  %2861 = vmatpush.bf16.msra.mxu3 %v8561_v23  ;;  %v10323_v10 = vld [vmem:[#allocation8 + $0xa4] sm:$0xf] }
 0x399   :  { %2424 = vmatmul.bf16.vlgmr.msrb.gmra.mxu0 %v2254_v12  ;;  %2438 = vmatmul.bf16.vlgmr.msrb.gmra.mxu1 %v2254_v12 }
 0x39a   :  { %2452 = vmatmul.bf16.vlgmr.msrb.gmra.mxu2 %v2254_v12  ;;  %2466 = vmatmul.bf16.vlgmr.msrb.gmra.mxu3 %v2254_v12  ;;  %v8534_v12 = vld [vmem:[#allocation8 + $0xb0] sm:$0xf0] }
 0x39b   :  { %v8537_v31 = vor.u32 %v10323_v10, %v8534_v12 }
 0x39d   :  { %2834 = vmatpush.bf16.msra.mxu1 %v8537_v31  ;;  %v8529_v31 = vor.u32 %v10320_v48, %v8526_v40  ;;  %v8468_v40 = vld [vmem:[#allocation8 + $0x20] sm:$0xf] }
 0x416   :  { %v2425_v21 = vpop.f32.mrf.mxu0  ;;  %v2439_v5 = vpop.f32.mrf.mxu1 }
 0x417   :  { %v2472_v58 = vadd.f32 %v2425_v21, %v378_v51  ;;  %v2473_v4 = vadd.f32 %v2439_v5, %v427_v41  ;;  %v476_v51 = vadd.f32 %v14105_v46, %v11583_v61  ;;  %v8540_v41 = vld [vmem:[#allocation8 + $0xa8] sm:$0xf]  ;;  %v10326_v21 = vld [vmem:[#allocation8 + $0xb4] sm:$0xf0]  ;;  %v14106_v5 = vld [vmem:[#allocation21_spill] sm:$0xff] }
 0x418   :  { %v10307_v46 = vld [vmem:[#allocation8 + $0x24] sm:$0xf] }
 0x419   :  { %v8444_v33 = vmul.f32 -1.442695, %v2472_v58  ;;  %v8446_v17 = vmul.f32 -1.442695, %v2473_v4  ;;  %v527_v58 = vadd.f32 %v14106_v5, %v11570_v53  ;;  %v10308_v5 = vld [vmem:[#allocation8 + $0x2c] sm:$0xf] }
 0x41b   :  { %10872 = vpow2.f32 %v8444_v33  ;;  %v8533_v33 = vor.u32 %v10325_v56, %v8532_v29  ;;  %v8500_v29 = vld [vmem:[#allocation8 + $0x60] sm:$0xf]  ;;  %v10317_v56 = vld [vmem:[#allocation8 + $0x6c] sm:$0xf0] }
 0x41c   :  { %10874 = vpow2.f32 %v8446_v17  ;;  %v10324_v17 = vld [vmem:[#allocation8 + $0xac] sm:$0xf] }
 0x41d   :  { %v2467_v30 = vpop.f32.mrf.mxu3  ;;  %v2453_v7 = vpop.f32.mrf.mxu2  ;;  %v8545_v24 = vor.u32 %v10324_v17, %v8542_v36  ;;  %2820 = vmatpush.bf16.msra.mxu0 %v8533_v33  ;;  %v8508_v17 = vld [vmem:[#allocation8 + $0x68] sm:$0xf] }
 0x41e   :  { %v2475_v39 = vadd.f32 %v2467_v30, %v525_v37  ;;  %v2427_v1 = vpop.f32.mrf.mxu0  ;;  %v2441_v25 = vpop.f32.mrf.mxu1  ;;  %v2474_v27 = vadd.f32 %v2453_v7, %v476_v51  ;;  %v8541_v37 = vor.u32 %v10326_v21, %v8540_v41  ;;  %v8518_v30 = vld [vmem:[#allocation8 + $0x90] sm:$0xf0] }
 0x41f   :  { %v2476_v22 = vadd.f32 %v2427_v1, %v380_v42  ;;  %v2477_v13 = vadd.f32 %v2441_v25, %v429_v43  ;;  %v8517_v43 = vor.u32 %v10321_v34, %v8516_v3  ;;  %v8521_v59 = vor.u32 %v10319_v57, %v8518_v30  ;;  %v14107_v1 = vld [vmem:[#allocation20_spill] sm:$0xff]  ;;  %2862 = vmatpush.bf16.msra.mxu3 %v8545_v24  ;;  %v8502_v41 = vld [vmem:[#allocation8 + $0x70] sm:$0xf0]  ;;  %v10318_v24 = vld [vmem:[#allocation8 + $0x74] sm:$0xf0] }
 0x420   :  { %v8448_v15 = vmul.f32 -1.442695, %v2475_v39  ;;  %2848 = vmatpush.bf16.msra.mxu2 %v8541_v37  ;;  %v478_v25 = vadd.f32 %v14107_v1, %v11583_v61  ;;  %v8501_v37 = vor.u32 %v10317_v56, %v8500_v29  ;;  %v10316_v3 = vld [vmem:[#allocation8 + $0x6c] sm:$0xf]  ;;  %v8510_v34 = vld [vmem:[#allocation8 + $0x78] sm:$0xf0] }
 0x421   :  { %v10873_v49 = vpop.eup %10872  ;;  %v8445_v20 = vmul.f32 -1.442695, %v2476_v22  ;;  %v8447_v54 = vmul.f32 -1.442695, %v2477_v13  ;;  %2821 = vmatpush.bf16.msra.mxu0 %v8517_v43  ;;  %2835 = vmatpush.bf16.msra.mxu1 %v8521_v59  ;;  %v8484_v30 = vld [vmem:[#allocation8 + $0x40] sm:$0xf] }
 0x422   :  { %v10875_v0 = vpop.eup %10874  ;;  %v12199_v6 = vadd.f32 1.0, %v10873_v49  ;;  %10876 = vpow2.f32 %v8448_v15  ;;  %v8470_v51 = vld [vmem:[#allocation8 + $0x30] sm:$0xf0] }
 0x423   :  { %v12201_v50 = vadd.f32 1.0, %v10875_v0  ;;  %10878 = vpow2.f32 %v8445_v20  ;;  %2863 = vmatpush.bf16.msra.mxu3 %v8529_v31 }
 0x424   :  { %10880 = vrcp.f32 %v12199_v6  ;;  %v2497_v4 = vand.u32 2147483647, %v12199_v6  ;;  %v2499_v38 = vand.u32 2147483648, %v12199_v6  ;;  %vm2493_vm1 = vweird.f32 %v12199_v6 }
 0x425   :  { %10882 = vrcp.f32 %v12201_v50  ;;  %v2469_v26 = vpop.f32.mrf.mxu3  ;;  %v2537_v22 = vand.u32 2147483648, %v12201_v50  ;;  %v2535_v60 = vand.u32 2147483647, %v12201_v50  ;;  %v2455_v52 = vpop.f32.mrf.mxu2  ;;  %vm2531_vm4 = vweird.f32 %v12201_v50  ;;  %2822 = vmatpush.bf16.msra.mxu0 %v8501_v37 }
 0x426   :  { %10884 = vpow2.f32 %v8447_v54  ;;  %v2479_v44 = vadd.f32 %v2469_v26, %v527_v58  ;;  %vm12227_vm0 = vcmp.eq.f32.partialorder %v2497_v4, 8.507059e+37  ;;  %v2500_v20 = vor.u32 1.1754944e-38, %v2499_v38  ;;  %v8524_v54 = vld [vmem:[#allocation8 + $0x88] sm:$0xf]  ;;  %v10315_v26 = vld [vmem:[#allocation8 + $0x64] sm:$0xf] }
 0x427   :  { %v2538_v11 = vor.u32 1.1754944e-38, %v2537_v22  ;;  %v2478_v7 = vadd.f32 %v2455_v52, %v478_v25  ;;  %vm12254_vm6 = vcmp.eq.f32.partialorder %v2535_v60, 8.507059e+37  ;;  %v10311_v38 = vld [vmem:[#allocation8 + $0x44] sm:$0xf]  ;;  %v8492_v22 = vld [vmem:[#allocation8 + $0x48] sm:$0xf] }
 0x428   :  { %v10877_v32 = vpop.eup %10876  ;;  %v8449_v55 = vmul.f32 -1.442695, %v2479_v44  ;;  %v8494_v52 = vld [vmem:[#allocation8 + $0x58] sm:$0xf0] }
 0x429   :  { %v10879_v35 = vpop.eup %10878  ;;  %v12210_v42 = vadd.f32 1.0, %v10877_v32 }
 0x42a   :  { %v12212_v16 = vpop.eup %10880  ;;  %v12215_v19 = vadd.f32 1.0, %v10879_v35 }
 0x42b   :  { %v12217_v39 = vpop.eup %10882  ;;  %v2489_v14 = vmul.f32 %v12212_v16, %v12199_v6  ;;  %10886 = vrcp.f32 %v12210_v42  ;;  %vm2494_vm2 = vweird.f32 %v12212_v16 }
 0x42c   :  { %v10885_v13 = vpop.eup %10884  ;;  %v2527_v63 = vmul.f32 %v12217_v39, %v12201_v50  ;;  %10888 = vtanh.f32 %v2474_v27  ;;  %vm2532_vm3 = vweird.f32 %v12217_v39  ;;  %v2512_v23 = vand.u32 2147483647, %v12215_v19  ;;  %vm12250_vm5 = vmor %vm2493_vm1, %vm2494_vm2 }
 0x42d   :  { %v2490_v15 = vsub.f32 1.0, %v2489_v14  ;;  %10890 = vrcp.f32 %v12215_v19  ;;  %v12233_v28 = vadd.f32 1.0, %v10885_v13  ;;  %v8525_v50 = vor.u32 %v10322_v18, %v8524_v54  ;;  %vm12260_vm7 = vmor %vm2531_vm4, %vm2532_vm3  ;;  %v8486_v14 = vld [vmem:[#allocation8 + $0x50] sm:$0xf0]  ;;  %v10314_v13 = vld [vmem:[#allocation8 + $0x54] sm:$0xf0] }
 0x42e   :  { %v2528_v49 = vsub.f32 1.0, %v2527_v63  ;;  %v2514_v4 = vand.u32 2147483648, %v12215_v19  ;;  %vm12282_vm8 = vcmp.eq.f32.partialorder %v2512_v23, 8.507059e+37  ;;  %vm2508_vm9 = vweird.f32 %v12215_v19 }
 0x42f   :  { %v2491_v0 = vmul.f32 %v12212_v16, %v2490_v15  ;;  %10892 = vrcp.f32 %v12233_v28  ;;  %v2552_v58 = vand.u32 2147483648, %v12233_v28  ;;  %v2550_v33 = vand.u32 2147483647, %v12233_v28  ;;  %2849 = vmatpush.bf16.msra.mxu2 %v8525_v50  ;;  %v10312_v15 = vld [vmem:[#allocation8 + $0x4c] sm:$0xf] }
 0x430   :  { %v2529_v8 = vmul.f32 %v12217_v39, %v2528_v49  ;;  %10894 = vpow2.f32 %v8449_v55  ;;  %v8513_v54 = vor.u32 %v10316_v3, %v8510_v34  ;;  %v8489_v29 = vor.u32 %v10311_v38, %v8486_v14  ;;  %v10303_v3 = vld [vmem:[#allocation8 + $0x4] sm:$0xf]  ;;  %v8454_v34 = vld [vmem:[#allocation8 + $0x10] sm:$0xf0]  ;;  %v8462_v14 = vld [vmem:[#allocation8 + $0x18] sm:$0xf0] }
 0x431   :  { %v12243_v10 = vpop.eup %10886  ;;  %v2492_v12 = vadd.f32 %v12212_v16, %v2491_v0  ;;  %10896 = vtanh.f32 %v2478_v7  ;;  %v8493_v56 = vor.u32 %v10314_v13, %v8492_v22  ;;  %vm2546_vm13 = vweird.f32 %v12233_v28 }
 0x432   :  { %v10889_v21 = vpop.eup %10888  ;;  %v2530_v6 = vadd.f32 %v12217_v39, %v2529_v8  ;;  %v2567_v27 = vmul.f32 %v12243_v10, %v12210_v42  ;;  %v10309_v8 = vld [vmem:[#allocation8 + $0x2c] sm:$0xf0]  ;;  %2864 = vmatpush.bf16.msra.mxu3 %v8513_v54  ;;  %vm2551_vm15 = vcmp.eq.f32.partialorder %v2550_v33, 8.507059e+37  ;;  %vm2571_vm1 = vweird.f32 %v12210_v42 }
 0x433   :  { %v12268_v36 = vpop.eup %10890  ;;  %v2496_v32 = vsel %vm12250_vm5, %v12212_v16, %v2492_v12  ;;  %v10313_v16 = vld [vmem:[#allocation8 + $0x4c] sm:$0xf0]  ;;  %v8497_v12 = vor.u32 %v10312_v15, %v8494_v52  ;;  %v8469_v37 = vor.u32 %v10309_v8, %v8468_v40 }
 0x434   :  { %v2501_v57 = vsel %vm12227_vm0, %v2500_v20, %v2496_v32  ;;  %v2534_v35 = vsel %vm12260_vm7, %v12217_v39, %v2530_v6  ;;  %v2504_v44 = vmul.f32 %v12268_v36, %v12215_v19  ;;  %v8505_v39 = vor.u32 %v10315_v26, %v8502_v41  ;;  %v8476_v41 = vld [vmem:[#allocation8 + $0x28] sm:$0xf]  ;;  %v10305_v32 = vld [vmem:[#allocation8 + $0xc] sm:$0xf0] }
 0x435   :  { %v12286_v59 = vpop.eup %10892  ;;  %v2539_v1 = vsel %vm12254_vm6, %v2538_v11, %v2534_v35  ;;  %v2598_v25 = vmul.f32 %v10889_v21, %v2501_v57  ;;  %vm2509_vm10 = vweird.f32 %v12268_v36  ;;  %v2568_v49 = vsub.f32 1.0, %v2567_v27  ;;  %v10310_v21 = vld [vmem:[#allocation8 + $0x34] sm:$0xf0] }
 0x436   :  { %v2596_v63 = vmul.f32 %v2539_v1, %v12128_v62  ;;  %v2505_v45 = vsub.f32 1.0, %v2504_v44  ;;  %v2542_v60 = vmul.f32 %v12286_v59, %v12233_v28  ;;  %v10895_v55 = vpop.eup %10894  ;;  %2836 = vmatpush.bf16.msra.mxu1 %v8505_v39  ;;  %v8509_v20 = vor.u32 %v10318_v24, %v8508_v17  ;;  %vm12302_vm11 = vmor %vm2508_vm9, %vm2509_vm10  ;;  %v8452_v17 = vld [vmem:[#allocation8] sm:$0xf]  ;;  %2865 = vmatpush.bf16.msra.mxu3 %v8497_v12  ;;  %v10306_v39 = vld [vmem:[#allocation8 + $0x14] sm:$0xf0] }
 0x437   :  { %v8485_v18 = vor.u32 %v10313_v16, %v8484_v30  ;;  %v2515_v62 = vor.u32 1.1754944e-38, %v2514_v4  ;;  %v12306_v23 = vadd.f32 1.0, %v10895_v55  ;;  %v10897_v50 = vpop.eup %10896  ;;  %vm2547_vm12 = vweird.f32 %v12286_v59  ;;  %v8478_v4 = vld [vmem:[#allocation8 + $0x38] sm:$0xf0]  ;;  %v8460_v30 = vld [vmem:[#allocation8 + $0x8] sm:$0xf] }
 0x438   :  { %v12295_v11 = vadd.f32 %v2598_v25, %v2596_v63  ;;  %v2543_v0 = vsub.f32 1.0, %v2542_v60  ;;  %v2506_v48 = vmul.f32 %v12268_v36, %v2505_v45  ;;  %2850 = vmatpush.bf16.msra.mxu2 %v8509_v20  ;;  %v2569_v6 = vmul.f32 %v12243_v10, %v2568_v49  ;;  %vm12320_vm14 = vmor %vm2546_vm13, %vm2547_vm12 }
 0x439   :  { %2823 = vmatpush.bf16.msra.mxu0 %v8485_v18  ;;  %10898 = vrcp.f32 %v12306_v23  ;;  %v8473_v24 = vor.u32 %v10307_v46, %v8470_v51  ;;  %v2553_v35 = vor.u32 1.1754944e-38, %v2552_v58  ;;  %v8481_v1 = vor.u32 %v10308_v5, %v8478_v4  ;;  %v10304_v58 = vld [vmem:[#allocation8 + $0xc] sm:$0xf] }
 0x43a   :  { %v2544_v26 = vmul.f32 %v12286_v59, %v2543_v0  ;;  %v2507_v19 = vadd.f32 %v12268_v36, %v2506_v48  ;;  %2837 = vmatpush.bf16.msra.mxu1 %v8489_v29  ;;  %v8453_v25 = vor.u32 %v10305_v32, %v8452_v17  ;;  %10900 = vtanh.f32 %v12295_v11  ;;  %v8698_v32 = vld [vmem:[#allocation8 + $0xe0] sm:$0xf] }
 0x43b   :  { %v8457_v28 = vor.u32 %v10303_v3, %v8454_v34  ;;  %v2570_v33 = vadd.f32 %v12243_v10, %v2569_v6  ;;  %vm2572_vm0 = vweird.f32 %v12243_v10  ;;  %2866 = vmatpush.bf16.msra.mxu3 %v8481_v1  ;;  %v8461_v63 = vor.u32 %v10306_v39, %v8460_v30  ;;  %v8706_v3 = vld [vmem:[#allocation8 + $0xe8] sm:$0xf]  ;;  %v10366_v34 = vld [vmem:[#allocation8 + $0xf4] sm:$0xf0]  ;;  %v10364_v30 = vld [vmem:[#allocation8 + $0xec] sm:$0xf] }
 0x43c   :  { %v2511_v27 = vsel %vm12302_vm11, %v12268_v36, %v2507_v19  ;;  %v2545_v31 = vadd.f32 %v12286_v59, %v2544_v26  ;;  %2851 = vmatpush.bf16.msra.mxu2 %v8493_v56  ;;  %v8477_v36 = vor.u32 %v10310_v21, %v8476_v41  ;;  %v8465_v45 = vor.u32 %v10304_v58, %v8462_v14  ;;  %vm2573_vm2 = vmor %vm2571_vm1, %vm2572_vm0  ;;  %v14123_v41 = vld [vmem:[#allocation23_spill] sm:$0xff]  ;;  %v14124_v58 = vld [vmem:[#allocation25_spill] sm:$0xff] }
 0x43d   :  { %v2516_v44 = vsel %vm12282_vm8, %v2515_v62, %v2511_v27  ;;  %2824 = vmatpush.bf16.msra.mxu0 %v8469_v37  ;;  %v2575_v60 = vand.u32 2147483647, %v12210_v42  ;;  %v2592_v54 = vand.u32 2147483648, %v12306_v23  ;;  %v2590_v18 = vand.u32 2147483647, %v12306_v23 }
 0x43e   :  { %v2549_v16 = vsel %vm12320_vm14, %v12286_v59, %v2545_v31  ;;  %v2599_v38 = vmul.f32 %v10897_v50, %v2516_v44  ;;  %2838 = vmatpush.bf16.msra.mxu1 %v8473_v24  ;;  %v2577_v59 = vand.u32 2147483648, %v12210_v42  ;;  %vm2586_vm5 = vweird.f32 %v12306_v23  ;;  %v10365_v27 = vld [vmem:[#allocation8 + $0xec] sm:$0xf0]  ;;  %v10363_v31 = vld [vmem:[#allocation8 + $0xe4] sm:$0xf] }
 0x43f   :  { %v2554_v43 = vsel %vm2551_vm15, %v2553_v35, %v2549_v16  ;;  %v10899_v13 = vpop.eup %10898  ;;  %2867 = vmatpush.bf16.msra.mxu3 %v8465_v45  ;;  %vm2576_vm3 = vcmp.eq.f32.partialorder %v2575_v60, 8.507059e+37  ;;  %vm2591_vm7 = vcmp.eq.f32.partialorder %v2590_v18, 8.507059e+37  ;;  %v432_v21 = vadd.f32 %v14123_v41, %v11561_v2  ;;  %v8700_v24 = vld [vmem:[#allocation8 + $0xf0] sm:$0xf0]  ;;  %v8708_v16 = vld [vmem:[#allocation8 + $0xf8] sm:$0xf0] }
 0x440   :  { %v2597_v22 = vmul.f32 %v2554_v43, %v12173_v47  ;;  %2852 = vmatpush.bf16.msra.mxu2 %v8477_v36  ;;  %v2582_v52 = vmul.f32 %v10899_v13, %v12306_v23  ;;  %v2574_v47 = vsel %vm2573_vm2, %v12243_v10, %v2570_v33  ;;  %v10901_v49 = vpop.eup %10900  ;;  %v2578_v20 = vor.u32 1.1754944e-38, %v2577_v59  ;;  %v14122_v23 = vld [vmem:[#allocation22_spill] sm:$0xff]  ;;  %v8682_v1 = vld [vmem:[#allocation8 + $0xc0] sm:$0xf]  ;;  %v10359_v39 = vld [vmem:[#allocation8 + $0xc4] sm:$0xf] }
 0x441   :  { %2825 = vmatpush.bf16.msra.mxu0 %v8453_v25  ;;  %vm2587_vm4 = vweird.f32 %v10899_v13  ;;  %v2593_v10 = vor.u32 1.1754944e-38, %v2592_v54  ;;  %v383_v19 = vadd.f32 %v14122_v23, %v11556_v9  ;;  %v8699_v37 = vor.u32 %v10365_v27, %v8698_v32  ;;  %v10361_v25 = vld [vmem:[#allocation8 + $0xcc] sm:$0xf0]  ;;  %v8690_v33 = vld [vmem:[#allocation8 + $0xc8] sm:$0xf] }
 0x442   :  { %v12340_v15 = vadd.f32 %v2599_v38, %v2597_v22  ;;  %2839 = vmatpush.bf16.msra.mxu1 %v8457_v28  ;;  %v2583_v55 = vsub.f32 1.0, %v2582_v52  ;;  %v2579_v0 = vsel %vm2576_vm3, %v2578_v20, %v2574_v47  ;;  %vm2588_vm6 = vmor %vm2586_vm5, %vm2587_vm4  ;;  %v8703_v44 = vor.u32 %v10363_v31, %v8700_v24  ;;  %v8684_v28 = vld [vmem:[#allocation8 + $0xd0] sm:$0xf0]  ;;  %v10362_v22 = vld [vmem:[#allocation8 + $0xd4] sm:$0xf0] }
 0x443   :  { %v2604_v62 = vmul.f32 %v10901_v49, %v2579_v0  ;;  %v8707_v36 = vor.u32 %v10366_v34, %v8706_v3  ;;  %v8711_v38 = vor.u32 %v10364_v30, %v8708_v16  ;;  %v530_v14 = vadd.f32 %v14124_v58, %v11570_v53  ;;  %v8692_v49 = vld [vmem:[#allocation8 + $0xd8] sm:$0xf0]  ;;  %v10358_v23 = vld [vmem:[#allocation8 + $0xb4] sm:$0xf0]  ;;  %v8650_v32 = vld [vmem:[#allocation8 + $0x80] sm:$0xf] }
 0x444   :  { %10902 = vtanh.f32 %v12340_v15  ;;  %2853 = vmatpush.bf16.msra.mxu2 %v8461_v63  ;;  %v2584_v42 = vmul.f32 %v10899_v13, %v2583_v55  ;;  %v8683_v43 = vor.u32 %v10361_v25, %v8682_v1  ;;  %v14126_v63 = vld [vmem:[#allocation27_spill] sm:$0xff]  ;;  %v8687_v52 = vor.u32 %v10359_v39, %v8684_v28  ;;  %v10360_v55 = vld [vmem:[#allocation8 + $0xcc] sm:$0xf]  ;;  %v10353_v27 = vld [vmem:[#allocation8 + $0x8c] sm:$0xf0] }
 0x445   :  { %v2606_v56 = vpack.c.bf16 %v2604_v62, %v2604_v62  ;;  %3220 = vmatpush.bf16.msrb.mxu0 %v8699_v37  ;;  %v434_v45 = vadd.f32 %v14126_v63, %v11561_v2  ;;  %3262 = vmatpush.bf16.msrb.mxu3 %v8711_v38  ;;  %v8691_v47 = vor.u32 %v10362_v22, %v8690_v33  ;;  %v10351_v31 = vld [vmem:[#allocation8 + $0x84] sm:$0xf]  ;;  %v8652_v37 = vld [vmem:[#allocation8 + $0x90] sm:$0xf0]  ;;  %v14127_v24 = vld [vmem:[#allocation24_spill] sm:$0xff] }
 0x446   :  { %v2585_v48 = vadd.f32 %v10899_v13, %v2584_v42  ;;  %3234 = vmatpush.bf16.msrb.mxu1 %v8703_v44  ;;  %v8695_v18 = vor.u32 %v10360_v55, %v8692_v49  ;;  %v481_v3 = vadd.f32 %v14127_v24, %v11583_v61  ;;  %v14128_v44 = vld [vmem:[#allocation29_spill] sm:$0xff]  ;;  %v8651_v16 = vor.u32 %v10353_v27, %v8650_v32  ;;  %v10352_v38 = vld [vmem:[#allocation8 + $0x8c] sm:$0xf]  ;;  %v8660_v1 = vld [vmem:[#allocation8 + $0x98] sm:$0xf0] }
 0x447   :  { %v2654_v51 = vunpack.c.l.b16 %v2606_v56  ;;  %v8674_v56 = vld [vmem:[#allocation8 + $0xa8] sm:$0xf]  ;;  %v8655_v58 = vor.u32 %v10351_v31, %v8652_v37  ;;  %v8634_v28 = vld [vmem:[#allocation8 + $0x60] sm:$0xf]  ;;  %v10349_v33 = vld [vmem:[#allocation8 + $0x6c] sm:$0xf0] }
 0x448   :  { %v2589_v8 = vsel %vm2588_vm6, %v10899_v13, %v2585_v48  ;;  %3248 = vmatpush.bf16.msrb.mxu2 %v8707_v36  ;;  %v14125_v13 = vld [vmem:[#allocation26_spill] sm:$0xff]  ;;  %v532_v36 = vadd.f32 %v14128_v44, %v11570_v53  ;;  %v10347_v22 = vld [vmem:[#allocation8 + $0x64] sm:$0xf]  ;;  %v10345_v32 = vld [vmem:[#allocation8 + $0x4c] sm:$0xf0] }
 0x449   :  { %v2594_v7 = vsel %vm2591_vm7, %v2593_v10, %v2589_v8  ;;  %v385_v59 = vadd.f32 %v14125_v13, %v11556_v9  ;;  %3221 = vmatpush.bf16.msrb.mxu0 %v8683_v43  ;;  %v10357_v10 = vld [vmem:[#allocation8 + $0xac] sm:$0xf0]  ;;  %3263 = vmatpush.bf16.msrb.mxu3 %v8695_v18  ;;  %v8663_v43 = vor.u32 %v10352_v38, %v8660_v1 }
 0x44a   :  { %v10903_v40 = vpop.eup %10902  ;;  %3235 = vmatpush.bf16.msrb.mxu1 %v8687_v52 }
 0x44b   :  { %v2605_v29 = vmul.f32 %v10903_v40, %v2594_v7  ;;  %v10355_v40 = vld [vmem:[#allocation8 + $0xa4] sm:$0xf] }
 0x44c   :  { %3249 = vmatpush.bf16.msrb.mxu2 %v8691_v47 }
 0x44d   :  { %v2607_v12 = vpack.c.bf16 %v2605_v29, %v2605_v29  ;;  %v10718_v46 = vpack.c.bf16 %v2605_v29, %v2604_v62  ;;  %v8666_v62 = vld [vmem:[#allocation8 + $0xa0] sm:$0xf]  ;;  %v8668_v29 = vld [vmem:[#allocation8 + $0xb0] sm:$0xf0] }
 0x44e   :  { %v8667_v7 = vor.u32 %v10357_v10, %v8666_v62 }
 0x44f   :  { %10719 = vst [vmem:[#allocation2 + $0x8] sm:$0xff] %v10718_v46   ;;  %v2655_v50 = vunpack.c.l.b16 %v2607_v12 }
 0x450   :  { %3222 = vmatpush.bf16.msrb.mxu0 %v8667_v7 }
 0x451   :  { %v2656_v26 = vpack.c.b16 %v2655_v50, %v2654_v51 }
 0x453   :  { %2826 = vmatmul.bf16.vlgmr.msra.gmra.mxu0 %v2656_v26  ;;  %2840 = vmatmul.bf16.vlgmr.msra.gmra.mxu1 %v2656_v26 }
 0x454   :  { %2854 = vmatmul.bf16.vlgmr.msra.gmra.mxu2 %v2656_v26  ;;  %2868 = vmatmul.bf16.vlgmr.msra.gmra.mxu3 %v2656_v26  ;;  %v8671_v26 = vor.u32 %v10355_v40, %v8668_v29  ;;  %v8612_v40 = vld [vmem:[#allocation8 + $0x38] sm:$0xf0] }
 0x455   :  { %3223 = vmatpush.bf16.msrb.mxu0 %v8651_v16 }
 0x456   :  { %3236 = vmatpush.bf16.msrb.mxu1 %v8671_v26  ;;  %v10350_v26 = vld [vmem:[#allocation8 + $0x74] sm:$0xf0] }
 0x45a   :  { %3237 = vmatpush.bf16.msrb.mxu1 %v8655_v58  ;;  %v10346_v58 = vld [vmem:[#allocation8 + $0x54] sm:$0xf0] }
 0x4d0   :  { %v2827_v5 = vpop.f32.mrf.mxu0  ;;  %v2841_v6 = vpop.f32.mrf.mxu1 }
 0x4d1   :  { %v2874_v4 = vadd.f32 %v2827_v5, %v383_v19  ;;  %v2875_v17 = vadd.f32 %v2841_v6, %v432_v21  ;;  %v8675_v21 = vor.u32 %v10358_v23, %v8674_v56  ;;  %v10356_v5 = vld [vmem:[#allocation8 + $0xac] sm:$0xf]  ;;  %v8676_v6 = vld [vmem:[#allocation8 + $0xb8] sm:$0xf0] }
 0x4d3   :  { %v8578_v57 = vmul.f32 -1.442695, %v2874_v4  ;;  %v8580_v35 = vmul.f32 -1.442695, %v2875_v17  ;;  %v8679_v17 = vor.u32 %v10356_v5, %v8676_v6  ;;  %3250 = vmatpush.bf16.msrb.mxu2 %v8675_v21  ;;  %v10348_v21 = vld [vmem:[#allocation8 + $0x6c] sm:$0xf] }
 0x4d4   :  { %v8644_v6 = vld [vmem:[#allocation8 + $0x78] sm:$0xf0] }
 0x4d5   :  { %10904 = vpow2.f32 %v8578_v57  ;;  %3264 = vmatpush.bf16.msrb.mxu3 %v8679_v17  ;;  %v8658_v57 = vld [vmem:[#allocation8 + $0x88] sm:$0xf]  ;;  %v8618_v17 = vld [vmem:[#allocation8 + $0x40] sm:$0xf] }
 0x4d6   :  { %10906 = vpow2.f32 %v8580_v35  ;;  %v10354_v35 = vld [vmem:[#allocation8 + $0x94] sm:$0xf0] }
 0x4d7   :  { %v2869_v60 = vpop.f32.mrf.mxu3  ;;  %v2855_v46 = vpop.f32.mrf.mxu2 }
 0x4d8   :  { %v2877_v20 = vadd.f32 %v2869_v60, %v530_v14  ;;  %v2829_v54 = vpop.f32.mrf.mxu0  ;;  %v2843_v42 = vpop.f32.mrf.mxu1  ;;  %v2876_v39 = vadd.f32 %v2855_v46, %v481_v3  ;;  %v8659_v14 = vor.u32 %v10354_v35, %v8658_v57  ;;  %v8636_v60 = vld [vmem:[#allocation8 + $0x70] sm:$0xf0] }
 0x4d9   :  { %v2878_v0 = vadd.f32 %v2829_v54, %v385_v59  ;;  %v2879_v48 = vadd.f32 %v2843_v42, %v434_v45  ;;  %v8635_v45 = vor.u32 %v10349_v33, %v8634_v28  ;;  %v8639_v49 = vor.u32 %v10347_v22, %v8636_v60  ;;  %v14129_v54 = vld [vmem:[#allocation28_spill] sm:$0xff]  ;;  %3265 = vmatpush.bf16.msrb.mxu3 %v8663_v43  ;;  %v8620_v3 = vld [vmem:[#allocation8 + $0x50] sm:$0xf0]  ;;  %v8628_v43 = vld [vmem:[#allocation8 + $0x58] sm:$0xf0] }
 0x4da   :  { %v8582_v8 = vmul.f32 -1.442695, %v2877_v20  ;;  %3251 = vmatpush.bf16.msrb.mxu2 %v8659_v14  ;;  %v483_v42 = vadd.f32 %v14129_v54, %v11583_v61  ;;  %v10344_v14 = vld [vmem:[#allocation8 + $0x4c] sm:$0xf]  ;;  %v8610_v54 = vld [vmem:[#allocation8 + $0x28] sm:$0xf] }
 0x4db   :  { %v10905_v12 = vpop.eup %10904  ;;  %v8579_v51 = vmul.f32 -1.442695, %v2878_v0  ;;  %v8581_v50 = vmul.f32 -1.442695, %v2879_v48  ;;  %3224 = vmatpush.bf16.msrb.mxu0 %v8635_v45  ;;  %3238 = vmatpush.bf16.msrb.mxu1 %v8639_v49  ;;  %v10339_v45 = vld [vmem:[#allocation8 + $0x24] sm:$0xf] }
 0x4dc   :  { %v10907_v19 = vpop.eup %10906  ;;  %v12358_v41 = vadd.f32 1.0, %v10905_v12  ;;  %10908 = vpow2.f32 %v8582_v8 }
 0x4dd   :  { %v12360_v4 = vadd.f32 1.0, %v10907_v19  ;;  %10910 = vpow2.f32 %v8579_v51 }
 0x4de   :  { %10912 = vrcp.f32 %v12358_v41  ;;  %v2899_v30 = vand.u32 2147483647, %v12358_v41  ;;  %v2901_v47 = vand.u32 2147483648, %v12358_v41  ;;  %vm2895_vm12 = vweird.f32 %v12358_v41 }
 0x4df   :  { %10914 = vrcp.f32 %v12360_v4  ;;  %v2871_v34 = vpop.f32.mrf.mxu3  ;;  %v2939_v0 = vand.u32 2147483648, %v12360_v4  ;;  %v2857_v48 = vpop.f32.mrf.mxu2  ;;  %v2937_v8 = vand.u32 2147483647, %v12360_v4  ;;  %vm2933_vm11 = vweird.f32 %v12360_v4 }
 0x4e0   :  { %10916 = vpow2.f32 %v8581_v50  ;;  %v2881_v63 = vadd.f32 %v2871_v34, %v532_v36  ;;  %vm12386_vm8 = vcmp.eq.f32.partialorder %v2899_v30, 8.507059e+37  ;;  %v2902_v46 = vor.u32 1.1754944e-38, %v2901_v47  ;;  %v8642_v50 = vld [vmem:[#allocation8 + $0x68] sm:$0xf] }
 0x4e1   :  { %v2880_v51 = vadd.f32 %v2857_v48, %v483_v42  ;;  %v2940_v23 = vor.u32 1.1754944e-38, %v2939_v0  ;;  %vm12410_vm14 = vcmp.eq.f32.partialorder %v2937_v8, 8.507059e+37  ;;  %v8626_v30 = vld [vmem:[#allocation8 + $0x48] sm:$0xf]  ;;  %v10342_v42 = vld [vmem:[#allocation8 + $0x34] sm:$0xf0] }
 0x4e2   :  { %v10909_v25 = vpop.eup %10908  ;;  %v8583_v56 = vmul.f32 -1.442695, %v2881_v63  ;;  %v10341_v63 = vld [vmem:[#allocation8 + $0x2c] sm:$0xf0] }
 0x4e3   :  { %v10911_v13 = vpop.eup %10910  ;;  %v12369_v59 = vadd.f32 1.0, %v10909_v25  ;;  %v8647_v25 = vor.u32 %v10348_v21, %v8644_v6  ;;  %v8611_v6 = vor.u32 %v10342_v42, %v8610_v54 }
 0x4e4   :  { %v12371_v52 = vpop.eup %10912  ;;  %v12374_v55 = vadd.f32 1.0, %v10911_v13  ;;  %v8602_v13 = vld [vmem:[#allocation8 + $0x20] sm:$0xf] }
 0x4e5   :  { %v12376_v20 = vpop.eup %10914  ;;  %v2891_v18 = vmul.f32 %v12371_v52, %v12358_v41  ;;  %10918 = vrcp.f32 %v12369_v59  ;;  %vm2896_vm9 = vweird.f32 %v12371_v52  ;;  %v10343_v41 = vld [vmem:[#allocation8 + $0x44] sm:$0xf]  ;;  %3266 = vmatpush.bf16.msrb.mxu3 %v8647_v25 }
 0x4e6   :  { %v10917_v62 = vpop.eup %10916  ;;  %v2929_v10 = vmul.f32 %v12376_v20, %v12360_v4  ;;  %10920 = vtanh.f32 %v2876_v39  ;;  %vm2934_vm10 = vweird.f32 %v12376_v20  ;;  %vm12406_vm13 = vmor %vm2895_vm12, %vm2896_vm9  ;;  %v8643_v4 = vor.u32 %v10350_v26, %v8642_v50 }
 0x4e7   :  { %v2892_v7 = vsub.f32 1.0, %v2891_v18  ;;  %10922 = vrcp.f32 %v12374_v55  ;;  %v12392_v29 = vadd.f32 1.0, %v10917_v62  ;;  %vm12416_vm15 = vmor %vm2933_vm11, %vm2934_vm10  ;;  %v2914_v36 = vand.u32 2147483647, %v12374_v55 }
 0x4e8   :  { %v2930_v12 = vsub.f32 1.0, %v2929_v10  ;;  %3252 = vmatpush.bf16.msrb.mxu2 %v8643_v4  ;;  %v8619_v39 = vor.u32 %v10345_v32, %v8618_v17  ;;  %vm2910_vm0 = vweird.f32 %v12374_v55  ;;  %v8623_v49 = vor.u32 %v10343_v41, %v8620_v3  ;;  %v10340_v10 = vld [vmem:[#allocation8 + $0x2c] sm:$0xf]  ;;  %v10335_v32 = vld [vmem:[#allocation8 + $0x4] sm:$0xf] }
 0x4e9   :  { %v2893_v19 = vmul.f32 %v12371_v52, %v2892_v7  ;;  %10924 = vrcp.f32 %v12392_v29  ;;  %v2954_v44 = vand.u32 2147483648, %v12392_v29  ;;  %vm2948_vm1 = vweird.f32 %v12392_v29  ;;  %v8594_v41 = vld [vmem:[#allocation8 + $0x8] sm:$0xf]  ;;  %v10338_v3 = vld [vmem:[#allocation8 + $0x14] sm:$0xf0] }
 0x4ea   :  { %v2931_v5 = vmul.f32 %v12376_v20, %v2930_v12  ;;  %10926 = vpow2.f32 %v8583_v56  ;;  %3225 = vmatpush.bf16.msrb.mxu0 %v8619_v39  ;;  %v2916_v62 = vand.u32 2147483648, %v12374_v55  ;;  %3239 = vmatpush.bf16.msrb.mxu1 %v8623_v49  ;;  %v8627_v56 = vor.u32 %v10346_v58, %v8626_v30  ;;  %v8596_v30 = vld [vmem:[#allocation8 + $0x18] sm:$0xf0] }
 0x4eb   :  { %v12401_v27 = vpop.eup %10918  ;;  %v2894_v31 = vadd.f32 %v12371_v52, %v2893_v19  ;;  %10928 = vtanh.f32 %v2880_v51  ;;  %v8631_v12 = vor.u32 %v10344_v14, %v8628_v43  ;;  %v10337_v19 = vld [vmem:[#allocation8 + $0xc] sm:$0xf0]  ;;  %v8615_v17 = vor.u32 %v10340_v10, %v8612_v40 }
 0x4ec   :  { %v10921_v34 = vpop.eup %10920  ;;  %v2932_v35 = vadd.f32 %v12376_v20, %v2931_v5  ;;  %v2969_v1 = vmul.f32 %v12401_v27, %v12369_v59  ;;  %3253 = vmatpush.bf16.msrb.mxu2 %v8627_v56  ;;  %v2952_v4 = vand.u32 2147483647, %v12392_v29  ;;  %vm2915_vm5 = vcmp.eq.f32.partialorder %v2914_v36, 8.507059e+37 }
 0x4ed   :  { %v12423_v16 = vpop.eup %10922  ;;  %v2898_v38 = vsel %vm12406_vm13, %v12371_v52, %v2894_v31  ;;  %3267 = vmatpush.bf16.msrb.mxu3 %v8631_v12  ;;  %v8588_v31 = vld [vmem:[#allocation8 + $0x10] sm:$0xf0]  ;;  %v2917_v57 = vor.u32 1.1754944e-38, %v2916_v62  ;;  %v8595_v58 = vor.u32 %v10338_v3, %v8594_v41  ;;  %vm2973_vm9 = vweird.f32 %v12369_v59  ;;  %v10391_v41 = vld [vmem:[#allocation8 + $0xc4] sm:$0xf] }
 0x4ee   :  { %v2903_v28 = vsel %vm12386_vm8, %v2902_v46, %v2898_v38  ;;  %v2936_v33 = vsel %vm12416_vm15, %v12376_v20, %v2932_v35  ;;  %v2906_v22 = vmul.f32 %v12423_v16, %v12374_v55  ;;  %v8604_v20 = vld [vmem:[#allocation8 + $0x30] sm:$0xf0]  ;;  %v2970_v7 = vsub.f32 1.0, %v2969_v1  ;;  %v10336_v35 = vld [vmem:[#allocation8 + $0xc] sm:$0xf] }
 0x4ef   :  { %v12438_v60 = vpop.eup %10924  ;;  %v2941_v52 = vsel %vm12410_vm14, %v2940_v23, %v2936_v33  ;;  %v3000_v47 = vmul.f32 %v10921_v34, %v2903_v28  ;;  %v8603_v46 = vor.u32 %v10341_v63, %v8602_v13  ;;  %vm2911_vm2 = vweird.f32 %v12423_v16  ;;  %v8586_v23 = vld [vmem:[#allocation8] sm:$0xf] }
 0x4f0   :  { %v2998_v18 = vmul.f32 %v2941_v52, %v12295_v11  ;;  %v2907_v0 = vsub.f32 1.0, %v2906_v22  ;;  %v2944_v48 = vmul.f32 %v12438_v60, %v12392_v29  ;;  %v10927_v8 = vpop.eup %10926  ;;  %v8607_v5 = vor.u32 %v10339_v45, %v8604_v20  ;;  %vm2912_vm4 = vmor %vm2910_vm0, %vm2911_vm2  ;;  %3254 = vmatpush.bf16.msrb.mxu2 %v8611_v6 }
 0x4f1   :  { %v10929_v51 = vpop.eup %10928  ;;  %v12451_v21 = vadd.f32 1.0, %v10927_v8  ;;  %vm2949_vm3 = vweird.f32 %v12438_v60  ;;  %3226 = vmatpush.bf16.msrb.mxu0 %v8603_v46  ;;  %v2971_v34 = vmul.f32 %v12401_v27, %v2970_v7  ;;  %v8587_v25 = vor.u32 %v10337_v19, %v8586_v23  ;;  %3268 = vmatpush.bf16.msrb.mxu3 %v8615_v17  ;;  %v8834_v19 = vld [vmem:[#allocation8 + $0xf0] sm:$0xf0] }
 0x4f2   :  { %v12447_v50 = vadd.f32 %v3000_v47, %v2998_v18  ;;  %v2945_v26 = vsub.f32 1.0, %v2944_v48  ;;  %v2908_v11 = vmul.f32 %v12423_v16, %v2907_v0  ;;  %3240 = vmatpush.bf16.msrb.mxu1 %v8607_v5  ;;  %v8591_v39 = vor.u32 %v10335_v32, %v8588_v31  ;;  %vm2950_vm6 = vmor %vm2948_vm1, %vm2949_vm3  ;;  %v10398_v5 = vld [vmem:[#allocation8 + $0xf4] sm:$0xf0]  ;;  %v10396_v32 = vld [vmem:[#allocation8 + $0xec] sm:$0xf] }
 0x4f3   :  { %10930 = vrcp.f32 %v12451_v21  ;;  %v2955_v55 = vor.u32 1.1754944e-38, %v2954_v44  ;;  %vm2953_vm7 = vcmp.eq.f32.partialorder %v2952_v4, 8.507059e+37  ;;  %v8599_v43 = vor.u32 %v10336_v35, %v8596_v30  ;;  %v8842_v31 = vld [vmem:[#allocation8 + $0xf8] sm:$0xf0]  ;;  %v10393_v4 = vld [vmem:[#allocation8 + $0xcc] sm:$0xf0] }
 0x4f4   :  { %v2946_v37 = vmul.f32 %v12438_v60, %v2945_v26  ;;  %v2909_v24 = vadd.f32 %v12423_v16, %v2908_v11  ;;  %10932 = vtanh.f32 %v12447_v50  ;;  %v2972_v33 = vadd.f32 %v12401_v27, %v2971_v34  ;;  %3255 = vmatpush.bf16.msrb.mxu2 %v8595_v58  ;;  %v10397_v26 = vld [vmem:[#allocation8 + $0xec] sm:$0xf0]  ;;  %v10395_v11 = vld [vmem:[#allocation8 + $0xe4] sm:$0xf]  ;;  %v8818_v34 = vld [vmem:[#allocation8 + $0xd0] sm:$0xf0] }
 0x4f5   :  { %3227 = vmatpush.bf16.msrb.mxu0 %v8587_v25  ;;  %vm2974_vm8 = vweird.f32 %v12401_v27  ;;  %v2979_v22 = vand.u32 2147483648, %v12369_v59  ;;  %3269 = vmatpush.bf16.msrb.mxu3 %v8599_v43  ;;  %v2977_v13 = vand.u32 2147483647, %v12369_v59  ;;  %v2994_v49 = vand.u32 2147483648, %v12451_v21  ;;  %v10394_v35 = vld [vmem:[#allocation8 + $0xd4] sm:$0xf0] }
 0x4f6   :  { %v2913_v38 = vsel %vm2912_vm4, %v12423_v16, %v2909_v24  ;;  %v2947_v1 = vadd.f32 %v12438_v60, %v2946_v37  ;;  %3241 = vmatpush.bf16.msrb.mxu1 %v8591_v39  ;;  %vm2975_vm10 = vmor %vm2973_vm9, %vm2974_vm8  ;;  %v2992_v54 = vand.u32 2147483647, %v12451_v21  ;;  %vm2988_vm13 = vweird.f32 %v12451_v21  ;;  %v8816_v24 = vld [vmem:[#allocation8 + $0xc0] sm:$0xf]  ;;  %v8826_v25 = vld [vmem:[#allocation8 + $0xd8] sm:$0xf0] }
 0x4f7   :  { %v2918_v36 = vsel %vm2915_vm5, %v2917_v57, %v2913_v38  ;;  %v2980_v47 = vor.u32 1.1754944e-38, %v2979_v22  ;;  %vm2978_vm11 = vcmp.eq.f32.partialorder %v2977_v13, 8.507059e+37  ;;  %v2995_v0 = vor.u32 1.1754944e-38, %v2994_v49  ;;  %v8824_v57 = vld [vmem:[#allocation8 + $0xc8] sm:$0xf]  ;;  %v14138_v13 = vld [vmem:[#allocation30_spill] sm:$0xff] }
 0x4f8   :  { %v2951_v14 = vsel %vm2950_vm6, %v12438_v60, %v2947_v1  ;;  %v3001_v16 = vmul.f32 %v10929_v51, %v2918_v36  ;;  %v2976_v60 = vsel %vm2975_vm10, %v12401_v27, %v2972_v33  ;;  %vm2993_vm15 = vcmp.eq.f32.partialorder %v2992_v54, 8.507059e+37  ;;  %v8832_v51 = vld [vmem:[#allocation8 + $0xe0] sm:$0xf]  ;;  %v10392_v1 = vld [vmem:[#allocation8 + $0xcc] sm:$0xf] }
 0x4f9   :  { %v2956_v28 = vsel %vm2953_vm7, %v2955_v55, %v2951_v14  ;;  %v10931_v44 = vpop.eup %10930  ;;  %v2981_v59 = vsel %vm2978_vm11, %v2980_v47, %v2976_v60  ;;  %v8833_v23 = vor.u32 %v10397_v26, %v8832_v51  ;;  %v8837_v6 = vor.u32 %v10395_v11, %v8834_v19  ;;  %v8800_v55 = vld [vmem:[#allocation8 + $0xa0] sm:$0xf]  ;;  %v10389_v36 = vld [vmem:[#allocation8 + $0xac] sm:$0xf0]  ;;  %v10387_v58 = vld [vmem:[#allocation8 + $0xa4] sm:$0xf] }
 0x4fa   :  { %v2999_v29 = vmul.f32 %v2956_v28, %v12340_v15  ;;  %v2984_v45 = vmul.f32 %v10931_v44, %v12451_v21  ;;  %v10933_v15 = vpop.eup %10932  ;;  %vm2989_vm12 = vweird.f32 %v10931_v44  ;;  %v8840_v21 = vld [vmem:[#allocation8 + $0xe8] sm:$0xf]  ;;  %v8845_v37 = vor.u32 %v10396_v32, %v8842_v31  ;;  %v10390_v28 = vld [vmem:[#allocation8 + $0xb4] sm:$0xf0]  ;;  %v8810_v22 = vld [vmem:[#allocation8 + $0xb8] sm:$0xf0] }
 0x4fb   :  { %v3006_v18 = vmul.f32 %v10933_v15, %v2981_v59  ;;  %vm2990_vm14 = vmor %vm2988_vm13, %vm2989_vm12  ;;  %v8841_v17 = vor.u32 %v10398_v5, %v8840_v21  ;;  %3622 = vmatpush.bf16.msra.mxu0 %v8833_v23  ;;  %3636 = vmatpush.bf16.msra.mxu1 %v8837_v6  ;;  %v8817_v3 = vor.u32 %v10393_v4, %v8816_v24  ;;  %v8808_v43 = vld [vmem:[#allocation8 + $0xa8] sm:$0xf]  ;;  %v14139_v60 = vld [vmem:[#allocation31_spill] sm:$0xff] }
 0x4fc   :  { %v12481_v63 = vadd.f32 %v3001_v16, %v2999_v29  ;;  %v2985_v52 = vsub.f32 1.0, %v2984_v45  ;;  %3664 = vmatpush.bf16.msra.mxu3 %v8845_v37  ;;  %v8821_v30 = vor.u32 %v10391_v41, %v8818_v34  ;;  %v8825_v38 = vor.u32 %v10394_v35, %v8824_v57  ;;  %v8802_v16 = vld [vmem:[#allocation8 + $0xb0] sm:$0xf0]  ;;  %v10385_v54 = vld [vmem:[#allocation8 + $0x8c] sm:$0xf0]  ;;  %v14141_v4 = vld [vmem:[#allocation34_spill] sm:$0xff] }
 0x4fd   :  { %v3008_v40 = vpack.c.bf16 %v3006_v18, %v3006_v18  ;;  %3650 = vmatpush.bf16.msra.mxu2 %v8841_v17  ;;  %v8829_v39 = vor.u32 %v10392_v1, %v8826_v25  ;;  %v8801_v14 = vor.u32 %v10389_v36, %v8800_v55  ;;  %v8805_v33 = vor.u32 %v10387_v58, %v8802_v16  ;;  %v10383_v59 = vld [vmem:[#allocation8 + $0x84] sm:$0xf]  ;;  %v8768_v51 = vld [vmem:[#allocation8 + $0x60] sm:$0xf]  ;;  %v10381_v26 = vld [vmem:[#allocation8 + $0x6c] sm:$0xf0] }
 0x4fe   :  { %10934 = vtanh.f32 %v12481_v63  ;;  %v2986_v20 = vmul.f32 %v10931_v44, %v2985_v52  ;;  %v8809_v29 = vor.u32 %v10390_v28, %v8808_v43  ;;  %v388_v45 = vadd.f32 %v14138_v13, %v11556_v9  ;;  %v10379_v11 = vld [vmem:[#allocation8 + $0x64] sm:$0xf]  ;;  %v8770_v19 = vld [vmem:[#allocation8 + $0x70] sm:$0xf0]  ;;  %v8776_v21 = vld [vmem:[#allocation8 + $0x68] sm:$0xf] }
 0x4ff   :  { %v3056_v56 = vunpack.c.l.b16 %v3008_v40  ;;  %3623 = vmatpush.bf16.msra.mxu0 %v8817_v3  ;;  %3637 = vmatpush.bf16.msra.mxu1 %v8821_v30  ;;  %v437_v52 = vadd.f32 %v14139_v60, %v11561_v2  ;;  %v8769_v23 = vor.u32 %v10381_v26, %v8768_v51  ;;  %v10382_v5 = vld [vmem:[#allocation8 + $0x74] sm:$0xf0]  ;;  %v14140_v6 = vld [vmem:[#allocation33_spill] sm:$0xff]  ;;  %v8773_v32 = vor.u32 %v10379_v11, %v8770_v19  ;;  %v10380_v37 = vld [vmem:[#allocation8 + $0x6c] sm:$0xf] }
 0x500   :  { %v2987_v42 = vadd.f32 %v10931_v44, %v2986_v20  ;;  %3665 = vmatpush.bf16.msra.mxu3 %v8829_v39  ;;  %v8784_v20 = vld [vmem:[#allocation8 + $0x80] sm:$0xf]  ;;  %v535_v17 = vadd.f32 %v14140_v6, %v11570_v53  ;;  %v8777_v31 = vor.u32 %v10382_v5, %v8776_v21  ;;  %v8778_v24 = vld [vmem:[#allocation8 + $0x78] sm:$0xf0]  ;;  %v390_v41 = vadd.f32 %v14141_v4, %v11556_v9  ;;  %v10377_v39 = vld [vmem:[#allocation8 + $0x4c] sm:$0xf0] }
 0x501   :  { %3651 = vmatpush.bf16.msra.mxu2 %v8825_v38  ;;  %v14142_v3 = vld [vmem:[#allocation35_spill] sm:$0xff]  ;;  %v8781_v35 = vor.u32 %v10380_v37, %v8778_v24  ;;  %v8754_v16 = vld [vmem:[#allocation8 + $0x50] sm:$0xf0]  ;;  %v8760_v43 = vld [vmem:[#allocation8 + $0x48] sm:$0xf] }
 0x502   :  { %v2991_v48 = vsel %vm2990_vm14, %v10931_v44, %v2987_v42  ;;  %v10388_v44 = vld [vmem:[#allocation8 + $0xac] sm:$0xf]  ;;  %v439_v34 = vadd.f32 %v14142_v3, %v11561_v2  ;;  %v8752_v25 = vld [vmem:[#allocation8 + $0x40] sm:$0xf]  ;;  %v10375_v55 = vld [vmem:[#allocation8 + $0x44] sm:$0xf] }
 0x503   :  { %v2996_v62 = vsel %vm2993_vm15, %v2995_v0, %v2991_v48  ;;  %3624 = vmatpush.bf16.msra.mxu0 %v8801_v14  ;;  %v8813_v15 = vor.u32 %v10388_v44, %v8810_v22  ;;  %3638 = vmatpush.bf16.msra.mxu1 %v8805_v33  ;;  %v8785_v0 = vor.u32 %v10385_v54, %v8784_v20  ;;  %v8792_v48 = vld [vmem:[#allocation8 + $0x88] sm:$0xf]  ;;  %v10378_v28 = vld [vmem:[#allocation8 + $0x54] sm:$0xf0]  ;;  %v10376_v22 = vld [vmem:[#allocation8 + $0x4c] sm:$0xf] }
 0x504   :  { %v10935_v27 = vpop.eup %10934  ;;  %v8753_v14 = vor.u32 %v10377_v39, %v8752_v25  ;;  %v8761_v44 = vor.u32 %v10378_v28, %v8760_v43  ;;  %v8762_v13 = vld [vmem:[#allocation8 + $0x58] sm:$0xf0]  ;;  %v8736_v20 = vld [vmem:[#allocation8 + $0x20] sm:$0xf]  ;;  %v10373_v54 = vld [vmem:[#allocation8 + $0x2c] sm:$0xf0] }
 0x505   :  { %v3007_v10 = vmul.f32 %v10935_v27, %v2996_v62  ;;  %3652 = vmatpush.bf16.msra.mxu2 %v8809_v29  ;;  %3666 = vmatpush.bf16.msra.mxu3 %v8813_v15  ;;  %v8786_v27 = vld [vmem:[#allocation8 + $0x90] sm:$0xf0]  ;;  %v10386_v62 = vld [vmem:[#allocation8 + $0x94] sm:$0xf0]  ;;  %v8757_v29 = vor.u32 %v10375_v55, %v8754_v16  ;;  %v8765_v15 = vor.u32 %v10376_v22, %v8762_v13  ;;  %v8720_v11 = vld [vmem:[#allocation8] sm:$0xf] }
 0x506   :  { %v8793_v40 = vor.u32 %v10386_v62, %v8792_v48  ;;  %v8744_v48 = vld [vmem:[#allocation8 + $0x28] sm:$0xf]  ;;  %v10374_v62 = vld [vmem:[#allocation8 + $0x34] sm:$0xf0] }
 0x507   :  { %v3009_v8 = vpack.c.bf16 %v3007_v10, %v3007_v10  ;;  %v10723_v7 = vpack.c.bf16 %v3007_v10, %v3006_v18  ;;  %v8789_v10 = vor.u32 %v10383_v59, %v8786_v27  ;;  %3625 = vmatpush.bf16.msra.mxu0 %v8785_v0  ;;  %v10371_v0 = vld [vmem:[#allocation8 + $0x24] sm:$0xf]  ;;  %v8738_v27 = vld [vmem:[#allocation8 + $0x30] sm:$0xf0]  ;;  %v8745_v5 = vor.u32 %v10374_v62, %v8744_v48  ;;  %v8728_v37 = vld [vmem:[#allocation8 + $0x8] sm:$0xf] }
 0x508   :  { %v8741_v26 = vor.u32 %v10371_v0, %v8738_v27  ;;  %v14145_v25 = vld [vmem:[#allocation38_spill] sm:$0xff]  ;;  %v10435_v0 = vld [vmem:[#allocation6 + $0xe4] sm:$0xf]  ;;  %v9005_v27 = vld [vmem:[#allocation6 + $0xf0] sm:$0xf0] }
 0x509   :  { %10724 = vst [vmem:[#allocation2 + $0x20] sm:$0xff] %v10723_v7   ;;  %v3057_v12 = vunpack.c.l.b16 %v3009_v8  ;;  %v10384_v8 = vld [vmem:[#allocation8 + $0x8c] sm:$0xf]  ;;  %v8794_v7 = vld [vmem:[#allocation8 + $0x98] sm:$0xf0]  ;;  %3639 = vmatpush.bf16.msra.mxu1 %v8789_v10  ;;  %3653 = vmatpush.bf16.msra.mxu2 %v8793_v40  ;;  %v488_v39 = vadd.f32 %v14145_v25, %v11583_v61 }
 0x50a   :  { %v14143_v10 = vld [vmem:[#allocation32_spill] sm:$0xff] }
 0x50b   :  { %v3058_v46 = vpack.c.b16 %v3057_v12, %v3056_v56  ;;  %3626 = vmatpush.bf16.msra.mxu0 %v8769_v23  ;;  %v486_v40 = vadd.f32 %v14143_v10, %v11583_v61  ;;  %v10369_v23 = vld [vmem:[#allocation8 + $0xc] sm:$0xf0]  ;;  %v8979_v10 = vld [vmem:[#allocation6 + $0xa8] sm:$0xf] }
 0x50d   :  { %3228 = vmatmul.bf16.vlgmr.msrb.gmra.mxu0 %v3058_v46  ;;  %3242 = vmatmul.bf16.vlgmr.msrb.gmra.mxu1 %v3058_v46 }
 0x50e   :  { %3256 = vmatmul.bf16.vlgmr.msrb.gmra.mxu2 %v3058_v46  ;;  %3270 = vmatmul.bf16.vlgmr.msrb.gmra.mxu3 %v3058_v46  ;;  %v8797_v46 = vor.u32 %v10384_v8, %v8794_v7  ;;  %v10372_v7 = vld [vmem:[#allocation8 + $0x2c] sm:$0xf] }
 0x50f   :  { %3640 = vmatpush.bf16.msra.mxu1 %v8773_v32  ;;  %3654 = vmatpush.bf16.msra.mxu2 %v8777_v31  ;;  %v10367_v32 = vld [vmem:[#allocation8 + $0x4] sm:$0xf]  ;;  %v8722_v31 = vld [vmem:[#allocation8 + $0x10] sm:$0xf0] }
 0x510   :  { %3667 = vmatpush.bf16.msra.mxu3 %v8797_v46  ;;  %3627 = vmatpush.bf16.msra.mxu0 %v8753_v14  ;;  %v8725_v3 = vor.u32 %v10367_v32, %v8722_v31  ;;  %v8987_v32 = vld [vmem:[#allocation6 + $0xc0] sm:$0xf]  ;;  %v10433_v31 = vld [vmem:[#allocation6 + $0xcc] sm:$0xf0] }
 0x513   :  { %3641 = vmatpush.bf16.msra.mxu1 %v8757_v29  ;;  %3655 = vmatpush.bf16.msra.mxu2 %v8761_v44 }
 0x514   :  { %3668 = vmatpush.bf16.msra.mxu3 %v8781_v35 }
 0x517   :  { %3642 = vmatpush.bf16.msra.mxu1 %v8741_v26  ;;  %3656 = vmatpush.bf16.msra.mxu2 %v8745_v5 }
 0x518   :  { %3669 = vmatpush.bf16.msra.mxu3 %v8765_v15 }
 0x51b   :  { %3643 = vmatpush.bf16.msra.mxu1 %v8725_v3 }
 0x58a   :  { %v3229_v47 = vpop.f32.mrf.mxu0  ;;  %v3243_v49 = vpop.f32.mrf.mxu1 }
 0x58b   :  { %v3276_v42 = vadd.f32 %v3229_v47, %v388_v45  ;;  %v3277_v18 = vadd.f32 %v3243_v49, %v437_v52 }
 0x58d   :  { %v8712_v56 = vmul.f32 -1.442695, %v3276_v42  ;;  %v8714_v12 = vmul.f32 -1.442695, %v3277_v18  ;;  %v8737_v18 = vor.u32 %v10373_v54, %v8736_v20  ;;  %v10437_v20 = vld [vmem:[#allocation6 + $0xec] sm:$0xf0] }
 0x58f   :  { %10936 = vpow2.f32 %v8712_v56  ;;  %3628 = vmatpush.bf16.msra.mxu0 %v8737_v18  ;;  %v8746_v56 = vld [vmem:[#allocation8 + $0x38] sm:$0xf0] }
 0x590   :  { %10938 = vpow2.f32 %v8714_v12  ;;  %v14144_v12 = vld [vmem:[#allocation36_spill] sm:$0xff]  ;;  %v8749_v6 = vor.u32 %v10372_v7, %v8746_v56  ;;  %v10438_v7 = vld [vmem:[#allocation6 + $0xf4] sm:$0xf0] }
 0x591   :  { %v3271_v57 = vpop.f32.mrf.mxu3  ;;  %v3257_v42 = vpop.f32.mrf.mxu2  ;;  %v537_v46 = vadd.f32 %v14144_v12, %v11570_v53  ;;  %v8955_v12 = vld [vmem:[#allocation6 + $0x80] sm:$0xf] }
 0x592   :  { %v3279_v30 = vadd.f32 %v3271_v57, %v535_v17  ;;  %v3231_v38 = vpop.f32.mrf.mxu0  ;;  %v3245_v1 = vpop.f32.mrf.mxu1  ;;  %v3278_v21 = vadd.f32 %v3257_v42, %v486_v40  ;;  %v8721_v17 = vor.u32 %v10369_v23, %v8720_v11  ;;  %3670 = vmatpush.bf16.msra.mxu3 %v8749_v6  ;;  %v10436_v11 = vld [vmem:[#allocation6 + $0xec] sm:$0xf]  ;;  %v9008_v6 = vor.u32 %v10435_v0, %v9005_v27  ;;  %v10430_v40 = vld [vmem:[#allocation6 + $0xb4] sm:$0xf0] }
 0x593   :  { %v3280_v36 = vadd.f32 %v3231_v38, %v390_v41  ;;  %v3281_v58 = vadd.f32 %v3245_v1, %v439_v34  ;;  %v10370_v34 = vld [vmem:[#allocation8 + $0x14] sm:$0xf0] }
 0x594   :  { %v8716_v33 = vmul.f32 -1.442695, %v3279_v30  ;;  %v8729_v38 = vor.u32 %v10370_v34, %v8728_v37  ;;  %3629 = vmatpush.bf16.msra.mxu0 %v8721_v17  ;;  %v9013_v17 = vld [vmem:[#allocation6 + $0xf8] sm:$0xf0]  ;;  %v10431_v34 = vld [vmem:[#allocation6 + $0xc4] sm:$0xf]  ;;  %4139 = vmatpush.bf16.msrb.mxu1 %v9008_v6 }
 0x595   :  { %v10937_v45 = vpop.eup %10936  ;;  %v8713_v60 = vmul.f32 -1.442695, %v3280_v36  ;;  %v8715_v52 = vmul.f32 -1.442695, %v3281_v58 }
 0x596   :  { %v10939_v47 = vpop.eup %10938  ;;  %v12499_v49 = vadd.f32 1.0, %v10937_v45  ;;  %10940 = vpow2.f32 %v8716_v33  ;;  %3657 = vmatpush.bf16.msra.mxu2 %v8729_v38  ;;  %v10368_v45 = vld [vmem:[#allocation8 + $0xc] sm:$0xf] }
 0x597   :  { %v12501_v59 = vadd.f32 1.0, %v10939_v47  ;;  %10942 = vpow2.f32 %v8713_v60  ;;  %v8730_v60 = vld [vmem:[#allocation8 + $0x18] sm:$0xf0]  ;;  %v9003_v47 = vld [vmem:[#allocation6 + $0xe0] sm:$0xf] }
 0x598   :  { %10944 = vrcp.f32 %v12499_v49  ;;  %v3301_v51 = vand.u32 2147483647, %v12499_v49  ;;  %v3303_v35 = vand.u32 2147483648, %v12499_v49  ;;  %vm3297_vm1 = vweird.f32 %v12499_v49 }
 0x599   :  { %10946 = vrcp.f32 %v12501_v59  ;;  %v3273_v8 = vpop.f32.mrf.mxu3  ;;  %v3341_v36 = vand.u32 2147483648, %v12501_v59  ;;  %v3339_v43 = vand.u32 2147483647, %v12501_v59  ;;  %v3259_v29 = vpop.f32.mrf.mxu2  ;;  %vm3335_vm4 = vweird.f32 %v12501_v59 }
 0x59a   :  { %10948 = vpow2.f32 %v8715_v52  ;;  %v3283_v41 = vadd.f32 %v3273_v8, %v537_v46  ;;  %vm12527_vm0 = vcmp.eq.f32.partialorder %v3301_v51, 8.507059e+37  ;;  %v3304_v13 = vor.u32 1.1754944e-38, %v3303_v35  ;;  %v9011_v8 = vld [vmem:[#allocation6 + $0xe8] sm:$0xf] }
 0x59b   :  { %v3342_v52 = vor.u32 1.1754944e-38, %v3341_v36  ;;  %v3282_v42 = vadd.f32 %v3259_v29, %v488_v39  ;;  %vm12554_vm6 = vcmp.eq.f32.partialorder %v3339_v43, 8.507059e+37  ;;  %v9004_v5 = vor.u32 %v10437_v20, %v9003_v47  ;;  %v8995_v35 = vld [vmem:[#allocation6 + $0xc8] sm:$0xf]  ;;  %v10432_v36 = vld [vmem:[#allocation6 + $0xcc] sm:$0xf] }
 0x59c   :  { %v10941_v19 = vpop.eup %10940  ;;  %v8717_v44 = vmul.f32 -1.442695, %v3283_v41  ;;  %v10429_v29 = vld [vmem:[#allocation6 + $0xac] sm:$0xf0]  ;;  %v10427_v20 = vld [vmem:[#allocation6 + $0xa4] sm:$0xf] }
 0x59d   :  { %v10943_v24 = vpop.eup %10942  ;;  %v12510_v4 = vadd.f32 1.0, %v10941_v19  ;;  %4090 = vmatpush.bf16.msrb.mxu0 %v9004_v5 }
 0x59e   :  { %v12512_v57 = vpop.eup %10944  ;;  %v12515_v30 = vadd.f32 1.0, %v10943_v24 }
 0x59f   :  { %v12517_v1 = vpop.eup %10946  ;;  %v3293_v55 = vmul.f32 %v12512_v57, %v12499_v49  ;;  %10950 = vrcp.f32 %v12510_v4  ;;  %vm3298_vm2 = vweird.f32 %v12512_v57 }
 0x5a0   :  { %v10949_v58 = vpop.eup %10948  ;;  %v3331_v14 = vmul.f32 %v12517_v1, %v12501_v59  ;;  %10952 = vtanh.f32 %v3278_v21  ;;  %vm3336_vm3 = vweird.f32 %v12517_v1  ;;  %v3316_v18 = vand.u32 2147483647, %v12515_v30  ;;  %vm12550_vm5 = vmor %vm3297_vm1, %vm3298_vm2 }
 0x5a1   :  { %v3294_v28 = vsub.f32 1.0, %v3293_v55  ;;  %10954 = vrcp.f32 %v12515_v30  ;;  %v12533_v33 = vadd.f32 1.0, %v10949_v58  ;;  %v8733_v59 = vor.u32 %v10368_v45, %v8730_v60  ;;  %vm12560_vm7 = vmor %vm3335_vm4, %vm3336_vm3  ;;  %v10434_v55 = vld [vmem:[#allocation6 + $0xd4] sm:$0xf0]  ;;  %v8997_v58 = vld [vmem:[#allocation6 + $0xd8] sm:$0xf0] }
 0x5a2   :  { %v3332_v22 = vsub.f32 1.0, %v3331_v14  ;;  %v3318_v51 = vand.u32 2147483648, %v12515_v30  ;;  %vm12582_vm8 = vcmp.eq.f32.partialorder %v3316_v18, 8.507059e+37  ;;  %vm3312_vm9 = vweird.f32 %v12515_v30 }
 0x5a3   :  { %v3295_v15 = vmul.f32 %v12512_v57, %v3294_v28  ;;  %10956 = vrcp.f32 %v12533_v33  ;;  %v3356_v46 = vand.u32 2147483648, %v12533_v33  ;;  %v3354_v26 = vand.u32 2147483647, %v12533_v33  ;;  %3671 = vmatpush.bf16.msra.mxu3 %v8733_v59  ;;  %v8971_v28 = vld [vmem:[#allocation6 + $0xa0] sm:$0xf] }
 0x5a4   :  { %v3333_v54 = vmul.f32 %v12517_v1, %v3332_v22  ;;  %10958 = vpow2.f32 %v8717_v44  ;;  %v8988_v45 = vor.u32 %v10433_v31, %v8987_v32  ;;  %v8996_v0 = vor.u32 %v10434_v55, %v8995_v35  ;;  %v8963_v32 = vld [vmem:[#allocation6 + $0x88] sm:$0xf]  ;;  %v10426_v31 = vld [vmem:[#allocation6 + $0x94] sm:$0xf0]  ;;  %v10421_v55 = vld [vmem:[#allocation6 + $0x6c] sm:$0xf0] }
 0x5a5   :  { %v12543_v48 = vpop.eup %10950  ;;  %v3296_v62 = vadd.f32 %v12512_v57, %v3295_v15  ;;  %10960 = vtanh.f32 %v3282_v42  ;;  %v9000_v27 = vor.u32 %v10432_v36, %v8997_v58  ;;  %vm3350_vm13 = vweird.f32 %v12533_v33  ;;  %v10419_v36 = vld [vmem:[#allocation6 + $0x64] sm:$0xf]  ;;  %v8941_v58 = vld [vmem:[#allocation6 + $0x70] sm:$0xf0] }
 0x5a6   :  { %v10953_v56 = vpop.eup %10952  ;;  %v3334_v49 = vadd.f32 %v12517_v1, %v3333_v54  ;;  %v3371_v21 = vmul.f32 %v12543_v48, %v12510_v4  ;;  %v8973_v54 = vld [vmem:[#allocation6 + $0xb0] sm:$0xf0]  ;;  %4091 = vmatpush.bf16.msrb.mxu0 %v8988_v45  ;;  %vm3355_vm15 = vcmp.eq.f32.partialorder %v3354_v26, 8.507059e+37  ;;  %v8964_v3 = vor.u32 %v10426_v31, %v8963_v32  ;;  %v10415_v42 = vld [vmem:[#allocation6 + $0x44] sm:$0xf] }
 0x5a7   :  { %v12568_v23 = vpop.eup %10954  ;;  %v3300_v19 = vsel %vm12550_vm5, %v12512_v57, %v3296_v62  ;;  %v8989_v57 = vld [vmem:[#allocation6 + $0xd0] sm:$0xf0]  ;;  %v8972_v62 = vor.u32 %v10429_v29, %v8971_v28  ;;  %v8976_v6 = vor.u32 %v10427_v20, %v8973_v54  ;;  %v10422_v28 = vld [vmem:[#allocation6 + $0x74] sm:$0xf0]  ;;  %vm3375_vm1 = vweird.f32 %v12510_v4 }
 0x5a8   :  { %v3305_v37 = vsel %vm12527_vm0, %v3304_v13, %v3300_v19  ;;  %v3338_v24 = vsel %vm12560_vm7, %v12517_v1, %v3334_v49  ;;  %v3308_v41 = vmul.f32 %v12568_v23, %v12515_v30  ;;  %v9012_v1 = vor.u32 %v10438_v7, %v9011_v8  ;;  %v10428_v7 = vld [vmem:[#allocation6 + $0xac] sm:$0xf]  ;;  %v8957_v19 = vld [vmem:[#allocation6 + $0x90] sm:$0xf0] }
 0x5a9   :  { %v12586_v38 = vpop.eup %10956  ;;  %v3343_v25 = vsel %vm12554_vm6, %v3342_v52, %v3338_v24  ;;  %v3402_v39 = vmul.f32 %v10953_v56, %v3305_v37  ;;  %vm3313_vm10 = vweird.f32 %v12568_v23  ;;  %v3372_v22 = vsub.f32 1.0, %v3371_v21  ;;  %v8981_v56 = vld [vmem:[#allocation6 + $0xb8] sm:$0xf0]  ;;  %v8909_v32 = vld [vmem:[#allocation6 + $0x30] sm:$0xf0] }
 0x5aa   :  { %v3400_v14 = vmul.f32 %v3343_v25, %v12447_v50  ;;  %v3309_v16 = vsub.f32 1.0, %v3308_v41  ;;  %v3346_v43 = vmul.f32 %v12586_v38, %v12533_v33  ;;  %v10959_v44 = vpop.eup %10958  ;;  %4188 = vmatpush.bf16.msrb.mxu2 %v9012_v1  ;;  %v9016_v13 = vor.u32 %v10436_v11, %v9013_v17  ;;  %vm12602_vm11 = vmor %vm3312_vm9, %vm3313_vm10  ;;  %v10423_v11 = vld [vmem:[#allocation6 + $0x84] sm:$0xf]  ;;  %4092 = vmatpush.bf16.msrb.mxu0 %v8972_v62  ;;  %v8965_v1 = vld [vmem:[#allocation6 + $0x98] sm:$0xf0] }
 0x5ab   :  { %v8992_v60 = vor.u32 %v10431_v34, %v8989_v57  ;;  %v3319_v50 = vor.u32 1.1754944e-38, %v3318_v51  ;;  %v12606_v18 = vadd.f32 1.0, %v10959_v44  ;;  %v10961_v59 = vpop.eup %10960  ;;  %vm3351_vm12 = vweird.f32 %v12586_v38  ;;  %v10425_v51 = vld [vmem:[#allocation6 + $0x8c] sm:$0xf0]  ;;  %v10424_v34 = vld [vmem:[#allocation6 + $0x8c] sm:$0xf] }
 0x5ac   :  { %v12595_v52 = vadd.f32 %v3402_v39, %v3400_v14  ;;  %v3347_v15 = vsub.f32 1.0, %v3346_v43  ;;  %v3310_v47 = vmul.f32 %v12568_v23, %v3309_v16  ;;  %4237 = vmatpush.bf16.msrb.mxu3 %v9016_v13  ;;  %v3373_v49 = vmul.f32 %v12543_v48, %v3372_v22  ;;  %vm12620_vm14 = vmor %vm3350_vm13, %vm3351_vm12  ;;  %v8947_v43 = vld [vmem:[#allocation6 + $0x68] sm:$0xf]  ;;  %v10420_v13 = vld [vmem:[#allocation6 + $0x6c] sm:$0xf] }
 0x5ad   :  { %4140 = vmatpush.bf16.msrb.mxu1 %v8992_v60  ;;  %10962 = vrcp.f32 %v12606_v18  ;;  %v8980_v17 = vor.u32 %v10430_v40, %v8979_v10  ;;  %v3357_v24 = vor.u32 1.1754944e-38, %v3356_v46  ;;  %v8956_v25 = vor.u32 %v10425_v51, %v8955_v12  ;;  %v8939_v46 = vld [vmem:[#allocation6 + $0x60] sm:$0xf]  ;;  %v8931_v40 = vld [vmem:[#allocation6 + $0x48] sm:$0xf] }
 0x5ae   :  { %v3348_v8 = vmul.f32 %v12586_v38, %v3347_v15  ;;  %v3311_v30 = vadd.f32 %v12568_v23, %v3310_v47  ;;  %4189 = vmatpush.bf16.msrb.mxu2 %v8996_v0  ;;  %v8960_v39 = vor.u32 %v10423_v11, %v8957_v19  ;;  %10964 = vtanh.f32 %v12595_v52  ;;  %v8949_v47 = vld [vmem:[#allocation6 + $0x78] sm:$0xf0]  ;;  %v8925_v0 = vld [vmem:[#allocation6 + $0x50] sm:$0xf0]  ;;  %v8907_v19 = vld [vmem:[#allocation6 + $0x20] sm:$0xf] }
 0x5af   :  { %v3379_v33 = vand.u32 2147483647, %v12510_v4  ;;  %v3374_v14 = vadd.f32 %v12543_v48, %v3373_v49  ;;  %vm3376_vm0 = vweird.f32 %v12543_v48  ;;  %4093 = vmatpush.bf16.msrb.mxu0 %v8956_v25  ;;  %v8968_v44 = vor.u32 %v10424_v34, %v8965_v1  ;;  %v10416_v49 = vld [vmem:[#allocation6 + $0x4c] sm:$0xf]  ;;  %v8933_v11 = vld [vmem:[#allocation6 + $0x58] sm:$0xf0] }
 0x5b0   :  { %v3315_v21 = vsel %vm12602_vm11, %v12568_v23, %v3311_v30  ;;  %v3349_v5 = vadd.f32 %v12586_v38, %v3348_v8  ;;  %4238 = vmatpush.bf16.msrb.mxu3 %v9000_v27  ;;  %v8984_v23 = vor.u32 %v10428_v7, %v8981_v56  ;;  %v8940_v22 = vor.u32 %v10421_v55, %v8939_v46  ;;  %vm12648_vm2 = vmor %vm3375_vm1, %vm3376_vm0  ;;  %v10412_v25 = vld [vmem:[#allocation6 + $0x2c] sm:$0xf]  ;;  %v8917_v46 = vld [vmem:[#allocation6 + $0x38] sm:$0xf0] }
 0x5b1   :  { %v3320_v41 = vsel %vm12582_vm8, %v3319_v50, %v3315_v21  ;;  %4141 = vmatpush.bf16.msrb.mxu1 %v8976_v6  ;;  %v8944_v15 = vor.u32 %v10419_v36, %v8941_v58  ;;  %v10417_v50 = vld [vmem:[#allocation6 + $0x4c] sm:$0xf0]  ;;  %vm12652_vm3 = vcmp.eq.f32.partialorder %v3379_v33, 8.507059e+37  ;;  %v3378_v27 = vsel %vm12648_vm2, %v12543_v48, %v3374_v14  ;;  %v8891_v55 = vld [vmem:[#allocation6] sm:$0xf] }
 0x5b2   :  { %v3353_v57 = vsel %vm12620_vm14, %v12586_v38, %v3349_v5  ;;  %v3403_v35 = vmul.f32 %v10961_v59, %v3320_v41  ;;  %4190 = vmatpush.bf16.msrb.mxu2 %v8980_v17  ;;  %v3381_v38 = vand.u32 2147483648, %v12510_v4  ;;  %v8948_v4 = vor.u32 %v10422_v28, %v8947_v43  ;;  %v10418_v59 = vld [vmem:[#allocation6 + $0x54] sm:$0xf0]  ;;  %v10413_v21 = vld [vmem:[#allocation6 + $0x2c] sm:$0xf0] }
 0x5b3   :  { %v3358_v26 = vsel %vm3355_vm15, %v3357_v24, %v3353_v57  ;;  %v12639_v29 = vpop.eup %10962  ;;  %v3394_v30 = vand.u32 2147483647, %v12606_v18  ;;  %v3396_v7 = vand.u32 2147483648, %v12606_v18  ;;  %4094 = vmatpush.bf16.msrb.mxu0 %v8940_v22  ;;  %v8952_v56 = vor.u32 %v10420_v13, %v8949_v47  ;;  %v10411_v17 = vld [vmem:[#allocation6 + $0x24] sm:$0xf] }
 0x5b4   :  { %v3401_v16 = vmul.f32 %v3358_v26, %v12481_v63  ;;  %4239 = vmatpush.bf16.msrb.mxu3 %v8984_v23  ;;  %v3386_v60 = vmul.f32 %v12639_v29, %v12606_v18  ;;  %v8923_v63 = vld [vmem:[#allocation6 + $0x40] sm:$0xf]  ;;  %v3382_v62 = vor.u32 1.1754944e-38, %v3381_v38  ;;  %v10965_v8 = vpop.eup %10964  ;;  %vm3391_vm4 = vweird.f32 %v12639_v29  ;;  %v8915_v24 = vld [vmem:[#allocation6 + $0x28] sm:$0xf] }
 0x5b5   :  { %4142 = vmatpush.bf16.msrb.mxu1 %v8960_v39  ;;  %v8924_v12 = vor.u32 %v10417_v50, %v8923_v63  ;;  %v8928_v48 = vor.u32 %v10415_v42, %v8925_v0  ;;  %v8932_v6 = vor.u32 %v10418_v59, %v8931_v40  ;;  %vm3390_vm5 = vweird.f32 %v12606_v18  ;;  %v10414_v41 = vld [vmem:[#allocation6 + $0x34] sm:$0xf0]  ;;  %v10409_v33 = vld [vmem:[#allocation6 + $0xc] sm:$0xf0]  ;;  %v10407_v36 = vld [vmem:[#allocation6 + $0x4] sm:$0xf] }
 0x5b6   :  { %v12642_v45 = vadd.f32 %v3403_v35, %v3401_v16  ;;  %4191 = vmatpush.bf16.msrb.mxu2 %v8964_v3  ;;  %v3387_v10 = vsub.f32 1.0, %v3386_v60  ;;  %v3383_v5 = vsel %vm12652_vm3, %v3382_v62, %v3378_v27  ;;  %vm12670_vm6 = vmor %vm3390_vm5, %vm3391_vm4  ;;  %vm3395_vm7 = vcmp.eq.f32.partialorder %v3394_v30, 8.507059e+37  ;;  %v8893_v58 = vld [vmem:[#allocation6 + $0x10] sm:$0xf0]  ;;  %v8899_v16 = vld [vmem:[#allocation6 + $0x8] sm:$0xf] }
 0x5b7   :  { %v3408_v37 = vmul.f32 %v10965_v8, %v3383_v5  ;;  %v3397_v34 = vor.u32 1.1754944e-38, %v3396_v7  ;;  %4095 = vmatpush.bf16.msrb.mxu0 %v8924_v12  ;;  %v8936_v57 = vor.u32 %v10416_v49, %v8933_v11  ;;  %v8908_v35 = vor.u32 %v10413_v21, %v8907_v19  ;;  %v10410_v43 = vld [vmem:[#allocation6 + $0x14] sm:$0xf0]  ;;  %v8901_v47 = vld [vmem:[#allocation6 + $0x18] sm:$0xf0]  ;;  %v10400_v42 = vld [vmem:[#allocation2] sm:$0xff] }
 0x5b8   :  { %10966 = vtanh.f32 %v12642_v45  ;;  %4240 = vmatpush.bf16.msrb.mxu3 %v8968_v44  ;;  %v3388_v51 = vmul.f32 %v12639_v29, %v3387_v10  ;;  %v8912_v1 = vor.u32 %v10411_v17, %v8909_v32  ;;  %v8916_v3 = vor.u32 %v10414_v41, %v8915_v24  ;;  %v9131_v0 = vld [vmem:[#allocation8 + $0x1e0] sm:$0xf]  ;;  %v10469_v27 = vld [vmem:[#allocation8 + $0x1ec] sm:$0xf0]  ;;  %v10467_v62 = vld [vmem:[#allocation8 + $0x1e4] sm:$0xf] }
 0x5b9   :  { %4143 = vmatpush.bf16.msrb.mxu1 %v8944_v15  ;;  %v3410_v38 = vpack.c.bf16 %v3408_v37, %v3408_v37  ;;  %v8920_v28 = vor.u32 %v10412_v25, %v8917_v46  ;;  %v8892_v44 = vor.u32 %v10409_v33, %v8891_v55  ;;  %v8896_v13 = vor.u32 %v10407_v36, %v8893_v58  ;;  %v10408_v15 = vld [vmem:[#allocation6 + $0xc] sm:$0xf]  ;;  %v9133_v40 = vld [vmem:[#allocation8 + $0x1f0] sm:$0xf0]  ;;  %v10401_v8 = vld [vmem:[#allocation2 + $0x18] sm:$0xff] }
 0x5ba   :  { %4192 = vmatpush.bf16.msrb.mxu2 %v8948_v4  ;;  %v3389_v31 = vadd.f32 %v12639_v29, %v3388_v51  ;;  %v8900_v60 = vor.u32 %v10410_v43, %v8899_v16  ;;  %v8904_v54 = vor.u32 %v10408_v15, %v8901_v47  ;;  %v10399_v4 = vld [vmem:[#allocation2 + $0x30] sm:$0xff]  ;;  %v9132_v10 = vor.u32 %v10469_v27, %v9131_v0  ;;  %v10468_v30 = vld [vmem:[#allocation8 + $0x1ec] sm:$0xf]  ;;  %v9141_v7 = vld [vmem:[#allocation8 + $0x1f8] sm:$0xf0] }
 0x5bb   :  { %4096 = vmatpush.bf16.msrb.mxu0 %v8908_v35  ;;  %v3458_v63 = vunpack.c.l.b16 %v3410_v38  ;;  %v9136_v59 = vor.u32 %v10467_v62, %v9133_v40  ;;  %v9144_v12 = vor.u32 %v10468_v30, %v9141_v7  ;;  %v10470_v49 = vld [vmem:[#allocation8 + $0x1f4] sm:$0xf0]  ;;  %v9115_v51 = vld [vmem:[#allocation8 + $0x1c0] sm:$0xf]  ;;  %v10463_v21 = vld [vmem:[#allocation8 + $0x1c4] sm:$0xf] }
 0x5bc   :  { %4241 = vmatpush.bf16.msrb.mxu3 %v8952_v56  ;;  %v3393_v18 = vsel %vm12670_vm6, %v12639_v29, %v3389_v31  ;;  %v9139_v56 = vld [vmem:[#allocation8 + $0x1e8] sm:$0xf]  ;;  %v9117_v5 = vld [vmem:[#allocation8 + $0x1d0] sm:$0xf0]  ;;  %v10464_v32 = vld [vmem:[#allocation8 + $0x1cc] sm:$0xf] }
 0x5bd   :  { %4144 = vmatpush.bf16.msrb.mxu1 %v8928_v48  ;;  %v3398_v26 = vsel %vm3395_vm7, %v3397_v34, %v3393_v18  ;;  %v10465_v48 = vld [vmem:[#allocation8 + $0x1cc] sm:$0xf0]  ;;  %v9140_v11 = vor.u32 %v10470_v49, %v9139_v56  ;;  %v9125_v31 = vld [vmem:[#allocation8 + $0x1d8] sm:$0xf0]  ;;  %v10466_v41 = vld [vmem:[#allocation8 + $0x1d4] sm:$0xf0] }
 0x5be   :  { %v10967_v39 = vpop.eup %10966  ;;  %4193 = vmatpush.bf16.msrb.mxu2 %v8932_v6  ;;  %v9116_v19 = vor.u32 %v10465_v48, %v9115_v51  ;;  %v9120_v6 = vor.u32 %v10463_v21, %v9117_v5  ;;  %v10402_v17 = vld [vmem:[#allocation2 + $0x10] sm:$0xff]  ;;  %v9128_v24 = vor.u32 %v10464_v32, %v9125_v31  ;;  %v9099_v23 = vld [vmem:[#allocation8 + $0x1a0] sm:$0xf]  ;;  %v10459_v25 = vld [vmem:[#allocation8 + $0x1a4] sm:$0xf] }
 0x5bf   :  { %v3409_v14 = vmul.f32 %v10967_v39, %v3398_v26  ;;  %4097 = vmatpush.bf16.msrb.mxu0 %v8892_v44  ;;  %v10461_v34 = vld [vmem:[#allocation8 + $0x1ac] sm:$0xf0]  ;;  %v9101_v39 = vld [vmem:[#allocation8 + $0x1b0] sm:$0xf0]  ;;  %v10460_v46 = vld [vmem:[#allocation8 + $0x1ac] sm:$0xf] }
 0x5c0   :  { %4242 = vmatpush.bf16.msrb.mxu3 %v8936_v57  ;;  %v9100_v35 = vor.u32 %v10461_v34, %v9099_v23  ;;  %v9104_v18 = vor.u32 %v10459_v25, %v9101_v39  ;;  %v9109_v55 = vld [vmem:[#allocation8 + $0x1b8] sm:$0xf0]  ;;  %v9107_v33 = vld [vmem:[#allocation8 + $0x1a8] sm:$0xf]  ;;  %v10404_v58 = vld [vmem:[#allocation2 + $0x20] sm:$0xff] }
 0x5c1   :  { %v3411_v22 = vpack.c.bf16 %v3409_v14, %v3409_v14  ;;  %v10728_v29 = vpack.c.bf16 %v3409_v14, %v3408_v37  ;;  %4145 = vmatpush.bf16.msrb.mxu1 %v8912_v1  ;;  %v9123_v37 = vld [vmem:[#allocation8 + $0x1c8] sm:$0xf]  ;;  %v9112_v26 = vor.u32 %v10460_v46, %v9109_v55  ;;  %v9083_v38 = vld [vmem:[#allocation8 + $0x180] sm:$0xf]  ;;  %v10457_v16 = vld [vmem:[#allocation8 + $0x18c] sm:$0xf0] }
 0x5c2   :  { %4194 = vmatpush.bf16.msrb.mxu2 %v8916_v3  ;;  %v9124_v57 = vor.u32 %v10466_v41, %v9123_v37  ;;  %v10403_v1 = vld [vmem:[#allocation2 + $0x8] sm:$0xff]  ;;  %v10462_v3 = vld [vmem:[#allocation8 + $0x1b4] sm:$0xf0]  ;;  %v10455_v43 = vld [vmem:[#allocation8 + $0x184] sm:$0xf] }
 0x5c3   :  { %10729 = vst [vmem:[#allocation2 + $0x28] sm:$0xff] %v10728_v29   ;;  %v3459_v50 = vunpack.c.l.b16 %v3411_v22  ;;  %v9108_v36 = vor.u32 %v10462_v3, %v9107_v33  ;;  %v9085_v44 = vld [vmem:[#allocation8 + $0x190] sm:$0xf0]  ;;  %v10456_v22 = vld [vmem:[#allocation8 + $0x18c] sm:$0xf] }
 0x5c4   :  { %4243 = vmatpush.bf16.msrb.mxu3 %v8920_v28  ;;  %v9084_v28 = vor.u32 %v10457_v16, %v9083_v38  ;;  %v9093_v29 = vld [vmem:[#allocation8 + $0x198] sm:$0xf0]  ;;  %v14166_v15 = vld [vmem:[#allocation37_spill] sm:$0xff]  ;;  %v14168_v62 = vld [vmem:[#allocation40_spill] sm:$0xff] }
 0x5c5   :  { %v3460_v20 = vpack.c.b16 %v3459_v50, %v3458_v63  ;;  %4146 = vmatpush.bf16.msrb.mxu1 %v8896_v13  ;;  %v9088_v13 = vor.u32 %v10455_v43, %v9085_v44  ;;  %v393_v47 = vadd.f32 %v14166_v15, %v11556_v9  ;;  %v14167_v63 = vld [vmem:[#allocation39_spill] sm:$0xff]  ;;  %v14169_v40 = vld [vmem:[#allocation41_spill] sm:$0xff]  ;;  %v14172_v41 = vld [vmem:[#allocation44_spill] sm:$0xff] }
 0x5c6   :  { %4195 = vmatpush.bf16.msrb.mxu2 %v8900_v60  ;;  %v9096_v60 = vor.u32 %v10456_v22, %v9093_v29  ;;  %v442_v50 = vadd.f32 %v14167_v63, %v11561_v2  ;;  %v542_v23 = vadd.f32 %v14172_v41, %v11570_v53  ;;  %v9091_v63 = vld [vmem:[#allocation8 + $0x188] sm:$0xf] }
 0x5c7   :  { %3630 = vmatmul.bf16.vlgmr.msra.gmra.mxu0 %v3460_v20  ;;  %3644 = vmatmul.bf16.vlgmr.msra.gmra.mxu1 %v3460_v20 }
 0x5c8   :  { %3658 = vmatmul.bf16.vlgmr.msra.gmra.mxu2 %v3460_v20  ;;  %3672 = vmatmul.bf16.vlgmr.msra.gmra.mxu3 %v3460_v20 }
 0x5c9   :  { %4244 = vmatpush.bf16.msrb.mxu3 %v8904_v54  ;;  %4552 = vmatpush.bf16.msra.mxu0 %v9132_v10  ;;  %v540_v10 = vadd.f32 %v14168_v62, %v11570_v53 }
 0x5ca   :  { %4566 = vmatpush.bf16.msra.mxu1 %v9136_v59  ;;  %4580 = vmatpush.bf16.msra.mxu2 %v9140_v11  ;;  %v10405_v14 = vld [vmem:[#allocation2 + $0x28] sm:$0xff]  ;;  %v395_v59 = vadd.f32 %v14169_v40, %v11556_v9  ;;  %v14171_v9 = vld [vmem:[#allocation43_spill] sm:$0xff]  ;;  %v10453_v40 = vld [vmem:[#allocation8 + $0x16c] sm:$0xf0] }
 0x5cb   :  { %v491_v37 = vadd.f32 %v14171_v9, %v11583_v61 }
 0x5cd   :  { %4594 = vmatpush.bf16.msra.mxu3 %v9144_v12  ;;  %4553 = vmatpush.bf16.msra.mxu0 %v9116_v19 }
 0x5ce   :  { %4567 = vmatpush.bf16.msra.mxu1 %v9120_v6  ;;  %4581 = vmatpush.bf16.msra.mxu2 %v9124_v57 }
 0x5d1   :  { %4595 = vmatpush.bf16.msra.mxu3 %v9128_v24  ;;  %4554 = vmatpush.bf16.msra.mxu0 %v9100_v35 }
 0x5d2   :  { %4568 = vmatpush.bf16.msra.mxu1 %v9104_v18  ;;  %4582 = vmatpush.bf16.msra.mxu2 %v9108_v36 }
 0x5d5   :  { %4596 = vmatpush.bf16.msra.mxu3 %v9112_v26  ;;  %4555 = vmatpush.bf16.msra.mxu0 %v9084_v28 }
 0x5d6   :  { %4569 = vmatpush.bf16.msra.mxu1 %v9088_v13 }
 0x5d7   :  { %4098 = vmatmul.bf16.vlgmr.msrb.gmra.mxu0 %v10399_v4  ;;  %4147 = vmatmul.bf16.vlgmr.msrb.gmra.mxu1 %v10399_v4 }
 0x5d8   :  { %4196 = vmatmul.bf16.vlgmr.msrb.gmra.mxu2 %v10399_v4  ;;  %4245 = vmatmul.bf16.vlgmr.msrb.gmra.mxu3 %v10399_v4 }
 0x5d9   :  { %4597 = vmatpush.bf16.msra.mxu3 %v9096_v60 }
 0x5e7   :  { %4103 = vmatmul.bf16.gmra.mxu0 %v10400_v42  ;;  %4152 = vmatmul.bf16.gmra.mxu1 %v10400_v42 }
 0x5e8   :  { %4201 = vmatmul.bf16.gmra.mxu2 %v10400_v42  ;;  %4250 = vmatmul.bf16.gmra.mxu3 %v10400_v42 }
 0x5f7   :  { %4108 = vmatmul.bf16.gmra.mxu0 %v10401_v8  ;;  %4157 = vmatmul.bf16.gmra.mxu1 %v10401_v8 }
 0x5f8   :  { %4206 = vmatmul.bf16.gmra.mxu2 %v10401_v8  ;;  %4255 = vmatmul.bf16.gmra.mxu3 %v10401_v8  ;;  %v14170_v8 = vld [vmem:[#allocation42_spill] sm:$0xff] }
 0x5f9   :  { %v444_v30 = vadd.f32 %v14170_v8, %v11561_v2 }
 0x607   :  { %4113 = vmatmul.bf16.gmra.mxu0 %v10402_v17  ;;  %4162 = vmatmul.bf16.gmra.mxu1 %v10402_v17 }
 0x608   :  { %4211 = vmatmul.bf16.gmra.mxu2 %v10402_v17  ;;  %4260 = vmatmul.bf16.gmra.mxu3 %v10402_v17 }
 0x617   :  { %4118 = vmatmul.bf16.gmra.mxu0 %v10403_v1  ;;  %4167 = vmatmul.bf16.gmra.mxu1 %v10403_v1 }
 0x618   :  { %4216 = vmatmul.bf16.gmra.mxu2 %v10403_v1  ;;  %4265 = vmatmul.bf16.gmra.mxu3 %v10403_v1  ;;  %v14173_v1 = vld [vmem:[#allocation45_spill] sm:$0xff] }
 0x619   :  { %v493_v46 = vadd.f32 %v14173_v1, %v11583_v61 }
 0x627   :  { %4123 = vmatmul.bf16.gmra.mxu0 %v10404_v58  ;;  %4172 = vmatmul.bf16.gmra.mxu1 %v10404_v58 }
 0x628   :  { %4221 = vmatmul.bf16.gmra.mxu2 %v10404_v58  ;;  %4270 = vmatmul.bf16.gmra.mxu3 %v10404_v58 }
 0x637   :  { %4128 = vmatmul.bf16.gmra.mxu0 %v10405_v14  ;;  %4177 = vmatmul.bf16.gmra.mxu1 %v10405_v14 }
 0x638   :  { %4226 = vmatmul.bf16.gmra.mxu2 %v10405_v14  ;;  %4275 = vmatmul.bf16.gmra.mxu3 %v10405_v14 }
 0x644   :  { %v3631_v20 = vpop.f32.mrf.mxu0  ;;  %v3645_v54 = vpop.f32.mrf.mxu1 }
 0x645   :  { %v3678_v4 = vadd.f32 %v3631_v20, %v393_v47  ;;  %v3679_v42 = vadd.f32 %v3645_v54, %v442_v50 }
 0x647   :  { %v8846_v0 = vmul.f32 -1.442695, %v3678_v4  ;;  %v8848_v27 = vmul.f32 -1.442695, %v3679_v42  ;;  %v10458_v42 = vld [vmem:[#allocation8 + $0x194] sm:$0xf0] }
 0x649   :  { %10968 = vpow2.f32 %v8846_v0  ;;  %v9067_v0 = vld [vmem:[#allocation8 + $0x160] sm:$0xf] }
 0x64a   :  { %10970 = vpow2.f32 %v8848_v27 }
 0x64b   :  { %v3673_v7 = vpop.f32.mrf.mxu3  ;;  %v3659_v51 = vpop.f32.mrf.mxu2 }
 0x64c   :  { %v3681_v56 = vadd.f32 %v3673_v7, %v540_v10  ;;  %v3633_v12 = vpop.f32.mrf.mxu0  ;;  %v3647_v49 = vpop.f32.mrf.mxu1  ;;  %v3680_v2 = vadd.f32 %v3659_v51, %v491_v37 }
 0x64d   :  { %v3682_v48 = vadd.f32 %v3633_v12, %v395_v59  ;;  %v3683_v11 = vadd.f32 %v3647_v49, %v444_v30  ;;  %v10451_v59 = vld [vmem:[#allocation8 + $0x164] sm:$0xf]  ;;  %v9068_v12 = vor.u32 %v10453_v40, %v9067_v0  ;;  %v9069_v49 = vld [vmem:[#allocation8 + $0x170] sm:$0xf0]  ;;  %v10450_v0 = vld [vmem:[#allocation8 + $0x154] sm:$0xf0] }
 0x64e   :  { %v8850_v19 = vmul.f32 -1.442695, %v3681_v56  ;;  %v9092_v56 = vor.u32 %v10458_v42, %v9091_v63  ;;  %v9072_v9 = vor.u32 %v10451_v59, %v9069_v49 }
 0x64f   :  { %v10969_v21 = vpop.eup %10968  ;;  %v8847_v5 = vmul.f32 -1.442695, %v3682_v48  ;;  %v8849_v32 = vmul.f32 -1.442695, %v3683_v11  ;;  %4556 = vmatpush.bf16.msra.mxu0 %v9068_v12 }
 0x650   :  { %v10971_v6 = vpop.eup %10970  ;;  %v3692_v17 = vadd.f32 1.0, %v10969_v21  ;;  %10972 = vpow2.f32 %v8850_v19  ;;  %v10452_v21 = vld [vmem:[#allocation8 + $0x16c] sm:$0xf]  ;;  %4583 = vmatpush.bf16.msra.mxu2 %v9092_v56  ;;  %4570 = vmatpush.bf16.msra.mxu1 %v9072_v9 }
 0x651   :  { %v3730_v31 = vadd.f32 1.0, %v10971_v6  ;;  %10974 = vpow2.f32 %v8847_v5  ;;  %v9077_v5 = vld [vmem:[#allocation8 + $0x178] sm:$0xf0] }
 0x652   :  { %10976 = vrcp.f32 %v3692_v17  ;;  %v3703_v55 = vand.u32 2147483647, %v3692_v17  ;;  %v3705_v36 = vand.u32 2147483648, %v3692_v17  ;;  %vm3699_vm9 = vweird.f32 %v3692_v17 }
 0x653   :  { %10978 = vrcp.f32 %v3730_v31  ;;  %v3675_v24 = vpop.f32.mrf.mxu3  ;;  %v3661_v25 = vpop.f32.mrf.mxu2  ;;  %v3743_v14 = vand.u32 2147483648, %v3730_v31  ;;  %v3741_v38 = vand.u32 2147483647, %v3730_v31  ;;  %vm3737_vm8 = vweird.f32 %v3730_v31 }
 0x654   :  { %10980 = vpow2.f32 %v8849_v32  ;;  %v3685_v39 = vadd.f32 %v3675_v24, %v542_v23  ;;  %v3684_v16 = vadd.f32 %v3661_v25, %v493_v46  ;;  %vm12701_vm10 = vcmp.eq.f32.partialorder %v3703_v55, 8.507059e+37 }
 0x655   :  { %10982 = vtanh.f32 %v3680_v2  ;;  %v3706_v47 = vor.u32 1.1754944e-38, %v3705_v36  ;;  %v3744_v20 = vor.u32 1.1754944e-38, %v3743_v14  ;;  %vm12709_vm13 = vcmp.eq.f32.partialorder %v3741_v38, 8.507059e+37  ;;  %v9075_v36 = vld [vmem:[#allocation8 + $0x168] sm:$0xf] }
 0x656   :  { %v10973_v34 = vpop.eup %10972  ;;  %v8851_v61 = vmul.f32 -1.442695, %v3685_v39  ;;  %v9051_v38 = vld [vmem:[#allocation8 + $0x140] sm:$0xf] }
 0x657   :  { %v10975_v57 = vpop.eup %10974  ;;  %v12691_v35 = vadd.f32 1.0, %v10973_v34 }
 0x658   :  { %v10977_v18 = vpop.eup %10976  ;;  %v12695_v33 = vadd.f32 1.0, %v10975_v57 }
 0x659   :  { %v10979_v26 = vpop.eup %10978  ;;  %v3695_v3 = vmul.f32 %v10977_v18, %v3692_v17  ;;  %10984 = vrcp.f32 %v12691_v35  ;;  %vm3700_vm11 = vweird.f32 %v10977_v18  ;;  %v3783_v13 = vand.u32 2147483648, %v12691_v35 }
 0x65a   :  { %v10981_v53 = vpop.eup %10980  ;;  %v3733_v58 = vmul.f32 %v10979_v26, %v3730_v31  ;;  %10986 = vrcp.f32 %v12695_v33  ;;  %vm3738_vm12 = vweird.f32 %v10979_v26  ;;  %vm3701_vm14 = vmor %vm3699_vm9, %vm3700_vm11  ;;  %vm3777_vm15 = vweird.f32 %v12691_v35 }
 0x65b   :  { %v3696_v43 = vsub.f32 1.0, %v3695_v3  ;;  %v12699_v28 = vadd.f32 1.0, %v10981_v53  ;;  %v10983_v60 = vpop.eup %10982  ;;  %v3781_v10 = vand.u32 2147483647, %v12691_v35  ;;  %vm3739_vm0 = vmor %vm3737_vm8, %vm3738_vm12  ;;  %v12723_v7 = vor.u32 1.1754944e-38, %v3783_v13 }
 0x65c   :  { %v3734_v44 = vsub.f32 1.0, %v3733_v58  ;;  %v3718_v31 = vand.u32 2147483647, %v12695_v33  ;;  %v3720_v25 = vand.u32 2147483648, %v12695_v33  ;;  %vm3714_vm4 = vweird.f32 %v12695_v33  ;;  %v10454_v53 = vld [vmem:[#allocation8 + $0x174] sm:$0xf0] }
 0x65d   :  { %v3697_v29 = vmul.f32 %v10977_v18, %v3696_v43  ;;  %10988 = vrcp.f32 %v12699_v28  ;;  %vm12739_vm2 = vcmp.eq.f32.partialorder %v3781_v10, 8.507059e+37  ;;  %v3756_v39 = vand.u32 2147483647, %v12699_v28  ;;  %v9053_v13 = vld [vmem:[#allocation8 + $0x150] sm:$0xf0] }
 0x65e   :  { %v3735_v15 = vmul.f32 %v10979_v26, %v3734_v44  ;;  %10990 = vtanh.f32 %v3684_v16  ;;  %vm3719_vm8 = vcmp.eq.f32.partialorder %v3718_v31, 8.507059e+37  ;;  %v3721_v43 = vor.u32 1.1754944e-38, %v3720_v25  ;;  %v10439_v31 = vld [vmem:[#allocation8 + $0x104] sm:$0xf]  ;;  %v9027_v25 = vld [vmem:[#allocation8 + $0x108] sm:$0xf]  ;;  %v12787_v16 = vpop.f32.mrf.mxu0 }
 0x65f   :  { %v12707_v50 = vpop.eup %10984  ;;  %v3698_v54 = vadd.f32 %v10977_v18, %v3697_v29  ;;  %10992 = vpow2.f32 %v8851_v61  ;;  %v10447_v61 = vld [vmem:[#allocation8 + $0x144] sm:$0xf]  ;;  %vm3752_vm9 = vweird.f32 %v12699_v28  ;;  %v9076_v29 = vor.u32 %v10454_v53, %v9075_v36 }
 0x660   :  { %v3736_v27 = vadd.f32 %v10979_v26, %v3735_v15  ;;  %v3773_v62 = vmul.f32 %v12707_v50, %v12691_v35  ;;  %v12719_v8 = vpop.eup %10986  ;;  %vm3778_vm1 = vweird.f32 %v12707_v50  ;;  %v10449_v35 = vld [vmem:[#allocation8 + $0x14c] sm:$0xf0]  ;;  %v9061_v15 = vld [vmem:[#allocation8 + $0x158] sm:$0xf0]  ;;  %vm3757_vm11 = vcmp.eq.f32.partialorder %v3756_v39, 8.507059e+37 }
 0x661   :  { %v3702_v30 = vsel %vm3701_vm14, %v10977_v18, %v3698_v54  ;;  %v3710_v19 = vmul.f32 %v12719_v8, %v12695_v33  ;;  %v9080_v18 = vor.u32 %v10452_v21, %v9077_v5  ;;  %vm3715_vm3 = vweird.f32 %v12719_v8  ;;  %vm12756_vm5 = vmor %vm3777_vm15, %vm3778_vm1  ;;  %4584 = vmatpush.bf16.msra.mxu2 %v9076_v29  ;;  %v10442_v39 = vld [vmem:[#allocation8 + $0x114] sm:$0xf0] }
 0x662   :  { %v3707_v51 = vsel %vm12701_vm10, %v3706_v47, %v3702_v30  ;;  %v3740_v48 = vsel %vm3739_vm0, %v10979_v26, %v3736_v27  ;;  %v3774_v11 = vsub.f32 1.0, %v3773_v62  ;;  %v3758_v26 = vand.u32 2147483648, %v12699_v28  ;;  %vm12763_vm7 = vmor %vm3714_vm4, %vm3715_vm3  ;;  %v9035_v27 = vld [vmem:[#allocation8 + $0x120] sm:$0xf]  ;;  %v10445_v62 = vld [vmem:[#allocation8 + $0x12c] sm:$0xf0] }
 0x663   :  { %v12729_v6 = vpop.eup %10988  ;;  %v3745_v17 = vsel %vm12709_vm13, %v3744_v20, %v3740_v48  ;;  %v3804_v32 = vmul.f32 %v10983_v60, %v3707_v51  ;;  %v3711_v41 = vsub.f32 1.0, %v3710_v19  ;;  %4598 = vmatpush.bf16.msra.mxu3 %v9080_v18  ;;  %v10448_v60 = vld [vmem:[#allocation8 + $0x14c] sm:$0xf]  ;;  %v9052_v42 = vor.u32 %v10449_v35, %v9051_v38  ;;  %v9045_v51 = vld [vmem:[#allocation8 + $0x138] sm:$0xf0] }
 0x664   :  { %v10991_v37 = vpop.eup %10990  ;;  %v3802_v2 = vmul.f32 %v3745_v17, %v12595_v52  ;;  %v3775_v24 = vmul.f32 %v12707_v50, %v3774_v11  ;;  %v3748_v23 = vmul.f32 %v12729_v6, %v12699_v28  ;;  %vm3753_vm6 = vweird.f32 %v12729_v6  ;;  %v9059_v28 = vld [vmem:[#allocation8 + $0x148] sm:$0xf]  ;;  %v10444_v30 = vld [vmem:[#allocation8 + $0x12c] sm:$0xf]  ;;  %v10446_v11 = vld [vmem:[#allocation8 + $0x134] sm:$0xf0] }
 0x665   :  { %v10993_v34 = vpop.eup %10992  ;;  %v3712_v46 = vmul.f32 %v12719_v8, %v3711_v41  ;;  %vm3754_vm10 = vmor %vm3752_vm9, %vm3753_vm6  ;;  %v3759_v63 = vor.u32 1.1754944e-38, %v3758_v26  ;;  %v9056_v40 = vor.u32 %v10447_v61, %v9053_v13  ;;  %v9064_v59 = vor.u32 %v10448_v60, %v9061_v15  ;;  %4557 = vmatpush.bf16.msra.mxu0 %v9052_v42  ;;  %v9043_v48 = vld [vmem:[#allocation8 + $0x128] sm:$0xf]  ;;  %v9019_v17 = vld [vmem:[#allocation8 + $0x100] sm:$0xf]  ;;  %v12791_v61 = vpop.f32.mrf.mxu2 }
 0x666   :  { %v3806_v52 = vadd.f32 %v3804_v32, %v3802_v2  ;;  %v3749_v1 = vsub.f32 1.0, %v3748_v23  ;;  %v3776_v55 = vadd.f32 %v12707_v50, %v3775_v24  ;;  %v12750_v3 = vadd.f32 1.0, %v10993_v34  ;;  %v10441_v32 = vld [vmem:[#allocation8 + $0x10c] sm:$0xf0]  ;;  %v10440_v24 = vld [vmem:[#allocation8 + $0x10c] sm:$0xf] }
 0x667   :  { %v3713_v33 = vadd.f32 %v12719_v8, %v3712_v46  ;;  %4571 = vmatpush.bf16.msra.mxu1 %v9056_v40  ;;  %4599 = vmatpush.bf16.msra.mxu3 %v9064_v59  ;;  %v9060_v5 = vor.u32 %v10450_v0, %v9059_v28  ;;  %v9048_v41 = vor.u32 %v10444_v30, %v9045_v51  ;;  %v12832_v59 = vld [vmem:[%s14010_s7] sm:$0xff]  ;;  %v12841_v30 = vld [vmem:[%s14010_s7 + $0x8] sm:$0xff] }
 0x668   :  { %10994 = vtanh.f32 %v3806_v52  ;;  %v3750_v14 = vmul.f32 %v12729_v6, %v3749_v1  ;;  %v3780_v47 = vsel %vm12756_vm5, %v12707_v50, %v3776_v55  ;;  %v9037_v50 = vld [vmem:[#allocation8 + $0x130] sm:$0xf0]  ;;  %v9044_v23 = vor.u32 %v10446_v11, %v9043_v48 }
 0x669   :  { %10996 = vrcp.f32 %v12750_v3  ;;  %v3717_v44 = vsel %vm12763_vm7, %v12719_v8, %v3713_v33  ;;  %v10443_v8 = vld [vmem:[#allocation8 + $0x124] sm:$0xf]  ;;  %v3785_v12 = vsel %vm12739_vm2, %v12723_v7, %v3780_v47  ;;  %v9021_v7 = vld [vmem:[#allocation8 + $0x110] sm:$0xf0]  ;;  %4585 = vmatpush.bf16.msra.mxu2 %v9060_v5  ;;  %v9020_v57 = vor.u32 %v10441_v32, %v9019_v17 }
 0x66a   :  { %v3751_v22 = vadd.f32 %v12729_v6, %v3750_v14  ;;  %v3722_v20 = vsel %vm3719_vm8, %v3721_v43, %v3717_v44  ;;  %v9040_v2 = vor.u32 %v10443_v8, %v9037_v50  ;;  %v3798_v18 = vand.u32 2147483648, %v12750_v3  ;;  %v12789_v43 = vpop.f32.mrf.mxu1  ;;  %v12795_v44 = vpop.f32.mrf.mxu0 }
 0x66b   :  { %v3805_v4 = vmul.f32 %v10991_v37, %v3722_v20  ;;  %4600 = vmatpush.bf16.msra.mxu3 %v9048_v41  ;;  %v9024_v52 = vor.u32 %v10439_v31, %v9021_v7  ;;  %v3796_v55 = vand.u32 2147483647, %v12750_v3  ;;  %v9028_v26 = vor.u32 %v10442_v39, %v9027_v25  ;;  %v8853_v20 = vld [vmem:[%s14008_s5 + $0x18] sm:$0xff] }
 0x66c   :  { %v3755_v54 = vsel %vm3754_vm10, %v12729_v6, %v3751_v22  ;;  %v9036_v6 = vor.u32 %v10445_v62, %v9035_v27  ;;  %4572 = vmatpush.bf16.msra.mxu1 %v9040_v2  ;;  %vm3792_vm13 = vweird.f32 %v12750_v3  ;;  %v3799_v53 = vor.u32 1.1754944e-38, %v3798_v18 }
 0x66d   :  { %v3760_v10 = vsel %vm3757_vm11, %v3759_v63, %v3755_v54  ;;  %4586 = vmatpush.bf16.msra.mxu2 %v9044_v23  ;;  %vm3797_vm15 = vcmp.eq.f32.partialorder %v3796_v55, 8.507059e+37  ;;  %v12799_v13 = vpop.f32.mrf.mxu2  ;;  %v8852_v63 = vld [vmem:[%s14008_s5 + $0x10] sm:$0xff]  ;;  %v14012_v8 = vmov 0   ;;  %vm4742_vm0 = vcmp.gt.s32.totalorder %v12832_v59, 0 }
 0x66e   :  { %v10995_v56 = vpop.eup %10994  ;;  %v3803_v49 = vmul.f32 %v3760_v10, %v12642_v45  ;;  %v9029_v45 = vld [vmem:[#allocation8 + $0x118] sm:$0xf0]  ;;  %4558 = vmatpush.bf16.msra.mxu0 %v9036_v6  ;;  %v4358_v28 = vpack.c.bf16 %v8853_v20, %v8852_v63  ;;  %10741 = vset.pattern.permute.xlu0 %v14012_v8  ;;  %v4744_v50 = vsel %vm4742_vm0, 1, %v14012_v8  ;;  %vm4743_vm1 = vcmp.gt.s32.totalorder %v12841_v30, 0 }
 0x66f   :  { %v10997_v19 = vpop.eup %10996  ;;  %v3810_v21 = vmul.f32 %v10995_v56, %v3785_v12  ;;  %v9032_v1 = vor.u32 %v10440_v24, %v9029_v45  ;;  %10742 = vset.pattern.permute.xlu1 %v14012_v8  ;;  %10743 = vset.pattern.permute.xlu2 %v14012_v8  ;;  %v4745_v48 = vsel %vm4743_vm1, 1, %v14012_v8 }
 0x670   :  { %v3807_v9 = vadd.f32 %v3805_v4, %v3803_v49  ;;  %v3788_v37 = vmul.f32 %v10997_v19, %v12750_v3  ;;  %vm3793_vm12 = vweird.f32 %v10997_v19  ;;  %4573 = vmatpush.bf16.msra.mxu1 %v9024_v52  ;;  %v12793_v3 = vpop.f32.mrf.mxu3  ;;  %4747 = vperm.xlu0 %10741, %v4744_v50  }
 0x671   :  { %vm3794_vm14 = vmor %vm3792_vm13, %vm3793_vm12  ;;  %4601 = vmatpush.bf16.msra.mxu3 %v9032_v1  ;;  %4587 = vmatpush.bf16.msra.mxu2 %v9028_v26 }
 0x672   :  { %10998 = vtanh.f32 %v3807_v9  ;;  %v3789_v34 = vsub.f32 1.0, %v3788_v37  ;;  %4559 = vmatpush.bf16.msra.mxu0 %v9020_v57  ;;  %v12797_v22 = vpop.f32.mrf.mxu1  ;;  %v12803_v15 = vpop.f32.mrf.mxu0 }
 0x674   :  { %v3790_v46 = vmul.f32 %v10997_v19, %v3789_v34 }
 0x675   :  { %v12813_v54 = vpop.f32.mrf.mxu2 }
 0x676   :  { %v3791_v36 = vadd.f32 %v10997_v19, %v3790_v46 }
 0x678   :  { %v10999_v58 = vpop.eup %10998  ;;  %v3795_v14 = vsel %vm3794_vm14, %v10997_v19, %v3791_v36  ;;  %v12801_v60 = vpop.f32.mrf.mxu3  ;;  %4750 = vperm.xlu0 %10741, %v4745_v48  }
 0x679   :  { %v3800_v33 = vsel %vm3797_vm15, %v3799_v53, %v3795_v14 }
 0x67a   :  { %v3811_v38 = vmul.f32 %v10999_v58, %v3800_v33  ;;  %v12805_v47 = vpop.f32.mrf.mxu1  ;;  %v12817_v42 = vpop.f32.mrf.mxu0 }
 0x67c   :  { %v10733_v35 = vpack.c.bf16 %v3811_v38, %v3810_v21 }
 0x67d   :  { %v12821_v27 = vpop.f32.mrf.mxu2 }
 0x67e   :  { %10734 = vst [vmem:[#allocation2 + $0x38] sm:$0xff] %v10733_v35  }
 0x680   :  { %v12815_v4 = vpop.f32.mrf.mxu3 }
 0x682   :  { %v12819_v0 = vpop.f32.mrf.mxu1  ;;  %v12825_v10 = vpop.f32.mrf.mxu0 }
 0x685   :  { %v10406_v29 = vld [vmem:[#allocation2 + $0x38] sm:$0xff]  ;;  %v12844_v56 = vpop.f32.mrf.mxu2 }
 0x686   :  { %4133 = vmatmul.bf16.gmra.mxu0 %v10406_v29  ;;  %4182 = vmatmul.bf16.gmra.mxu1 %v10406_v29 }
 0x687   :  { %4231 = vmatmul.bf16.gmra.mxu2 %v10406_v29  ;;  %4280 = vmatmul.bf16.gmra.mxu3 %v10406_v29 }
 0x688   :  { %v12823_v62 = vpop.f32.mrf.mxu3 }
 0x68a   :  { %v12827_v40 = vpop.f32.mrf.mxu1  ;;  %v12849_v49 = vpop.f32.mrf.mxu0 }
 0x68d   :  { %v12854_v11 = vpop.f32.mrf.mxu2 }
 0x690   :  { %v12846_v12 = vpop.f32.mrf.mxu3 }
 0x692   :  { %v12851_v51 = vpop.f32.mrf.mxu1  ;;  %v12858_v21 = vpop.f32.mrf.mxu0 }
 0x695   :  { %v12862_v6 = vpop.f32.mrf.mxu2 }
 0x696   :  { %4560 = vmatmul.bf16.vlgmr.msra.gmra.mxu0 %v4358_v28  ;;  %4574 = vmatmul.bf16.vlgmr.msra.gmra.mxu1 %v4358_v28  ;;  %14184 = vst [vmem:[#allocation11_spill] sm:$0xff] %v12862_v6 }
 0x697   :  { %4588 = vmatmul.bf16.vlgmr.msra.gmra.mxu2 %v4358_v28  ;;  %4602 = vmatmul.bf16.vlgmr.msra.gmra.mxu3 %v4358_v28  ;;  %v12929_v28 = vld [vmem:[%s14007_s4 + $0x4] sm:$0xf] }
 0x698   :  { %v12856_v19 = vpop.f32.mrf.mxu3 }
 0x69a   :  { %v12860_v5 = vpop.f32.mrf.mxu1  ;;  %v12866_v32 = vpop.f32.mrf.mxu0 }
 0x69d   :  { %v12870_v9 = vpop.f32.mrf.mxu2 }
 0x69e   :  { %14186 = vst [vmem:[#allocation12_spill] sm:$0xff] %v12870_v9 }
 0x6a0   :  { %v12864_v17 = vpop.f32.mrf.mxu3 }
 0x6a2   :  { %v12868_v31 = vpop.f32.mrf.mxu1  ;;  %v12874_v2 = vpop.f32.mrf.mxu0 }
 0x6a3   :  { %14185 = vst [vmem:[#allocation13_spill] sm:$0xff] %v12868_v31 }
 0x6a4   :  { %14188 = vst [vmem:[#allocation15_spill] sm:$0xff] %v12874_v2 }
 0x6a5   :  { %v12878_v24 = vpop.f32.mrf.mxu2 }
 0x6a6   :  { %14190 = vst [vmem:[#allocation18_spill] sm:$0xff] %v12878_v24 }
 0x6a8   :  { %v12872_v37 = vpop.f32.mrf.mxu3 }
 0x6a9   :  { %14187 = vst [vmem:[#allocation14_spill] sm:$0xff] %v12872_v37 }
 0x6aa   :  { %v12876_v7 = vpop.f32.mrf.mxu1  ;;  %v12882_v41 = vpop.f32.mrf.mxu0 }
 0x6ab   :  { %14189 = vst [vmem:[#allocation17_spill] sm:$0xff] %v12876_v7 }
 0x6ac   :  { %14192 = vst [vmem:[#allocation16_spill] sm:$0xff] %v12882_v41 }
 0x6ad   :  { %v12886_v34 = vpop.f32.mrf.mxu2 }
 0x6ae   :  { %14194 = vst [vmem:[#allocation20_spill] sm:$0xff] %v12886_v34 }
 0x6b0   :  { %v12880_v45 = vpop.f32.mrf.mxu3 }
 0x6b1   :  { %14191 = vst [vmem:[#allocation19_spill] sm:$0xff] %v12880_v45 }
 0x6b2   :  { %v12884_v23 = vpop.f32.mrf.mxu1  ;;  %v12890_v25 = vpop.f32.mrf.mxu0 }
 0x6b3   :  { %14193 = vst [vmem:[#allocation21_spill] sm:$0xff] %v12884_v23 }
 0x6b4   :  { %14196 = vst [vmem:[#allocation23_spill] sm:$0xff] %v12890_v25  ;;  %v9259_v25 = vld [vmem:[#allocation8 + $0x1d8] sm:$0xf0] }
 0x6b5   :  { %v12894_v18 = vpop.f32.mrf.mxu2 }
 0x6b6   :  { %14198 = vst [vmem:[#allocation26_spill] sm:$0xff] %v12894_v18  ;;  %v10497_v18 = vld [vmem:[#allocation8 + $0x1cc] sm:$0xf0] }
 0x6b8   :  { %v12888_v57 = vpop.f32.mrf.mxu3 }
 0x6b9   :  { %14195 = vst [vmem:[#allocation22_spill] sm:$0xff] %v12888_v57 }
 0x6ba   :  { %v12892_v39 = vpop.f32.mrf.mxu1  ;;  %v12898_v1 = vpop.f32.mrf.mxu0 }
 0x6bb   :  { %14197 = vst [vmem:[#allocation25_spill] sm:$0xff] %v12892_v39  ;;  %v10496_v39 = vld [vmem:[#allocation8 + $0x1cc] sm:$0xf] }
 0x6bc   :  { %14200 = vst [vmem:[#allocation24_spill] sm:$0xff] %v12898_v1 }
 0x6bd   :  { %v12902_v55 = vpop.f32.mrf.mxu2 }
 0x6be   :  { %14202 = vst [vmem:[#allocation28_spill] sm:$0xff] %v12902_v55  ;;  %v10500_v55 = vld [vmem:[#allocation8 + $0x1ec] sm:$0xf] }
 0x6c0   :  { %v12896_v52 = vpop.f32.mrf.mxu3 }
 0x6c1   :  { %14199 = vst [vmem:[#allocation27_spill] sm:$0xff] %v12896_v52 }
 0x6c2   :  { %v12900_v46 = vpop.f32.mrf.mxu1  ;;  %v12906_v36 = vpop.f32.mrf.mxu0 }
 0x6c3   :  { %14201 = vst [vmem:[#allocation29_spill] sm:$0xff] %v12900_v46  ;;  %v10495_v46 = vld [vmem:[#allocation8 + $0x1c4] sm:$0xf] }
 0x6c4   :  { %14204 = vst [vmem:[#allocation31_spill] sm:$0xff] %v12906_v36 }
 0x6c5   :  { %v12910_v58 = vpop.f32.mrf.mxu2 }
 0x6c6   :  { %14206 = vst [vmem:[#allocation34_spill] sm:$0xff] %v12910_v58 }
 0x6c8   :  { %v12904_v26 = vpop.f32.mrf.mxu3 }
 0x6c9   :  { %14203 = vst [vmem:[#allocation30_spill] sm:$0xff] %v12904_v26 }
 0x6ca   :  { %v12908_v53 = vpop.f32.mrf.mxu1  ;;  %v12914_v33 = vpop.f32.mrf.mxu0 }
 0x6cb   :  { %14205 = vst [vmem:[#allocation33_spill] sm:$0xff] %v12908_v53  ;;  %v9273_v53 = vld [vmem:[#allocation8 + $0x1e8] sm:$0xf] }
 0x6cc   :  { %14208 = vst [vmem:[#allocation32_spill] sm:$0xff] %v12914_v33  ;;  %v10499_v33 = vld [vmem:[#allocation8 + $0x1e4] sm:$0xf] }
 0x6cd   :  { %v12918_v35 = vpop.f32.mrf.mxu2 }
 0x6ce   :  { %14210 = vst [vmem:[#allocation38_spill] sm:$0xff] %v12918_v35  ;;  %v12940_v35 = vperm.slane %v12929_v28, 0 }
 0x6d0   :  { %v12912_v14 = vpop.f32.mrf.mxu3  ;;  %v4100_v1 = vadd.f32 %v12787_v16, %v12940_v35  ;;  %v12954_v16 = vperm.slane %v12929_v28, 3 }
 0x6d1   :  { %14207 = vst [vmem:[#allocation35_spill] sm:$0xff] %v12912_v14  ;;  %v9267_v14 = vld [vmem:[#allocation8 + $0x1f0] sm:$0xf0] }
 0x6d2   :  { %v12916_v38 = vpop.f32.mrf.mxu1  ;;  %v9270_v36 = vor.u32 %v10499_v33, %v9267_v14  ;;  %v9251_v33 = vld [vmem:[#allocation8 + $0x1d0] sm:$0xf0] }
 0x6d3   :  { %14209 = vst [vmem:[#allocation36_spill] sm:$0xff] %v12916_v38 }
 0x6d4   :  { %4973 = vmatpush.bf16.msrb.mxu1 %v9270_v36 }
 0x6d8   :  { %v12920_v29 = vpop.f32.mrf.mxu3 }
 0x6d9   :  { %14211 = vst [vmem:[#allocation37_spill] sm:$0xff] %v12920_v29  ;;  %v10501_v29 = vld [vmem:[#allocation8 + $0x1ec] sm:$0xf0] }
 0x703   :  { %v12922_v63 = vpop.f32.mrf.mxu0  ;;  %v12924_v20 = vpop.f32.mrf.mxu1 }
 0x704   :  { %14212 = vst [vmem:[#allocation39_spill] sm:$0xff] %v12922_v63  ;;  %v12943_v63 = vperm.slane %v12929_v28, 1 }
 0x705   :  { %14213 = vst [vmem:[#allocation40_spill] sm:$0xff] %v12924_v20  ;;  %v9265_v20 = vld [vmem:[#allocation8 + $0x1e0] sm:$0xf] }
 0x706   :  { %v9266_v38 = vor.u32 %v10501_v29, %v9265_v20  ;;  %v4149_v29 = vadd.f32 %v12789_v43, %v12943_v63 }
 0x708   :  { %4959 = vmatpush.bf16.msrb.mxu0 %v9266_v38 }
 0x70a   :  { %v12931_v50 = vpop.f32.mrf.mxu2  ;;  %v12933_v48 = vpop.f32.mrf.mxu3 }
 0x70b   :  { %14214 = vst [vmem:[#allocation41_spill] sm:$0xff] %v12931_v50  ;;  %v12935_v8 = vpop.f32.mrf.mxu0  ;;  %v12937_v58 = vpop.f32.mrf.mxu1  ;;  %v10502_v50 = vld [vmem:[#allocation8 + $0x1f4] sm:$0xf0] }
 0x70c   :  { %14215 = vst [vmem:[#allocation42_spill] sm:$0xff] %v12933_v48  ;;  %v9275_v48 = vld [vmem:[#allocation8 + $0x1f8] sm:$0xf0] }
 0x70d   :  { %14216 = vst [vmem:[#allocation43_spill] sm:$0xff] %v12935_v8  ;;  %v9274_v8 = vor.u32 %v10502_v50, %v9273_v53  ;;  %v9278_v26 = vor.u32 %v10500_v55, %v9275_v48  ;;  %v9257_v53 = vld [vmem:[#allocation8 + $0x1c8] sm:$0xf]  ;;  %v10498_v55 = vld [vmem:[#allocation8 + $0x1d4] sm:$0xf0]  ;;  %v9254_v50 = vor.u32 %v10495_v46, %v9251_v33 }
 0x70e   :  { %14217 = vst [vmem:[#allocation44_spill] sm:$0xff] %v12937_v58  ;;  %v9249_v58 = vld [vmem:[#allocation8 + $0x1c0] sm:$0xf]  ;;  %v9258_v48 = vor.u32 %v10498_v55, %v9257_v53  ;;  %v9235_v46 = vld [vmem:[#allocation8 + $0x1b0] sm:$0xf0] }
 0x70f   :  { %4987 = vmatpush.bf16.msrb.mxu2 %v9274_v8  ;;  %5001 = vmatpush.bf16.msrb.mxu3 %v9278_v26  ;;  %v9250_v14 = vor.u32 %v10497_v18, %v9249_v58  ;;  %v9233_v8 = vld [vmem:[#allocation8 + $0x1a0] sm:$0xf]  ;;  %v10493_v26 = vld [vmem:[#allocation8 + $0x1ac] sm:$0xf0]  ;;  %v10491_v18 = vld [vmem:[#allocation8 + $0x1a4] sm:$0xf] }
 0x710   :  { %4974 = vmatpush.bf16.msrb.mxu1 %v9254_v50  ;;  %v9234_v57 = vor.u32 %v10493_v26, %v9233_v8  ;;  %v9238_v33 = vor.u32 %v10491_v18, %v9235_v46  ;;  %v9241_v53 = vld [vmem:[#allocation8 + $0x1a8] sm:$0xf]  ;;  %v10494_v55 = vld [vmem:[#allocation8 + $0x1b4] sm:$0xf0] }
 0x711   :  { %4960 = vmatpush.bf16.msrb.mxu0 %v9250_v14  ;;  %v9242_v24 = vor.u32 %v10494_v55, %v9241_v53  ;;  %v9217_v14 = vld [vmem:[#allocation8 + $0x180] sm:$0xf]  ;;  %v10490_v8 = vld [vmem:[#allocation8 + $0x194] sm:$0xf0] }
 0x712   :  { %v12949_v20 = vpop.f32.mrf.mxu2  ;;  %v12951_v52 = vpop.f32.mrf.mxu3 }
 0x713   :  { %14218 = vst [vmem:[#allocation45_spill] sm:$0xff] %v12949_v20  ;;  %v4561_v36 = vpop.f32.mrf.mxu0  ;;  %v4575_v38 = vpop.f32.mrf.mxu1  ;;  %v9262_v20 = vor.u32 %v10496_v39, %v9259_v25  ;;  %4988 = vmatpush.bf16.msrb.mxu2 %v9258_v48  ;;  %v4247_v25 = vadd.f32 %v12793_v3, %v12954_v16  ;;  %v9219_v48 = vld [vmem:[#allocation8 + $0x190] sm:$0xf0]  ;;  %v12963_v3 = vperm.slane %v12929_v28, 2 }
 0x714   :  { %14219 = vst [vmem:[#allocation46_spill] sm:$0xff] %v12951_v52  ;;  %v4608_v43 = vadd.f32 %v4561_v36, %v4100_v1  ;;  %v4609_v34 = vadd.f32 %v4575_v38, %v4149_v29  ;;  %v10492_v1 = vld [vmem:[#allocation8 + $0x1ac] sm:$0xf]  ;;  %v9243_v29 = vld [vmem:[#allocation8 + $0x1b8] sm:$0xf0]  ;;  %4975 = vmatpush.bf16.msrb.mxu1 %v9238_v33  ;;  %v4151_v38 = vadd.f32 %v12797_v22, %v12943_v63 }
 0x715   :  { %5002 = vmatpush.bf16.msrb.mxu3 %v9262_v20  ;;  %4961 = vmatpush.bf16.msrb.mxu0 %v9234_v57  ;;  %v9246_v39 = vor.u32 %v10492_v1, %v9243_v29  ;;  %v10487_v36 = vld [vmem:[#allocation8 + $0x184] sm:$0xf]  ;;  %v4102_v20 = vadd.f32 %v12795_v44, %v12940_v35  ;;  %v10488_v33 = vld [vmem:[#allocation8 + $0x18c] sm:$0xf]  ;;  %v9227_v44 = vld [vmem:[#allocation8 + $0x198] sm:$0xf0] }
 0x716   :  { %v9145_v58 = vmul.f32 -1.442695, %v4608_v43  ;;  %v9147_v52 = vmul.f32 -1.442695, %v4609_v34  ;;  %v10489_v34 = vld [vmem:[#allocation8 + $0x18c] sm:$0xf0] }
 0x717   :  { %4989 = vmatpush.bf16.msrb.mxu2 %v9242_v24  ;;  %v9218_v57 = vor.u32 %v10489_v34, %v9217_v14  ;;  %v9225_v43 = vld [vmem:[#allocation8 + $0x188] sm:$0xf]  ;;  %v9230_v24 = vor.u32 %v10488_v33, %v9227_v44  ;;  %v9201_v29 = vld [vmem:[#allocation8 + $0x160] sm:$0xf]  ;;  %v10485_v14 = vld [vmem:[#allocation8 + $0x16c] sm:$0xf0]  ;;  %v4200_v44 = vadd.f32 %v12799_v13, %v12963_v3 }
 0x718   :  { %11000 = vpow2.f32 %v9145_v58  ;;  %v9222_v58 = vor.u32 %v10487_v36, %v9219_v48  ;;  %v9226_v46 = vor.u32 %v10490_v8, %v9225_v43  ;;  %v9209_v8 = vld [vmem:[#allocation8 + $0x168] sm:$0xf]  ;;  %v10479_v33 = vld [vmem:[#allocation8 + $0x144] sm:$0xf] }
 0x719   :  { %11002 = vpow2.f32 %v9147_v52  ;;  %5003 = vmatpush.bf16.msrb.mxu3 %v9246_v39  ;;  %4962 = vmatpush.bf16.msrb.mxu0 %v9218_v57  ;;  %v4198_v39 = vadd.f32 %v12791_v61, %v12963_v3 }
 0x71a   :  { %v4603_v50 = vpop.f32.mrf.mxu3  ;;  %v4589_v53 = vpop.f32.mrf.mxu2  ;;  %4976 = vmatpush.bf16.msrb.mxu1 %v9222_v58  ;;  %v9211_v58 = vld [vmem:[#allocation8 + $0x178] sm:$0xf0] }
 0x71b   :  { %v4611_v52 = vadd.f32 %v4603_v50, %v4247_v25  ;;  %v4563_v26 = vpop.f32.mrf.mxu0  ;;  %v4577_v18 = vpop.f32.mrf.mxu1  ;;  %4990 = vmatpush.bf16.msrb.mxu2 %v9226_v46  ;;  %v9202_v25 = vor.u32 %v10485_v14, %v9201_v29  ;;  %v10483_v50 = vld [vmem:[#allocation8 + $0x164] sm:$0xf]  ;;  %v4610_v43 = vadd.f32 %v4589_v53, %v4198_v39  ;;  %v9185_v46 = vld [vmem:[#allocation8 + $0x140] sm:$0xf] }
 0x71c   :  { %v4612_v55 = vadd.f32 %v4563_v26, %v4102_v20  ;;  %v4613_v22 = vadd.f32 %v4577_v18, %v4151_v38  ;;  %v9203_v38 = vld [vmem:[#allocation8 + $0x170] sm:$0xf0]  ;;  %v4249_v26 = vadd.f32 %v12801_v60, %v12954_v16  ;;  %v10484_v18 = vld [vmem:[#allocation8 + $0x16c] sm:$0xf] }
 0x71d   :  { %v9149_v1 = vmul.f32 -1.442695, %v4611_v52  ;;  %5004 = vmatpush.bf16.msrb.mxu3 %v9230_v24  ;;  %4963 = vmatpush.bf16.msrb.mxu0 %v9202_v25  ;;  %v9206_v48 = vor.u32 %v10483_v50, %v9203_v38  ;;  %v10486_v52 = vld [vmem:[#allocation8 + $0x174] sm:$0xf0]  ;;  %v9193_v24 = vld [vmem:[#allocation8 + $0x148] sm:$0xf]  ;;  %v9214_v60 = vor.u32 %v10484_v18, %v9211_v58 }
 0x71e   :  { %v11001_v34 = vpop.eup %11000  ;;  %v9146_v28 = vmul.f32 -1.442695, %v4612_v55  ;;  %v9148_v20 = vmul.f32 -1.442695, %v4613_v22  ;;  %v9210_v53 = vor.u32 %v10486_v52, %v9209_v8  ;;  %v9187_v22 = vld [vmem:[#allocation8 + $0x150] sm:$0xf0] }
 0x71f   :  { %v11003_v23 = vpop.eup %11002  ;;  %v12967_v36 = vadd.f32 1.0, %v11001_v34  ;;  %11004 = vpow2.f32 %v9149_v1  ;;  %4977 = vmatpush.bf16.msrb.mxu1 %v9206_v48  ;;  %v9190_v14 = vor.u32 %v10479_v33, %v9187_v22  ;;  %v10482_v34 = vld [vmem:[#allocation8 + $0x154] sm:$0xf0]  ;;  %v9195_v25 = vld [vmem:[#allocation8 + $0x158] sm:$0xf0] }
 0x720   :  { %v12969_v57 = vadd.f32 1.0, %v11003_v23  ;;  %11006 = vpow2.f32 %v9146_v28  ;;  %v10481_v23 = vld [vmem:[#allocation8 + $0x14c] sm:$0xf0]  ;;  %v10480_v28 = vld [vmem:[#allocation8 + $0x14c] sm:$0xf]  ;;  %4991 = vmatpush.bf16.msrb.mxu2 %v9210_v53  ;;  %v9194_v48 = vor.u32 %v10482_v34, %v9193_v24 }
 0x721   :  { %11008 = vrcp.f32 %v12967_v36  ;;  %v9186_v29 = vor.u32 %v10481_v23, %v9185_v46  ;;  %v4633_v39 = vand.u32 2147483647, %v12967_v36  ;;  %5005 = vmatpush.bf16.msrb.mxu3 %v9214_v60  ;;  %vm4629_vm2 = vweird.f32 %v12967_v36 }
 0x722   :  { %11010 = vrcp.f32 %v12969_v57  ;;  %v4605_v61 = vpop.f32.mrf.mxu3  ;;  %v4591_v13 = vpop.f32.mrf.mxu2  ;;  %v4673_v52 = vand.u32 2147483648, %v12969_v57  ;;  %v4671_v46 = vand.u32 2147483647, %v12969_v57  ;;  %vm4667_vm6 = vweird.f32 %v12969_v57 }
 0x723   :  { %11012 = vpow2.f32 %v9148_v20  ;;  %v4615_v55 = vadd.f32 %v4605_v61, %v4249_v26  ;;  %v4635_v20 = vand.u32 2147483648, %v12967_v36  ;;  %4964 = vmatpush.bf16.msrb.mxu0 %v9186_v29  ;;  %v9198_v61 = vor.u32 %v10480_v28, %v9195_v25  ;;  %4978 = vmatpush.bf16.msrb.mxu1 %v9190_v14  ;;  %v9169_v25 = vld [vmem:[#allocation8 + $0x120] sm:$0xf] }
 0x724   :  { %11014 = vtanh.f32 %v4610_v43  ;;  %v4614_v53 = vadd.f32 %v4591_v13, %v4200_v44  ;;  %vm12990_vm3 = vcmp.eq.f32.partialorder %v4633_v39, 8.507059e+37  ;;  %4992 = vmatpush.bf16.msrb.mxu2 %v9194_v48  ;;  %v4674_v29 = vor.u32 1.1754944e-38, %v4673_v52  ;;  %v10475_v39 = vld [vmem:[#allocation8 + $0x124] sm:$0xf]  ;;  %v9177_v48 = vld [vmem:[#allocation8 + $0x128] sm:$0xf] }
 0x725   :  { %v11005_v1 = vpop.eup %11004  ;;  %v9150_v26 = vmul.f32 -1.442695, %v4615_v55  ;;  %v4636_v14 = vor.u32 1.1754944e-38, %v4635_v20  ;;  %5006 = vmatpush.bf16.msrb.mxu3 %v9198_v61  ;;  %vm12996_vm5 = vcmp.eq.f32.partialorder %v4671_v46, 8.507059e+37 }
 0x726   :  { %v11007_v50 = vpop.eup %11006  ;;  %v12979_v38 = vadd.f32 1.0, %v11005_v1 }
 0x727   :  { %v11009_v8 = vpop.eup %11008  ;;  %v12982_v43 = vadd.f32 1.0, %v11007_v50  ;;  %v10477_v50 = vld [vmem:[#allocation8 + $0x12c] sm:$0xf0] }
 0x728   :  { %v11011_v18 = vpop.eup %11010  ;;  %v4625_v58 = vmul.f32 %v11009_v8, %v12967_v36  ;;  %11016 = vrcp.f32 %v12979_v38  ;;  %vm4630_vm4 = vweird.f32 %v11009_v8  ;;  %vm4707_vm11 = vweird.f32 %v12979_v38 }
 0x729   :  { %v11013_v23 = vpop.eup %11012  ;;  %v4663_v33 = vmul.f32 %v11011_v18, %v12969_v57  ;;  %11018 = vrcp.f32 %v12982_v43  ;;  %vm4668_vm7 = vweird.f32 %v11011_v18  ;;  %vm4644_vm8 = vweird.f32 %v12982_v43  ;;  %vm4631_vm9 = vmor %vm4629_vm2, %vm4630_vm4 }
 0x72a   :  { %v4626_v22 = vsub.f32 1.0, %v4625_v58  ;;  %v12994_v24 = vadd.f32 1.0, %v11013_v23  ;;  %v11015_v1 = vpop.eup %11014  ;;  %11020 = vpow2.f32 %v9150_v26  ;;  %v4650_v52 = vand.u32 2147483648, %v12982_v43  ;;  %v9171_v26 = vld [vmem:[#allocation8 + $0x130] sm:$0xf0]  ;;  %vm13022_vm10 = vmor %vm4667_vm6, %vm4668_vm7 }
 0x72b   :  { %v4664_v60 = vsub.f32 1.0, %v4663_v33  ;;  %v8854_v58 = vld [vmem:[%s14009_s6 + $0x10] sm:$0xff]  ;;  %v10478_v33 = vld [vmem:[#allocation8 + $0x134] sm:$0xf0]  ;;  %v9174_v2 = vor.u32 %v10475_v39, %v9171_v26 }
 0x72c   :  { %v4627_v34 = vmul.f32 %v11009_v8, %v4626_v22  ;;  %11022 = vrcp.f32 %v12994_v24  ;;  %vm4682_vm13 = vweird.f32 %v12994_v24  ;;  %v10472_v22 = vld [vmem:[#allocation8 + $0x10c] sm:$0xf] }
 0x72d   :  { %v4665_v28 = vmul.f32 %v11011_v18, %v4664_v60  ;;  %11024 = vtanh.f32 %v4614_v53  ;;  %v4713_v53 = vand.u32 2147483648, %v12979_v38  ;;  %4979 = vmatpush.bf16.msrb.mxu1 %v9174_v2 }
 0x72e   :  { %v13002_v13 = vpop.eup %11016  ;;  %v4628_v20 = vadd.f32 %v11009_v8, %v4627_v34  ;;  %v4688_v34 = vand.u32 2147483648, %v12994_v24 }
 0x72f   :  { %v13007_v61 = vpop.eup %11018  ;;  %v4666_v46 = vadd.f32 %v11011_v18, %v4665_v28  ;;  %v4703_v23 = vmul.f32 %v13002_v13, %v12979_v38  ;;  %v9170_v28 = vor.u32 %v10477_v50, %v9169_v25  ;;  %vm4708_vm14 = vweird.f32 %v13002_v13 }
 0x730   :  { %v4632_v60 = vsel %vm4631_vm9, %v11009_v8, %v4628_v20  ;;  %v4640_v36 = vmul.f32 %v13007_v61, %v12982_v43  ;;  %v11021_v41 = vpop.eup %11020  ;;  %v10476_v8 = vld [vmem:[#allocation8 + $0x12c] sm:$0xf]  ;;  %v9179_v20 = vld [vmem:[#allocation8 + $0x138] sm:$0xf0]  ;;  %vm4645_vm12 = vweird.f32 %v13007_v61  ;;  %vm13068_vm2 = vmor %vm4707_vm11, %vm4708_vm14 }
 0x731   :  { %v4637_v45 = vsel %vm12990_vm3, %v4636_v14, %v4632_v60  ;;  %v4670_v57 = vsel %vm13022_vm10, %v11011_v18, %v4666_v46  ;;  %v4704_v7 = vsub.f32 1.0, %v4703_v23  ;;  %v13038_v50 = vadd.f32 1.0, %v11021_v41  ;;  %4965 = vmatpush.bf16.msrb.mxu0 %v9170_v28  ;;  %v10473_v41 = vld [vmem:[#allocation8 + $0x10c] sm:$0xf0]  ;;  %v10471_v46 = vld [vmem:[#allocation8 + $0x104] sm:$0xf]  ;;  %vm4646_vm0 = vmor %vm4644_vm8, %vm4645_vm12 }
 0x732   :  { %v13034_v9 = vpop.eup %11022  ;;  %v4675_v37 = vsel %vm12996_vm5, %v4674_v29, %v4670_v57  ;;  %v4734_v6 = vmul.f32 %v11015_v1, %v4637_v45  ;;  %v4641_v25 = vsub.f32 1.0, %v4640_v36  ;;  %v9178_v29 = vor.u32 %v10478_v33, %v9177_v48  ;;  %v9153_v1 = vld [vmem:[#allocation8 + $0x100] sm:$0xf]  ;;  %v9155_v48 = vld [vmem:[#allocation8 + $0x110] sm:$0xf0] }
 0x733   :  { %v11025_v31 = vpop.eup %11024  ;;  %v4732_v55 = vmul.f32 %v8854_v58, %v4675_v37  ;;  %v4678_v14 = vmul.f32 %v13034_v9, %v12994_v24  ;;  %v4705_v18 = vmul.f32 %v13002_v13, %v4704_v7  ;;  %11026 = vrcp.f32 %v13038_v50  ;;  %v9161_v23 = vld [vmem:[#allocation8 + $0x108] sm:$0xf]  ;;  %v10474_v33 = vld [vmem:[#allocation8 + $0x114] sm:$0xf0]  ;;  %v9163_v60 = vld [vmem:[#allocation8 + $0x118] sm:$0xf0] }
 0x734   :  { %v4642_v39 = vmul.f32 %v13007_v61, %v4641_v25  ;;  %v9182_v45 = vor.u32 %v10476_v8, %v9179_v20  ;;  %v4651_v37 = vor.u32 1.1754944e-38, %v4650_v52  ;;  %v4686_v58 = vand.u32 2147483647, %v12994_v24  ;;  %4993 = vmatpush.bf16.msrb.mxu2 %v9178_v29 }
 0x735   :  { %v13046_v44 = vadd.f32 %v4734_v6, %v4732_v55  ;;  %v4679_v26 = vsub.f32 1.0, %v4678_v14  ;;  %v4706_v2 = vadd.f32 %v13002_v13, %v4705_v18  ;;  %vm4683_vm15 = vweird.f32 %v13034_v9  ;;  %v9403_v55 = vld [vmem:[#allocation8 + $0x1f0] sm:$0xf0] }
 0x736   :  { %v4643_v7 = vadd.f32 %v13007_v61, %v4642_v39  ;;  %5007 = vmatpush.bf16.msrb.mxu3 %v9182_v45  ;;  %v9154_v52 = vor.u32 %v10473_v41, %v9153_v1  ;;  %v4689_v36 = vor.u32 1.1754944e-38, %v4688_v34  ;;  %v14226_v57 = vand.u32 2147483647, %v12982_v43  ;;  %vm4684_vm3 = vmor %vm4682_vm13, %vm4683_vm15  ;;  %v8855_v43 = vld [vmem:[%s14009_s6 + $0x18] sm:$0xff] }
 0x737   :  { %v4680_v6 = vmul.f32 %v13034_v9, %v4679_v26  ;;  %11028 = vtanh.f32 %v13046_v44  ;;  %v4714_v8 = vor.u32 1.1754944e-38, %v4713_v53  ;;  %v9158_v14 = vor.u32 %v10471_v46, %v9155_v48  ;;  %v4748_v53 = vpop.permute.xlu0 %4747 }
 0x738   :  { %v4647_v28 = vsel %vm4646_vm0, %v13007_v61, %v4643_v7  ;;  %vm4649_vm1 = vcmp.eq.f32.partialorder %v14226_v57, 8.507059e+37  ;;  %4966 = vmatpush.bf16.msrb.mxu0 %v9154_v52  ;;  %v9162_v34 = vor.u32 %v10474_v33, %v9161_v23  ;;  %vm4687_vm4 = vcmp.eq.f32.partialorder %v4686_v58, 8.507059e+37 }
 0x739   :  { %v4652_v20 = vsel %vm4649_vm1, %v4651_v37, %v4647_v28  ;;  %v4681_v25 = vadd.f32 %v13034_v9, %v4680_v6  ;;  %v11027_v18 = vpop.eup %11026  ;;  %v4710_v61 = vsel %vm13068_vm2, %v13002_v13, %v4706_v2  ;;  %v9166_v39 = vor.u32 %v10472_v22, %v9163_v60  ;;  %4980 = vmatpush.bf16.msrb.mxu1 %v9158_v14  ;;  %v9409_v14 = vld [vmem:[#allocation8 + $0x1e8] sm:$0xf] }
 0x73a   :  { %vm5149_vm5 = vcmp.gt.s32.totalorder %v12832_v59, 1  ;;  %v4735_v45 = vmul.f32 %v11025_v31, %v4652_v20  ;;  %v4718_v1 = vmul.f32 %v11027_v18, %v13038_v50  ;;  %4994 = vmatpush.bf16.msrb.mxu2 %v9162_v34  ;;  %v14229_v24 = vmov 0   ;;  %v10531_v20 = vld [vmem:[#allocation8 + $0x1e4] sm:$0xf]  ;;  %v10534_v34 = vld [vmem:[#allocation8 + $0x1f4] sm:$0xf0] }
 0x73b   :  { %v4685_v29 = vsel %vm4684_vm3, %v13034_v9, %v4681_v25  ;;  %v5151_v41 = vsel %vm5149_vm5, 1, %v14229_v24  ;;  %v14230_v37 = vand.u32 2147483647, %v12979_v38  ;;  %5008 = vmatpush.bf16.msrb.mxu3 %v9166_v39  ;;  %vm4752_vm7 = vcmp.eq.s32.totalorder %v4748_v53, 1  ;;  %v9411_v53 = vld [vmem:[#allocation8 + $0x1f8] sm:$0xf0] }
 0x73c   :  { %v4690_v26 = vsel %vm4687_vm4, %v4689_v36, %v4685_v29  ;;  %5154 = vperm.xlu1 %10742, %v5151_v41   ;;  %v4719_v59 = vsub.f32 1.0, %v4718_v1  ;;  %vm5150_vm8 = vcmp.gt.s32.totalorder %v12841_v30, 1  ;;  %vm4723_vm9 = vweird.f32 %v11027_v18  ;;  %v9385_v29 = vld [vmem:[#allocation8 + $0x1c0] sm:$0xf]  ;;  %v10527_v1 = vld [vmem:[#allocation8 + $0x1c4] sm:$0xf] }
 0x73d   :  { %vm4712_vm6 = vcmp.eq.f32.partialorder %v14230_v37, 8.507059e+37  ;;  %v11029_v13 = vpop.eup %11028  ;;  %v4733_v58 = vmul.f32 %v8855_v43, %v4690_v26  ;;  %v4728_v48 = vand.u32 2147483648, %v13038_v50  ;;  %v5152_v23 = vsel %vm5150_vm8, 1, %v14229_v24  ;;  %v9387_v26 = vld [vmem:[#allocation8 + $0x1d0] sm:$0xf0] }
 0x73e   :  { %v4715_v46 = vsel %vm4712_vm6, %v4714_v8, %v4710_v61  ;;  %v4720_v9 = vmul.f32 %v11027_v18, %v4719_v59  ;;  %vm4722_vm10 = vweird.f32 %v13038_v50  ;;  %v4726_v30 = vand.u32 2147483647, %v13038_v50  ;;  %v9401_v50 = vld [vmem:[#allocation8 + $0x1e0] sm:$0xf]  ;;  %v10533_v8 = vld [vmem:[#allocation8 + $0x1ec] sm:$0xf0] }
 0x73f   :  { %v4740_v7 = vmul.f32 %v11029_v13, %v4715_v46  ;;  %v13089_v31 = vadd.f32 %v4735_v45, %v4733_v58  ;;  %vm4724_vm11 = vmor %vm4722_vm10, %vm4723_vm9  ;;  %v4751_v6 = vpop.permute.xlu0 %4750  ;;  %v4729_v52 = vor.u32 1.1754944e-38, %v4728_v48  ;;  %v9402_v25 = vor.u32 %v10533_v8, %v9401_v50  ;;  %v10532_v61 = vld [vmem:[#allocation8 + $0x1ec] sm:$0xf]  ;;  %v10529_v45 = vld [vmem:[#allocation8 + $0x1cc] sm:$0xf0] }
 0x740   :  { %v4721_v38 = vadd.f32 %v11027_v18, %v4720_v9  ;;  %vm4727_vm12 = vcmp.eq.f32.partialorder %v4726_v30, 8.507059e+37  ;;  %vm4753_vm13 = vcmp.eq.s32.totalorder %v4751_v6, 1  ;;  %v9410_v43 = vor.u32 %v10534_v34, %v9409_v14  ;;  %v9393_v37 = vld [vmem:[#allocation8 + $0x1c8] sm:$0xf]  ;;  %v10530_v13 = vld [vmem:[#allocation8 + $0x1d4] sm:$0xf0] }
 0x741   :  { %v4754_v2 = vsel %vm4752_vm7, %v4740_v7, 0.0  ;;  %11030 = vtanh.f32 %v13089_v31  ;;  %5367 = vmatpush.bf16.msra.mxu0 %v9402_v25  ;;  %v9414_v39 = vor.u32 %v10532_v61, %v9411_v53  ;;  %v9386_v41 = vor.u32 %v10529_v45, %v9385_v29  ;;  %v10528_v9 = vld [vmem:[#allocation8 + $0x1cc] sm:$0xf]  ;;  %v9369_v6 = vld [vmem:[#allocation8 + $0x1a0] sm:$0xf] }
 0x742   :  { %4756 = vst [vmem:[%s14011_s8] sm:$0xff] %v4754_v2  ;;  %v4725_v33 = vsel %vm4724_vm11, %v11027_v18, %v4721_v38  ;;  %v9406_v18 = vor.u32 %v10531_v20, %v9403_v55  ;;  %5395 = vmatpush.bf16.msra.mxu2 %v9410_v43  ;;  %v4105_v58 = vadd.f32 %v12803_v15, %v12940_v35  ;;  %v9395_v2 = vld [vmem:[#allocation8 + $0x1d8] sm:$0xf0]  ;;  %v10524_v20 = vld [vmem:[#allocation8 + $0x1ac] sm:$0xf]  ;;  %v9353_v14 = vld [vmem:[#allocation8 + $0x180] sm:$0xf] }
 0x743   :  { %v4730_v60 = vsel %vm4727_vm12, %v4729_v52, %v4725_v33  ;;  %5409 = vmatpush.bf16.msra.mxu3 %v9414_v39  ;;  %v4154_v46 = vadd.f32 %v12805_v47, %v12943_v63  ;;  %v9390_v59 = vor.u32 %v10527_v1, %v9387_v26  ;;  %v10525_v52 = vld [vmem:[#allocation8 + $0x1ac] sm:$0xf0]  ;;  %v10526_v47 = vld [vmem:[#allocation8 + $0x1b4] sm:$0xf0]  ;;  %v9379_v25 = vld [vmem:[#allocation8 + $0x1b8] sm:$0xf0]  ;;  %v4252_v43 = vadd.f32 %v12815_v4, %v12954_v16 }
 0x744   :  { %5157 = vperm.xlu1 %10742, %v5152_v23   ;;  %5381 = vmatpush.bf16.msra.mxu1 %v9406_v18  ;;  %v9398_v23 = vor.u32 %v10528_v9, %v9395_v2  ;;  %v9370_v15 = vor.u32 %v10525_v52, %v9369_v6  ;;  %v9382_v55 = vor.u32 %v10524_v20, %v9379_v25  ;;  %v10521_v34 = vld [vmem:[#allocation8 + $0x18c] sm:$0xf0]  ;;  %v10519_v18 = vld [vmem:[#allocation8 + $0x184] sm:$0xf]  ;;  %v9355_v53 = vld [vmem:[#allocation8 + $0x190] sm:$0xf0] }
 0x745   :  { %5368 = vmatpush.bf16.msra.mxu0 %v9386_v41  ;;  %v9354_v61 = vor.u32 %v10521_v34, %v9353_v14  ;;  %v9361_v39 = vld [vmem:[#allocation8 + $0x188] sm:$0xf]  ;;  %v10522_v29 = vld [vmem:[#allocation8 + $0x194] sm:$0xf0]  ;;  %v4107_v45 = vadd.f32 %v12817_v42, %v12940_v35  ;;  %v4156_v1 = vadd.f32 %v12819_v0, %v12943_v63  ;;  %v9358_v26 = vor.u32 %v10519_v18, %v9355_v53  ;;  %v10517_v42 = vld [vmem:[#allocation8 + $0x16c] sm:$0xf0] }
 0x746   :  { %v9345_v6 = vld [vmem:[#allocation8 + $0x168] sm:$0xf]  ;;  %v9321_v14 = vld [vmem:[#allocation8 + $0x140] sm:$0xf]  ;;  %v10513_v34 = vld [vmem:[#allocation8 + $0x14c] sm:$0xf0]  ;;  %v4254_v18 = vadd.f32 %v12823_v62, %v12954_v16 }
 0x747   :  { %v11031_v22 = vpop.eup %11030  ;;  %5410 = vmatpush.bf16.msra.mxu3 %v9398_v23  ;;  %v9323_v53 = vld [vmem:[#allocation8 + $0x150] sm:$0xf0]  ;;  %v10509_v62 = vld [vmem:[#allocation8 + $0x12c] sm:$0xf0] }
 0x748   :  { %v4741_v36 = vmul.f32 %v11031_v22, %v4730_v60  ;;  %5382 = vmatpush.bf16.msra.mxu1 %v9390_v59  ;;  %v10523_v22 = vld [vmem:[#allocation8 + $0x1a4] sm:$0xf]  ;;  %v9371_v60 = vld [vmem:[#allocation8 + $0x1b0] sm:$0xf0] }
 0x749   :  { %v9374_v50 = vor.u32 %v10523_v22, %v9371_v60  ;;  %5369 = vmatpush.bf16.msra.mxu0 %v9370_v15 }
 0x74a   :  { %v4766_v28 = vpack.c.bf16 %v4741_v36, %v4740_v7  ;;  %v4755_v57 = vsel %vm4753_vm13, %v4741_v36, 0.0  ;;  %v9394_v7 = vor.u32 %v10530_v13, %v9393_v37  ;;  %v9377_v36 = vld [vmem:[#allocation8 + $0x1a8] sm:$0xf]  ;;  %v9362_v37 = vor.u32 %v10522_v29, %v9361_v39  ;;  %v10520_v13 = vld [vmem:[#allocation8 + $0x18c] sm:$0xf] }
 0x74b   :  { %4757 = vst [vmem:[%s14011_s8 + $0x8] sm:$0xff] %v4755_v57  ;;  %v9378_v8 = vor.u32 %v10526_v47, %v9377_v36  ;;  %5411 = vmatpush.bf16.msra.mxu3 %v9382_v55  ;;  %v10518_v36 = vld [vmem:[#allocation8 + $0x174] sm:$0xf0]  ;;  %v4203_v55 = vadd.f32 %v12813_v54, %v12963_v3  ;;  %v9329_v29 = vld [vmem:[#allocation8 + $0x148] sm:$0xf]  ;;  %v9322_v54 = vor.u32 %v10513_v34, %v9321_v14 }
 0x74c   :  { %4967 = vmatmul.bf16.vlgmr.msrb.gmra.mxu0 %v4766_v28  ;;  %4981 = vmatmul.bf16.vlgmr.msrb.gmra.mxu1 %v4766_v28 }
 0x74d   :  { %4995 = vmatmul.bf16.vlgmr.msrb.gmra.mxu2 %v4766_v28  ;;  %5009 = vmatmul.bf16.vlgmr.msrb.gmra.mxu3 %v4766_v28 }
 0x74e   :  { %5396 = vmatpush.bf16.msra.mxu2 %v9394_v7  ;;  %5383 = vmatpush.bf16.msra.mxu1 %v9374_v50  ;;  %v10516_v50 = vld [vmem:[#allocation8 + $0x16c] sm:$0xf] }
 0x74f   :  { %5370 = vmatpush.bf16.msra.mxu0 %v9354_v61  ;;  %v10511_v61 = vld [vmem:[#allocation8 + $0x144] sm:$0xf] }
 0x752   :  { %5397 = vmatpush.bf16.msra.mxu2 %v9378_v8  ;;  %5384 = vmatpush.bf16.msra.mxu1 %v9358_v26  ;;  %v9347_v8 = vld [vmem:[#allocation8 + $0x178] sm:$0xf0] }
 0x753   :  { %v9350_v25 = vor.u32 %v10516_v50, %v9347_v8  ;;  %v9331_v26 = vld [vmem:[#allocation8 + $0x158] sm:$0xf0] }
 0x756   :  { %5398 = vmatpush.bf16.msra.mxu2 %v9362_v37 }
 0x7c9   :  { %v4968_v38 = vpop.f32.mrf.mxu0  ;;  %v4982_v48 = vpop.f32.mrf.mxu1 }
 0x7ca   :  { %v5015_v30 = vadd.f32 %v4968_v38, %v4105_v58  ;;  %v5016_v33 = vadd.f32 %v4982_v48, %v4154_v46  ;;  %v9363_v58 = vld [vmem:[#allocation8 + $0x198] sm:$0xf0]  ;;  %v9337_v38 = vld [vmem:[#allocation8 + $0x160] sm:$0xf]  ;;  %v10515_v48 = vld [vmem:[#allocation8 + $0x164] sm:$0xf] }
 0x7cb   :  { %v9366_v7 = vor.u32 %v10520_v13, %v9363_v58  ;;  %v9326_v13 = vor.u32 %v10511_v61, %v9323_v53  ;;  %v9313_v53 = vld [vmem:[#allocation8 + $0x128] sm:$0xf] }
 0x7cc   :  { %v9279_v28 = vmul.f32 -1.442695, %v5015_v30  ;;  %v9281_v57 = vmul.f32 -1.442695, %v5016_v33  ;;  %v9338_v30 = vor.u32 %v10517_v42, %v9337_v38  ;;  %v9339_v33 = vld [vmem:[#allocation8 + $0x170] sm:$0xf0] }
 0x7cd   :  { %5412 = vmatpush.bf16.msra.mxu3 %v9366_v7  ;;  %v9342_v60 = vor.u32 %v10515_v48, %v9339_v33  ;;  %v9307_v38 = vld [vmem:[#allocation8 + $0x130] sm:$0xf0] }
 0x7ce   :  { %11032 = vpow2.f32 %v9279_v28  ;;  %5371 = vmatpush.bf16.msra.mxu0 %v9338_v30 }
 0x7cf   :  { %11034 = vpow2.f32 %v9281_v57  ;;  %v9346_v57 = vor.u32 %v10518_v36, %v9345_v6  ;;  %5385 = vmatpush.bf16.msra.mxu1 %v9342_v60  ;;  %v4205_v6 = vadd.f32 %v12821_v27, %v12963_v3 }
 0x7d0   :  { %v5010_v41 = vpop.f32.mrf.mxu3  ;;  %v4996_v23 = vpop.f32.mrf.mxu2 }
 0x7d1   :  { %v5018_v46 = vadd.f32 %v5010_v41, %v4252_v43  ;;  %v4970_v59 = vpop.f32.mrf.mxu0  ;;  %v4984_v4 = vpop.f32.mrf.mxu1  ;;  %5399 = vmatpush.bf16.msra.mxu2 %v9346_v57  ;;  %5413 = vmatpush.bf16.msra.mxu3 %v9350_v25  ;;  %v5017_v39 = vadd.f32 %v4996_v23, %v4203_v55  ;;  %v10512_v41 = vld [vmem:[#allocation8 + $0x14c] sm:$0xf] }
 0x7d2   :  { %v5019_v9 = vadd.f32 %v4970_v59, %v4107_v45  ;;  %v5020_v2 = vadd.f32 %v4984_v4, %v4156_v1  ;;  %v10514_v45 = vld [vmem:[#allocation8 + $0x154] sm:$0xf0]  ;;  %v9305_v59 = vld [vmem:[#allocation8 + $0x120] sm:$0xf]  ;;  %v10507_v4 = vld [vmem:[#allocation8 + $0x124] sm:$0xf]  ;;  %5372 = vmatpush.bf16.msra.mxu0 %v9322_v54 }
 0x7d3   :  { %v9283_v0 = vmul.f32 -1.442695, %v5018_v46  ;;  %v9330_v58 = vor.u32 %v10514_v45, %v9329_v29  ;;  %v9334_v46 = vor.u32 %v10512_v41, %v9331_v26  ;;  %5386 = vmatpush.bf16.msra.mxu1 %v9326_v13  ;;  %v9310_v30 = vor.u32 %v10507_v4, %v9307_v38  ;;  %v10508_v54 = vld [vmem:[#allocation8 + $0x12c] sm:$0xf]  ;;  %v9315_v41 = vld [vmem:[#allocation8 + $0x138] sm:$0xf0] }
 0x7d4   :  { %v11033_v52 = vpop.eup %11032  ;;  %v9280_v22 = vmul.f32 -1.442695, %v5019_v9  ;;  %v9282_v15 = vmul.f32 -1.442695, %v5020_v2  ;;  %v9306_v2 = vor.u32 %v10509_v62, %v9305_v59 }
 0x7d5   :  { %v11035_v47 = vpop.eup %11034  ;;  %v13112_v28 = vadd.f32 1.0, %v11033_v52  ;;  %11036 = vpow2.f32 %v9283_v0  ;;  %5400 = vmatpush.bf16.msra.mxu2 %v9330_v58  ;;  %5414 = vmatpush.bf16.msra.mxu3 %v9334_v46 }
 0x7d6   :  { %v13114_v20 = vadd.f32 1.0, %v11035_v47  ;;  %11038 = vpow2.f32 %v9280_v22  ;;  %5373 = vmatpush.bf16.msra.mxu0 %v9306_v2 }
 0x7d7   :  { %11040 = vrcp.f32 %v13112_v28  ;;  %v5040_v22 = vand.u32 2147483647, %v13112_v28  ;;  %v5042_v47 = vand.u32 2147483648, %v13112_v28  ;;  %vm5036_vm15 = vweird.f32 %v13112_v28  ;;  %5387 = vmatpush.bf16.msra.mxu1 %v9310_v30 }
 0x7d8   :  { %11042 = vrcp.f32 %v13114_v20  ;;  %v5012_v43 = vpop.f32.mrf.mxu3  ;;  %v4998_v23 = vpop.f32.mrf.mxu2  ;;  %v5080_v36 = vand.u32 2147483648, %v13114_v20  ;;  %v5078_v50 = vand.u32 2147483647, %v13114_v20  ;;  %vm5074_vm14 = vweird.f32 %v13114_v20 }
 0x7d9   :  { %11044 = vpow2.f32 %v9282_v15  ;;  %v5022_v1 = vadd.f32 %v5012_v43, %v4254_v18  ;;  %v5021_v8 = vadd.f32 %v4998_v23, %v4205_v6  ;;  %vm13140_vm1 = vcmp.eq.f32.partialorder %v5040_v22, 8.507059e+37 }
 0x7da   :  { %11046 = vtanh.f32 %v5017_v39  ;;  %v5081_v43 = vor.u32 1.1754944e-38, %v5080_v36  ;;  %v5043_v61 = vor.u32 1.1754944e-38, %v5042_v47  ;;  %v10510_v39 = vld [vmem:[#allocation8 + $0x134] sm:$0xf0]  ;;  %vm13147_vm3 = vcmp.eq.f32.partialorder %v5078_v50, 8.507059e+37 }
 0x7db   :  { %v11037_v37 = vpop.eup %11036  ;;  %v9284_v0 = vmul.f32 -1.442695, %v5022_v1  ;;  %v9314_v4 = vor.u32 %v10510_v39, %v9313_v53  ;;  %v9289_v36 = vld [vmem:[#allocation8 + $0x100] sm:$0xf]  ;;  %v10505_v47 = vld [vmem:[#allocation8 + $0x10c] sm:$0xf0] }
 0x7dc   :  { %v11039_v7 = vpop.eup %11038  ;;  %v13122_v9 = vadd.f32 1.0, %v11037_v37  ;;  %v9290_v39 = vor.u32 %v10505_v47, %v9289_v36  ;;  %v9299_v1 = vld [vmem:[#allocation8 + $0x118] sm:$0xf0] }
 0x7dd   :  { %v11041_v42 = vpop.eup %11040  ;;  %v13124_v48 = vadd.f32 1.0, %v11039_v7  ;;  %5401 = vmatpush.bf16.msra.mxu2 %v9314_v4  ;;  %v9521_v4 = vld [vmem:[#allocation8 + $0x1c0] sm:$0xf] }
 0x7de   :  { %v11043_v33 = vpop.eup %11042  ;;  %v5032_v52 = vmul.f32 %v11041_v42, %v13112_v28  ;;  %11048 = vrcp.f32 %v13122_v9  ;;  %vm5037_vm0 = vweird.f32 %v11041_v42  ;;  %vm5114_vm7 = vweird.f32 %v13122_v9  ;;  %5374 = vmatpush.bf16.msra.mxu0 %v9290_v39  ;;  %v10563_v39 = vld [vmem:[#allocation8 + $0x1e4] sm:$0xf] }
 0x7df   :  { %v11045_v15 = vpop.eup %11044  ;;  %v5070_v60 = vmul.f32 %v11043_v33, %v13114_v20  ;;  %11050 = vrcp.f32 %v13124_v48  ;;  %vm5075_vm2 = vweird.f32 %v11043_v33  ;;  %vm5051_vm4 = vweird.f32 %v13124_v48  ;;  %vm5038_vm5 = vmor %vm5036_vm15, %vm5037_vm0 }
 0x7e0   :  { %v5033_v57 = vsub.f32 1.0, %v5032_v52  ;;  %v13136_v27 = vadd.f32 1.0, %v11045_v15  ;;  %11052 = vpow2.f32 %v9284_v0  ;;  %v11047_v34 = vpop.eup %11046  ;;  %v5055_v13 = vand.u32 2147483647, %v13124_v48  ;;  %vm5076_vm6 = vmor %vm5074_vm14, %vm5075_vm2 }
 0x7e1   :  { %v5071_v25 = vsub.f32 1.0, %v5070_v60  ;;  %v5057_v58 = vand.u32 2147483648, %v13124_v48  ;;  %v5118_v28 = vand.u32 2147483647, %v13122_v9  ;;  %v9318_v0 = vor.u32 %v10508_v54, %v9315_v41 }
 0x7e2   :  { %v5034_v55 = vmul.f32 %v11041_v42, %v5033_v57  ;;  %11054 = vrcp.f32 %v13136_v27  ;;  %v5095_v50 = vand.u32 2147483648, %v13136_v27  ;;  %vm5089_vm9 = vweird.f32 %v13136_v27 }
 0x7e3   :  { %v5072_v18 = vmul.f32 %v11043_v33, %v5071_v25  ;;  %11056 = vtanh.f32 %v5021_v8  ;;  %5415 = vmatpush.bf16.msra.mxu3 %v9318_v0  ;;  %v10503_v25 = vld [vmem:[#allocation8 + $0x104] sm:$0xf]  ;;  %v5093_v41 = vand.u32 2147483647, %v13136_v27  ;;  %vm5056_vm13 = vcmp.eq.f32.partialorder %v5055_v13, 8.507059e+37 }
 0x7e4   :  { %v13145_v29 = vpop.eup %11048  ;;  %v5035_v45 = vadd.f32 %v11041_v42, %v5034_v55  ;;  %v9291_v55 = vld [vmem:[#allocation8 + $0x110] sm:$0xf0]  ;;  %vm5119_vm2 = vcmp.eq.f32.partialorder %v5118_v28, 8.507059e+37 }
 0x7e5   :  { %v11051_v26 = vpop.eup %11050  ;;  %v5073_v37 = vadd.f32 %v11043_v33, %v5072_v18  ;;  %v5110_v46 = vmul.f32 %v13145_v29, %v13122_v9  ;;  %v9297_v18 = vld [vmem:[#allocation8 + $0x108] sm:$0xf]  ;;  %vm5115_vm10 = vweird.f32 %v13145_v29 }
 0x7e6   :  { %v5039_v59 = vsel %vm5038_vm5, %v11041_v42, %v5035_v45  ;;  %v5047_v62 = vmul.f32 %v11051_v26, %v13124_v48  ;;  %v11053_v7 = vpop.eup %11052  ;;  %vm5052_vm8 = vweird.f32 %v11051_v26  ;;  %v10504_v45 = vld [vmem:[#allocation8 + $0x10c] sm:$0xf]  ;;  %vm13197_vm14 = vmor %vm5114_vm7, %vm5115_vm10  ;;  %v5155_v48 = vpop.permute.xlu1 %5154 }
 0x7e7   :  { %v5044_v2 = vsel %vm13140_vm1, %v5043_v61, %v5039_v59  ;;  %v5077_v38 = vsel %vm5076_vm6, %v11043_v33, %v5073_v37  ;;  %v5111_v23 = vsub.f32 1.0, %v5110_v46  ;;  %v13171_v52 = vadd.f32 1.0, %v11053_v7  ;;  %vm5053_vm12 = vmor %vm5051_vm4, %vm5052_vm8 }
 0x7e8   :  { %v13167_v30 = vpop.eup %11054  ;;  %v5082_v20 = vsel %vm13147_vm3, %v5081_v43, %v5077_v38  ;;  %v5141_v42 = vmul.f32 %v11047_v34, %v5044_v2  ;;  %v5048_v6 = vsub.f32 1.0, %v5047_v62  ;;  %v5120_v33 = vand.u32 2147483648, %v13122_v9  ;;  %v10506_v43 = vld [vmem:[#allocation8 + $0x114] sm:$0xf0] }
 0x7e9   :  { %v5139_v22 = vmul.f32 %v5082_v20, %v13046_v44  ;;  %v5085_v15 = vmul.f32 %v13167_v30, %v13136_v27  ;;  %v5112_v60 = vmul.f32 %v13145_v29, %v5111_v23  ;;  %v11057_v57 = vpop.eup %11056  ;;  %11058 = vrcp.f32 %v13171_v52 }
 0x7ea   :  { %v5049_v8 = vmul.f32 %v11051_v26, %v5048_v6  ;;  %v5058_v34 = vor.u32 1.1754944e-38, %v5057_v58  ;;  %vm5090_vm11 = vweird.f32 %v13167_v30  ;;  %v9294_v58 = vor.u32 %v10503_v25, %v9291_v55 }
 0x7eb   :  { %v13180_v44 = vadd.f32 %v5141_v42, %v5139_v22  ;;  %v5086_v14 = vsub.f32 1.0, %v5085_v15  ;;  %v5113_v53 = vadd.f32 %v13145_v29, %v5112_v60  ;;  %v9298_v46 = vor.u32 %v10506_v43, %v9297_v18  ;;  %vm5091_vm0 = vmor %vm5089_vm9, %vm5090_vm11 }
 0x7ec   :  { %v5050_v61 = vadd.f32 %v11051_v26, %v5049_v8  ;;  %v9302_v7 = vor.u32 %v10504_v45, %v9299_v1  ;;  %v5096_v2 = vor.u32 1.1754944e-38, %v5095_v50  ;;  %v5121_v23 = vor.u32 1.1754944e-38, %v5120_v33  ;;  %5388 = vmatpush.bf16.msra.mxu1 %v9294_v58  ;;  %v9539_v1 = vld [vmem:[#allocation8 + $0x1f0] sm:$0xf0] }
 0x7ed   :  { %v5087_v54 = vmul.f32 %v13167_v30, %v5086_v14  ;;  %11060 = vtanh.f32 %v13180_v44  ;;  %v5117_v38 = vsel %vm13197_vm14, %v13145_v29, %v5113_v53  ;;  %5402 = vmatpush.bf16.msra.mxu2 %v9298_v46  ;;  %vm5094_vm1 = vcmp.eq.f32.partialorder %v5093_v41, 8.507059e+37  ;;  %v10565_v53 = vld [vmem:[#allocation8 + $0x1ec] sm:$0xf0]  ;;  %v10566_v41 = vld [vmem:[#allocation8 + $0x1f4] sm:$0xf0] }
 0x7ee   :  { %v5054_v37 = vsel %vm5053_vm12, %v11051_v26, %v5050_v61  ;;  %v13204_v26 = vld [vmem:[%s14010_s7] sm:$0xff]  ;;  %5416 = vmatpush.bf16.msra.mxu3 %v9302_v7  ;;  %vm5159_vm3 = vcmp.eq.s32.totalorder %v5155_v48, 1  ;;  %v5122_v15 = vsel %vm5119_vm2, %v5121_v23, %v5117_v38  ;;  %v5135_v28 = vand.u32 2147483648, %v13171_v52  ;;  %v5158_v25 = vpop.permute.xlu1 %5157  ;;  %v10564_v46 = vld [vmem:[#allocation8 + $0x1ec] sm:$0xf] }
 0x7ef   :  { %v5059_v59 = vsel %vm5056_vm13, %v5058_v34, %v5054_v37  ;;  %v5088_v62 = vadd.f32 %v13167_v30, %v5087_v54  ;;  %vm5557_vm15 = vcmp.gt.s32.totalorder %v13204_v26, 2  ;;  %v11059_v13 = vpop.eup %11058  ;;  %vm5129_vm6 = vweird.f32 %v13171_v52  ;;  %v9545_v54 = vld [vmem:[#allocation8 + $0x1e8] sm:$0xf]  ;;  %v10561_v48 = vld [vmem:[#allocation8 + $0x1cc] sm:$0xf0] }
 0x7f0   :  { %v5559_v0 = vsel %vm5557_vm15, 1, %v14229_v24  ;;  %v5142_v42 = vmul.f32 %v11057_v57, %v5059_v59  ;;  %v5125_v6 = vmul.f32 %v11059_v13, %v13171_v52  ;;  %vm5130_vm5 = vweird.f32 %v11059_v13  ;;  %v9547_v59 = vld [vmem:[#allocation8 + $0x1f8] sm:$0xf0]  ;;  %v10559_v7 = vld [vmem:[#allocation8 + $0x1c4] sm:$0xf] }
 0x7f1   :  { %v5092_v20 = vsel %vm5091_vm0, %v13167_v30, %v5088_v62  ;;  %5562 = vperm.xlu2 %10743, %v5559_v0   ;;  %v13223_v30 = vld [vmem:[%s14010_s7 + $0x8] sm:$0xff]  ;;  %v5133_v50 = vand.u32 2147483647, %v13171_v52  ;;  %vm5131_vm7 = vmor %vm5129_vm6, %vm5130_vm5  ;;  %v5136_v55 = vor.u32 1.1754944e-38, %v5135_v28  ;;  %vm5160_vm9 = vcmp.eq.s32.totalorder %v5158_v25, 1 }
 0x7f2   :  { %v5097_v27 = vsel %vm5094_vm1, %v5096_v2, %v5092_v20  ;;  %v5126_v60 = vsub.f32 1.0, %v5125_v6  ;;  %vm5558_vm4 = vcmp.gt.s32.totalorder %v13223_v30, 2  ;;  %v9537_v52 = vld [vmem:[#allocation8 + $0x1e0] sm:$0xf]  ;;  %v9542_v37 = vor.u32 %v10563_v39, %v9539_v1  ;;  %v9523_v2 = vld [vmem:[#allocation8 + $0x1d0] sm:$0xf0] }
 0x7f3   :  { %v11061_v22 = vpop.eup %11060  ;;  %v5140_v29 = vmul.f32 %v5097_v27, %v13089_v31  ;;  %v5560_v9 = vsel %vm5558_vm4, 1, %v14229_v24  ;;  %vm5134_vm8 = vcmp.eq.f32.partialorder %v5133_v50, 8.507059e+37  ;;  %v9538_v45 = vor.u32 %v10565_v53, %v9537_v52  ;;  %v9529_v38 = vld [vmem:[#allocation8 + $0x1c8] sm:$0xf]  ;;  %v10562_v23 = vld [vmem:[#allocation8 + $0x1d4] sm:$0xf0] }
 0x7f4   :  { %v5147_v33 = vmul.f32 %v11061_v22, %v5122_v15  ;;  %v5127_v47 = vmul.f32 %v11059_v13, %v5126_v60  ;;  %v9546_v58 = vor.u32 %v10566_v41, %v9545_v54  ;;  %v9550_v62 = vor.u32 %v10564_v46, %v9547_v59  ;;  %5789 = vmatpush.bf16.msrb.mxu1 %v9542_v37  ;;  %v10560_v27 = vld [vmem:[#allocation8 + $0x1cc] sm:$0xf]  ;;  %v9531_v22 = vld [vmem:[#allocation8 + $0x1d8] sm:$0xf0]  ;;  %v9507_v28 = vld [vmem:[#allocation8 + $0x1b0] sm:$0xf0] }
 0x7f5   :  { %v13226_v36 = vadd.f32 %v5142_v42, %v5140_v29  ;;  %5775 = vmatpush.bf16.msrb.mxu0 %v9538_v45  ;;  %v4110_v0 = vadd.f32 %v12825_v10, %v12940_v35  ;;  %v4159_v20 = vadd.f32 %v12827_v40, %v12943_v63  ;;  %v9526_v42 = vor.u32 %v10559_v7, %v9523_v2  ;;  %v9513_v50 = vld [vmem:[#allocation8 + $0x1a8] sm:$0xf]  ;;  %v10558_v40 = vld [vmem:[#allocation8 + $0x1b4] sm:$0xf0]  ;;  %v10553_v52 = vld [vmem:[#allocation8 + $0x18c] sm:$0xf0] }
 0x7f6   :  { %v5161_v57 = vsel %vm5159_vm3, %v5147_v33, 0.0  ;;  %v5128_v31 = vadd.f32 %v11059_v13, %v5127_v47  ;;  %5803 = vmatpush.bf16.msrb.mxu2 %v9546_v58  ;;  %5817 = vmatpush.bf16.msrb.mxu3 %v9550_v62  ;;  %v9530_v6 = vor.u32 %v10562_v23, %v9529_v38  ;;  %v9534_v60 = vor.u32 %v10560_v27, %v9531_v22  ;;  %v10551_v53 = vld [vmem:[#allocation8 + $0x184] sm:$0xf]  ;;  %v9491_v1 = vld [vmem:[#allocation8 + $0x190] sm:$0xf0] }
 0x7f7   :  { %9285 = vst [vmem:[%s14011_s8 + $0x10] sm:$0xff] %v5161_v57  ;;  %11062 = vtanh.f32 %v13226_v36  ;;  %v9505_v57 = vld [vmem:[#allocation8 + $0x1a0] sm:$0xf]  ;;  %v4257_v39 = vadd.f32 %v12846_v12, %v12954_v16  ;;  %v9497_v54 = vld [vmem:[#allocation8 + $0x188] sm:$0xf]  ;;  %v4112_v37 = vadd.f32 %v12849_v49, %v12940_v35  ;;  %v4161_v58 = vadd.f32 %v12851_v51, %v12943_v63 }
 0x7f8   :  { %v5132_v8 = vsel %vm5131_vm7, %v11059_v13, %v5128_v31  ;;  %v9522_v13 = vor.u32 %v10561_v48, %v9521_v4  ;;  %5790 = vmatpush.bf16.msrb.mxu1 %v9526_v42  ;;  %v10555_v31 = vld [vmem:[#allocation8 + $0x1a4] sm:$0xf]  ;;  %v10554_v41 = vld [vmem:[#allocation8 + $0x194] sm:$0xf0]  ;;  %v9494_v59 = vor.u32 %v10551_v53, %v9491_v1  ;;  %v10552_v4 = vld [vmem:[#allocation8 + $0x18c] sm:$0xf] }
 0x7f9   :  { %5565 = vperm.xlu2 %10743, %v5560_v9   ;;  %v5137_v34 = vsel %vm5134_vm8, %v5136_v55, %v5132_v8  ;;  %v10557_v9 = vld [vmem:[#allocation8 + $0x1ac] sm:$0xf0]  ;;  %v9510_v55 = vor.u32 %v10555_v31, %v9507_v28  ;;  %v9498_v62 = vor.u32 %v10554_v41, %v9497_v54  ;;  %v9499_v48 = vld [vmem:[#allocation8 + $0x198] sm:$0xf0]  ;;  %v9475_v27 = vld [vmem:[#allocation8 + $0x170] sm:$0xf0] }
 0x7fa   :  { %5776 = vmatpush.bf16.msrb.mxu0 %v9522_v13  ;;  %5804 = vmatpush.bf16.msrb.mxu2 %v9530_v6  ;;  %v9506_v10 = vor.u32 %v10557_v9, %v9505_v57  ;;  %v9502_v2 = vor.u32 %v10552_v4, %v9499_v48  ;;  %v10549_v49 = vld [vmem:[#allocation8 + $0x16c] sm:$0xf0]  ;;  %v9481_v22 = vld [vmem:[#allocation8 + $0x168] sm:$0xf]  ;;  %v9483_v28 = vld [vmem:[#allocation8 + $0x178] sm:$0xf0] }
 0x7fb   :  { %5818 = vmatpush.bf16.msrb.mxu3 %v9534_v60  ;;  %v9467_v1 = vld [vmem:[#allocation8 + $0x158] sm:$0xf0] }
 0x7fc   :  { %5791 = vmatpush.bf16.msrb.mxu1 %v9510_v55  ;;  %v10545_v55 = vld [vmem:[#allocation8 + $0x14c] sm:$0xf0] }
 0x7fd   :  { %v11063_v14 = vpop.eup %11062 }
 0x7fe   :  { %v5148_v18 = vmul.f32 %v11063_v14, %v5137_v34  ;;  %v9514_v14 = vor.u32 %v10558_v40, %v9513_v50  ;;  %v10556_v34 = vld [vmem:[#allocation8 + $0x1ac] sm:$0xf]  ;;  %5777 = vmatpush.bf16.msrb.mxu0 %v9506_v10  ;;  %v4208_v50 = vadd.f32 %v12844_v56, %v12963_v3  ;;  %v9459_v56 = vld [vmem:[#allocation8 + $0x150] sm:$0xf0] }
 0x7ff   :  { %v10548_v10 = vld [vmem:[#allocation8 + $0x16c] sm:$0xf] }
 0x800   :  { %v5174_v43 = vpack.c.bf16 %v5148_v18, %v5147_v33  ;;  %v5162_v61 = vsel %vm5160_vm9, %v5148_v18, 0.0  ;;  %v9515_v18 = vld [vmem:[#allocation8 + $0x1b8] sm:$0xf0]  ;;  %5805 = vmatpush.bf16.msrb.mxu2 %v9514_v14  ;;  %5792 = vmatpush.bf16.msrb.mxu1 %v9494_v59  ;;  %v4259_v14 = vadd.f32 %v12856_v19, %v12954_v16  ;;  %v10541_v19 = vld [vmem:[#allocation8 + $0x12c] sm:$0xf0] }
 0x801   :  { %9286 = vst [vmem:[%s14011_s8 + $0x18] sm:$0xff] %v5162_v61  ;;  %v9489_v61 = vld [vmem:[#allocation8 + $0x180] sm:$0xf]  ;;  %v10539_v59 = vld [vmem:[#allocation8 + $0x124] sm:$0xf] }
 0x802   :  { %5375 = vmatmul.bf16.vlgmr.msra.gmra.mxu0 %v5174_v43  ;;  %5389 = vmatmul.bf16.vlgmr.msra.gmra.mxu1 %v5174_v43  ;;  %v9490_v45 = vor.u32 %v10553_v52, %v9489_v61  ;;  %v9465_v61 = vld [vmem:[#allocation8 + $0x148] sm:$0xf]  ;;  %v10546_v52 = vld [vmem:[#allocation8 + $0x154] sm:$0xf0] }
 0x803   :  { %5403 = vmatmul.bf16.vlgmr.msra.gmra.mxu2 %v5174_v43  ;;  %5417 = vmatmul.bf16.vlgmr.msra.gmra.mxu3 %v5174_v43  ;;  %v9518_v43 = vor.u32 %v10556_v34, %v9515_v18 }
 0x804   :  { %5778 = vmatpush.bf16.msrb.mxu0 %v9490_v45  ;;  %5806 = vmatpush.bf16.msrb.mxu2 %v9498_v62  ;;  %v10544_v45 = vld [vmem:[#allocation8 + $0x14c] sm:$0xf] }
 0x805   :  { %5819 = vmatpush.bf16.msrb.mxu3 %v9518_v43  ;;  %v10543_v43 = vld [vmem:[#allocation8 + $0x144] sm:$0xf] }
 0x806   :  { %v9462_v41 = vor.u32 %v10543_v43, %v9459_v56  ;;  %v10540_v43 = vld [vmem:[#allocation8 + $0x12c] sm:$0xf]  ;;  %v9451_v56 = vld [vmem:[#allocation8 + $0x138] sm:$0xf0] }
 0x809   :  { %5820 = vmatpush.bf16.msrb.mxu3 %v9502_v2 }
 0x87f   :  { %v5376_v29 = vpop.f32.mrf.mxu0  ;;  %v5390_v15 = vpop.f32.mrf.mxu1 }
 0x880   :  { %v5423_v33 = vadd.f32 %v5376_v29, %v4110_v0  ;;  %v5424_v47 = vadd.f32 %v5390_v15, %v4159_v20  ;;  %v9473_v0 = vld [vmem:[#allocation8 + $0x160] sm:$0xf]  ;;  %v10547_v20 = vld [vmem:[#allocation8 + $0x164] sm:$0xf] }
 0x881   :  { %v9474_v6 = vor.u32 %v10549_v49, %v9473_v0 }
 0x882   :  { %v9415_v8 = vmul.f32 -1.442695, %v5423_v33  ;;  %v9417_v25 = vmul.f32 -1.442695, %v5424_v47  ;;  %v9478_v33 = vor.u32 %v10547_v20, %v9475_v27  ;;  %v10550_v47 = vld [vmem:[#allocation8 + $0x174] sm:$0xf0]  ;;  %v4210_v20 = vadd.f32 %v12854_v11, %v12963_v3 }
 0x883   :  { %5779 = vmatpush.bf16.msrb.mxu0 %v9474_v6  ;;  %v9482_v31 = vor.u32 %v10550_v47, %v9481_v22  ;;  %v10538_v47 = vld [vmem:[#allocation8 + $0x114] sm:$0xf0] }
 0x884   :  { %11064 = vpow2.f32 %v9415_v8  ;;  %5793 = vmatpush.bf16.msrb.mxu1 %v9478_v33  ;;  %v9486_v8 = vor.u32 %v10548_v10, %v9483_v28 }
 0x885   :  { %11066 = vpow2.f32 %v9417_v25  ;;  %5807 = vmatpush.bf16.msrb.mxu2 %v9482_v31  ;;  %v9457_v25 = vld [vmem:[#allocation8 + $0x140] sm:$0xf] }
 0x886   :  { %v5418_v46 = vpop.f32.mrf.mxu3  ;;  %v5404_v42 = vpop.f32.mrf.mxu2  ;;  %5821 = vmatpush.bf16.msrb.mxu3 %v9486_v8 }
 0x887   :  { %v5426_v7 = vadd.f32 %v5418_v46, %v4257_v39  ;;  %v5378_v13 = vpop.f32.mrf.mxu0  ;;  %v5392_v12 = vpop.f32.mrf.mxu1  ;;  %v5425_v34 = vadd.f32 %v5404_v42, %v4208_v50  ;;  %v9458_v39 = vor.u32 %v10545_v55, %v9457_v25  ;;  %v9441_v46 = vld [vmem:[#allocation8 + $0x120] sm:$0xf]  ;;  %v9449_v25 = vld [vmem:[#allocation8 + $0x128] sm:$0xf]  ;;  %v10542_v55 = vld [vmem:[#allocation8 + $0x134] sm:$0xf0] }
 0x888   :  { %v5427_v38 = vadd.f32 %v5378_v13, %v4112_v37  ;;  %v5428_v23 = vadd.f32 %v5392_v12, %v4161_v58  ;;  %v9466_v37 = vor.u32 %v10546_v52, %v9465_v61  ;;  %v9470_v58 = vor.u32 %v10544_v45, %v9467_v1  ;;  %5794 = vmatpush.bf16.msrb.mxu1 %v9462_v41 }
 0x889   :  { %v9419_v51 = vmul.f32 -1.442695, %v5426_v7  ;;  %5780 = vmatpush.bf16.msrb.mxu0 %v9458_v39  ;;  %v9442_v48 = vor.u32 %v10541_v19, %v9441_v46  ;;  %v9443_v7 = vld [vmem:[#allocation8 + $0x130] sm:$0xf0]  ;;  %v9450_v41 = vor.u32 %v10542_v55, %v9449_v25 }
 0x88a   :  { %v11065_v29 = vpop.eup %11064  ;;  %v9416_v15 = vmul.f32 -1.442695, %v5427_v38  ;;  %v9418_v60 = vmul.f32 -1.442695, %v5428_v23  ;;  %5808 = vmatpush.bf16.msrb.mxu2 %v9466_v37  ;;  %v9446_v0 = vor.u32 %v10539_v59, %v9443_v7  ;;  %5822 = vmatpush.bf16.msrb.mxu3 %v9470_v58  ;;  %v9454_v59 = vor.u32 %v10540_v43, %v9451_v56 }
 0x88b   :  { %v11067_v57 = vpop.eup %11066  ;;  %v13249_v9 = vadd.f32 1.0, %v11065_v29  ;;  %11068 = vpow2.f32 %v9419_v51 }
 0x88c   :  { %v13253_v40 = vadd.f32 1.0, %v11067_v57  ;;  %11070 = vpow2.f32 %v9416_v15  ;;  %5795 = vmatpush.bf16.msrb.mxu1 %v9446_v0 }
 0x88d   :  { %11072 = vrcp.f32 %v13249_v9  ;;  %v5448_v12 = vand.u32 2147483647, %v13249_v9  ;;  %v5450_v51 = vand.u32 2147483648, %v13249_v9  ;;  %vm5444_vm10 = vweird.f32 %v13249_v9  ;;  %5781 = vmatpush.bf16.msrb.mxu0 %v9442_v48 }
 0x88e   :  { %11074 = vrcp.f32 %v13253_v40  ;;  %v5420_v18 = vpop.f32.mrf.mxu3  ;;  %v5406_v38 = vpop.f32.mrf.mxu2  ;;  %v5488_v22 = vand.u32 2147483648, %v13253_v40  ;;  %v5486_v29 = vand.u32 2147483647, %v13253_v40  ;;  %vm5482_vm11 = vweird.f32 %v13253_v40  ;;  %5809 = vmatpush.bf16.msrb.mxu2 %v9450_v41  ;;  %5823 = vmatpush.bf16.msrb.mxu3 %v9454_v59 }
 0x88f   :  { %11076 = vpow2.f32 %v9418_v60  ;;  %v5430_v53 = vadd.f32 %v5420_v18, %v4259_v14  ;;  %v5429_v60 = vadd.f32 %v5406_v38, %v4210_v20  ;;  %vm13277_vm12 = vcmp.eq.f32.partialorder %v5448_v12, 8.507059e+37  ;;  %v9425_v12 = vld [vmem:[#allocation8 + $0x100] sm:$0xf]  ;;  %v10537_v20 = vld [vmem:[#allocation8 + $0x10c] sm:$0xf0] }
 0x890   :  { %11078 = vtanh.f32 %v5425_v34  ;;  %v5451_v10 = vor.u32 1.1754944e-38, %v5450_v51  ;;  %v5489_v50 = vor.u32 1.1754944e-38, %v5488_v22  ;;  %vm13282_vm15 = vcmp.eq.f32.partialorder %v5486_v29, 8.507059e+37  ;;  %v9433_v22 = vld [vmem:[#allocation8 + $0x108] sm:$0xf] }
 0x891   :  { %v11069_v54 = vpop.eup %11068  ;;  %v9420_v23 = vmul.f32 -1.442695, %v5430_v53  ;;  %v9434_v43 = vor.u32 %v10538_v47, %v9433_v22  ;;  %v10598_v22 = vld [vmem:[#allocation8 + $0x1f4] sm:$0xf0]  ;;  %v9683_v47 = vld [vmem:[#allocation8 + $0x1f8] sm:$0xf0] }
 0x892   :  { %v11071_v62 = vpop.eup %11070  ;;  %v13259_v4 = vadd.f32 1.0, %v11069_v54 }
 0x893   :  { %v11073_v13 = vpop.eup %11072  ;;  %v13262_v2 = vadd.f32 1.0, %v11071_v62  ;;  %5810 = vmatpush.bf16.msrb.mxu2 %v9434_v43 }
 0x894   :  { %v11075_v49 = vpop.eup %11074  ;;  %v5440_v42 = vmul.f32 %v11073_v13, %v13249_v9  ;;  %11080 = vrcp.f32 %v13259_v4  ;;  %vm5445_vm13 = vweird.f32 %v11073_v13  ;;  %v5526_v45 = vand.u32 2147483647, %v13259_v4 }
 0x895   :  { %v11077_v6 = vpop.eup %11076  ;;  %v5478_v27 = vmul.f32 %v11075_v49, %v13253_v40  ;;  %11082 = vrcp.f32 %v13262_v2  ;;  %vm5483_vm14 = vweird.f32 %v11075_v49  ;;  %vm5459_vm0 = vweird.f32 %v13262_v2  ;;  %vm5446_vm1 = vmor %vm5444_vm10, %vm5445_vm13 }
 0x896   :  { %v5441_v15 = vsub.f32 1.0, %v5440_v42  ;;  %v13274_v11 = vadd.f32 1.0, %v11077_v6  ;;  %11084 = vpow2.f32 %v9420_v23  ;;  %v11079_v57 = vpop.eup %11078  ;;  %v5463_v18 = vand.u32 2147483647, %v13262_v2  ;;  %vm5484_vm2 = vmor %vm5482_vm11, %vm5483_vm14  ;;  %v10535_v42 = vld [vmem:[#allocation8 + $0x104] sm:$0xf] }
 0x897   :  { %v5479_v33 = vsub.f32 1.0, %v5478_v27  ;;  %v5465_v53 = vand.u32 2147483648, %v13262_v2  ;;  %vm5522_vm3 = vweird.f32 %v13259_v4  ;;  %v5528_v9 = vand.u32 2147483648, %v13259_v4  ;;  %v9675_v27 = vld [vmem:[#allocation8 + $0x1f0] sm:$0xf0] }
 0x898   :  { %v5442_v31 = vmul.f32 %v11073_v13, %v5441_v15  ;;  %11086 = vrcp.f32 %v13274_v11  ;;  %vm5497_vm4 = vweird.f32 %v13274_v11  ;;  %v5503_v0 = vand.u32 2147483648, %v13274_v11 }
 0x899   :  { %v5480_v28 = vmul.f32 %v11075_v49, %v5479_v33  ;;  %11088 = vtanh.f32 %v5429_v60  ;;  %vm13317_vm6 = vcmp.eq.f32.partialorder %v5463_v18, 8.507059e+37  ;;  %v5466_v60 = vor.u32 1.1754944e-38, %v5465_v53  ;;  %v9667_v53 = vld [vmem:[#allocation8 + $0x1d8] sm:$0xf0] }
 0x89a   :  { %v13286_v14 = vpop.eup %11080  ;;  %v5443_v34 = vadd.f32 %v11073_v13, %v5442_v31  ;;  %v5501_v33 = vand.u32 2147483647, %v13274_v11  ;;  %v5504_v25 = vor.u32 1.1754944e-38, %v5503_v0  ;;  %vm5965_vm11 = vcmp.gt.s32.totalorder %v13204_v26, 3 }
 0x89b   :  { %v11083_v61 = vpop.eup %11082  ;;  %v5481_v52 = vadd.f32 %v11075_v49, %v5480_v28  ;;  %v5518_v39 = vmul.f32 %v13286_v14, %v13259_v4  ;;  %vm5523_vm7 = vweird.f32 %v13286_v14  ;;  %v10536_v28 = vld [vmem:[#allocation8 + $0x10c] sm:$0xf]  ;;  %vm5966_vm14 = vcmp.gt.s32.totalorder %v13223_v30, 3 }
 0x89c   :  { %v5447_v1 = vsel %vm5446_vm1, %v11073_v13, %v5443_v34  ;;  %v5455_v54 = vmul.f32 %v11083_v61, %v13262_v2  ;;  %v11085_v37 = vpop.eup %11084  ;;  %vm5460_vm5 = vweird.f32 %v11083_v61  ;;  %v5529_v34 = vor.u32 1.1754944e-38, %v5528_v9  ;;  %vm13340_vm10 = vmor %vm5522_vm3, %vm5523_vm7 }
 0x89d   :  { %v5452_v58 = vsel %vm13277_vm12, %v5451_v10, %v5447_v1  ;;  %v5485_v46 = vsel %vm5484_vm2, %v11075_v49, %v5481_v52  ;;  %v5519_v19 = vsub.f32 1.0, %v5518_v39  ;;  %v13310_v13 = vadd.f32 1.0, %v11085_v37  ;;  %vm5461_vm9 = vmor %vm5459_vm0, %vm5460_vm5  ;;  %v5563_v1 = vpop.permute.xlu2 %5562 }
 0x89e   :  { %v13306_v62 = vpop.eup %11086  ;;  %v5490_v40 = vsel %vm13282_vm15, %v5489_v50, %v5485_v46  ;;  %v5549_v48 = vmul.f32 %v11079_v57, %v5452_v58  ;;  %v5456_v7 = vsub.f32 1.0, %v5455_v54  ;;  %v9426_v10 = vor.u32 %v10537_v20, %v9425_v12  ;;  %v9435_v50 = vld [vmem:[#allocation8 + $0x118] sm:$0xf0] }
 0x89f   :  { %v5547_v38 = vmul.f32 %v5490_v40, %v13180_v44  ;;  %v5493_v23 = vmul.f32 %v13306_v62, %v13274_v11  ;;  %v5520_v49 = vmul.f32 %v13286_v14, %v5519_v19  ;;  %v11089_v51 = vpop.eup %11088  ;;  %11090 = vrcp.f32 %v13310_v13  ;;  %v9427_v44 = vld [vmem:[#allocation8 + $0x110] sm:$0xf0] }
 0x8a0   :  { %v5457_v6 = vmul.f32 %v11083_v61, %v5456_v7  ;;  %vm5498_vm8 = vweird.f32 %v13306_v62  ;;  %5782 = vmatpush.bf16.msrb.mxu0 %v9426_v10  ;;  %v9430_v18 = vor.u32 %v10535_v42, %v9427_v44  ;;  %v9438_v2 = vor.u32 %v10536_v28, %v9435_v50  ;;  %v10597_v42 = vld [vmem:[#allocation8 + $0x1ec] sm:$0xf0]  ;;  %v9681_v44 = vld [vmem:[#allocation8 + $0x1e8] sm:$0xf]  ;;  %v10591_v28 = vld [vmem:[#allocation8 + $0x1c4] sm:$0xf] }
 0x8a1   :  { %v13322_v29 = vadd.f32 %v5549_v48, %v5547_v38  ;;  %v5494_v15 = vsub.f32 1.0, %v5493_v23  ;;  %v5521_v31 = vadd.f32 %v13286_v14, %v5520_v49  ;;  %vm5499_vm12 = vmor %vm5497_vm4, %vm5498_vm8  ;;  %vm5502_vm13 = vcmp.eq.f32.partialorder %v5501_v33, 8.507059e+37  ;;  %v10596_v33 = vld [vmem:[#allocation8 + $0x1ec] sm:$0xf]  ;;  %v10593_v10 = vld [vmem:[#allocation8 + $0x1cc] sm:$0xf0] }
 0x8a2   :  { %v5458_v57 = vadd.f32 %v11083_v61, %v5457_v6  ;;  %5796 = vmatpush.bf16.msrb.mxu1 %v9430_v18  ;;  %v5967_v54 = vsel %vm5965_vm11, 1, %v14229_v24  ;;  %5824 = vmatpush.bf16.msrb.mxu3 %v9438_v2  ;;  %v5968_v11 = vsel %vm5966_vm14, 1, %v14229_v24  ;;  %vm5527_vm15 = vcmp.eq.f32.partialorder %v5526_v45, 8.507059e+37 }
 0x8a3   :  { %v5495_v8 = vmul.f32 %v13306_v62, %v5494_v15  ;;  %11092 = vtanh.f32 %v13322_v29  ;;  %v5525_v39 = vsel %vm13340_vm10, %v13286_v14, %v5521_v31  ;;  %5970 = vperm.xlu0 %10741, %v5967_v54   ;;  %5973 = vperm.xlu1 %10742, %v5968_v11   ;;  %vm5567_vm0 = vcmp.eq.s32.totalorder %v5563_v1, 1  ;;  %v9657_v31 = vld [vmem:[#allocation8 + $0x1c0] sm:$0xf]  ;;  %v9643_v11 = vld [vmem:[#allocation8 + $0x1b0] sm:$0xf0] }
 0x8a4   :  { %v5462_v55 = vsel %vm5461_vm9, %v11083_v61, %v5458_v57  ;;  %v5530_v46 = vsel %vm5527_vm15, %v5529_v34, %v5525_v39  ;;  %v5543_v4 = vand.u32 2147483648, %v13310_v13  ;;  %vm5537_vm2 = vweird.f32 %v13310_v13 }
 0x8a5   :  { %v5467_v56 = vsel %vm13317_vm6, %v5466_v60, %v5462_v55  ;;  %v5496_v52 = vadd.f32 %v13306_v62, %v5495_v8  ;;  %v11091_v61 = vpop.eup %11090  ;;  %v5566_v7 = vpop.permute.xlu2 %5565  ;;  %v9682_v60 = vor.u32 %v10598_v22, %v9681_v44  ;;  %v9686_v57 = vor.u32 %v10596_v33, %v9683_v47  ;;  %v9659_v8 = vld [vmem:[#allocation8 + $0x1d0] sm:$0xf0]  ;;  %v10594_v55 = vld [vmem:[#allocation8 + $0x1d4] sm:$0xf0]  ;;  %v9609_v47 = vld [vmem:[#allocation8 + $0x160] sm:$0xf] }
 0x8a6   :  { %v5550_v9 = vmul.f32 %v11089_v51, %v5467_v56  ;;  %v5533_v41 = vmul.f32 %v11091_v61, %v13310_v13  ;;  %vm5538_vm1 = vweird.f32 %v11091_v61  ;;  %v5544_v12 = vor.u32 1.1754944e-38, %v5543_v4  ;;  %v10595_v51 = vld [vmem:[#allocation8 + $0x1e4] sm:$0xf]  ;;  %v10585_v4 = vld [vmem:[#allocation8 + $0x18c] sm:$0xf0] }
 0x8a7   :  { %v5500_v26 = vsel %vm5499_vm12, %v13306_v62, %v5496_v52  ;;  %vm5539_vm3 = vmor %vm5537_vm2, %vm5538_vm1  ;;  %vm5568_vm5 = vcmp.eq.s32.totalorder %v5566_v7, 1  ;;  %v9678_v15 = vor.u32 %v10595_v51, %v9675_v27  ;;  %6211 = vmatpush.bf16.msra.mxu2 %v9682_v60  ;;  %6225 = vmatpush.bf16.msra.mxu3 %v9686_v57  ;;  %v9658_v50 = vor.u32 %v10593_v10, %v9657_v31  ;;  %v10592_v52 = vld [vmem:[#allocation8 + $0x1cc] sm:$0xf]  ;;  %v9635_v27 = vld [vmem:[#allocation8 + $0x198] sm:$0xf0] }
 0x8a8   :  { %v5505_v37 = vsel %vm5502_vm13, %v5504_v25, %v5500_v26  ;;  %v5534_v30 = vsub.f32 1.0, %v5533_v41  ;;  %v9665_v25 = vld [vmem:[#allocation8 + $0x1c8] sm:$0xf]  ;;  %v4115_v34 = vadd.f32 %v12858_v21, %v12940_v35  ;;  %v4164_v18 = vadd.f32 %v12860_v5, %v12943_v63  ;;  %v9641_v26 = vld [vmem:[#allocation8 + $0x1a0] sm:$0xf] }
 0x8a9   :  { %v11093_v14 = vpop.eup %11092  ;;  %v5548_v58 = vmul.f32 %v5505_v37, %v13226_v36  ;;  %v5541_v36 = vand.u32 2147483647, %v13310_v13  ;;  %v9673_v13 = vld [vmem:[#allocation8 + $0x1e0] sm:$0xf]  ;;  %6197 = vmatpush.bf16.msra.mxu1 %v9678_v15  ;;  %v9662_v43 = vor.u32 %v10591_v28, %v9659_v8  ;;  %v9666_v56 = vor.u32 %v10594_v55, %v9665_v25  ;;  %v10587_v41 = vld [vmem:[#allocation8 + $0x1a4] sm:$0xf] }
 0x8aa   :  { %v5555_v19 = vmul.f32 %v11093_v14, %v5530_v46  ;;  %v5535_v62 = vmul.f32 %v11091_v61, %v5534_v30  ;;  %v9674_v6 = vor.u32 %v10597_v42, %v9673_v13  ;;  %v9670_v39 = vor.u32 %v10592_v52, %v9667_v53  ;;  %v9649_v37 = vld [vmem:[#allocation8 + $0x1a8] sm:$0xf]  ;;  %v10590_v5 = vld [vmem:[#allocation8 + $0x1b4] sm:$0xf0]  ;;  %v10579_v57 = vld [vmem:[#allocation8 + $0x164] sm:$0xf] }
 0x8ab   :  { %v13360_v59 = vadd.f32 %v5550_v9, %v5548_v58  ;;  %vm5542_vm4 = vcmp.eq.f32.partialorder %v5541_v36, 8.507059e+37  ;;  %6212 = vmatpush.bf16.msra.mxu2 %v9666_v56  ;;  %v10589_v9 = vld [vmem:[#allocation8 + $0x1ac] sm:$0xf0]  ;;  %v9646_v46 = vor.u32 %v10587_v41, %v9643_v11  ;;  %v9650_v30 = vor.u32 %v10590_v5, %v9649_v37  ;;  %v10583_v36 = vld [vmem:[#allocation8 + $0x184] sm:$0xf] }
 0x8ac   :  { %v5569_v40 = vsel %vm5567_vm0, %v5555_v19, 0.0  ;;  %v5536_v48 = vadd.f32 %v11091_v61, %v5535_v62  ;;  %6183 = vmatpush.bf16.msra.mxu0 %v9674_v6  ;;  %6226 = vmatpush.bf16.msra.mxu3 %v9670_v39  ;;  %v9642_v21 = vor.u32 %v10589_v9, %v9641_v26  ;;  %v9651_v62 = vld [vmem:[#allocation8 + $0x1b8] sm:$0xf0]  ;;  %v10584_v6 = vld [vmem:[#allocation8 + $0x18c] sm:$0xf]  ;;  %v14246_v39 = vld [vmem:[#allocation11_spill] sm:$0xff] }
 0x8ad   :  { %9421 = vst [vmem:[%s14011_s8 + $0x20] sm:$0xff] %v5569_v40  ;;  %11094 = vtanh.f32 %v13360_v59  ;;  %6198 = vmatpush.bf16.msra.mxu1 %v9662_v43  ;;  %v9638_v15 = vor.u32 %v10584_v6, %v9635_v27  ;;  %v9617_v8 = vld [vmem:[#allocation8 + $0x168] sm:$0xf]  ;;  %v10582_v43 = vld [vmem:[#allocation8 + $0x174] sm:$0xf0] }
 0x8ae   :  { %v5540_v45 = vsel %vm5539_vm3, %v11091_v61, %v5536_v48  ;;  %v9625_v48 = vld [vmem:[#allocation8 + $0x180] sm:$0xf]  ;;  %v9618_v53 = vor.u32 %v10582_v43, %v9617_v8  ;;  %v10577_v41 = vld [vmem:[#allocation8 + $0x14c] sm:$0xf0] }
 0x8af   :  { %v5545_v23 = vsel %vm5542_vm4, %v5544_v12, %v5540_v45  ;;  %6213 = vmatpush.bf16.msra.mxu2 %v9650_v30  ;;  %v4262_v45 = vadd.f32 %v12864_v17, %v12954_v16  ;;  %v9626_v7 = vor.u32 %v10585_v4, %v9625_v48  ;;  %v9627_v12 = vld [vmem:[#allocation8 + $0x190] sm:$0xf0]  ;;  %v9593_v9 = vld [vmem:[#allocation8 + $0x140] sm:$0xf]  ;;  %v10578_v30 = vld [vmem:[#allocation8 + $0x154] sm:$0xf0] }
 0x8b0   :  { %6184 = vmatpush.bf16.msra.mxu0 %v9658_v50  ;;  %v9630_v42 = vor.u32 %v10583_v36, %v9627_v12  ;;  %v9611_v50 = vld [vmem:[#allocation8 + $0x170] sm:$0xf0]  ;;  %v9603_v48 = vld [vmem:[#allocation8 + $0x158] sm:$0xf0]  ;;  %v9577_v12 = vld [vmem:[#allocation8 + $0x120] sm:$0xf] }
 0x8b1   :  { %6199 = vmatpush.bf16.msra.mxu1 %v9646_v46  ;;  %v9601_v46 = vld [vmem:[#allocation8 + $0x148] sm:$0xf] }
 0x8b3   :  { %v11095_v38 = vpop.eup %11094 }
 0x8b4   :  { %v5556_v0 = vmul.f32 %v11095_v38, %v5545_v23  ;;  %6185 = vmatpush.bf16.msra.mxu0 %v9642_v21  ;;  %v9633_v38 = vld [vmem:[#allocation8 + $0x188] sm:$0xf]  ;;  %v10586_v23 = vld [vmem:[#allocation8 + $0x194] sm:$0xf0] }
 0x8b5   :  { %v9634_v51 = vor.u32 %v10586_v23, %v9633_v38  ;;  %6200 = vmatpush.bf16.msra.mxu1 %v9630_v42  ;;  %v14247_v21 = vld [vmem:[#allocation14_spill] sm:$0xff]  ;;  %v10573_v38 = vld [vmem:[#allocation8 + $0x12c] sm:$0xf0]  ;;  %v10571_v23 = vld [vmem:[#allocation8 + $0x124] sm:$0xf] }
 0x8b6   :  { %v5582_v49 = vpack.c.bf16 %v5556_v0, %v5555_v19  ;;  %v5570_v20 = vsel %vm5568_vm5, %v5556_v0, 0.0  ;;  %v10588_v19 = vld [vmem:[#allocation8 + $0x1ac] sm:$0xf]  ;;  %v4117_v0 = vadd.f32 %v12866_v32, %v12940_v35  ;;  %v10581_v32 = vld [vmem:[#allocation8 + $0x16c] sm:$0xf0]  ;;  %v4264_v11 = vadd.f32 %v14247_v21, %v12954_v16 }
 0x8b7   :  { %9422 = vst [vmem:[%s14011_s8 + $0x28] sm:$0xff] %v5570_v20  ;;  %v9654_v40 = vor.u32 %v10588_v19, %v9651_v62  ;;  %6214 = vmatpush.bf16.msra.mxu2 %v9634_v51  ;;  %v9610_v28 = vor.u32 %v10581_v32, %v9609_v47  ;;  %v9594_v62 = vor.u32 %v10577_v41, %v9593_v9  ;;  %v10572_v41 = vld [vmem:[#allocation8 + $0x12c] sm:$0xf]  ;;  %v9587_v21 = vld [vmem:[#allocation8 + $0x138] sm:$0xf0] }
 0x8b8   :  { %5783 = vmatmul.bf16.vlgmr.msrb.gmra.mxu0 %v5582_v49  ;;  %5797 = vmatmul.bf16.vlgmr.msrb.gmra.mxu1 %v5582_v49 }
 0x8b9   :  { %5811 = vmatmul.bf16.vlgmr.msrb.gmra.mxu2 %v5582_v49  ;;  %5825 = vmatmul.bf16.vlgmr.msrb.gmra.mxu3 %v5582_v49  ;;  %v14245_v49 = vld [vmem:[#allocation13_spill] sm:$0xff] }
 0x8ba   :  { %v4166_v20 = vadd.f32 %v14245_v49, %v12943_v63  ;;  %6227 = vmatpush.bf16.msra.mxu3 %v9654_v40  ;;  %6186 = vmatpush.bf16.msra.mxu0 %v9626_v7  ;;  %v10576_v40 = vld [vmem:[#allocation8 + $0x14c] sm:$0xf] }
 0x8bb   :  { %6215 = vmatpush.bf16.msra.mxu2 %v9618_v53  ;;  %v9606_v7 = vor.u32 %v10576_v40, %v9603_v48 }
 0x8be   :  { %6228 = vmatpush.bf16.msra.mxu3 %v9638_v15  ;;  %6187 = vmatpush.bf16.msra.mxu0 %v9610_v28  ;;  %v14248_v15 = vld [vmem:[#allocation12_spill] sm:$0xff] }
 0x8c2   :  { %6188 = vmatpush.bf16.msra.mxu0 %v9594_v62 }
 0x935   :  { %v5784_v2 = vpop.f32.mrf.mxu0  ;;  %v5798_v61 = vpop.f32.mrf.mxu1 }
 0x936   :  { %v5831_v1 = vadd.f32 %v5784_v2, %v4115_v34  ;;  %v5832_v54 = vadd.f32 %v5798_v61, %v4164_v18  ;;  %v9614_v18 = vor.u32 %v10579_v57, %v9611_v50  ;;  %v10580_v2 = vld [vmem:[#allocation8 + $0x16c] sm:$0xf]  ;;  %v9619_v61 = vld [vmem:[#allocation8 + $0x178] sm:$0xf0] }
 0x937   :  { %v9622_v26 = vor.u32 %v10580_v2, %v9619_v61  ;;  %v9585_v61 = vld [vmem:[#allocation8 + $0x128] sm:$0xf] }
 0x938   :  { %v9551_v14 = vmul.f32 -1.442695, %v5831_v1  ;;  %v9553_v58 = vmul.f32 -1.442695, %v5832_v54  ;;  %v4213_v1 = vadd.f32 %v14246_v39, %v12963_v3  ;;  %6201 = vmatpush.bf16.msra.mxu1 %v9614_v18  ;;  %v10574_v39 = vld [vmem:[#allocation8 + $0x134] sm:$0xf0] }
 0x939   :  { %6229 = vmatpush.bf16.msra.mxu3 %v9622_v26 }
 0x93a   :  { %11096 = vpow2.f32 %v9551_v14  ;;  %v10575_v14 = vld [vmem:[#allocation8 + $0x144] sm:$0xf] }
 0x93b   :  { %11098 = vpow2.f32 %v9553_v58  ;;  %v9595_v58 = vld [vmem:[#allocation8 + $0x150] sm:$0xf0] }
 0x93c   :  { %v5826_v13 = vpop.f32.mrf.mxu3  ;;  %v5812_v31 = vpop.f32.mrf.mxu2  ;;  %v9598_v36 = vor.u32 %v10575_v14, %v9595_v58 }
 0x93d   :  { %v5834_v44 = vadd.f32 %v5826_v13, %v4262_v45  ;;  %v5786_v22 = vpop.f32.mrf.mxu0  ;;  %v5800_v17 = vpop.f32.mrf.mxu1  ;;  %v5833_v37 = vadd.f32 %v5812_v31, %v4213_v1  ;;  %v9602_v45 = vor.u32 %v10578_v30, %v9601_v46  ;;  %v9579_v13 = vld [vmem:[#allocation8 + $0x130] sm:$0xf0]  ;;  %6230 = vmatpush.bf16.msra.mxu3 %v9606_v7 }
 0x93e   :  { %v5835_v60 = vadd.f32 %v5786_v22, %v4117_v0  ;;  %v5836_v33 = vadd.f32 %v5800_v17, %v4166_v20  ;;  %v9578_v20 = vor.u32 %v10573_v38, %v9577_v12  ;;  %6202 = vmatpush.bf16.msra.mxu1 %v9598_v36  ;;  %v9582_v22 = vor.u32 %v10571_v23, %v9579_v13  ;;  %v9561_v23 = vld [vmem:[#allocation8 + $0x100] sm:$0xf] }
 0x93f   :  { %v9555_v10 = vmul.f32 -1.442695, %v5834_v44  ;;  %6216 = vmatpush.bf16.msra.mxu2 %v9602_v45  ;;  %v9590_v36 = vor.u32 %v10572_v41, %v9587_v21 }
 0x940   :  { %v11097_v25 = vpop.eup %11096  ;;  %v9552_v55 = vmul.f32 -1.442695, %v5835_v60  ;;  %v9554_v34 = vmul.f32 -1.442695, %v5836_v33  ;;  %v4215_v60 = vadd.f32 %v14248_v15, %v12963_v3  ;;  %6189 = vmatpush.bf16.msra.mxu0 %v9578_v20  ;;  %v9569_v15 = vld [vmem:[#allocation8 + $0x108] sm:$0xf] }
 0x941   :  { %v11099_v56 = vpop.eup %11098  ;;  %v13382_v52 = vadd.f32 1.0, %v11097_v25  ;;  %11100 = vpow2.f32 %v9555_v10  ;;  %6231 = vmatpush.bf16.msra.mxu3 %v9590_v36 }
 0x942   :  { %v13386_v54 = vadd.f32 1.0, %v11099_v56  ;;  %11102 = vpow2.f32 %v9552_v55  ;;  %6203 = vmatpush.bf16.msra.mxu1 %v9582_v22 }
 0x943   :  { %11104 = vrcp.f32 %v13382_v52  ;;  %v5856_v51 = vand.u32 2147483647, %v13382_v52  ;;  %v5858_v47 = vand.u32 2147483648, %v13382_v52  ;;  %vm5852_vm6 = vweird.f32 %v13382_v52 }
 0x944   :  { %11106 = vrcp.f32 %v13386_v54  ;;  %v5828_v5 = vpop.f32.mrf.mxu3  ;;  %v5814_v27 = vpop.f32.mrf.mxu2  ;;  %v5896_v31 = vand.u32 2147483648, %v13386_v54  ;;  %v5894_v10 = vand.u32 2147483647, %v13386_v54  ;;  %vm5890_vm7 = vweird.f32 %v13386_v54 }
 0x945   :  { %11108 = vpow2.f32 %v9554_v34  ;;  %v5838_v19 = vadd.f32 %v5828_v5, %v4264_v11  ;;  %v5837_v8 = vadd.f32 %v5814_v27, %v4215_v60  ;;  %vm13410_vm8 = vcmp.eq.f32.partialorder %v5856_v51, 8.507059e+37  ;;  %v10569_v51 = vld [vmem:[#allocation8 + $0x10c] sm:$0xf0]  ;;  %v10567_v27 = vld [vmem:[#allocation8 + $0x104] sm:$0xf] }
 0x946   :  { %11110 = vtanh.f32 %v5833_v37  ;;  %v5859_v43 = vor.u32 1.1754944e-38, %v5858_v47  ;;  %v5897_v53 = vor.u32 1.1754944e-38, %v5896_v31  ;;  %vm13415_vm11 = vcmp.eq.f32.partialorder %v5894_v10, 8.507059e+37 }
 0x947   :  { %v11101_v4 = vpop.eup %11100  ;;  %v9556_v44 = vmul.f32 -1.442695, %v5838_v19  ;;  %v9586_v19 = vor.u32 %v10574_v39, %v9585_v61  ;;  %v10624_v39 = vld [vmem:[#allocation8 + $0x1cc] sm:$0xf] }
 0x948   :  { %v11103_v0 = vpop.eup %11102  ;;  %v13392_v49 = vadd.f32 1.0, %v11101_v4 }
 0x949   :  { %v11105_v42 = vpop.eup %11104  ;;  %v13395_v6 = vadd.f32 1.0, %v11103_v0  ;;  %6217 = vmatpush.bf16.msra.mxu2 %v9586_v19 }
 0x94a   :  { %v11107_v17 = vpop.eup %11106  ;;  %v5848_v33 = vmul.f32 %v11105_v42, %v13382_v52  ;;  %11112 = vrcp.f32 %v13392_v49  ;;  %vm5853_vm9 = vweird.f32 %v11105_v42  ;;  %v5934_v58 = vand.u32 2147483647, %v13392_v49 }
 0x94b   :  { %v11109_v32 = vpop.eup %11108  ;;  %v5886_v57 = vmul.f32 %v11107_v17, %v13386_v54  ;;  %11114 = vrcp.f32 %v13395_v6  ;;  %vm5891_vm10 = vweird.f32 %v11107_v17  ;;  %vm5867_vm12 = vweird.f32 %v13395_v6  ;;  %vm5854_vm13 = vmor %vm5852_vm6, %vm5853_vm9 }
 0x94c   :  { %v5849_v28 = vsub.f32 1.0, %v5848_v33  ;;  %v13407_v50 = vadd.f32 1.0, %v11109_v32  ;;  %11116 = vpow2.f32 %v9556_v44  ;;  %v11111_v34 = vpop.eup %11110  ;;  %v5871_v9 = vand.u32 2147483647, %v13395_v6  ;;  %vm5892_vm14 = vmor %vm5890_vm7, %vm5891_vm10 }
 0x94d   :  { %v5887_v25 = vsub.f32 1.0, %v5886_v57  ;;  %v5873_v5 = vand.u32 2147483648, %v13395_v6  ;;  %vm5930_vm15 = vweird.f32 %v13392_v49  ;;  %v5936_v52 = vand.u32 2147483648, %v13392_v49  ;;  %v10570_v57 = vld [vmem:[#allocation8 + $0x114] sm:$0xf0] }
 0x94e   :  { %v5850_v18 = vmul.f32 %v11105_v42, %v5849_v28  ;;  %11118 = vrcp.f32 %v13407_v50  ;;  %vm5905_vm0 = vweird.f32 %v13407_v50  ;;  %v5911_v13 = vand.u32 2147483648, %v13407_v50 }
 0x94f   :  { %v5888_v56 = vmul.f32 %v11107_v17, %v5887_v25  ;;  %11120 = vtanh.f32 %v5837_v8  ;;  %vm13450_vm2 = vcmp.eq.f32.partialorder %v5871_v9, 8.507059e+37  ;;  %v5874_v47 = vor.u32 1.1754944e-38, %v5873_v5  ;;  %v10568_v8 = vld [vmem:[#allocation8 + $0x10c] sm:$0xf]  ;;  %v9571_v25 = vld [vmem:[#allocation8 + $0x118] sm:$0xf0] }
 0x950   :  { %v13419_v1 = vpop.eup %11112  ;;  %v5851_v26 = vadd.f32 %v11105_v42, %v5850_v18  ;;  %v5909_v32 = vand.u32 2147483647, %v13407_v50  ;;  %v9562_v28 = vor.u32 %v10569_v51, %v9561_v23  ;;  %v13498_v5 = vld [vmem:[%s14010_s7] sm:$0xff]  ;;  %v10629_v51 = vld [vmem:[#allocation8 + $0x1ec] sm:$0xf0] }
 0x951   :  { %v11115_v11 = vpop.eup %11114  ;;  %v5889_v37 = vadd.f32 %v11107_v17, %v5888_v56  ;;  %v5926_v14 = vmul.f32 %v13419_v1, %v13392_v49  ;;  %vm5931_vm3 = vweird.f32 %v13419_v1  ;;  %vm6373_vm10 = vcmp.gt.s32.totalorder %v13498_v5, 4 }
 0x952   :  { %v5855_v46 = vsel %vm5854_vm13, %v11105_v42, %v5851_v26  ;;  %v5863_v30 = vmul.f32 %v11115_v11, %v13395_v6  ;;  %v11117_v62 = vpop.eup %11116  ;;  %vm5868_vm1 = vweird.f32 %v11115_v11  ;;  %6190 = vmatpush.bf16.msra.mxu0 %v9562_v28  ;;  %vm13473_vm6 = vmor %vm5930_vm15, %vm5931_vm3  ;;  %v9574_v6 = vor.u32 %v10568_v8, %v9571_v25  ;;  %v13480_v26 = vld [vmem:[%s14010_s7 + $0x8] sm:$0xff]  ;;  %v10623_v28 = vld [vmem:[#allocation8 + $0x1c4] sm:$0xf] }
 0x953   :  { %v5860_v40 = vsel %vm13410_vm8, %v5859_v43, %v5855_v46  ;;  %v5893_v48 = vsel %vm5892_vm14, %v11107_v17, %v5889_v37  ;;  %v5927_v4 = vsub.f32 1.0, %v5926_v14  ;;  %v13443_v38 = vadd.f32 1.0, %v11117_v62  ;;  %vm5869_vm5 = vmor %vm5867_vm12, %vm5868_vm1  ;;  %v9817_v17 = vld [vmem:[#allocation8 + $0x1e8] sm:$0xf]  ;;  %v9795_v25 = vld [vmem:[#allocation8 + $0x1d0] sm:$0xf0] }
 0x954   :  { %v13439_v45 = vpop.eup %11118  ;;  %v5898_v54 = vsel %vm13415_vm11, %v5897_v53, %v5893_v48  ;;  %v5957_v7 = vmul.f32 %v11111_v34, %v5860_v40  ;;  %v5864_v12 = vsub.f32 1.0, %v5863_v30  ;;  %v5912_v34 = vor.u32 1.1754944e-38, %v5911_v13  ;;  %6232 = vmatpush.bf16.msra.mxu3 %v9574_v6  ;;  %v9803_v6 = vld [vmem:[#allocation8 + $0x1d8] sm:$0xf0] }
 0x955   :  { %v5955_v0 = vmul.f32 %v5898_v54, %v13322_v29  ;;  %v5901_v20 = vmul.f32 %v13439_v45, %v13407_v50  ;;  %v5928_v42 = vmul.f32 %v13419_v1, %v5927_v4  ;;  %v11121_v44 = vpop.eup %11120  ;;  %11122 = vrcp.f32 %v13443_v38  ;;  %v9563_v29 = vld [vmem:[#allocation8 + $0x110] sm:$0xf0] }
 0x956   :  { %v5865_v22 = vmul.f32 %v11115_v11, %v5864_v12  ;;  %vm5906_vm4 = vweird.f32 %v13439_v45  ;;  %v5937_v43 = vor.u32 1.1754944e-38, %v5936_v52  ;;  %v9566_v56 = vor.u32 %v10567_v27, %v9563_v29  ;;  %v10627_v27 = vld [vmem:[#allocation8 + $0x1e4] sm:$0xf]  ;;  %v10630_v29 = vld [vmem:[#allocation8 + $0x1f4] sm:$0xf0] }
 0x957   :  { %v13455_v60 = vadd.f32 %v5957_v7, %v5955_v0  ;;  %v5902_v33 = vsub.f32 1.0, %v5901_v20  ;;  %v5929_v10 = vadd.f32 %v13419_v1, %v5928_v42  ;;  %v9570_v53 = vor.u32 %v10570_v57, %v9569_v15  ;;  %vm13487_vm8 = vmor %vm5905_vm0, %vm5906_vm4  ;;  %v5974_v7 = vpop.permute.xlu1 %5973 }
 0x958   :  { %v5866_v31 = vadd.f32 %v11115_v11, %v5865_v22  ;;  %vm6374_vm7 = vcmp.gt.s32.totalorder %v13480_v26, 4  ;;  %vm5910_vm9 = vcmp.eq.f32.partialorder %v5909_v32, 8.507059e+37  ;;  %6204 = vmatpush.bf16.msra.mxu1 %v9566_v56  ;;  %vm5935_vm11 = vcmp.eq.f32.partialorder %v5934_v58, 8.507059e+37  ;;  %v9811_v22 = vld [vmem:[#allocation8 + $0x1f0] sm:$0xf0] }
 0x959   :  { %v5903_v55 = vmul.f32 %v13439_v45, %v5902_v33  ;;  %11124 = vtanh.f32 %v13455_v60  ;;  %v5933_v21 = vsel %vm13473_vm6, %v13419_v1, %v5929_v10  ;;  %6218 = vmatpush.bf16.msra.mxu2 %v9570_v53  ;;  %v6376_v37 = vsel %vm6374_vm7, 1, %v14229_v24  ;;  %v9819_v32 = vld [vmem:[#allocation8 + $0x1f8] sm:$0xf0]  ;;  %v10625_v10 = vld [vmem:[#allocation8 + $0x1cc] sm:$0xf0] }
 0x95a   :  { %v5870_v18 = vsel %vm5869_vm5, %v11115_v11, %v5866_v31  ;;  %v5971_v11 = vpop.permute.xlu0 %5970  ;;  %6381 = vperm.xlu0 %10741, %v6376_v37   ;;  %v6375_v1 = vsel %vm6373_vm10, 1, %v14229_v24  ;;  %v5938_v62 = vsel %vm5935_vm11, %v5937_v43, %v5933_v21  ;;  %v5951_v49 = vand.u32 2147483648, %v13443_v38  ;;  %v9793_v31 = vld [vmem:[#allocation8 + $0x1c0] sm:$0xf]  ;;  %v14260_v56 = vld [vmem:[#allocation17_spill] sm:$0xff] }
 0x95b   :  { %v5875_v2 = vsel %vm13450_vm2, %v5874_v47, %v5870_v18  ;;  %v5904_v61 = vadd.f32 %v13439_v45, %v5903_v55  ;;  %v11123_v9 = vpop.eup %11122  ;;  %6378 = vperm.xlu2 %10743, %v6375_v1   ;;  %vm5975_vm12 = vcmp.eq.s32.totalorder %v5971_v11, 1  ;;  %vm5945_vm14 = vweird.f32 %v13443_v38  ;;  %v10628_v47 = vld [vmem:[#allocation8 + $0x1ec] sm:$0xf]  ;;  %v9801_v55 = vld [vmem:[#allocation8 + $0x1c8] sm:$0xf]  ;;  %v14259_v18 = vld [vmem:[#allocation15_spill] sm:$0xff] }
 0x95c   :  { %v5958_v14 = vmul.f32 %v11121_v44, %v5875_v2  ;;  %v5941_v46 = vmul.f32 %v11123_v9, %v13443_v38  ;;  %vm5946_vm13 = vweird.f32 %v11123_v9  ;;  %v5952_v12 = vor.u32 1.1754944e-38, %v5951_v49 }
 0x95d   :  { %v5908_v50 = vsel %vm13487_vm8, %v13439_v45, %v5904_v61  ;;  %vm5947_vm15 = vmor %vm5945_vm14, %vm5946_vm13  ;;  %vm5976_vm1 = vcmp.eq.s32.totalorder %v5974_v7, 1  ;;  %v9814_v15 = vor.u32 %v10627_v27, %v9811_v22  ;;  %v9818_v33 = vor.u32 %v10630_v29, %v9817_v17  ;;  %v10615_v7 = vld [vmem:[#allocation8 + $0x184] sm:$0xf]  ;;  %v14263_v27 = vld [vmem:[#allocation21_spill] sm:$0xff] }
 0x95e   :  { %v5913_v30 = vsel %vm5910_vm9, %v5912_v34, %v5908_v50  ;;  %v5942_v40 = vsub.f32 1.0, %v5941_v46  ;;  %v9822_v57 = vor.u32 %v10628_v47, %v9819_v32  ;;  %v9794_v8 = vor.u32 %v10625_v10, %v9793_v31  ;;  %v10626_v34 = vld [vmem:[#allocation8 + $0x1d4] sm:$0xf0]  ;;  %v9777_v50 = vld [vmem:[#allocation8 + $0x1a0] sm:$0xf] }
 0x95f   :  { %v11125_v52 = vpop.eup %11124  ;;  %v5956_v19 = vmul.f32 %v5913_v30, %v13360_v59  ;;  %v5949_v59 = vand.u32 2147483647, %v13443_v38  ;;  %v9809_v38 = vld [vmem:[#allocation8 + $0x1e0] sm:$0xf]  ;;  %6605 = vmatpush.bf16.msrb.mxu1 %v9814_v15  ;;  %6619 = vmatpush.bf16.msrb.mxu2 %v9818_v33  ;;  %v4120_v43 = vadd.f32 %v14259_v18, %v12940_v35  ;;  %v4169_v53 = vadd.f32 %v14260_v56, %v12943_v63  ;;  %v10619_v46 = vld [vmem:[#allocation8 + $0x1a4] sm:$0xf] }
 0x960   :  { %v5963_v48 = vmul.f32 %v11125_v52, %v5938_v62  ;;  %v5943_v36 = vmul.f32 %v11123_v9, %v5942_v40  ;;  %v9810_v44 = vor.u32 %v10629_v51, %v9809_v38  ;;  %6633 = vmatpush.bf16.msrb.mxu3 %v9822_v57  ;;  %v9798_v2 = vor.u32 %v10623_v28, %v9795_v25  ;;  %v9779_v30 = vld [vmem:[#allocation8 + $0x1b0] sm:$0xf0]  ;;  %v9785_v52 = vld [vmem:[#allocation8 + $0x1a8] sm:$0xf]  ;;  %v10616_v15 = vld [vmem:[#allocation8 + $0x18c] sm:$0xf] }
 0x961   :  { %v13509_v4 = vadd.f32 %v5958_v14, %v5956_v19  ;;  %vm5950_vm0 = vcmp.eq.f32.partialorder %v5949_v59, 8.507059e+37  ;;  %v9802_v61 = vor.u32 %v10626_v34, %v9801_v55  ;;  %v9806_v21 = vor.u32 %v10624_v39, %v9803_v6  ;;  %v10621_v14 = vld [vmem:[#allocation8 + $0x1ac] sm:$0xf0]  ;;  %v10622_v19 = vld [vmem:[#allocation8 + $0x1b4] sm:$0xf0]  ;;  %v14262_v38 = vld [vmem:[#allocation16_spill] sm:$0xff] }
 0x962   :  { %v5977_v45 = vsel %vm5975_vm12, %v5963_v48, 0.0  ;;  %v5944_v54 = vadd.f32 %v11123_v9, %v5943_v36  ;;  %6591 = vmatpush.bf16.msrb.mxu0 %v9810_v44  ;;  %v9778_v1 = vor.u32 %v10621_v14, %v9777_v50  ;;  %v9786_v36 = vor.u32 %v10622_v19, %v9785_v52  ;;  %v9761_v59 = vld [vmem:[#allocation8 + $0x180] sm:$0xf]  ;;  %v9771_v33 = vld [vmem:[#allocation8 + $0x198] sm:$0xf0] }
 0x963   :  { %9557 = vst [vmem:[%s14011_s8 + $0x30] sm:$0xff] %v5977_v45  ;;  %11126 = vtanh.f32 %v13509_v4  ;;  %6606 = vmatpush.bf16.msrb.mxu1 %v9798_v2  ;;  %6620 = vmatpush.bf16.msrb.mxu2 %v9802_v61  ;;  %v10620_v45 = vld [vmem:[#allocation8 + $0x1ac] sm:$0xf]  ;;  %v4122_v51 = vadd.f32 %v14262_v38, %v12940_v35  ;;  %v4171_v44 = vadd.f32 %v14263_v27, %v12943_v63  ;;  %v10613_v25 = vld [vmem:[#allocation8 + $0x16c] sm:$0xf0]  ;;  %v14264_v14 = vld [vmem:[#allocation18_spill] sm:$0xff] }
 0x964   :  { %v5948_v58 = vsel %vm5947_vm15, %v11123_v9, %v5944_v54  ;;  %6634 = vmatpush.bf16.msrb.mxu3 %v9806_v21  ;;  %v9787_v54 = vld [vmem:[#allocation8 + $0x1b8] sm:$0xf0]  ;;  %v9774_v31 = vor.u32 %v10616_v15, %v9771_v33  ;;  %v10611_v55 = vld [vmem:[#allocation8 + $0x164] sm:$0xf]  ;;  %v9747_v56 = vld [vmem:[#allocation8 + $0x170] sm:$0xf0] }
 0x965   :  { %v5953_v0 = vsel %vm5950_vm0, %v5952_v12, %v5948_v58  ;;  %v9790_v49 = vor.u32 %v10620_v45, %v9787_v54  ;;  %v10617_v58 = vld [vmem:[#allocation8 + $0x18c] sm:$0xf0]  ;;  %v14261_v12 = vld [vmem:[#allocation19_spill] sm:$0xff]  ;;  %v9750_v6 = vor.u32 %v10611_v55, %v9747_v56  ;;  %v9755_v50 = vld [vmem:[#allocation8 + $0x178] sm:$0xf0] }
 0x966   :  { %6592 = vmatpush.bf16.msrb.mxu0 %v9794_v8  ;;  %v9745_v8 = vld [vmem:[#allocation8 + $0x160] sm:$0xf]  ;;  %v10609_v19 = vld [vmem:[#allocation8 + $0x14c] sm:$0xf0]  ;;  %v10607_v45 = vld [vmem:[#allocation8 + $0x144] sm:$0xf] }
 0x967   :  { %6621 = vmatpush.bf16.msrb.mxu2 %v9786_v36  ;;  %v9729_v52 = vld [vmem:[#allocation8 + $0x140] sm:$0xf]  ;;  %v9731_v54 = vld [vmem:[#allocation8 + $0x150] sm:$0xf0]  ;;  %v10603_v27 = vld [vmem:[#allocation8 + $0x124] sm:$0xf] }
 0x968   :  { %6635 = vmatpush.bf16.msrb.mxu3 %v9790_v49  ;;  %v9737_v49 = vld [vmem:[#allocation8 + $0x148] sm:$0xf]  ;;  %v9713_v38 = vld [vmem:[#allocation8 + $0x120] sm:$0xf] }
 0x969   :  { %v11127_v23 = vpop.eup %11126 }
 0x96a   :  { %v5964_v20 = vmul.f32 %v11127_v23, %v5953_v0  ;;  %6593 = vmatpush.bf16.msrb.mxu0 %v9778_v1  ;;  %v4267_v23 = vadd.f32 %v14261_v12, %v12954_v16  ;;  %v9762_v0 = vor.u32 %v10617_v58, %v9761_v59  ;;  %v10610_v59 = vld [vmem:[#allocation8 + $0x154] sm:$0xf0]  ;;  %v10608_v12 = vld [vmem:[#allocation8 + $0x14c] sm:$0xf] }
 0x96c   :  { %v5990_v13 = vpack.c.bf16 %v5964_v20, %v5963_v48  ;;  %v5978_v42 = vsel %vm5976_vm1, %v5964_v20, 0.0  ;;  %v9782_v48 = vor.u32 %v10619_v46, %v9779_v30  ;;  %v9763_v20 = vld [vmem:[#allocation8 + $0x190] sm:$0xf0]  ;;  %6636 = vmatpush.bf16.msrb.mxu3 %v9774_v31  ;;  %v4218_v46 = vadd.f32 %v14264_v14, %v12963_v3 }
 0x96d   :  { %9558 = vst [vmem:[%s14011_s8 + $0x38] sm:$0xff] %v5978_v42  ;;  %v10618_v42 = vld [vmem:[#allocation8 + $0x194] sm:$0xf0]  ;;  %v9766_v17 = vor.u32 %v10615_v7, %v9763_v20  ;;  %v9730_v7 = vor.u32 %v10609_v19, %v9729_v52  ;;  %v9734_v20 = vor.u32 %v10607_v45, %v9731_v54 }
 0x96e   :  { %6191 = vmatmul.bf16.vlgmr.msra.gmra.mxu0 %v5990_v13  ;;  %6205 = vmatmul.bf16.vlgmr.msra.gmra.mxu1 %v5990_v13 }
 0x96f   :  { %6219 = vmatmul.bf16.vlgmr.msra.gmra.mxu2 %v5990_v13  ;;  %6233 = vmatmul.bf16.vlgmr.msra.gmra.mxu3 %v5990_v13  ;;  %v9769_v13 = vld [vmem:[#allocation8 + $0x188] sm:$0xf] }
 0x970   :  { %6607 = vmatpush.bf16.msrb.mxu1 %v9782_v48  ;;  %v9770_v29 = vor.u32 %v10618_v42, %v9769_v13  ;;  %6594 = vmatpush.bf16.msrb.mxu0 %v9762_v0  ;;  %v9738_v13 = vor.u32 %v10610_v59, %v9737_v49 }
 0x972   :  { %6622 = vmatpush.bf16.msrb.mxu2 %v9770_v29  ;;  %v9715_v29 = vld [vmem:[#allocation8 + $0x130] sm:$0xf0] }
 0x973   :  { %v9718_v31 = vor.u32 %v10603_v27, %v9715_v29 }
 0x974   :  { %6608 = vmatpush.bf16.msrb.mxu1 %v9766_v17 }
 0x978   :  { %6609 = vmatpush.bf16.msrb.mxu1 %v9750_v6  ;;  %v10600_v6 = vld [vmem:[#allocation8 + $0x10c] sm:$0xf] }
 0x97c   :  { %6610 = vmatpush.bf16.msrb.mxu1 %v9734_v20 }
 0x980   :  { %6611 = vmatpush.bf16.msrb.mxu1 %v9718_v31  ;;  %v10599_v31 = vld [vmem:[#allocation8 + $0x104] sm:$0xf] }
 0x9eb   :  { %v6192_v9 = vpop.f32.mrf.mxu0  ;;  %v6206_v41 = vpop.f32.mrf.mxu1 }
 0x9ec   :  { %v6239_v11 = vadd.f32 %v6192_v9, %v4120_v43  ;;  %v6240_v37 = vadd.f32 %v6206_v41, %v4169_v53  ;;  %v9746_v43 = vor.u32 %v10613_v25, %v9745_v8  ;;  %v9753_v53 = vld [vmem:[#allocation8 + $0x168] sm:$0xf]  ;;  %v10614_v9 = vld [vmem:[#allocation8 + $0x174] sm:$0xf0] }
 0x9ee   :  { %v9687_v62 = vmul.f32 -1.442695, %v6239_v11  ;;  %v9689_v40 = vmul.f32 -1.442695, %v6240_v37  ;;  %6595 = vmatpush.bf16.msrb.mxu0 %v9746_v43  ;;  %v9754_v11 = vor.u32 %v10614_v9, %v9753_v53  ;;  %v10612_v37 = vld [vmem:[#allocation8 + $0x16c] sm:$0xf] }
 0x9ef   :  { %v9758_v30 = vor.u32 %v10612_v37, %v9755_v50 }
 0x9f0   :  { %11128 = vpow2.f32 %v9687_v62  ;;  %6623 = vmatpush.bf16.msrb.mxu2 %v9754_v11  ;;  %v14265_v62 = vld [vmem:[#allocation22_spill] sm:$0xff] }
 0x9f1   :  { %11130 = vpow2.f32 %v9689_v40  ;;  %v4269_v40 = vadd.f32 %v14265_v62, %v12954_v16  ;;  %6637 = vmatpush.bf16.msrb.mxu3 %v9758_v30  ;;  %v10606_v30 = vld [vmem:[#allocation8 + $0x134] sm:$0xf0] }
 0x9f2   :  { %v6234_v22 = vpop.f32.mrf.mxu3  ;;  %v6220_v34 = vpop.f32.mrf.mxu2  ;;  %6596 = vmatpush.bf16.msrb.mxu0 %v9730_v7 }
 0x9f3   :  { %v6242_v47 = vadd.f32 %v6234_v22, %v4267_v23  ;;  %v6194_v32 = vpop.f32.mrf.mxu0  ;;  %v6208_v57 = vpop.f32.mrf.mxu1  ;;  %v6241_v48 = vadd.f32 %v6220_v34, %v4218_v46  ;;  %v9739_v23 = vld [vmem:[#allocation8 + $0x158] sm:$0xf0]  ;;  %v9721_v46 = vld [vmem:[#allocation8 + $0x128] sm:$0xf] }
 0x9f4   :  { %v6243_v10 = vadd.f32 %v6194_v32, %v4122_v51  ;;  %v6244_v28 = vadd.f32 %v6208_v57, %v4171_v44  ;;  %v9742_v42 = vor.u32 %v10608_v12, %v9739_v23  ;;  %v10605_v51 = vld [vmem:[#allocation8 + $0x12c] sm:$0xf0]  ;;  %6624 = vmatpush.bf16.msrb.mxu2 %v9738_v13  ;;  %v9722_v12 = vor.u32 %v10606_v30, %v9721_v46 }
 0x9f5   :  { %v9691_v18 = vmul.f32 -1.442695, %v6242_v47  ;;  %v9714_v17 = vor.u32 %v10605_v51, %v9713_v38 }
 0x9f6   :  { %v11129_v2 = vpop.eup %11128  ;;  %v9688_v61 = vmul.f32 -1.442695, %v6243_v10  ;;  %v9690_v39 = vmul.f32 -1.442695, %v6244_v28  ;;  %v14266_v28 = vld [vmem:[#allocation20_spill] sm:$0xff]  ;;  %6638 = vmatpush.bf16.msrb.mxu3 %v9742_v42 }
 0x9f7   :  { %v11131_v41 = vpop.eup %11130  ;;  %v13531_v21 = vadd.f32 1.0, %v11129_v2  ;;  %11132 = vpow2.f32 %v9691_v18  ;;  %v4220_v8 = vadd.f32 %v14266_v28, %v12963_v3  ;;  %6597 = vmatpush.bf16.msrb.mxu0 %v9714_v17  ;;  %v9697_v17 = vld [vmem:[#allocation8 + $0x100] sm:$0xf] }
 0x9f8   :  { %v13535_v1 = vadd.f32 1.0, %v11131_v41  ;;  %11134 = vpow2.f32 %v9688_v61  ;;  %6625 = vmatpush.bf16.msrb.mxu2 %v9722_v12 }
 0x9f9   :  { %11136 = vrcp.f32 %v13531_v21  ;;  %v6264_v33 = vand.u32 2147483647, %v13531_v21  ;;  %v6266_v55 = vand.u32 2147483648, %v13531_v21  ;;  %vm6260_vm2 = vweird.f32 %v13531_v21 }
 0x9fa   :  { %11138 = vrcp.f32 %v13535_v1  ;;  %v6236_v36 = vpop.f32.mrf.mxu3  ;;  %v6222_v32 = vpop.f32.mrf.mxu2  ;;  %v6304_v43 = vand.u32 2147483648, %v13535_v1  ;;  %v6302_v56 = vand.u32 2147483647, %v13535_v1  ;;  %vm6298_vm3 = vweird.f32 %v13535_v1 }
 0x9fb   :  { %11140 = vpow2.f32 %v9690_v39  ;;  %v6246_v58 = vadd.f32 %v6236_v36, %v4269_v40  ;;  %v6245_v61 = vadd.f32 %v6222_v32, %v4220_v8  ;;  %vm13559_vm4 = vcmp.eq.f32.partialorder %v6264_v33, 8.507059e+37  ;;  %v10604_v40 = vld [vmem:[#allocation8 + $0x12c] sm:$0xf] }
 0x9fc   :  { %11142 = vtanh.f32 %v6241_v48  ;;  %v6267_v11 = vor.u32 1.1754944e-38, %v6266_v55  ;;  %v6305_v50 = vor.u32 1.1754944e-38, %v6304_v43  ;;  %vm13564_vm7 = vcmp.eq.f32.partialorder %v6302_v56, 8.507059e+37  ;;  %v9723_v48 = vld [vmem:[#allocation8 + $0x138] sm:$0xf0] }
 0x9fd   :  { %v11133_v0 = vpop.eup %11132  ;;  %v9692_v57 = vmul.f32 -1.442695, %v6246_v58  ;;  %v9726_v42 = vor.u32 %v10604_v40, %v9723_v48  ;;  %v10602_v56 = vld [vmem:[#allocation8 + $0x114] sm:$0xf0] }
 0x9fe   :  { %v11135_v44 = vpop.eup %11134  ;;  %v13541_v22 = vadd.f32 1.0, %v11133_v0 }
 0x9ff   :  { %v11137_v15 = vpop.eup %11136  ;;  %v13544_v47 = vadd.f32 1.0, %v11135_v44  ;;  %6639 = vmatpush.bf16.msrb.mxu3 %v9726_v42  ;;  %v6382_v42 = vpop.permute.xlu0 %6381 }
 0xa00   :  { %v11139_v10 = vpop.eup %11138  ;;  %v6256_v25 = vmul.f32 %v11137_v15, %v13531_v21  ;;  %11144 = vrcp.f32 %v13541_v22  ;;  %vm6261_vm5 = vweird.f32 %v11137_v15  ;;  %v6342_v59 = vand.u32 2147483647, %v13541_v22 }
 0xa01   :  { %v11141_v34 = vpop.eup %11140  ;;  %v6294_v18 = vmul.f32 %v11139_v10, %v13535_v1  ;;  %11146 = vrcp.f32 %v13544_v47  ;;  %vm6299_vm6 = vweird.f32 %v11139_v10  ;;  %vm6275_vm8 = vweird.f32 %v13544_v47  ;;  %vm6262_vm9 = vmor %vm6260_vm2, %vm6261_vm5 }
 0xa02   :  { %v6257_v53 = vsub.f32 1.0, %v6256_v25  ;;  %v13556_v2 = vadd.f32 1.0, %v11141_v34  ;;  %11148 = vpow2.f32 %v9692_v57  ;;  %v11143_v9 = vpop.eup %11142  ;;  %v6279_v62 = vand.u32 2147483647, %v13544_v47  ;;  %vm6300_vm10 = vmor %vm6298_vm3, %vm6299_vm6  ;;  %v10601_v57 = vld [vmem:[#allocation8 + $0x10c] sm:$0xf0] }
 0xa03   :  { %v6295_v39 = vsub.f32 1.0, %v6294_v18  ;;  %v6281_v54 = vand.u32 2147483648, %v13544_v47  ;;  %vm6338_vm11 = vweird.f32 %v13541_v22  ;;  %v6344_v21 = vand.u32 2147483648, %v13541_v22  ;;  %v9705_v25 = vld [vmem:[#allocation8 + $0x108] sm:$0xf] }
 0xa04   :  { %v6258_v41 = vmul.f32 %v11137_v15, %v6257_v53  ;;  %11150 = vrcp.f32 %v13556_v2  ;;  %vm6313_vm12 = vweird.f32 %v13556_v2  ;;  %v6319_v33 = vand.u32 2147483648, %v13556_v2 }
 0xa05   :  { %v6296_v37 = vmul.f32 %v11139_v10, %v6295_v39  ;;  %11152 = vtanh.f32 %v6245_v61  ;;  %vm13599_vm14 = vcmp.eq.f32.partialorder %v6279_v62, 8.507059e+37  ;;  %v6282_v18 = vor.u32 1.1754944e-38, %v6281_v54 }
 0xa06   :  { %v13568_v52 = vpop.eup %11144  ;;  %v6259_v19 = vadd.f32 %v11137_v15, %v6258_v41  ;;  %v6317_v43 = vand.u32 2147483647, %v13556_v2  ;;  %v9698_v39 = vor.u32 %v10601_v57, %v9697_v17  ;;  %v9706_v46 = vor.u32 %v10602_v56, %v9705_v25  ;;  %v9947_v57 = vld [vmem:[#allocation8 + $0x1f0] sm:$0xf0]  ;;  %v9955_v25 = vld [vmem:[#allocation8 + $0x1f8] sm:$0xf0] }
 0xa07   :  { %v11147_v36 = vpop.eup %11146  ;;  %v6297_v45 = vadd.f32 %v11139_v10, %v6296_v37  ;;  %v6334_v49 = vmul.f32 %v13568_v52, %v13541_v22  ;;  %vm6339_vm15 = vweird.f32 %v13568_v52  ;;  %vm6781_vm3 = vcmp.gt.s32.totalorder %v13498_v5, 5  ;;  %v10655_v56 = vld [vmem:[#allocation8 + $0x1c4] sm:$0xf] }
 0xa08   :  { %v6263_v58 = vsel %vm6262_vm9, %v11137_v15, %v6259_v19  ;;  %v6271_v7 = vmul.f32 %v11147_v36, %v13544_v47  ;;  %v11149_v23 = vpop.eup %11148  ;;  %vm6276_vm13 = vweird.f32 %v11147_v36  ;;  %6598 = vmatpush.bf16.msrb.mxu0 %v9698_v39  ;;  %vm13622_vm2 = vmor %vm6338_vm11, %vm6339_vm15  ;;  %6626 = vmatpush.bf16.msrb.mxu2 %v9706_v46  ;;  %v6783_v54 = vsel %vm6781_vm3, 1, %v14229_v24  ;;  %v9937_v39 = vld [vmem:[#allocation8 + $0x1c8] sm:$0xf]  ;;  %v10656_v46 = vld [vmem:[#allocation8 + $0x1cc] sm:$0xf] }
 0xa09   :  { %v6268_v0 = vsel %vm13559_vm4, %v6267_v11, %v6263_v58  ;;  %v6301_v20 = vsel %vm6300_vm10, %v11139_v10, %v6297_v45  ;;  %v6335_v13 = vsub.f32 1.0, %v6334_v49  ;;  %v13592_v44 = vadd.f32 1.0, %v11149_v23  ;;  %vm6277_vm1 = vmor %vm6275_vm8, %vm6276_vm13  ;;  %v6379_v45 = vpop.permute.xlu2 %6378  ;;  %6786 = vperm.xlu1 %10742, %v6783_v54   ;;  %v10651_v54 = vld [vmem:[#allocation8 + $0x1a4] sm:$0xf] }
 0xa0a   :  { %v13588_v38 = vpop.eup %11150  ;;  %v6306_v1 = vsel %vm13564_vm7, %v6305_v50, %v6301_v20  ;;  %v6365_v51 = vmul.f32 %v11143_v9, %v6268_v0  ;;  %v6272_v27 = vsub.f32 1.0, %v6271_v7  ;;  %v9707_v9 = vld [vmem:[#allocation8 + $0x118] sm:$0xf0]  ;;  %v6320_v11 = vor.u32 1.1754944e-38, %v6319_v33  ;;  %v10659_v33 = vld [vmem:[#allocation8 + $0x1e4] sm:$0xf] }
 0xa0b   :  { %v6363_v29 = vmul.f32 %v6306_v1, %v13455_v60  ;;  %v6309_v15 = vmul.f32 %v13588_v38, %v13556_v2  ;;  %v6336_v32 = vmul.f32 %v13568_v52, %v6335_v13  ;;  %v11153_v10 = vpop.eup %11152  ;;  %11154 = vrcp.f32 %v13592_v44  ;;  %v9699_v60 = vld [vmem:[#allocation8 + $0x110] sm:$0xf0] }
 0xa0c   :  { %v6273_v28 = vmul.f32 %v11147_v36, %v6272_v27  ;;  %vm6314_vm0 = vweird.f32 %v13588_v38  ;;  %v6345_v50 = vor.u32 1.1754944e-38, %v6344_v21  ;;  %v9702_v14 = vor.u32 %v10599_v31, %v9699_v60  ;;  %v9953_v31 = vld [vmem:[#allocation8 + $0x1e8] sm:$0xf]  ;;  %v10660_v60 = vld [vmem:[#allocation8 + $0x1ec] sm:$0xf] }
 0xa0d   :  { %v13604_v55 = vadd.f32 %v6365_v51, %v6363_v29  ;;  %v6310_v34 = vsub.f32 1.0, %v6309_v15  ;;  %v6337_v61 = vadd.f32 %v13568_v52, %v6336_v32  ;;  %v9710_v47 = vor.u32 %v10600_v6, %v9707_v9  ;;  %vm6315_vm4 = vmor %vm6313_vm12, %vm6314_vm0  ;;  %v10661_v15 = vld [vmem:[#allocation8 + $0x1ec] sm:$0xf0]  ;;  %v10658_v6 = vld [vmem:[#allocation8 + $0x1d4] sm:$0xf0] }
 0xa0e   :  { %v6274_v53 = vadd.f32 %v11147_v36, %v6273_v28  ;;  %6612 = vmatpush.bf16.msrb.mxu1 %v9702_v14  ;;  %vm6782_vm5 = vcmp.gt.s32.totalorder %v13480_v26, 5  ;;  %vm6318_vm6 = vcmp.eq.f32.partialorder %v6317_v43, 8.507059e+37  ;;  %vm6343_vm7 = vcmp.eq.f32.partialorder %v6342_v59, 8.507059e+37  ;;  %v10657_v43 = vld [vmem:[#allocation8 + $0x1cc] sm:$0xf0]  ;;  %v14275_v9 = vld [vmem:[#allocation23_spill] sm:$0xff] }
 0xa0f   :  { %v6311_v41 = vmul.f32 %v13588_v38, %v6310_v34  ;;  %11156 = vtanh.f32 %v13604_v55  ;;  %6640 = vmatpush.bf16.msrb.mxu3 %v9710_v47  ;;  %v6784_v2 = vsel %vm6782_vm5, 1, %v14229_v24  ;;  %vm6383_vm8 = vcmp.eq.s32.totalorder %v6379_v45, 1  ;;  %v10653_v45 = vld [vmem:[#allocation8 + $0x1ac] sm:$0xf0] }
 0xa10   :  { %v6278_v37 = vsel %vm6277_vm1, %v11147_v36, %v6274_v53  ;;  %v6341_v36 = vsel %vm13622_vm2, %v13568_v52, %v6337_v61  ;;  %6789 = vperm.xlu2 %10743, %v6784_v2   ;;  %v6359_v22 = vand.u32 2147483648, %v13592_v44  ;;  %vm6353_vm10 = vweird.f32 %v13592_v44  ;;  %v9931_v61 = vld [vmem:[#allocation8 + $0x1d0] sm:$0xf0]  ;;  %v9921_v2 = vld [vmem:[#allocation8 + $0x1a8] sm:$0xf] }
 0xa11   :  { %v6283_v30 = vsel %vm13599_vm14, %v6282_v18, %v6278_v37  ;;  %v6312_v19 = vadd.f32 %v13588_v38, %v6311_v41  ;;  %v11155_v40 = vpop.eup %11154  ;;  %v6346_v21 = vsel %vm6343_vm7, %v6345_v50, %v6341_v36  ;;  %vm6384_vm13 = vcmp.eq.s32.totalorder %v6382_v42, 1  ;;  %v9929_v18 = vld [vmem:[#allocation8 + $0x1c0] sm:$0xf] }
 0xa12   :  { %v6366_v48 = vmul.f32 %v11153_v10, %v6283_v30  ;;  %v6349_v49 = vmul.f32 %v11155_v40, %v13592_v44  ;;  %vm6354_vm9 = vweird.f32 %v11155_v40  ;;  %v10662_v10 = vld [vmem:[#allocation8 + $0x1f4] sm:$0xf0]  ;;  %v9950_v28 = vor.u32 %v10659_v33, %v9947_v57  ;;  %v9939_v30 = vld [vmem:[#allocation8 + $0x1d8] sm:$0xf0]  ;;  %v9913_v36 = vld [vmem:[#allocation8 + $0x1a0] sm:$0xf] }
 0xa13   :  { %v6316_v5 = vsel %vm6315_vm4, %v13588_v38, %v6312_v19  ;;  %vm6355_vm11 = vmor %vm6353_vm10, %vm6354_vm9  ;;  %v6360_v38 = vor.u32 1.1754944e-38, %v6359_v22  ;;  %v9954_v8 = vor.u32 %v10662_v10, %v9953_v31  ;;  %v9958_v34 = vor.u32 %v10660_v60, %v9955_v25  ;;  %v10649_v22 = vld [vmem:[#allocation8 + $0x18c] sm:$0xf0]  ;;  %v10648_v31 = vld [vmem:[#allocation8 + $0x18c] sm:$0xf] }
 0xa14   :  { %v6321_v58 = vsel %vm6318_vm6, %v6320_v11, %v6316_v5  ;;  %v6350_v26 = vsub.f32 1.0, %v6349_v49  ;;  %7013 = vmatpush.bf16.msra.mxu1 %v9950_v28  ;;  %v9930_v53 = vor.u32 %v10657_v43, %v9929_v18  ;;  %v4125_v41 = vadd.f32 %v14275_v9, %v12940_v35  ;;  %v14276_v11 = vld [vmem:[#allocation25_spill] sm:$0xff]  ;;  %v9907_v10 = vld [vmem:[#allocation8 + $0x198] sm:$0xf0]  ;;  %v9881_v43 = vld [vmem:[#allocation8 + $0x160] sm:$0xf] }
 0xa15   :  { %v11157_v52 = vpop.eup %11156  ;;  %v6364_v7 = vmul.f32 %v6321_v58, %v13509_v4  ;;  %v6357_v4 = vand.u32 2147483647, %v13592_v44  ;;  %v9945_v44 = vld [vmem:[#allocation8 + $0x1e0] sm:$0xf]  ;;  %7027 = vmatpush.bf16.msra.mxu2 %v9954_v8  ;;  %7041 = vmatpush.bf16.msra.mxu3 %v9958_v34  ;;  %v4174_v37 = vadd.f32 %v14276_v11, %v12943_v63  ;;  %v9934_v50 = vor.u32 %v10655_v56, %v9931_v61  ;;  %v9915_v49 = vld [vmem:[#allocation8 + $0x1b0] sm:$0xf0] }
 0xa16   :  { %v6371_v12 = vmul.f32 %v11157_v52, %v6346_v21  ;;  %v6351_v0 = vmul.f32 %v11155_v40, %v6350_v26  ;;  %v9946_v32 = vor.u32 %v10661_v15, %v9945_v44  ;;  %v9938_v14 = vor.u32 %v10658_v6, %v9937_v39  ;;  %v10654_v58 = vld [vmem:[#allocation8 + $0x1b4] sm:$0xf0]  ;;  %v14279_v44 = vld [vmem:[#allocation29_spill] sm:$0xff] }
 0xa17   :  { %v13642_v23 = vadd.f32 %v6366_v48, %v6364_v7  ;;  %vm6358_vm12 = vcmp.eq.f32.partialorder %v6357_v4, 8.507059e+37  ;;  %v9942_v47 = vor.u32 %v10656_v46, %v9939_v30  ;;  %v9914_v5 = vor.u32 %v10653_v45, %v9913_v36  ;;  %v10647_v4 = vld [vmem:[#allocation8 + $0x184] sm:$0xf]  ;;  %v10645_v56 = vld [vmem:[#allocation8 + $0x16c] sm:$0xf0] }
 0xa18   :  { %v6385_v20 = vsel %vm6383_vm8, %v6371_v12, 0.0  ;;  %v6352_v13 = vadd.f32 %v11155_v40, %v6351_v0  ;;  %6999 = vmatpush.bf16.msra.mxu0 %v9946_v32  ;;  %7014 = vmatpush.bf16.msra.mxu1 %v9934_v50  ;;  %v9918_v21 = vor.u32 %v10651_v54, %v9915_v49  ;;  %v9922_v26 = vor.u32 %v10654_v58, %v9921_v2  ;;  %v9923_v0 = vld [vmem:[#allocation8 + $0x1b8] sm:$0xf0]  ;;  %v9883_v9 = vld [vmem:[#allocation8 + $0x170] sm:$0xf0] }
 0xa19   :  { %9693 = vst [vmem:[%s14011_s8 + $0x40] sm:$0xff] %v6385_v20  ;;  %11158 = vtanh.f32 %v13642_v23  ;;  %7028 = vmatpush.bf16.msra.mxu2 %v9938_v14  ;;  %7042 = vmatpush.bf16.msra.mxu3 %v9942_v47  ;;  %v4176_v15 = vadd.f32 %v14279_v44, %v12943_v63  ;;  %v9910_v25 = vor.u32 %v10648_v31, %v9907_v10  ;;  %v10646_v46 = vld [vmem:[#allocation8 + $0x174] sm:$0xf0]  ;;  %v10644_v47 = vld [vmem:[#allocation8 + $0x16c] sm:$0xf] }
 0xa1a   :  { %v6356_v59 = vsel %vm6355_vm11, %v11155_v40, %v6352_v13  ;;  %v9897_v13 = vld [vmem:[#allocation8 + $0x180] sm:$0xf]  ;;  %v9882_v6 = vor.u32 %v10645_v56, %v9881_v43  ;;  %v10641_v49 = vld [vmem:[#allocation8 + $0x14c] sm:$0xf0]  ;;  %v14281_v2 = vld [vmem:[#allocation30_spill] sm:$0xff] }
 0xa1b   :  { %v6361_v51 = vsel %vm6358_vm12, %v6360_v38, %v6356_v59  ;;  %v14277_v59 = vld [vmem:[#allocation27_spill] sm:$0xff]  ;;  %v9898_v38 = vor.u32 %v10649_v22, %v9897_v13  ;;  %v4274_v58 = vadd.f32 %v14281_v2, %v12954_v16  ;;  %v10640_v22 = vld [vmem:[#allocation8 + $0x14c] sm:$0xf]  ;;  %v9859_v2 = vld [vmem:[#allocation8 + $0x138] sm:$0xf0] }
 0xa1c   :  { %7000 = vmatpush.bf16.msra.mxu0 %v9930_v53  ;;  %7015 = vmatpush.bf16.msra.mxu1 %v9918_v21  ;;  %v4272_v42 = vadd.f32 %v14277_v59, %v12954_v16  ;;  %v10643_v53 = vld [vmem:[#allocation8 + $0x164] sm:$0xf] }
 0xa1d   :  { %7029 = vmatpush.bf16.msra.mxu2 %v9922_v26  ;;  %v9886_v14 = vor.u32 %v10643_v53, %v9883_v9  ;;  %v10639_v21 = vld [vmem:[#allocation8 + $0x144] sm:$0xf]  ;;  %v9867_v26 = vld [vmem:[#allocation8 + $0x150] sm:$0xf0] }
 0xa1f   :  { %v11159_v1 = vpop.eup %11158 }
 0xa20   :  { %v6372_v27 = vmul.f32 %v11159_v1, %v6361_v51  ;;  %7001 = vmatpush.bf16.msra.mxu0 %v9914_v5  ;;  %v9899_v1 = vld [vmem:[#allocation8 + $0x190] sm:$0xf0]  ;;  %v9905_v51 = vld [vmem:[#allocation8 + $0x188] sm:$0xf]  ;;  %v9865_v5 = vld [vmem:[#allocation8 + $0x140] sm:$0xf] }
 0xa21   :  { %v9902_v32 = vor.u32 %v10647_v4, %v9899_v1  ;;  %v9866_v13 = vor.u32 %v10641_v49, %v9865_v5  ;;  %v9875_v4 = vld [vmem:[#allocation8 + $0x158] sm:$0xf0]  ;;  %v10636_v49 = vld [vmem:[#allocation8 + $0x12c] sm:$0xf] }
 0xa22   :  { %v6398_v17 = vpack.c.bf16 %v6372_v27, %v6371_v12  ;;  %v6386_v29 = vsel %vm6384_vm13, %v6372_v27, 0.0  ;;  %v10652_v12 = vld [vmem:[#allocation8 + $0x1ac] sm:$0xf]  ;;  %v10650_v27 = vld [vmem:[#allocation8 + $0x194] sm:$0xf0]  ;;  %v9878_v1 = vor.u32 %v10640_v22, %v9875_v4 }
 0xa23   :  { %9694 = vst [vmem:[%s14011_s8 + $0x48] sm:$0xff] %v6386_v29  ;;  %v9926_v20 = vor.u32 %v10652_v12, %v9923_v0  ;;  %v9906_v57 = vor.u32 %v10650_v27, %v9905_v51  ;;  %7016 = vmatpush.bf16.msra.mxu1 %v9902_v32  ;;  %v9873_v12 = vld [vmem:[#allocation8 + $0x148] sm:$0xf]  ;;  %v10642_v0 = vld [vmem:[#allocation8 + $0x154] sm:$0xf0] }
 0xa24   :  { %6599 = vmatmul.bf16.vlgmr.msrb.gmra.mxu0 %v6398_v17  ;;  %6613 = vmatmul.bf16.vlgmr.msrb.gmra.mxu1 %v6398_v17  ;;  %v9849_v51 = vld [vmem:[#allocation8 + $0x120] sm:$0xf]  ;;  %v10637_v27 = vld [vmem:[#allocation8 + $0x12c] sm:$0xf0] }
 0xa25   :  { %6627 = vmatmul.bf16.vlgmr.msrb.gmra.mxu2 %v6398_v17  ;;  %6641 = vmatmul.bf16.vlgmr.msrb.gmra.mxu3 %v6398_v17  ;;  %v14278_v17 = vld [vmem:[#allocation24_spill] sm:$0xff] }
 0xa26   :  { %v4127_v29 = vadd.f32 %v14278_v17, %v12940_v35  ;;  %7043 = vmatpush.bf16.msra.mxu3 %v9926_v20  ;;  %7002 = vmatpush.bf16.msra.mxu0 %v9898_v38  ;;  %v9874_v38 = vor.u32 %v10642_v0, %v9873_v12  ;;  %v10635_v17 = vld [vmem:[#allocation8 + $0x124] sm:$0xf] }
 0xa27   :  { %7030 = vmatpush.bf16.msra.mxu2 %v9906_v57  ;;  %7017 = vmatpush.bf16.msra.mxu1 %v9886_v14 }
 0xa2a   :  { %7044 = vmatpush.bf16.msra.mxu3 %v9910_v25  ;;  %7003 = vmatpush.bf16.msra.mxu0 %v9882_v6  ;;  %v14282_v25 = vld [vmem:[#allocation28_spill] sm:$0xff] }
 0xa2e   :  { %7004 = vmatpush.bf16.msra.mxu0 %v9866_v13 }
 0xaa1   :  { %v6600_v19 = vpop.f32.mrf.mxu0  ;;  %v6614_v62 = vpop.f32.mrf.mxu1 }
 0xaa2   :  { %v6647_v40 = vadd.f32 %v6600_v19, %v4125_v41  ;;  %v6648_v48 = vadd.f32 %v6614_v62, %v4174_v37  ;;  %v9889_v41 = vld [vmem:[#allocation8 + $0x168] sm:$0xf] }
 0xaa3   :  { %v9890_v62 = vor.u32 %v10646_v46, %v9889_v41 }
 0xaa4   :  { %v9823_v52 = vmul.f32 -1.442695, %v6647_v40  ;;  %v9825_v7 = vmul.f32 -1.442695, %v6648_v48  ;;  %v9891_v40 = vld [vmem:[#allocation8 + $0x178] sm:$0xf0] }
 0xaa5   :  { %v14280_v48 = vld [vmem:[#allocation26_spill] sm:$0xff]  ;;  %v9894_v54 = vor.u32 %v10644_v47, %v9891_v40  ;;  %7031 = vmatpush.bf16.msra.mxu2 %v9890_v62  ;;  %v9857_v40 = vld [vmem:[#allocation8 + $0x128] sm:$0xf] }
 0xaa6   :  { %11160 = vpow2.f32 %v9823_v52  ;;  %v4223_v36 = vadd.f32 %v14280_v48, %v12963_v3  ;;  %v10638_v48 = vld [vmem:[#allocation8 + $0x134] sm:$0xf0] }
 0xaa7   :  { %11162 = vpow2.f32 %v9825_v7  ;;  %7045 = vmatpush.bf16.msra.mxu3 %v9894_v54 }
 0xaa8   :  { %v6642_v33 = vpop.f32.mrf.mxu3  ;;  %v6628_v61 = vpop.f32.mrf.mxu2 }
 0xaa9   :  { %v6650_v28 = vadd.f32 %v6642_v33, %v4272_v42  ;;  %v6602_v8 = vpop.f32.mrf.mxu0  ;;  %v6616_v60 = vpop.f32.mrf.mxu1  ;;  %v6649_v52 = vadd.f32 %v6628_v61, %v4223_v36  ;;  %v9870_v42 = vor.u32 %v10639_v21, %v9867_v26  ;;  %v9851_v33 = vld [vmem:[#allocation8 + $0x130] sm:$0xf0]  ;;  %7032 = vmatpush.bf16.msra.mxu2 %v9874_v38 }
 0xaaa   :  { %v6651_v34 = vadd.f32 %v6602_v8, %v4127_v29  ;;  %v6652_v18 = vadd.f32 %v6616_v60, %v4176_v15  ;;  %v9850_v15 = vor.u32 %v10637_v27, %v9849_v51  ;;  %v9854_v8 = vor.u32 %v10635_v17, %v9851_v33  ;;  %v9833_v17 = vld [vmem:[#allocation8 + $0x100] sm:$0xf] }
 0xaab   :  { %v9827_v39 = vmul.f32 -1.442695, %v6650_v28  ;;  %7018 = vmatpush.bf16.msra.mxu1 %v9870_v42  ;;  %7046 = vmatpush.bf16.msra.mxu3 %v9878_v1  ;;  %v9862_v42 = vor.u32 %v10636_v49, %v9859_v2 }
 0xaac   :  { %v11161_v11 = vpop.eup %11160  ;;  %v9824_v37 = vmul.f32 -1.442695, %v6651_v34  ;;  %v9826_v50 = vmul.f32 -1.442695, %v6652_v18  ;;  %v4225_v34 = vadd.f32 %v14282_v25, %v12963_v3  ;;  %7005 = vmatpush.bf16.msra.mxu0 %v9850_v15  ;;  %v9841_v25 = vld [vmem:[#allocation8 + $0x108] sm:$0xf] }
 0xaad   :  { %v11163_v30 = vpop.eup %11162  ;;  %v13664_v19 = vadd.f32 1.0, %v11161_v11  ;;  %11164 = vpow2.f32 %v9827_v39 }
 0xaae   :  { %v13668_v45 = vadd.f32 1.0, %v11163_v30  ;;  %11166 = vpow2.f32 %v9824_v37 }
 0xaaf   :  { %11168 = vrcp.f32 %v13664_v19  ;;  %v6672_v57 = vand.u32 2147483647, %v13664_v19  ;;  %v6674_v43 = vand.u32 2147483648, %v13664_v19  ;;  %vm6668_vm14 = vweird.f32 %v13664_v19  ;;  %7019 = vmatpush.bf16.msra.mxu1 %v9854_v8  ;;  %7047 = vmatpush.bf16.msra.mxu3 %v9862_v42 }
 0xab0   :  { %11170 = vrcp.f32 %v13668_v45  ;;  %v6644_v7 = vpop.f32.mrf.mxu3  ;;  %v6630_v10 = vpop.f32.mrf.mxu2  ;;  %v6712_v61 = vand.u32 2147483648, %v13668_v45  ;;  %v6710_v39 = vand.u32 2147483647, %v13668_v45  ;;  %vm6706_vm15 = vweird.f32 %v13668_v45 }
 0xab1   :  { %11172 = vpow2.f32 %v9826_v50  ;;  %v6654_v20 = vadd.f32 %v6644_v7, %v4274_v58  ;;  %v6653_v41 = vadd.f32 %v6630_v10, %v4225_v34  ;;  %vm13692_vm0 = vcmp.eq.f32.partialorder %v6672_v57, 8.507059e+37  ;;  %v10633_v57 = vld [vmem:[#allocation8 + $0x10c] sm:$0xf0]  ;;  %v10631_v10 = vld [vmem:[#allocation8 + $0x104] sm:$0xf] }
 0xab2   :  { %11174 = vtanh.f32 %v6649_v52  ;;  %v6675_v46 = vor.u32 1.1754944e-38, %v6674_v43  ;;  %v6713_v62 = vor.u32 1.1754944e-38, %v6712_v61  ;;  %vm13697_vm3 = vcmp.eq.f32.partialorder %v6710_v39, 8.507059e+37 }
 0xab3   :  { %v11165_v59 = vpop.eup %11164  ;;  %v9828_v28 = vmul.f32 -1.442695, %v6654_v20  ;;  %v9858_v20 = vor.u32 %v10638_v48, %v9857_v40  ;;  %v10688_v48 = vld [vmem:[#allocation8 + $0x1cc] sm:$0xf] }
 0xab4   :  { %v11167_v29 = vpop.eup %11166  ;;  %v13674_v44 = vadd.f32 1.0, %v11165_v59 }
 0xab5   :  { %v11169_v32 = vpop.eup %11168  ;;  %v13677_v31 = vadd.f32 1.0, %v11167_v29  ;;  %7033 = vmatpush.bf16.msra.mxu2 %v9858_v20 }
 0xab6   :  { %v11171_v60 = vpop.eup %11170  ;;  %v6664_v18 = vmul.f32 %v11169_v32, %v13664_v19  ;;  %11176 = vrcp.f32 %v13674_v44  ;;  %vm6669_vm1 = vweird.f32 %v11169_v32  ;;  %v6750_v26 = vand.u32 2147483647, %v13674_v44 }
 0xab7   :  { %v11173_v56 = vpop.eup %11172  ;;  %v6702_v53 = vmul.f32 %v11171_v60, %v13668_v45  ;;  %11178 = vrcp.f32 %v13677_v31  ;;  %vm6707_vm2 = vweird.f32 %v11171_v60  ;;  %vm6683_vm4 = vweird.f32 %v13677_v31  ;;  %vm6670_vm5 = vmor %vm6668_vm14, %vm6669_vm1 }
 0xab8   :  { %v6665_v6 = vsub.f32 1.0, %v6664_v18  ;;  %v13689_v9 = vadd.f32 1.0, %v11173_v56  ;;  %11180 = vpow2.f32 %v9828_v28  ;;  %v11175_v50 = vpop.eup %11174  ;;  %v6687_v5 = vand.u32 2147483647, %v13677_v31  ;;  %vm6708_vm6 = vmor %vm6706_vm15, %vm6707_vm2 }
 0xab9   :  { %v6703_v11 = vsub.f32 1.0, %v6702_v53  ;;  %v6689_v7 = vand.u32 2147483648, %v13677_v31  ;;  %vm6746_vm7 = vweird.f32 %v13674_v44  ;;  %v6752_v19 = vand.u32 2147483648, %v13674_v44  ;;  %v10634_v53 = vld [vmem:[#allocation8 + $0x114] sm:$0xf0] }
 0xaba   :  { %v6666_v14 = vmul.f32 %v11169_v32, %v6665_v6  ;;  %11182 = vrcp.f32 %v13689_v9  ;;  %vm6721_vm8 = vweird.f32 %v13689_v9  ;;  %v6727_v33 = vand.u32 2147483648, %v13689_v9 }
 0xabb   :  { %v6704_v30 = vmul.f32 %v11171_v60, %v6703_v11  ;;  %11184 = vtanh.f32 %v6653_v41  ;;  %vm13732_vm10 = vcmp.eq.f32.partialorder %v6687_v5, 8.507059e+37  ;;  %v6690_v43 = vor.u32 1.1754944e-38, %v6689_v7  ;;  %v10632_v41 = vld [vmem:[#allocation8 + $0x10c] sm:$0xf]  ;;  %v9843_v11 = vld [vmem:[#allocation8 + $0x118] sm:$0xf0] }
 0xabc   :  { %v13701_v36 = vpop.eup %11176  ;;  %v6667_v54 = vadd.f32 %v11169_v32, %v6666_v14  ;;  %v6725_v56 = vand.u32 2147483647, %v13689_v9  ;;  %v9834_v6 = vor.u32 %v10633_v57, %v9833_v17  ;;  %v10693_v57 = vld [vmem:[#allocation8 + $0x1ec] sm:$0xf0] }
 0xabd   :  { %v11179_v58 = vpop.eup %11178  ;;  %v6705_v52 = vadd.f32 %v11171_v60, %v6704_v30  ;;  %v6742_v21 = vmul.f32 %v13701_v36, %v13674_v44  ;;  %vm6747_vm11 = vweird.f32 %v13701_v36 }
 0xabe   :  { %v6671_v12 = vsel %vm6670_vm5, %v11169_v32, %v6667_v54  ;;  %v6679_v0 = vmul.f32 %v11179_v58, %v13677_v31  ;;  %v11181_v13 = vpop.eup %11180  ;;  %vm6684_vm9 = vweird.f32 %v11179_v58  ;;  %7006 = vmatpush.bf16.msra.mxu0 %v9834_v6  ;;  %vm13755_vm14 = vmor %vm6746_vm7, %vm6747_vm11  ;;  %v9846_v31 = vor.u32 %v10632_v41, %v9843_v11  ;;  %v13762_v54 = vld [vmem:[%s14010_s7] sm:$0xff]  ;;  %v10067_v11 = vld [vmem:[#allocation8 + $0x1d0] sm:$0xf0] }
 0xabf   :  { %v6676_v22 = vsel %vm13692_vm0, %v6675_v46, %v6671_v12  ;;  %v6709_v4 = vsel %vm6708_vm6, %v11171_v60, %v6705_v52  ;;  %v6743_v59 = vsub.f32 1.0, %v6742_v21  ;;  %v13725_v27 = vadd.f32 1.0, %v11181_v13  ;;  %vm6685_vm13 = vmor %vm6683_vm4, %vm6684_vm9  ;;  %v6787_v52 = vpop.permute.xlu1 %6786  ;;  %v13780_v21 = vld [vmem:[%s14010_s7 + $0x8] sm:$0xff]  ;;  %v10687_v6 = vld [vmem:[#allocation8 + $0x1c4] sm:$0xf] }
 0xac0   :  { %v13721_v38 = vpop.eup %11182  ;;  %v6714_v45 = vsel %vm13697_vm3, %v6713_v62, %v6709_v4  ;;  %v6773_v1 = vmul.f32 %v11175_v50, %v6676_v22  ;;  %v6680_v51 = vsub.f32 1.0, %v6679_v0  ;;  %v6728_v50 = vor.u32 1.1754944e-38, %v6727_v33  ;;  %7048 = vmatpush.bf16.msra.mxu3 %v9846_v31  ;;  %v10089_v60 = vld [vmem:[#allocation8 + $0x1e8] sm:$0xf]  ;;  %v10075_v31 = vld [vmem:[#allocation8 + $0x1d8] sm:$0xf0] }
 0xac1   :  { %v6771_v29 = vmul.f32 %v6714_v45, %v13604_v55  ;;  %v6717_v15 = vmul.f32 %v13721_v38, %v13689_v9  ;;  %v6744_v32 = vmul.f32 %v13701_v36, %v6743_v59  ;;  %v11185_v28 = vpop.eup %11184  ;;  %11186 = vrcp.f32 %v13725_v27  ;;  %v9835_v55 = vld [vmem:[#allocation8 + $0x110] sm:$0xf0] }
 0xac2   :  { %v6681_v8 = vmul.f32 %v11179_v58, %v6680_v51  ;;  %vm6722_vm12 = vweird.f32 %v13721_v38  ;;  %v6753_v46 = vor.u32 1.1754944e-38, %v6752_v19  ;;  %v9838_v30 = vor.u32 %v10631_v10, %v9835_v55  ;;  %v10691_v10 = vld [vmem:[#allocation8 + $0x1e4] sm:$0xf]  ;;  %v10694_v55 = vld [vmem:[#allocation8 + $0x1f4] sm:$0xf0] }
 0xac3   :  { %v13737_v34 = vadd.f32 %v6773_v1, %v6771_v29  ;;  %v6718_v18 = vsub.f32 1.0, %v6717_v15  ;;  %v6745_v39 = vadd.f32 %v13701_v36, %v6744_v32  ;;  %v9842_v62 = vor.u32 %v10634_v53, %v9841_v25  ;;  %vm13769_vm0 = vmor %vm6721_vm8, %vm6722_vm12  ;;  %v6790_v1 = vpop.permute.xlu2 %6789 }
 0xac4   :  { %v6682_v61 = vadd.f32 %v11179_v58, %v6681_v8  ;;  %vm7189_vm15 = vcmp.gt.s32.totalorder %v13762_v54, 6  ;;  %7020 = vmatpush.bf16.msra.mxu1 %v9838_v30  ;;  %vm7190_vm1 = vcmp.gt.s32.totalorder %v13780_v21, 6  ;;  %vm6726_vm2 = vcmp.eq.f32.partialorder %v6725_v56, 8.507059e+37  ;;  %v10083_v8 = vld [vmem:[#allocation8 + $0x1f0] sm:$0xf0] }
 0xac5   :  { %v6719_v37 = vmul.f32 %v13721_v38, %v6718_v18  ;;  %11188 = vtanh.f32 %v13737_v34  ;;  %7034 = vmatpush.bf16.msra.mxu2 %v9842_v62  ;;  %v7191_v7 = vsel %vm7189_vm15, 1, %v14229_v24  ;;  %vm6751_vm3 = vcmp.eq.f32.partialorder %v6750_v26, 8.507059e+37  ;;  %v10091_v56 = vld [vmem:[#allocation8 + $0x1f8] sm:$0xf0]  ;;  %v14294_v30 = vld [vmem:[#allocation33_spill] sm:$0xff] }
 0xac6   :  { %v6686_v14 = vsel %vm6685_vm13, %v11179_v58, %v6682_v61  ;;  %v6749_v58 = vsel %vm13755_vm14, %v13701_v36, %v6745_v39  ;;  %7194 = vperm.xlu0 %10741, %v7191_v7   ;;  %v7192_v36 = vsel %vm7190_vm1, 1, %v14229_v24  ;;  %vm6791_vm4 = vcmp.eq.s32.totalorder %v6787_v52, 1  ;;  %v10065_v61 = vld [vmem:[#allocation8 + $0x1c0] sm:$0xf]  ;;  %v10689_v39 = vld [vmem:[#allocation8 + $0x1cc] sm:$0xf0] }
 0xac7   :  { %v6691_v47 = vsel %vm13732_vm10, %v6690_v43, %v6686_v14  ;;  %v6720_v40 = vadd.f32 %v13721_v38, %v6719_v37  ;;  %v11187_v5 = vpop.eup %11186  ;;  %7197 = vperm.xlu1 %10742, %v7192_v36   ;;  %v6754_v13 = vsel %vm6751_vm3, %v6753_v46, %v6749_v58  ;;  %v6767_v44 = vand.u32 2147483648, %v13725_v27  ;;  %v10692_v43 = vld [vmem:[#allocation8 + $0x1ec] sm:$0xf]  ;;  %v10073_v37 = vld [vmem:[#allocation8 + $0x1c8] sm:$0xf]  ;;  %v14293_v14 = vld [vmem:[#allocation31_spill] sm:$0xff] }
 0xac8   :  { %v6774_v2 = vmul.f32 %v11185_v28, %v6691_v47  ;;  %v6757_v12 = vmul.f32 %v11187_v5, %v13725_v27  ;;  %vm6762_vm5 = vweird.f32 %v11187_v5  ;;  %vm6761_vm6 = vweird.f32 %v13725_v27  ;;  %v10049_v7 = vld [vmem:[#allocation8 + $0x1a0] sm:$0xf] }
 0xac9   :  { %v6724_v9 = vsel %vm13769_vm0, %v13721_v38, %v6720_v40  ;;  %vm6763_vm7 = vmor %vm6761_vm6, %vm6762_vm5  ;;  %v6768_v51 = vor.u32 1.1754944e-38, %v6767_v44  ;;  %vm6792_vm9 = vcmp.eq.s32.totalorder %v6790_v1, 1  ;;  %v10086_v25 = vor.u32 %v10691_v10, %v10083_v8  ;;  %v10679_v1 = vld [vmem:[#allocation8 + $0x184] sm:$0xf]  ;;  %v14297_v10 = vld [vmem:[#allocation36_spill] sm:$0xff] }
 0xaca   :  { %v6729_v0 = vsel %vm6726_vm2, %v6728_v50, %v6724_v9  ;;  %v6758_v22 = vsub.f32 1.0, %v6757_v12  ;;  %v10090_v18 = vor.u32 %v10694_v55, %v10089_v60  ;;  %v10094_v53 = vor.u32 %v10692_v43, %v10091_v56  ;;  %v10690_v50 = vld [vmem:[#allocation8 + $0x1d4] sm:$0xf0]  ;;  %v10685_v9 = vld [vmem:[#allocation8 + $0x1ac] sm:$0xf0] }
 0xacb   :  { %v11189_v19 = vpop.eup %11188  ;;  %v6772_v20 = vmul.f32 %v6729_v0, %v13642_v23  ;;  %v6765_v23 = vand.u32 2147483647, %v13725_v27  ;;  %v10081_v27 = vld [vmem:[#allocation8 + $0x1e0] sm:$0xf]  ;;  %7421 = vmatpush.bf16.msrb.mxu1 %v10086_v25  ;;  %v10066_v41 = vor.u32 %v10689_v39, %v10065_v61  ;;  %v4130_v46 = vadd.f32 %v14293_v14, %v12940_v35  ;;  %v10683_v12 = vld [vmem:[#allocation8 + $0x1a4] sm:$0xf] }
 0xacc   :  { %v6779_v4 = vmul.f32 %v11189_v19, %v6754_v13  ;;  %v6759_v42 = vmul.f32 %v11187_v5, %v6758_v22  ;;  %v10082_v28 = vor.u32 %v10693_v57, %v10081_v27  ;;  %7435 = vmatpush.bf16.msrb.mxu2 %v10090_v18  ;;  %7449 = vmatpush.bf16.msrb.mxu3 %v10094_v53  ;;  %v10051_v0 = vld [vmem:[#allocation8 + $0x1b0] sm:$0xf0]  ;;  %v10057_v19 = vld [vmem:[#allocation8 + $0x1a8] sm:$0xf]  ;;  %v10680_v25 = vld [vmem:[#allocation8 + $0x18c] sm:$0xf] }
 0xacd   :  { %v13791_v59 = vadd.f32 %v6774_v2, %v6772_v20  ;;  %vm6766_vm8 = vcmp.eq.f32.partialorder %v6765_v23, 8.507059e+37  ;;  %v4179_v62 = vadd.f32 %v14294_v30, %v12943_v63  ;;  %v10070_v47 = vor.u32 %v10687_v6, %v10067_v11  ;;  %v10686_v20 = vld [vmem:[#allocation8 + $0x1b4] sm:$0xf0]  ;;  %v10033_v23 = vld [vmem:[#allocation8 + $0x180] sm:$0xf]  ;;  %v14296_v27 = vld [vmem:[#allocation32_spill] sm:$0xff] }
 0xace   :  { %v6793_v38 = vsel %vm6791_vm4, %v6779_v4, 0.0  ;;  %v6760_v45 = vadd.f32 %v11187_v5, %v6759_v42  ;;  %7407 = vmatpush.bf16.msrb.mxu0 %v10082_v28  ;;  %v10074_v40 = vor.u32 %v10690_v50, %v10073_v37  ;;  %v10078_v2 = vor.u32 %v10688_v48, %v10075_v31  ;;  %v10043_v18 = vld [vmem:[#allocation8 + $0x198] sm:$0xf0]  ;;  %v10677_v11 = vld [vmem:[#allocation8 + $0x16c] sm:$0xf0] }
 0xacf   :  { %9829 = vst [vmem:[%s14011_s8 + $0x50] sm:$0xff] %v6793_v38  ;;  %11190 = vtanh.f32 %v13791_v59  ;;  %7422 = vmatpush.bf16.msrb.mxu1 %v10070_v47  ;;  %v10050_v36 = vor.u32 %v10685_v9, %v10049_v7  ;;  %v10058_v42 = vor.u32 %v10686_v20, %v10057_v19  ;;  %v10684_v38 = vld [vmem:[#allocation8 + $0x1ac] sm:$0xf]  ;;  %v4132_v57 = vadd.f32 %v14296_v27, %v12940_v35  ;;  %v10675_v37 = vld [vmem:[#allocation8 + $0x164] sm:$0xf]  ;;  %v14298_v9 = vld [vmem:[#allocation34_spill] sm:$0xff] }
 0xad0   :  { %v6764_v26 = vsel %vm6763_vm7, %v11187_v5, %v6760_v45  ;;  %7436 = vmatpush.bf16.msrb.mxu2 %v10074_v40  ;;  %7450 = vmatpush.bf16.msrb.mxu3 %v10078_v2  ;;  %v10059_v45 = vld [vmem:[#allocation8 + $0x1b8] sm:$0xf0]  ;;  %v4181_v28 = vadd.f32 %v14297_v10, %v12943_v63  ;;  %v10046_v61 = vor.u32 %v10680_v25, %v10043_v18  ;;  %v10019_v30 = vld [vmem:[#allocation8 + $0x170] sm:$0xf0]  ;;  %v10001_v19 = vld [vmem:[#allocation8 + $0x140] sm:$0xf] }
 0xad1   :  { %v6769_v29 = vsel %vm6766_vm8, %v6768_v51, %v6764_v26  ;;  %v10062_v44 = vor.u32 %v10684_v38, %v10059_v45  ;;  %v10681_v26 = vld [vmem:[#allocation8 + $0x18c] sm:$0xf0]  ;;  %v14295_v51 = vld [vmem:[#allocation35_spill] sm:$0xff]  ;;  %v10022_v31 = vor.u32 %v10675_v37, %v10019_v30  ;;  %v10027_v7 = vld [vmem:[#allocation8 + $0x178] sm:$0xf0] }
 0xad2   :  { %7408 = vmatpush.bf16.msrb.mxu0 %v10066_v41  ;;  %v10017_v41 = vld [vmem:[#allocation8 + $0x160] sm:$0xf]  ;;  %v10673_v20 = vld [vmem:[#allocation8 + $0x14c] sm:$0xf0]  ;;  %v10671_v38 = vld [vmem:[#allocation8 + $0x144] sm:$0xf] }
 0xad3   :  { %v10003_v45 = vld [vmem:[#allocation8 + $0x150] sm:$0xf0]  ;;  %v9985_v27 = vld [vmem:[#allocation8 + $0x120] sm:$0xf]  ;;  %v10667_v10 = vld [vmem:[#allocation8 + $0x124] sm:$0xf] }
 0xad4   :  { %7437 = vmatpush.bf16.msrb.mxu2 %v10058_v42  ;;  %7451 = vmatpush.bf16.msrb.mxu3 %v10062_v44  ;;  %v10009_v44 = vld [vmem:[#allocation8 + $0x148] sm:$0xf] }
 0xad5   :  { %v11191_v17 = vpop.eup %11190 }
 0xad6   :  { %v6780_v15 = vmul.f32 %v11191_v17, %v6769_v29  ;;  %7409 = vmatpush.bf16.msrb.mxu0 %v10050_v36  ;;  %v4277_v17 = vadd.f32 %v14295_v51, %v12954_v16  ;;  %v10034_v29 = vor.u32 %v10681_v26, %v10033_v23  ;;  %v10674_v23 = vld [vmem:[#allocation8 + $0x154] sm:$0xf0]  ;;  %v10672_v51 = vld [vmem:[#allocation8 + $0x14c] sm:$0xf] }
 0xad8   :  { %v6806_v33 = vpack.c.bf16 %v6780_v15, %v6779_v4  ;;  %v6794_v32 = vsel %vm6792_vm9, %v6780_v15, 0.0  ;;  %v10054_v4 = vor.u32 %v10683_v12, %v10051_v0  ;;  %v10035_v15 = vld [vmem:[#allocation8 + $0x190] sm:$0xf0]  ;;  %7452 = vmatpush.bf16.msrb.mxu3 %v10046_v61  ;;  %v4228_v12 = vadd.f32 %v14298_v9, %v12963_v3 }
 0xad9   :  { %9830 = vst [vmem:[%s14011_s8 + $0x58] sm:$0xff] %v6794_v32  ;;  %v10682_v32 = vld [vmem:[#allocation8 + $0x194] sm:$0xf0]  ;;  %v10038_v60 = vor.u32 %v10679_v1, %v10035_v15  ;;  %v10002_v1 = vor.u32 %v10673_v20, %v10001_v19  ;;  %v10006_v15 = vor.u32 %v10671_v38, %v10003_v45 }
 0xada   :  { %7007 = vmatmul.bf16.vlgmr.msra.gmra.mxu0 %v6806_v33  ;;  %7021 = vmatmul.bf16.vlgmr.msra.gmra.mxu1 %v6806_v33 }
 0xadb   :  { %7035 = vmatmul.bf16.vlgmr.msra.gmra.mxu2 %v6806_v33  ;;  %7049 = vmatmul.bf16.vlgmr.msra.gmra.mxu3 %v6806_v33  ;;  %v10041_v33 = vld [vmem:[#allocation8 + $0x188] sm:$0xf] }
 0xadc   :  { %7423 = vmatpush.bf16.msrb.mxu1 %v10054_v4  ;;  %v10042_v55 = vor.u32 %v10682_v32, %v10041_v33  ;;  %7410 = vmatpush.bf16.msrb.mxu0 %v10034_v29  ;;  %v10010_v33 = vor.u32 %v10674_v23, %v10009_v44 }
 0xade   :  { %7438 = vmatpush.bf16.msrb.mxu2 %v10042_v55  ;;  %v9987_v55 = vld [vmem:[#allocation8 + $0x130] sm:$0xf0] }
 0xadf   :  { %v9990_v61 = vor.u32 %v10667_v10, %v9987_v55 }
 0xae0   :  { %7424 = vmatpush.bf16.msrb.mxu1 %v10038_v60 }
 0xae4   :  { %7425 = vmatpush.bf16.msrb.mxu1 %v10022_v31  ;;  %v10664_v31 = vld [vmem:[#allocation8 + $0x10c] sm:$0xf] }
 0xae8   :  { %7426 = vmatpush.bf16.msrb.mxu1 %v10006_v15 }
 0xaec   :  { %7427 = vmatpush.bf16.msrb.mxu1 %v9990_v61  ;;  %v10663_v61 = vld [vmem:[#allocation8 + $0x104] sm:$0xf] }
 0xb57   :  { %v7008_v5 = vpop.f32.mrf.mxu0  ;;  %v7022_v49 = vpop.f32.mrf.mxu1 }
 0xb58   :  { %v7055_v58 = vadd.f32 %v7008_v5, %v4130_v46  ;;  %v7056_v52 = vadd.f32 %v7022_v49, %v4179_v62  ;;  %v10018_v46 = vor.u32 %v10677_v11, %v10017_v41  ;;  %v10025_v62 = vld [vmem:[#allocation8 + $0x168] sm:$0xf]  ;;  %v10678_v5 = vld [vmem:[#allocation8 + $0x174] sm:$0xf0] }
 0xb5a   :  { %v9959_v13 = vmul.f32 -1.442695, %v7055_v58  ;;  %v9961_v22 = vmul.f32 -1.442695, %v7056_v52  ;;  %7411 = vmatpush.bf16.msrb.mxu0 %v10018_v46  ;;  %v10026_v58 = vor.u32 %v10678_v5, %v10025_v62  ;;  %v10676_v52 = vld [vmem:[#allocation8 + $0x16c] sm:$0xf] }
 0xb5b   :  { %v10030_v0 = vor.u32 %v10676_v52, %v10027_v7 }
 0xb5c   :  { %11192 = vpow2.f32 %v9959_v13  ;;  %7439 = vmatpush.bf16.msrb.mxu2 %v10026_v58  ;;  %v14299_v13 = vld [vmem:[#allocation37_spill] sm:$0xff] }
 0xb5d   :  { %11194 = vpow2.f32 %v9961_v22  ;;  %v4279_v22 = vadd.f32 %v14299_v13, %v12954_v16  ;;  %7453 = vmatpush.bf16.msrb.mxu3 %v10030_v0  ;;  %v10670_v0 = vld [vmem:[#allocation8 + $0x134] sm:$0xf0] }
 0xb5e   :  { %v7050_v8 = vpop.f32.mrf.mxu3  ;;  %v7036_v50 = vpop.f32.mrf.mxu2  ;;  %7412 = vmatpush.bf16.msrb.mxu0 %v10002_v1 }
 0xb5f   :  { %v7058_v43 = vadd.f32 %v7050_v8, %v4277_v17  ;;  %v7010_v56 = vpop.f32.mrf.mxu0  ;;  %v7024_v53 = vpop.f32.mrf.mxu1  ;;  %v7057_v4 = vadd.f32 %v7036_v50, %v4228_v12  ;;  %v10011_v17 = vld [vmem:[#allocation8 + $0x158] sm:$0xf0]  ;;  %v9993_v12 = vld [vmem:[#allocation8 + $0x128] sm:$0xf] }
 0xb60   :  { %v7059_v39 = vadd.f32 %v7010_v56, %v4132_v57  ;;  %v7060_v6 = vadd.f32 %v7024_v53, %v4181_v28  ;;  %v10014_v32 = vor.u32 %v10672_v51, %v10011_v17  ;;  %v10669_v57 = vld [vmem:[#allocation8 + $0x12c] sm:$0xf0]  ;;  %7440 = vmatpush.bf16.msrb.mxu2 %v10010_v33  ;;  %v9994_v51 = vor.u32 %v10670_v0, %v9993_v12 }
 0xb61   :  { %v9963_v14 = vmul.f32 -1.442695, %v7058_v43  ;;  %v9986_v60 = vor.u32 %v10669_v57, %v9985_v27 }
 0xb62   :  { %v11193_v47 = vpop.eup %11192  ;;  %v9960_v40 = vmul.f32 -1.442695, %v7059_v39  ;;  %v9962_v48 = vmul.f32 -1.442695, %v7060_v6  ;;  %v14300_v6 = vld [vmem:[#allocation38_spill] sm:$0xff]  ;;  %7454 = vmatpush.bf16.msrb.mxu3 %v10014_v32 }
 0xb63   :  { %v11195_v49 = vpop.eup %11194  ;;  %v13813_v2 = vadd.f32 1.0, %v11193_v47  ;;  %11196 = vpow2.f32 %v9963_v14  ;;  %v4230_v41 = vadd.f32 %v14300_v6, %v12963_v3  ;;  %7413 = vmatpush.bf16.msrb.mxu0 %v9986_v60  ;;  %v9969_v60 = vld [vmem:[#allocation8 + $0x100] sm:$0xf] }
 0xb64   :  { %v13817_v36 = vadd.f32 1.0, %v11195_v49  ;;  %11198 = vpow2.f32 %v9960_v40  ;;  %7441 = vmatpush.bf16.msrb.mxu2 %v9994_v51 }
 0xb65   :  { %11200 = vrcp.f32 %v13813_v2  ;;  %v7080_v18 = vand.u32 2147483647, %v13813_v2  ;;  %v7082_v37 = vand.u32 2147483648, %v13813_v2  ;;  %vm7076_vm10 = vweird.f32 %v13813_v2 }
 0xb66   :  { %11202 = vrcp.f32 %v13817_v36  ;;  %v7052_v42 = vpop.f32.mrf.mxu3  ;;  %v7038_v56 = vpop.f32.mrf.mxu2  ;;  %v7120_v46 = vand.u32 2147483648, %v13817_v36  ;;  %v7118_v30 = vand.u32 2147483647, %v13817_v36  ;;  %vm7114_vm11 = vweird.f32 %v13817_v36 }
 0xb67   :  { %11204 = vpow2.f32 %v9962_v48  ;;  %v7062_v26 = vadd.f32 %v7052_v42, %v4279_v22  ;;  %v7061_v40 = vadd.f32 %v7038_v56, %v4230_v41  ;;  %vm13841_vm12 = vcmp.eq.f32.partialorder %v7080_v18, 8.507059e+37  ;;  %v10668_v22 = vld [vmem:[#allocation8 + $0x12c] sm:$0xf] }
 0xb68   :  { %11206 = vtanh.f32 %v7057_v4  ;;  %v7083_v58 = vor.u32 1.1754944e-38, %v7082_v37  ;;  %v7121_v7 = vor.u32 1.1754944e-38, %v7120_v46  ;;  %vm13846_vm15 = vcmp.eq.f32.partialorder %v7118_v30, 8.507059e+37  ;;  %v9995_v4 = vld [vmem:[#allocation8 + $0x138] sm:$0xf0] }
 0xb69   :  { %v11197_v29 = vpop.eup %11196  ;;  %v9964_v53 = vmul.f32 -1.442695, %v7062_v26  ;;  %v9998_v32 = vor.u32 %v10668_v22, %v9995_v4  ;;  %v10666_v30 = vld [vmem:[#allocation8 + $0x114] sm:$0xf0] }
 0xb6a   :  { %v11199_v28 = vpop.eup %11198  ;;  %v13823_v8 = vadd.f32 1.0, %v11197_v29 }
 0xb6b   :  { %v11201_v25 = vpop.eup %11200  ;;  %v13826_v43 = vadd.f32 1.0, %v11199_v28  ;;  %7455 = vmatpush.bf16.msrb.mxu3 %v9998_v32 }
 0xb6c   :  { %v11203_v39 = vpop.eup %11202  ;;  %v7072_v11 = vmul.f32 %v11201_v25, %v13813_v2  ;;  %11208 = vrcp.f32 %v13823_v8  ;;  %vm7077_vm13 = vweird.f32 %v11201_v25  ;;  %v7158_v23 = vand.u32 2147483647, %v13823_v8 }
 0xb6d   :  { %v11205_v50 = vpop.eup %11204  ;;  %v7110_v14 = vmul.f32 %v11203_v39, %v13817_v36  ;;  %11210 = vrcp.f32 %v13826_v43  ;;  %vm7115_vm14 = vweird.f32 %v11203_v39  ;;  %vm7091_vm0 = vweird.f32 %v13826_v43  ;;  %vm7078_vm1 = vmor %vm7076_vm10, %vm7077_vm13 }
 0xb6e   :  { %v7073_v62 = vsub.f32 1.0, %v7072_v11  ;;  %v13838_v47 = vadd.f32 1.0, %v11205_v50  ;;  %11212 = vpow2.f32 %v9964_v53  ;;  %v11207_v5 = vpop.eup %11206  ;;  %v7095_v13 = vand.u32 2147483647, %v13826_v43  ;;  %vm7116_vm2 = vmor %vm7114_vm11, %vm7115_vm14  ;;  %v10665_v53 = vld [vmem:[#allocation8 + $0x10c] sm:$0xf0] }
 0xb6f   :  { %v7111_v48 = vsub.f32 1.0, %v7110_v14  ;;  %v7097_v45 = vand.u32 2147483648, %v13826_v43  ;;  %vm7154_vm3 = vweird.f32 %v13823_v8  ;;  %v7160_v2 = vand.u32 2147483648, %v13823_v8  ;;  %v9977_v11 = vld [vmem:[#allocation8 + $0x108] sm:$0xf] }
 0xb70   :  { %v7074_v49 = vmul.f32 %v11201_v25, %v7073_v62  ;;  %11214 = vrcp.f32 %v13838_v47  ;;  %vm7129_vm4 = vweird.f32 %v13838_v47  ;;  %v7135_v18 = vand.u32 2147483648, %v13838_v47 }
 0xb71   :  { %v7112_v52 = vmul.f32 %v11203_v39, %v7111_v48  ;;  %11216 = vtanh.f32 %v7061_v40  ;;  %vm13881_vm6 = vcmp.eq.f32.partialorder %v7095_v13, 8.507059e+37  ;;  %v7098_v14 = vor.u32 1.1754944e-38, %v7097_v45 }
 0xb72   :  { %v13850_v19 = vpop.eup %11208  ;;  %v7075_v20 = vadd.f32 %v11201_v25, %v7074_v49  ;;  %v7133_v46 = vand.u32 2147483647, %v13838_v47  ;;  %v9970_v48 = vor.u32 %v10665_v53, %v9969_v60  ;;  %v9978_v12 = vor.u32 %v10666_v30, %v9977_v11 }
 0xb73   :  { %v11211_v42 = vpop.eup %11210  ;;  %v7113_v38 = vadd.f32 %v11203_v39, %v7112_v52  ;;  %v7150_v44 = vmul.f32 %v13850_v19, %v13823_v8  ;;  %vm7155_vm7 = vweird.f32 %v13850_v19  ;;  %vm7598_vm11 = vcmp.gt.s32.totalorder %v13780_v21, 7 }
 0xb74   :  { %v7079_v26 = vsel %vm7078_vm1, %v11201_v25, %v7075_v20  ;;  %v7087_v1 = vmul.f32 %v11211_v42, %v13826_v43  ;;  %v11213_v17 = vpop.eup %11212  ;;  %vm7092_vm5 = vweird.f32 %v11211_v42  ;;  %7414 = vmatpush.bf16.msrb.mxu0 %v9970_v48  ;;  %vm13904_vm10 = vmor %vm7154_vm3, %vm7155_vm7  ;;  %vm7134_vm13 = vcmp.eq.f32.partialorder %v7133_v46, 8.507059e+37  ;;  %7442 = vmatpush.bf16.msrb.mxu2 %v9978_v12  ;;  %v14313_v46 = vld [vmem:[#allocation44_spill] sm:$0xff] }
 0xb75   :  { %v7084_v29 = vsel %vm13841_vm12, %v7083_v58, %v7079_v26  ;;  %v7117_v15 = vsel %vm7116_vm2, %v11203_v39, %v7113_v38  ;;  %v7151_v33 = vsub.f32 1.0, %v7150_v44  ;;  %v13874_v28 = vadd.f32 1.0, %v11213_v17  ;;  %vm7093_vm9 = vmor %vm7091_vm0, %vm7092_vm5 }
 0xb76   :  { %v13870_v27 = vpop.eup %11214  ;;  %v7122_v36 = vsel %vm13846_vm15, %v7121_v7, %v7117_v15  ;;  %v7181_v57 = vmul.f32 %v11207_v5, %v7084_v29  ;;  %v7088_v10 = vsub.f32 1.0, %v7087_v1  ;;  %v9979_v5 = vld [vmem:[#allocation8 + $0x118] sm:$0xf0]  ;;  %v7136_v58 = vor.u32 1.1754944e-38, %v7135_v18 }
 0xb77   :  { %v7179_v55 = vmul.f32 %v7122_v36, %v13737_v34  ;;  %v7125_v25 = vmul.f32 %v13870_v27, %v13838_v47  ;;  %v7152_v56 = vmul.f32 %v13850_v19, %v7151_v33  ;;  %v11217_v39 = vpop.eup %11216  ;;  %11218 = vrcp.f32 %v13874_v28  ;;  %v9971_v34 = vld [vmem:[#allocation8 + $0x110] sm:$0xf0]  ;;  %v7198_v33 = vpop.permute.xlu1 %7197 }
 0xb78   :  { %v7089_v6 = vmul.f32 %v11211_v42, %v7088_v10  ;;  %vm7130_vm8 = vweird.f32 %v13870_v27  ;;  %v7161_v7 = vor.u32 1.1754944e-38, %v7160_v2  ;;  %v9974_v9 = vor.u32 %v10663_v61, %v9971_v34  ;;  %v14311_v34 = vld [vmem:[#allocation42_spill] sm:$0xff] }
 0xb79   :  { %v13886_v37 = vadd.f32 %v7181_v57, %v7179_v55  ;;  %v7126_v50 = vsub.f32 1.0, %v7125_v25  ;;  %v7153_v40 = vadd.f32 %v13850_v19, %v7152_v56  ;;  %v9982_v43 = vor.u32 %v10664_v31, %v9979_v5  ;;  %vm7131_vm12 = vmor %vm7129_vm4, %vm7130_vm8  ;;  %v14310_v25 = vld [vmem:[#allocation40_spill] sm:$0xff] }
 0xb7a   :  { %v7090_v62 = vadd.f32 %v11211_v42, %v7089_v6  ;;  %7428 = vmatpush.bf16.msrb.mxu1 %v9974_v9  ;;  %v7600_v38 = vsel %vm7598_vm11, 1, %v14229_v24  ;;  %vm7597_vm14 = vcmp.gt.s32.totalorder %v13762_v54, 7  ;;  %vm7159_vm15 = vcmp.eq.f32.partialorder %v7158_v23, 8.507059e+37 }
 0xb7b   :  { %v7127_v49 = vmul.f32 %v13870_v27, %v7126_v50  ;;  %11220 = vtanh.f32 %v13886_v37  ;;  %v7157_v4 = vsel %vm13904_vm10, %v13850_v19, %v7153_v40  ;;  %7456 = vmatpush.bf16.msrb.mxu3 %v9982_v43  ;;  %7605 = vperm.xlu0 %10741, %v7600_v38   ;;  %v7599_v47 = vsel %vm7597_vm14, 1, %v14229_v24  ;;  %v14312_v50 = vld [vmem:[#allocation43_spill] sm:$0xff] }
 0xb7c   :  { %v7094_v52 = vsel %vm7093_vm9, %v11211_v42, %v7090_v62  ;;  %v7195_v42 = vpop.permute.xlu0 %7194  ;;  %7602 = vperm.xlu2 %10743, %v7599_v47   ;;  %v7162_v2 = vsel %vm7159_vm15, %v7161_v7, %v7157_v4  ;;  %v7175_v8 = vand.u32 2147483648, %v13874_v28  ;;  %vm7169_vm2 = vweird.f32 %v13874_v28 }
 0xb7d   :  { %v7099_v0 = vsel %vm13881_vm6, %v7098_v14, %v7094_v52  ;;  %v7128_v20 = vadd.f32 %v13870_v27, %v7127_v49  ;;  %v11219_v22 = vpop.eup %11218  ;;  %vm7199_vm0 = vcmp.eq.s32.totalorder %v7195_v42, 1  ;;  %vm7200_vm5 = vcmp.eq.s32.totalorder %v7198_v33, 1 }
 0xb7e   :  { %v7182_v45 = vmul.f32 %v11217_v39, %v7099_v0  ;;  %v7165_v44 = vmul.f32 %v11219_v22, %v13874_v28  ;;  %vm7170_vm1 = vweird.f32 %v11219_v22  ;;  %v7176_v32 = vor.u32 1.1754944e-38, %v7175_v8 }
 0xb7f   :  { %v7132_v21 = vsel %vm7131_vm12, %v13870_v27, %v7128_v20  ;;  %vm7171_vm3 = vmor %vm7169_vm2, %vm7170_vm1  ;;  %v4184_v18 = vadd.f32 %v14310_v25, %v12943_v63  ;;  %v4282_v11 = vadd.f32 %v14311_v34, %v12954_v16  ;;  %v4137_v14 = vadd.f32 %v14312_v50, %v12940_v35 }
 0xb80   :  { %v7137_v26 = vsel %vm7134_vm13, %v7136_v58, %v7132_v21  ;;  %v7166_v54 = vsub.f32 1.0, %v7165_v44  ;;  %v4186_v30 = vadd.f32 %v14313_v46, %v12943_v63  ;;  %v14315_v63 = vld [vmem:[#allocation46_spill] sm:$0xff] }
 0xb81   :  { %v11221_v19 = vpop.eup %11220  ;;  %v7180_v1 = vmul.f32 %v7137_v26, %v13791_v59  ;;  %v7173_v59 = vand.u32 2147483647, %v13874_v28  ;;  %v14309_v28 = vld [vmem:[#allocation39_spill] sm:$0xff] }
 0xb82   :  { %v7187_v51 = vmul.f32 %v11221_v19, %v7162_v2  ;;  %v7167_v29 = vmul.f32 %v11219_v22, %v7166_v54  ;;  %v4135_v55 = vadd.f32 %v14309_v28, %v12940_v35  ;;  %v14314_v35 = vld [vmem:[#allocation41_spill] sm:$0xff] }
 0xb83   :  { %v13924_v17 = vadd.f32 %v7182_v45, %v7180_v1  ;;  %vm7174_vm4 = vcmp.eq.f32.partialorder %v7173_v59, 8.507059e+37  ;;  %v4233_v43 = vadd.f32 %v14314_v35, %v12963_v3 }
 0xb84   :  { %v7201_v15 = vsel %vm7199_vm0, %v7187_v51, 0.0  ;;  %v7168_v24 = vadd.f32 %v11219_v22, %v7167_v29 }
 0xb85   :  { %9965 = vst [vmem:[%s14011_s8 + $0x60] sm:$0xff] %v7201_v15  ;;  %11222 = vtanh.f32 %v13924_v17 }
 0xb86   :  { %v7172_v23 = vsel %vm7171_vm3, %v11219_v22, %v7168_v24  ;;  %v4284_v22 = vadd.f32 %v14315_v63, %v12954_v16  ;;  %v14316_v16 = vld [vmem:[#allocation45_spill] sm:$0xff] }
 0xb87   :  { %v7177_v36 = vsel %vm7174_vm4, %v7176_v32, %v7172_v23 }
 0xb8b   :  { %v11223_v27 = vpop.eup %11222 }
 0xb8c   :  { %v7188_v57 = vmul.f32 %v11223_v27, %v7177_v36 }
 0xb8e   :  { %v7214_v10 = vpack.c.bf16 %v7188_v57, %v7187_v51  ;;  %v7202_v60 = vsel %vm7200_vm5, %v7188_v57, 0.0  ;;  %v4235_v51 = vadd.f32 %v14316_v16, %v12963_v3 }
 0xb8f   :  { %9966 = vst [vmem:[%s14011_s8 + $0x68] sm:$0xff] %v7202_v60 }
 0xb90   :  { %7415 = vmatmul.bf16.vlgmr.msrb.gmra.mxu0 %v7214_v10  ;;  %7429 = vmatmul.bf16.vlgmr.msrb.gmra.mxu1 %v7214_v10 }
 0xb91   :  { %7443 = vmatmul.bf16.vlgmr.msrb.gmra.mxu2 %v7214_v10  ;;  %7457 = vmatmul.bf16.vlgmr.msrb.gmra.mxu3 %v7214_v10 }
 0xc0d   :  { %v7416_v56 = vpop.f32.mrf.mxu0  ;;  %v7430_v53 = vpop.f32.mrf.mxu1 }
 0xc0e   :  { %v7463_v61 = vadd.f32 %v7416_v56, %v4135_v55  ;;  %v7464_v39 = vadd.f32 %v7430_v53, %v4184_v18 }
 0xc10   :  { %v10095_v6 = vmul.f32 -1.442695, %v7463_v61  ;;  %v10097_v41 = vmul.f32 -1.442695, %v7464_v39 }
 0xc12   :  { %11224 = vpow2.f32 %v10095_v6 }
 0xc13   :  { %11226 = vpow2.f32 %v10097_v41 }
 0xc14   :  { %v7458_v62 = vpop.f32.mrf.mxu3  ;;  %v7444_v0 = vpop.f32.mrf.mxu2 }
 0xc15   :  { %v7466_v40 = vadd.f32 %v7458_v62, %v4282_v11  ;;  %v7418_v48 = vpop.f32.mrf.mxu0  ;;  %v7432_v31 = vpop.f32.mrf.mxu1  ;;  %v7465_v42 = vadd.f32 %v7444_v0, %v4233_v43 }
 0xc16   :  { %v7467_v5 = vadd.f32 %v7418_v48, %v4137_v14  ;;  %v7468_v49 = vadd.f32 %v7432_v31, %v4186_v30 }
 0xc17   :  { %v10099_v58 = vmul.f32 -1.442695, %v7466_v40 }
 0xc18   :  { %v11225_v52 = vpop.eup %11224  ;;  %v10096_v7 = vmul.f32 -1.442695, %v7467_v5  ;;  %v10098_v20 = vmul.f32 -1.442695, %v7468_v49 }
 0xc19   :  { %v11227_v9 = vpop.eup %11226  ;;  %v7477_v12 = vadd.f32 1.0, %v11225_v52  ;;  %11228 = vpow2.f32 %v10099_v58 }
 0xc1a   :  { %v7515_v13 = vadd.f32 1.0, %v11227_v9  ;;  %11230 = vpow2.f32 %v10096_v7 }
 0xc1b   :  { %11232 = vrcp.f32 %v7477_v12  ;;  %v7488_v8 = vand.u32 2147483647, %v7477_v12  ;;  %v7490_v59 = vand.u32 2147483648, %v7477_v12  ;;  %vm7484_vm9 = vweird.f32 %v7477_v12 }
 0xc1c   :  { %11234 = vrcp.f32 %v7515_v13  ;;  %v7460_v4 = vpop.f32.mrf.mxu3  ;;  %v7446_v15 = vpop.f32.mrf.mxu2  ;;  %v7528_v32 = vand.u32 2147483648, %v7515_v13  ;;  %v7526_v27 = vand.u32 2147483647, %v7515_v13  ;;  %vm7522_vm8 = vweird.f32 %v7515_v13 }
 0xc1d   :  { %11236 = vpow2.f32 %v10098_v20  ;;  %v7470_v38 = vadd.f32 %v7460_v4, %v4284_v22  ;;  %v7469_v57 = vadd.f32 %v7446_v15, %v4235_v51  ;;  %vm7489_vm10 = vcmp.eq.f32.partialorder %v7488_v8, 8.507059e+37 }
 0xc1e   :  { %11238 = vtanh.f32 %v7465_v42  ;;  %v7529_v25 = vor.u32 1.1754944e-38, %v7528_v32  ;;  %v7491_v18 = vor.u32 1.1754944e-38, %v7490_v59  ;;  %vm7527_vm13 = vcmp.eq.f32.partialorder %v7526_v27, 8.507059e+37 }
 0xc1f   :  { %v11229_v21 = vpop.eup %11228  ;;  %v10100_v19 = vmul.f32 -1.442695, %v7470_v38 }
 0xc20   :  { %v11231_v45 = vpop.eup %11230  ;;  %v13950_v44 = vadd.f32 1.0, %v11229_v21 }
 0xc21   :  { %v11233_v47 = vpop.eup %11232  ;;  %v13952_v26 = vadd.f32 1.0, %v11231_v45 }
 0xc22   :  { %v11235_v1 = vpop.eup %11234  ;;  %v7480_v2 = vmul.f32 %v11233_v47, %v7477_v12  ;;  %11240 = vrcp.f32 %v13950_v44  ;;  %vm7485_vm6 = vweird.f32 %v11233_v47  ;;  %v7568_v12 = vand.u32 2147483648, %v13950_v44 }
 0xc23   :  { %v11237_v54 = vpop.eup %11236  ;;  %v7518_v29 = vmul.f32 %v11235_v1, %v7515_v13  ;;  %11242 = vrcp.f32 %v13952_v26  ;;  %vm7523_vm7 = vweird.f32 %v11235_v1  ;;  %vm7486_vm11 = vmor %vm7484_vm9, %vm7485_vm6  ;;  %v7505_v11 = vand.u32 2147483648, %v13952_v26 }
 0xc24   :  { %v7481_v24 = vsub.f32 1.0, %v7480_v2  ;;  %v13958_v23 = vadd.f32 1.0, %v11237_v54  ;;  %11244 = vpow2.f32 %v10100_v19  ;;  %v11239_v10 = vpop.eup %11238  ;;  %vm7524_vm12 = vmor %vm7522_vm8, %vm7523_vm7  ;;  %vm7499_vm14 = vweird.f32 %v13952_v26  ;;  %v7603_v54 = vpop.permute.xlu2 %7602 }
 0xc25   :  { %v7519_v33 = vsub.f32 1.0, %v7518_v29  ;;  %v7503_v58 = vand.u32 2147483647, %v13952_v26  ;;  %v7506_v20 = vor.u32 1.1754944e-38, %v7505_v11  ;;  %vm7562_vm4 = vweird.f32 %v13950_v44 }
 0xc26   :  { %v7482_v36 = vmul.f32 %v11233_v47, %v7481_v24  ;;  %11246 = vrcp.f32 %v13958_v23  ;;  %v7543_v9 = vand.u32 2147483648, %v13958_v23  ;;  %v7541_v43 = vand.u32 2147483647, %v13958_v23 }
 0xc27   :  { %v7520_v3 = vmul.f32 %v11235_v1, %v7519_v33  ;;  %11248 = vtanh.f32 %v7469_v57  ;;  %vm7504_vm3 = vcmp.eq.f32.partialorder %v7503_v58, 8.507059e+37  ;;  %v7566_v22 = vand.u32 2147483647, %v13950_v44  ;;  %v7606_v57 = vpop.permute.xlu0 %7605 }
 0xc28   :  { %v13961_v60 = vpop.eup %11240  ;;  %v7483_v28 = vadd.f32 %v11233_v47, %v7482_v36  ;;  %vm7537_vm5 = vweird.f32 %v13958_v23  ;;  %v7544_v45 = vor.u32 1.1754944e-38, %v7543_v9  ;;  %vm7542_vm8 = vcmp.eq.f32.partialorder %v7541_v43, 8.507059e+37 }
 0xc29   :  { %v11243_v55 = vpop.eup %11242  ;;  %v7521_v56 = vadd.f32 %v11235_v1, %v7520_v3  ;;  %v7558_v53 = vmul.f32 %v13961_v60, %v13950_v44  ;;  %vm7563_vm0 = vweird.f32 %v13961_v60  ;;  %vm7567_vm9 = vcmp.eq.f32.partialorder %v7566_v22, 8.507059e+37 }
 0xc2a   :  { %v7487_v61 = vsel %vm7486_vm11, %v11233_v47, %v7483_v28  ;;  %v7495_v39 = vmul.f32 %v11243_v55, %v13952_v26  ;;  %v11245_v6 = vpop.eup %11244  ;;  %vm7500_vm15 = vweird.f32 %v11243_v55  ;;  %vm13985_vm6 = vmor %vm7562_vm4, %vm7563_vm0 }
 0xc2b   :  { %v7492_v41 = vsel %vm7489_vm10, %v7491_v18, %v7487_v61  ;;  %v7525_v34 = vsel %vm7524_vm12, %v11235_v1, %v7521_v56  ;;  %v7559_v50 = vsub.f32 1.0, %v7558_v53  ;;  %v13967_v40 = vadd.f32 1.0, %v11245_v6  ;;  %vm7501_vm2 = vmor %vm7499_vm14, %vm7500_vm15 }
 0xc2c   :  { %v11247_v14 = vpop.eup %11246  ;;  %v7530_v46 = vsel %vm7527_vm13, %v7529_v25, %v7525_v34  ;;  %v7589_v30 = vmul.f32 %v11239_v10, %v7492_v41  ;;  %v7496_v62 = vsub.f32 1.0, %v7495_v39  ;;  %v7569_v1 = vor.u32 1.1754944e-38, %v7568_v12 }
 0xc2d   :  { %v7587_v48 = vmul.f32 %v7530_v46, %v13886_v37  ;;  %v7533_v31 = vmul.f32 %v11247_v14, %v13958_v23  ;;  %v7560_v5 = vmul.f32 %v13961_v60, %v7559_v50  ;;  %11250 = vrcp.f32 %v13967_v40  ;;  %v11249_v0 = vpop.eup %11248 }
 0xc2e   :  { %v7497_v49 = vmul.f32 %v11243_v55, %v7496_v62  ;;  %vm7538_vm1 = vweird.f32 %v11247_v14  ;;  %vm7607_vm10 = vcmp.eq.s32.totalorder %v7603_v54, 1  ;;  %v7583_v32 = vand.u32 2147483648, %v13967_v40 }
 0xc2f   :  { %v7591_v52 = vadd.f32 %v7589_v30, %v7587_v48  ;;  %v7534_v7 = vsub.f32 1.0, %v7533_v31  ;;  %v7561_v13 = vadd.f32 %v13961_v60, %v7560_v5  ;;  %vm7539_vm7 = vmor %vm7537_vm5, %vm7538_vm1  ;;  %vm7577_vm12 = vweird.f32 %v13967_v40 }
 0xc30   :  { %v7498_v37 = vadd.f32 %v11243_v55, %v7497_v49  ;;  %v7584_v36 = vor.u32 1.1754944e-38, %v7583_v32  ;;  %vm7608_vm15 = vcmp.eq.s32.totalorder %v7606_v57, 1 }
 0xc31   :  { %v7535_v35 = vmul.f32 %v11247_v14, %v7534_v7  ;;  %11252 = vtanh.f32 %v7591_v52  ;;  %v7565_v26 = vsel %vm13985_vm6, %v13961_v60, %v7561_v13 }
 0xc32   :  { %v7502_v63 = vsel %vm7501_vm2, %v11243_v55, %v7498_v37  ;;  %v7570_v15 = vsel %vm7567_vm9, %v7569_v1, %v7565_v26 }
 0xc33   :  { %v7507_v4 = vsel %vm7504_vm3, %v7506_v20, %v7502_v63  ;;  %v7536_v42 = vadd.f32 %v11247_v14, %v7535_v35  ;;  %v11251_v21 = vpop.eup %11250 }
 0xc34   :  { %v7590_v47 = vmul.f32 %v11249_v0, %v7507_v4  ;;  %v7573_v44 = vmul.f32 %v11251_v21, %v13967_v40  ;;  %vm7578_vm11 = vweird.f32 %v11251_v21 }
 0xc35   :  { %v7540_v19 = vsel %vm7539_vm7, %v11247_v14, %v7536_v42  ;;  %vm7579_vm13 = vmor %vm7577_vm12, %vm7578_vm11 }
 0xc36   :  { %v7545_v2 = vsel %vm7542_vm8, %v7544_v45, %v7540_v19  ;;  %v7574_v29 = vsub.f32 1.0, %v7573_v44 }
 0xc37   :  { %v11253_v16 = vpop.eup %11252  ;;  %v7588_v51 = vmul.f32 %v7545_v2, %v13924_v17  ;;  %v7581_v17 = vand.u32 2147483647, %v13967_v40 }
 0xc38   :  { %v7595_v24 = vmul.f32 %v11253_v16, %v7570_v15  ;;  %v7575_v59 = vmul.f32 %v11251_v21, %v7574_v29 }
 0xc39   :  { %v7592_v8 = vadd.f32 %v7590_v47, %v7588_v51  ;;  %vm7582_vm14 = vcmp.eq.f32.partialorder %v7581_v17, 8.507059e+37 }
 0xc3a   :  { %v7609_v23 = vsel %vm7607_vm10, %v7595_v24, 0.0  ;;  %v7576_v33 = vadd.f32 %v11251_v21, %v7575_v59 }
 0xc3b   :  { %11254 = vtanh.f32 %v7592_v8  ;;  %10101 = vst [vmem:[%s14011_s8 + $0x70] sm:$0xff] %v7609_v23 }
 0xc3c   :  { %v7580_v27 = vsel %vm7579_vm13, %v11251_v21, %v7576_v33 }
 0xc3d   :  { %v7585_v3 = vsel %vm7582_vm14, %v7584_v36, %v7580_v27 }
 0xc41   :  { %v11255_v10 = vpop.eup %11254 }
 0xc42   :  { %v7596_v60 = vmul.f32 %v11255_v10, %v7585_v3 }
 0xc44   :  { %v7610_v28 = vsel %vm7608_vm15, %v7596_v60, 0.0 }
 0xc45   :  { %10102 = vst [vmem:[%s14011_s8 + $0x78] sm:$0xff] %v7610_v28 }
 0xc46   :  { %7618 = vsyncpa [#allocation5], 1 }
 0xc47   :  { %7619 = vsyncpa [#allocation7], 1 }

</bundles_post_ra>
